<compile_context>
chip_gen: v5e
topology: v5e:2x2
jax: 0.10.0
libtpu: 0.0.40
codegen_flags: <defaults>
</compile_context>

<pallas_src>
import functools

import jax
import jax.numpy as jnp
from jax.experimental import pallas as pl
from jax.experimental.pallas import tpu as pltpu


# ---------------------------------------------------------------------------
# helpers
# ---------------------------------------------------------------------------
def _round_up(x, m):
    return ((x + m - 1) // m) * m


def _pick_tile(m, candidates=(1024, 512, 256, 128)):
    """Largest tile dividing round_up(m,128); prefer >=2 blocks (v7x 2 TCs)."""
    base = _round_up(m, 128)
    for t in candidates:
        if t <= base and base % t == 0 and base // t >= 2:
            return t
    for t in candidates:
        if t <= base and base % t == 0:
            return t
    return 128


def _sigmoid(x):
    # Exact, numerically-stable sigmoid; tanh runs on the EUP slot.
    return 0.5 * (jnp.tanh(0.5 * x) + 1.0)


# Scoped-VMEM cap: tiles below are <= a few hundred KiB, comfortably inside
# v7x's 64 MiB physical VMEM (and v5e/v6e's 128 MiB).
_VMEM_LIMIT = 32 * 1024 * 1024


# ---------------------------------------------------------------------------
# Kernel 1: matmul + bias (+ SiLU).  Single-K-block fast path (no scratch, no
# pl.when) -- used by every backbone conv here.  K-gridded accumulator
# fallback kept for large K (never traced at this config).
# ---------------------------------------------------------------------------
def _mm_bias_act_kernel(a_ref, w_ref, b_ref, o_ref, *, act):
    out = jnp.dot(a_ref[...], w_ref[...], preferred_element_type=jnp.float32)
    out = out + b_ref[...]
    if act:
        out = out * _sigmoid(out)
    o_ref[...] = out.astype(o_ref.dtype)


def _mm_bias_act_acc_kernel(a_ref, w_ref, b_ref, o_ref, acc_ref, *, act):
    k = pl.program_id(1)

    @pl.when(k == 0)
    def _init():
        acc_ref[...] = jnp.zeros_like(acc_ref)

    acc_ref[...] += jnp.dot(a_ref[...], w_ref[...],
                            preferred_element_type=jnp.float32)

    @pl.when(k == pl.num_programs(1) - 1)
    def _fin():
        out = acc_ref[...] + b_ref[...]
        if act:
            out = out * _sigmoid(out)
        o_ref[...] = out.astype(o_ref.dtype)


def matmul_bias_act(a, w_p, b_row, *, act, out_dtype=jnp.bfloat16):
    """o = act(a @ w_p + b).  a:[M,K]; w_p:[Kp,N] pre-padded bf16; b:[1,N] f32."""
    M, K = a.shape
    Kp, N = w_p.shape
    TM = _pick_tile(M)
    Mp = _round_up(M, TM)
    a_p = jnp.pad(a.astype(jnp.bfloat16), ((0, Mp - M), (0, Kp - K)))

    if Kp <= 1024:
        grid = (Mp // TM,)
        cost = pl.CostEstimate(
            flops=2 * Mp * Kp * N,
            transcendentals=Mp * N if act else 0,
            bytes_accessed=(Mp * Kp + Kp * N) * 2 + N * 4
            + Mp * N * jnp.dtype(out_dtype).itemsize)
        out = pl.pallas_call(
            functools.partial(_mm_bias_act_kernel, act=act),
            out_shape=jax.ShapeDtypeStruct((Mp, N), out_dtype),
            grid_spec=pltpu.PrefetchScalarGridSpec(
                num_scalar_prefetch=0,
                grid=grid,
                in_specs=[
                    pl.BlockSpec((TM, Kp), lambda i: (i, 0)),
                    pl.BlockSpec((Kp, N), lambda i: (0, 0)),
                    pl.BlockSpec((1, N), lambda i: (0, 0)),
                ],
                out_specs=pl.BlockSpec((TM, N), lambda i: (i, 0))),
            compiler_params=pltpu.CompilerParams(
                dimension_semantics=("parallel",),
                vmem_limit_bytes=_VMEM_LIMIT),
            cost_estimate=cost,
        )(a_p, w_p, b_row)
    else:
        TK = 512
        Kpp = _round_up(Kp, TK)
        a_p = jnp.pad(a_p, ((0, 0), (0, Kpp - Kp)))
        w_pp = jnp.pad(w_p, ((0, Kpp - Kp), (0, 0)))
        grid = (Mp // TM, Kpp // TK)
        cost = pl.CostEstimate(
            flops=2 * Mp * Kpp * N,
            transcendentals=Mp * N if act else 0,
            bytes_accessed=(Mp * Kpp + Kpp * N) * 2 + N * 4
            + Mp * N * jnp.dtype(out_dtype).itemsize)
        out = pl.pallas_call(
            functools.partial(_mm_bias_act_acc_kernel, act=act),
            out_shape=jax.ShapeDtypeStruct((Mp, N), out_dtype),
            grid_spec=pltpu.PrefetchScalarGridSpec(
                num_scalar_prefetch=0,
                grid=grid,
                in_specs=[
                    pl.BlockSpec((TM, TK), lambda i, k: (i, k)),
                    pl.BlockSpec((TK, N), lambda i, k: (k, 0)),
                    pl.BlockSpec((1, N), lambda i, k: (0, 0)),
                ],
                out_specs=pl.BlockSpec((TM, N), lambda i, k: (i, 0)),
                scratch_shapes=[pltpu.VMEM((TM, N), jnp.float32)]),
            compiler_params=pltpu.CompilerParams(
                dimension_semantics=("parallel", "arbitrary"),
                vmem_limit_bytes=_VMEM_LIMIT),
            cost_estimate=cost,
        )(a_p, w_pp, b_row)
    return out[:M, :N]


# ---------------------------------------------------------------------------
# Kernel 2: level-batched matmul + bias + SiLU (grid axis 0 = pyramid level).
# Used for (a) the 3 FPN lateral 1x1 convs and (b) the 3 fused cls+reg 3x3
# head convs -- one pallas_call each instead of 3.
# ---------------------------------------------------------------------------
def _level_mm_silu_kernel(a_ref, w_ref, b_ref, o_ref):
    out = jnp.dot(a_ref[0, :, :], w_ref[0, :, :],
                  preferred_element_type=jnp.float32)
    out = out + b_ref[0, :, :]
    out = out * _sigmoid(out)
    o_ref[0, :, :] = out.astype(o_ref.dtype)


def level_matmul_silu(a_stack, w_stack, b_stack, *, out_dtype=jnp.bfloat16):
    L, Mp, K = a_stack.shape
    _, K2, N = w_stack.shape
    assert K == K2
    TM = _pick_tile(Mp)
    grid = (L, Mp // TM)
    cost = pl.CostEstimate(
        flops=2 * L * Mp * K * N,
        transcendentals=L * Mp * N,
        bytes_accessed=L * ((Mp * K + K * N) * 2 + N * 4
                            + Mp * N * jnp.dtype(out_dtype).itemsize))
    return pl.pallas_call(
        _level_mm_silu_kernel,
        out_shape=jax.ShapeDtypeStruct((L, Mp, N), out_dtype),
        grid_spec=pltpu.PrefetchScalarGridSpec(
            num_scalar_prefetch=0,
            grid=grid,
            in_specs=[
                pl.BlockSpec((1, TM, K), lambda l, m: (l, m, 0)),
                pl.BlockSpec((1, K, N), lambda l, m: (l, 0, 0)),
                pl.BlockSpec((1, 1, N), lambda l, m: (l, 0, 0)),
            ],
            out_specs=pl.BlockSpec((1, TM, N), lambda l, m: (l, m, 0))),
        compiler_params=pltpu.CompilerParams(
            dimension_semantics=("parallel", "parallel"),
            vmem_limit_bytes=_VMEM_LIMIT),
        cost_estimate=cost,
    )(a_stack, w_stack, b_stack)


# ---------------------------------------------------------------------------
# Kernel 3: level-batched fused prediction (obj/cls/reg 1x1 convs as ONE
# lane-dense matmul) with the YOLO box decode fused into a full-vreg epilogue.
#
# Output column layout (per level, n_pad = 128 lanes):
#   [0 : A*C)                cls logits     (anchor-major, class-minor)
#   [A*C : A*C+A)            obj logits
#   [reg_off : reg_off+4A)   decoded boxes  (x1,y1,x2,y2 per anchor)
# Anchor tensors are pre-laid-out so that (ax,ay) sit in the x1,y1 lanes and
# (aw,ah) in the x2,y2 lanes; the epilogue uses whole-tile sigmoid/exp (EUP),
# two pltpu.roll (XLU) and lane-mask selects (VPU) -- no narrow lane slices.
# ---------------------------------------------------------------------------
def _level_pred_decode_kernel(a_ref, w_ref, b_ref, axy_ref, awh_ref, st_ref,
                              o_ref, *, reg_off, box_cols):
    acc = jnp.dot(a_ref[0, :, :], w_ref[0, :, :],
                  preferred_element_type=jnp.float32)
    acc = acc + b_ref[0, :, :]
    stride = st_ref[0, :, :]                    # (1, N) broadcast row
    n = acc.shape[1]

    sig = _sigmoid(acc)                         # whole tile, EUP slot
    ctr = (sig * 2.0 - 0.5 + axy_ref[0, :, :]) * stride
    # clamp keeps exp finite on non-box / padded columns (anchors there are 0);
    # semantics unchanged for any sane twh logit (exp(60) ~ 1e26).
    wh = jnp.exp(jnp.minimum(acc, 60.0)) * awh_ref[0, :, :]
    x1y1 = ctr - 0.5 * pltpu.roll(wh, shift=n - 2, axis=1)   # wh[c+2] -> col c
    x2y2 = pltpu.roll(ctr, shift=2, axis=1) + 0.5 * wh       # ctr[c-2] -> col c

    col = jax.lax.broadcasted_iota(jnp.int32, acc.shape, 1)
    rel = col - reg_off
    is_box = jnp.logical_and(rel >= 0, rel < box_cols)
    is_xy = jnp.bitwise_and(rel, 3) < 2
    box = jnp.where(is_xy, x1y1, x2y2)
    o_ref[0, :, :] = jnp.where(is_box, box, acc)


def level_pred_decode(feat_stack, w_stack, b_stack, axy, awh, st_rows, *,
                      reg_off, num_anchors):
    L, Mp, K = feat_stack.shape
    _, K2, Np = w_stack.shape
    assert K == K2
    TM = _pick_tile(Mp)
    grid = (L, Mp // TM)
    cost = pl.CostEstimate(
        flops=2 * L * Mp * K * Np,
        transcendentals=2 * L * Mp * Np,
        bytes_accessed=L * ((Mp * K + K * Np) * 2 + 3 * Mp * Np * 4))
    kernel = functools.partial(_level_pred_decode_kernel,
                               reg_off=reg_off, box_cols=4 * num_anchors)
    return pl.pallas_call(
        kernel,
        out_shape=jax.ShapeDtypeStruct((L, Mp, Np), jnp.float32),
        grid_spec=pltpu.PrefetchScalarGridSpec(
            num_scalar_prefetch=0,
            grid=grid,
            in_specs=[
                pl.BlockSpec((1, TM, K), lambda l, m: (l, m, 0)),
                pl.BlockSpec((1, K, Np), lambda l, m: (l, 0, 0)),
                pl.BlockSpec((1, 1, Np), lambda l, m: (l, 0, 0)),
                pl.BlockSpec((1, TM, Np), lambda l, m: (l, m, 0)),
                pl.BlockSpec((1, TM, Np), lambda l, m: (l, m, 0)),
                pl.BlockSpec((1, 1, Np), lambda l, m: (l, 0, 0)),
            ],
            out_specs=pl.BlockSpec((1, TM, Np), lambda l, m: (l, m, 0))),
        compiler_params=pltpu.CompilerParams(
            dimension_semantics=("parallel", "parallel"),
            vmem_limit_bytes=_VMEM_LIMIT),
        cost_estimate=cost,
    )(feat_stack, w_stack, b_stack, axy, awh, st_rows)


# ---------------------------------------------------------------------------
# Conv2d = im2col (XLA glue) + Pallas matmul kernel
# ---------------------------------------------------------------------------
def _im2col(x_nhwc, kh, kw, stride, pad):
    # TODO(synk): replace the materialized im2col with in-kernel overlapping
    # window DMA (strided pl.ds on a pl.ANY input) and keep the whole deep
    # tail (c4/c5/fpn/heads) VMEM-resident in a single pallas_call;
    # overlapping / strided conv windows are not expressible with rectangular
    # BlockSpec index maps.
    B, H, W, C = x_nhwc.shape
    xp = (jnp.pad(x_nhwc, ((0, 0), (pad, pad), (pad, pad), (0, 0)))
          if pad else x_nhwc)
    Ho = (H + 2 * pad - kh) // stride + 1
    Wo = (W + 2 * pad - kw) // stride + 1
    if kh == 1 and kw == 1 and stride == 1:
        return xp.reshape(B * Ho * Wo, C), Ho, Wo
    patches = [xp[:, di:di + (Ho - 1) * stride + 1:stride,
                  dj:dj + (Wo - 1) * stride + 1:stride, :]
               for di in range(kh) for dj in range(kw)]
    a = jnp.concatenate(patches, axis=-1).reshape(B * Ho * Wo, kh * kw * C)
    return a, Ho, Wo


def conv2d_prepped(x_nhwc, w_mat, b_row, *, kh, kw, stride, pad, act=True,
                   out_dtype=jnp.bfloat16):
    """x: (B,H,W,Cin); w_mat: (Kp, Cout) pre-padded bf16; b_row: (1, Cout) f32."""
    B = x_nhwc.shape[0]
    a, Ho, Wo = _im2col(x_nhwc, kh, kw, stride, pad)
    out = matmul_bias_act(a, w_mat, b_row, act=act, out_dtype=out_dtype)
    return out.reshape(B, Ho, Wo, w_mat.shape[1])


# ---------------------------------------------------------------------------
# Parameter init (deterministic, synthetic)
# ---------------------------------------------------------------------------
def init_conv(key, kh, kw, cin, cout):
    kw_key, kb_key = jax.random.split(key)
    fan_in = kh * kw * cin
    w = jax.random.normal(kw_key, (kh, kw, cin, cout), jnp.float32) / jnp.sqrt(fan_in)
    b = jax.random.normal(kb_key, (cout,), jnp.float32) * 0.01
    return (w, b)


def build_params(key, num_classes, num_anchors, head_dim):
    keys = jax.random.split(key, 32)
    ki = iter(keys)
    p = {}
    p['stem'] = init_conv(next(ki), 3, 3, 3, 16)
    p['l1'] = init_conv(next(ki), 3, 3, 16, 16)
    p['l2'] = init_conv(next(ki), 3, 3, 16, 32)    # C3 (stride 8)
    p['l3'] = init_conv(next(ki), 3, 3, 32, 64)    # C4 (stride 16)
    p['l4'] = init_conv(next(ki), 3, 3, 64, 128)   # C5 (stride 32)
    feats_dim = [32, 64, 128]
    p['fpn'] = [init_conv(next(ki), 1, 1, d, head_dim) for d in feats_dim]
    p['head_cls'] = [init_conv(next(ki), 3, 3, head_dim, head_dim) for _ in range(3)]
    p['head_reg'] = [init_conv(next(ki), 3, 3, head_dim, head_dim) for _ in range(3)]
    p['obj'] = [init_conv(next(ki), 1, 1, head_dim, 1 * num_anchors) for _ in range(3)]
    p['cls'] = [init_conv(next(ki), 1, 1, head_dim, num_classes * num_anchors) for _ in range(3)]
    p['reg'] = [init_conv(next(ki), 1, 1, head_dim, 4 * num_anchors) for _ in range(3)]
    return p


# ---------------------------------------------------------------------------
# YOLOv5 forward (trainable path)
# ---------------------------------------------------------------------------
class YOLOv5Pallas:
    def __init__(self, cfg, num_classes=20):
        self.cfg = cfg
        self.stride = cfg['stride']
        self.num_classes = num_classes
        self.num_levels = 3
        self.num_anchors = len(cfg['anchor_size']) // self.num_levels
        self.anchor_size = jnp.asarray(cfg['anchor_size'], jnp.float32).reshape(
            self.num_levels, self.num_anchors, 2)
        self.head_dim = round(256 * cfg['width'])
        self.params = build_params(jax.random.PRNGKey(1), num_classes,
                                   self.num_anchors, self.head_dim)
        # Pre-fuse / pre-pad / pre-cast every weight ONCE (feedback item).
        self.proc = self._build_proc_params()
        self._consts_cache = {}
        self._jit_forward = jax.jit(self._forward_impl)

    # --- static weight preprocessing ------------------------------------
    def _build_proc_params(self):
        p = self.params
        hd, A, C = self.head_dim, self.num_anchors, self.num_classes
        proc = {}
        # backbone convs -> matmul-ready (Kp, Cout) bf16 + (1, Cout) f32 bias
        for name in ('stem', 'l1', 'l2', 'l3', 'l4'):
            w, b = p[name]
            kh, kw, cin, cout = w.shape
            K = kh * kw * cin
            Kp = _round_up(K, 16)
            proc[name + '_w'] = jnp.pad(w.reshape(K, cout),
                                        ((0, Kp - K), (0, 0))).astype(jnp.bfloat16)
            proc[name + '_b'] = b.astype(jnp.float32).reshape(1, cout)
        # FPN laterals, stacked over levels with K padded to max in-dim
        feats_dim = [p['fpn'][l][0].shape[2] for l in range(self.num_levels)]
        kfpn = _round_up(max(feats_dim), 16)
        fw, fb = [], []
        for l, d in enumerate(feats_dim):
            w, b = p['fpn'][l]
            fw.append(jnp.pad(w.reshape(d, hd), ((0, kfpn - d), (0, 0))))
            fb.append(b.reshape(1, hd))
        proc['fpn_w'] = jnp.stack(fw).astype(jnp.bfloat16)
        proc['fpn_b'] = jnp.stack(fb).astype(jnp.float32)
        # head 3x3: cls+reg convs fused along output channels, stacked per level
        hw, hb = [], []
        for l in range(self.num_levels):
            wc, bc = p['head_cls'][l]
            wr, br = p['head_reg'][l]
            hw.append(jnp.concatenate([wc, wr], axis=3).reshape(9 * hd, 2 * hd))
            hb.append(jnp.concatenate([bc, br], axis=0).reshape(1, 2 * hd))
        proc['head3_w'] = jnp.stack(hw).astype(jnp.bfloat16)
        proc['head3_b'] = jnp.stack(hb).astype(jnp.float32)
        # fused obj/cls/reg 1x1 prediction convs, lane-dense 128-wide columns
        reg_off = _round_up(A * C + A, 8)
        n_pad = _round_up(reg_off + 4 * A, 128)
        pw, pb = [], []
        for l in range(self.num_levels):
            w_cls, b_cls = p['cls'][l]
            w_obj, b_obj = p['obj'][l]
            w_reg, b_reg = p['reg'][l]
            W = jnp.zeros((2 * hd, n_pad), jnp.float32)
            W = W.at[:hd, 0:A * C].set(w_cls.reshape(hd, A * C))          # <- cls_feat
            W = W.at[hd:, A * C:A * C + A].set(w_obj.reshape(hd, A))      # <- reg_feat
            W = W.at[hd:, reg_off:reg_off + 4 * A].set(w_reg.reshape(hd, 4 * A))
            bvec = jnp.zeros((n_pad,), jnp.float32)
            bvec = bvec.at[0:A * C].set(b_cls)
            bvec = bvec.at[A * C:A * C + A].set(b_obj)
            bvec = bvec.at[reg_off:reg_off + 4 * A].set(b_reg)
            pw.append(W)
            pb.append(bvec.reshape(1, n_pad))
        proc['pred_w'] = jnp.stack(pw).astype(jnp.bfloat16)
        proc['pred_b'] = jnp.stack(pb).astype(jnp.float32)
        self.reg_off, self.n_pad, self.fpn_kp = reg_off, n_pad, kfpn
        return proc

    # --- static shape helpers -------------------------------------------
    def _fmp_sizes(self, H, W):
        sizes, h, w = [], H, W
        for _ in range(5):                       # 5 stride-2 3x3 pad-1 convs
            h = (h + 2 - 3) // 2 + 1
            w = (w + 2 - 3) // 2 + 1
            sizes.append((h, w))
        return sizes[-3:]

    # anchors pre-laid-out in the prediction lane columns, built once per shape
    def _build_consts(self, B, H, W):
        fmp_sizes = self._fmp_sizes(H, W)
        Ms = [B * h * w for h, w in fmp_sizes]
        Mstack = _round_up(max(Ms), 128)
        A = self.num_anchors
        axy_l, awh_l = [], []
        for level, (h, w) in enumerate(fmp_sizes):
            m = B * h * w
            gy, gx = jnp.meshgrid(jnp.arange(h, dtype=jnp.float32),
                                  jnp.arange(w, dtype=jnp.float32), indexing='ij')
            xy = jnp.stack([gx, gy], axis=-1).reshape(h * w, 2)
            xy = jnp.tile(xy, (B, 1))                       # (m, 2), matches row order
            axy = jnp.zeros((Mstack, self.n_pad), jnp.float32)
            awh = jnp.zeros((Mstack, self.n_pad), jnp.float32)
            for a in range(A):
                c0 = self.reg_off + 4 * a
                axy = axy.at[:m, c0].set(xy[:, 0]).at[:m, c0 + 1].set(xy[:, 1])
                awh = awh.at[:m, c0 + 2].set(self.anchor_size[level, a, 0])
                awh = awh.at[:m, c0 + 3].set(self.anchor_size[level, a, 1])
            axy_l.append(axy)
            awh_l.append(awh)
        st = (jnp.ones((self.num_levels, 1, self.n_pad), jnp.float32)
              * jnp.asarray(self.stride, jnp.float32).reshape(self.num_levels, 1, 1))
        return jnp.stack(axy_l), jnp.stack(awh_l), st

    # --- traced forward ----------------------------------------------------
    def _forward_impl(self, proc, x_nchw, axy, awh, st_rows):
        A, C, hd = self.num_anchors, self.num_classes, self.head_dim
        B = x_nchw.shape[0]
        fmp_sizes = self._fmp_sizes(x_nchw.shape[2], x_nchw.shape[3])
        Ms = [B * h * w for h, w in fmp_sizes]
        Mstack = _round_up(max(Ms), 128)

        # NCHW -> NHWC, bf16 MXU operands
        x = jnp.transpose(x_nchw, (0, 2, 3, 1)).astype(jnp.bfloat16)

        # backbone (sequential; each conv = one single-K-block Pallas matmul)
        h = conv2d_prepped(x, proc['stem_w'], proc['stem_b'], kh=3, kw=3, stride=2, pad=1)
        h = conv2d_prepped(h, proc['l1_w'], proc['l1_b'], kh=3, kw=3, stride=2, pad=1)
        c3 = conv2d_prepped(h, proc['l2_w'], proc['l2_b'], kh=3, kw=3, stride=2, pad=1)
        c4 = conv2d_prepped(c3, proc['l3_w'], proc['l3_b'], kh=3, kw=3, stride=2, pad=1)
        c5 = conv2d_prepped(c4, proc['l4_w'], proc['l4_b'], kh=3, kw=3, stride=2, pad=1)
        feats = [c3, c4, c5]

        # FPN lateral 1x1 convs: all 3 levels in ONE pallas_call
        fpn_in = []
        for f, m in zip(feats, Ms):
            a2 = f.reshape(m, f.shape[-1])
            fpn_in.append(jnp.pad(a2, ((0, Mstack - m), (0, self.fpn_kp - a2.shape[1]))))
        fpn_out = level_matmul_silu(jnp.stack(fpn_in), proc['fpn_w'], proc['fpn_b'])

        # fused cls+reg 3x3 head convs: all 3 levels in ONE pallas_call
        head_in = []
        for level, ((hh, ww), m) in enumerate(zip(fmp_sizes, Ms)):
            f = fpn_out[level, :m].reshape(B, hh, ww, hd)
            a2, _, _ = _im2col(f, 3, 3, 1, 1)
            head_in.append(jnp.pad(a2, ((0, Mstack - m), (0, 0))))
        head_feat = level_matmul_silu(jnp.stack(head_in),
                                      proc['head3_w'], proc['head3_b'])

        # fused obj/cls/reg 1x1 preds + box decode: all 3 levels in ONE call
        pred = level_pred_decode(head_feat, proc['pred_w'], proc['pred_b'],
                                 axy, awh, st_rows,
                                 reg_off=self.reg_off, num_anchors=A)

        # column layout -> (B, H*W*A, {C, 1, 4})  (== torch permute+view)
        all_obj, all_cls, all_box = [], [], []
        for level, ((hh, ww), m) in enumerate(zip(fmp_sizes, Ms)):
            p_lvl = pred[level, :m]
            all_cls.append(p_lvl[:, 0:A * C].reshape(B, hh * ww * A, C))
            all_obj.append(p_lvl[:, A * C:A * C + A].reshape(B, hh * ww * A, 1))
            all_box.append(p_lvl[:, self.reg_off:self.reg_off + 4 * A]
                           .reshape(B, hh * ww * A, 4))
        return all_obj, all_cls, all_box

    def forward(self, x_nchw):
        B, _, H, W = (int(s) for s in x_nchw.shape)
        key = (B, H, W)
        if key not in self._consts_cache:
            self._consts_cache[key] = self._build_consts(B, H, W)
        axy, awh, st_rows = self._consts_cache[key]
        all_obj, all_cls, all_box = self._jit_forward(self.proc, x_nchw,
                                                      axy, awh, st_rows)
        fmp_sizes = [list(s) for s in self._fmp_sizes(H, W)]
        return {'pred_obj': all_obj, 'pred_cls': all_cls, 'pred_box': all_box,
                'fmp_sizes': fmp_sizes, 'strides': self.stride}


# ---------------------------------------------------------------------------
if __name__ == "__main__":
    cfg = {
        'stride': [8, 16, 32],
        'width': 0.125,  # head_dim = round(256 * 0.125) = 32
        'anchor_size': [[10, 13], [16, 30], [33, 23],
                        [30, 61], [62, 45], [59, 119],
                        [116, 90], [156, 198], [373, 326]],
    }
    model = YOLOv5Pallas(cfg, num_classes=20)

    key = jax.random.PRNGKey(0)
    x = jax.random.normal(key, (2, 3, 64, 64), jnp.float32)  # NCHW like PyTorch

    out = model.forward(x)
    for k in ('pred_obj', 'pred_cls', 'pred_box'):
        for arr in out[k]:
            jax.block_until_ready(arr)

    # sanity: shapes per level (B, H*W*A, {1, C, 4})
    assert [a.shape for a in out['pred_obj']] == [(2, 192, 1), (2, 48, 1), (2, 12, 1)]
    assert [a.shape for a in out['pred_cls']] == [(2, 192, 20), (2, 48, 20), (2, 12, 20)]
    assert [a.shape for a in out['pred_box']] == [(2, 192, 4), (2, 48, 4), (2, 12, 4)]
    assert all(bool(jnp.all(jnp.isfinite(a))) for a in out['pred_box'])
    assert out['fmp_sizes'] == [[8, 8], [4, 4], [2, 2]]

    print("KERNEL_OK")
</pallas_src>

<mosaic_0001>
module attributes {stable_mosaic.version = 11 : i64} {
  func.func @_mm_bias_act_kernel(%arg0: i32, %arg1: memref<1024x32xbf16, #tpu.memory_space<vmem>>, %arg2: memref<32x16xbf16, #tpu.memory_space<vmem>>, %arg3: memref<1x16xf32, #tpu.memory_space<vmem>>, %arg4: memref<1024x16xbf16, #tpu.memory_space<vmem>>) attributes {dimension_semantics = [#tpu.dimension_semantics<parallel>], iteration_bounds = array<i64: 2>, scalar_prefetch = 0 : i64, scratch_operands = 0 : i64, tpu.core_type = #tpu.core_type<tc>, window_params = [{transform_indices = @transform_0, window_bounds = array<i64: 1024, 32>}, {pipeline_mode = #tpu.pipeline_mode<synchronous>, transform_indices = @transform_1, window_bounds = array<i64: 32, 16>}, {pipeline_mode = #tpu.pipeline_mode<synchronous>, transform_indices = @transform_2, window_bounds = array<i64: 1, 16>}, {transform_indices = @transform_3, window_bounds = array<i64: 1024, 16>}]} {
    %c0 = arith.constant 0 : index
    %c0_0 = arith.constant 0 : index
    %0 = vector.load %arg1[%c0, %c0_0] : memref<1024x32xbf16, #tpu.memory_space<vmem>>, vector<1024x32xbf16>
    %c0_1 = arith.constant 0 : index
    %c0_2 = arith.constant 0 : index
    %1 = vector.load %arg2[%c0_1, %c0_2] : memref<32x16xbf16, #tpu.memory_space<vmem>>, vector<32x16xbf16>
    %cst = arith.constant dense<0.000000e+00> : vector<1024x16xf32>
    %2 = tpu.matmul %0, %1, %cst {dimension_numbers = #tpu.dot_dimension_numbers<[1], [0], [0], [1], [0, 0, 1, 1], [], []>} : vector<1024x32xbf16>, vector<32x16xbf16>, vector<1024x16xf32> -> vector<1024x16xf32>
    %c0_3 = arith.constant 0 : index
    %c0_4 = arith.constant 0 : index
    %3 = vector.load %arg3[%c0_3, %c0_4] : memref<1x16xf32, #tpu.memory_space<vmem>>, vector<1x16xf32>
    %4 = vector.broadcast %3 : vector<1x16xf32> to vector<1024x16xf32>
    %5 = arith.addf %2, %4 : vector<1024x16xf32>
    %cst_5 = arith.constant 5.000000e-01 : f32
    %6 = vector.broadcast %cst_5 : f32 to vector<1024x16xf32>
    %7 = arith.mulf %6, %5 : vector<1024x16xf32>
    %8 = math.tanh %7 : vector<1024x16xf32>
    %cst_6 = arith.constant 1.000000e+00 : f32
    %9 = vector.broadcast %cst_6 : f32 to vector<1024x16xf32>
    %10 = arith.addf %8, %9 : vector<1024x16xf32>
    %cst_7 = arith.constant 5.000000e-01 : f32
    %11 = vector.broadcast %cst_7 : f32 to vector<1024x16xf32>
    %12 = arith.mulf %11, %10 : vector<1024x16xf32>
    %13 = arith.mulf %5, %12 : vector<1024x16xf32>
    %14 = arith.truncf %13 : vector<1024x16xf32> to vector<1024x16xbf16>
    %c0_8 = arith.constant 0 : index
    %c0_9 = arith.constant 0 : index
    %15 = vector.load %arg4[%c0_8, %c0_9] : memref<1024x16xbf16, #tpu.memory_space<vmem>>, vector<1024x16xbf16>
    tpu.vector_store %arg4[%c0_8, %c0_9], %14 {strides = array<i32>} : memref<1024x16xbf16, #tpu.memory_space<vmem>>, vector<1024x16xbf16>,
    return
  }
  func.func @transform_0(%arg0: i32) -> (i32, i32) {
    %c0_i32 = arith.constant 0 : i32
    %c0_i32_0 = arith.constant 0 : i32
    return %arg0, %c0_i32 : i32, i32
  }
  func.func @transform_1(%arg0: i32) -> (i32, i32) {
    %c0_i32 = arith.constant 0 : i32
    %c0_i32_0 = arith.constant 0 : i32
    %c0_i32_1 = arith.constant 0 : i32
    return %c0_i32, %c0_i32_0 : i32, i32
  }
  func.func @transform_2(%arg0: i32) -> (i32, i32) {
    %c0_i32 = arith.constant 0 : i32
    %c0_i32_0 = arith.constant 0 : i32
    %c0_i32_1 = arith.constant 0 : i32
    return %c0_i32, %c0_i32_0 : i32, i32
  }
  func.func @transform_3(%arg0: i32) -> (i32, i32) {
    %c0_i32 = arith.constant 0 : i32
    %c0_i32_0 = arith.constant 0 : i32
    return %arg0, %c0_i32 : i32, i32
  }
}

module attributes {stable_mosaic.version = 11 : i64} {
  func.func @_mm_bias_act_kernel(%arg0: i32, %arg1: memref<256x144xbf16, #tpu.memory_space<vmem>>, %arg2: memref<144x16xbf16, #tpu.memory_space<vmem>>, %arg3: memref<1x16xf32, #tpu.memory_space<vmem>>, %arg4: memref<256x16xbf16, #tpu.memory_space<vmem>>) attributes {dimension_semantics = [#tpu.dimension_semantics<parallel>], iteration_bounds = array<i64: 2>, scalar_prefetch = 0 : i64, scratch_operands = 0 : i64, tpu.core_type = #tpu.core_type<tc>, window_params = [{transform_indices = @transform_0, window_bounds = array<i64: 256, 144>}, {pipeline_mode = #tpu.pipeline_mode<synchronous>, transform_indices = @transform_1, window_bounds = array<i64: 144, 16>}, {pipeline_mode = #tpu.pipeline_mode<synchronous>, transform_indices = @transform_2, window_bounds = array<i64: 1, 16>}, {transform_indices = @transform_3, window_bounds = array<i64: 256, 16>}]} {
    %c0 = arith.constant 0 : index
    %c0_0 = arith.constant 0 : index
    %0 = vector.load %arg1[%c0, %c0_0] : memref<256x144xbf16, #tpu.memory_space<vmem>>, vector<256x144xbf16>
    %c0_1 = arith.constant 0 : index
    %c0_2 = arith.constant 0 : index
    %1 = vector.load %arg2[%c0_1, %c0_2] : memref<144x16xbf16, #tpu.memory_space<vmem>>, vector<144x16xbf16>
    %cst = arith.constant dense<0.000000e+00> : vector<256x16xf32>
    %2 = tpu.matmul %0, %1, %cst {dimension_numbers = #tpu.dot_dimension_numbers<[1], [0], [0], [1], [0, 0, 1, 1], [], []>} : vector<256x144xbf16>, vector<144x16xbf16>, vector<256x16xf32> -> vector<256x16xf32>
    %c0_3 = arith.constant 0 : index
    %c0_4 = arith.constant 0 : index
    %3 = vector.load %arg3[%c0_3, %c0_4] : memref<1x16xf32, #tpu.memory_space<vmem>>, vector<1x16xf32>
    %4 = vector.broadcast %3 : vector<1x16xf32> to vector<256x16xf32>
    %5 = arith.addf %2, %4 : vector<256x16xf32>
    %cst_5 = arith.constant 5.000000e-01 : f32
    %6 = vector.broadcast %cst_5 : f32 to vector<256x16xf32>
    %7 = arith.mulf %6, %5 : vector<256x16xf32>
    %8 = math.tanh %7 : vector<256x16xf32>
    %cst_6 = arith.constant 1.000000e+00 : f32
    %9 = vector.broadcast %cst_6 : f32 to vector<256x16xf32>
    %10 = arith.addf %8, %9 : vector<256x16xf32>
    %cst_7 = arith.constant 5.000000e-01 : f32
    %11 = vector.broadcast %cst_7 : f32 to vector<256x16xf32>
    %12 = arith.mulf %11, %10 : vector<256x16xf32>
    %13 = arith.mulf %5, %12 : vector<256x16xf32>
    %14 = arith.truncf %13 : vector<256x16xf32> to vector<256x16xbf16>
    %c0_8 = arith.constant 0 : index
    %c0_9 = arith.constant 0 : index
    %15 = vector.load %arg4[%c0_8, %c0_9] : memref<256x16xbf16, #tpu.memory_space<vmem>>, vector<256x16xbf16>
    tpu.vector_store %arg4[%c0_8, %c0_9], %14 {strides = array<i32>} : memref<256x16xbf16, #tpu.memory_space<vmem>>, vector<256x16xbf16>,
    return
  }
  func.func @transform_0(%arg0: i32) -> (i32, i32) {
    %c0_i32 = arith.constant 0 : i32
    %c0_i32_0 = arith.constant 0 : i32
    return %arg0, %c0_i32 : i32, i32
  }
  func.func @transform_1(%arg0: i32) -> (i32, i32) {
    %c0_i32 = arith.constant 0 : i32
    %c0_i32_0 = arith.constant 0 : i32
    %c0_i32_1 = arith.constant 0 : i32
    return %c0_i32, %c0_i32_0 : i32, i32
  }
  func.func @transform_2(%arg0: i32) -> (i32, i32) {
    %c0_i32 = arith.constant 0 : i32
    %c0_i32_0 = arith.constant 0 : i32
    %c0_i32_1 = arith.constant 0 : i32
    return %c0_i32, %c0_i32_0 : i32, i32
  }
  func.func @transform_3(%arg0: i32) -> (i32, i32) {
    %c0_i32 = arith.constant 0 : i32
    %c0_i32_0 = arith.constant 0 : i32
    return %arg0, %c0_i32 : i32, i32
  }
}

module attributes {stable_mosaic.version = 11 : i64} {
  func.func @_mm_bias_act_kernel(%arg0: i32, %arg1: memref<128x144xbf16, #tpu.memory_space<vmem>>, %arg2: memref<144x32xbf16, #tpu.memory_space<vmem>>, %arg3: memref<1x32xf32, #tpu.memory_space<vmem>>, %arg4: memref<128x32xbf16, #tpu.memory_space<vmem>>) attributes {dimension_semantics = [#tpu.dimension_semantics<parallel>], iteration_bounds = array<i64: 1>, scalar_prefetch = 0 : i64, scratch_operands = 0 : i64, tpu.core_type = #tpu.core_type<tc>, window_params = [{transform_indices = @transform_0, window_bounds = array<i64: 128, 144>}, {pipeline_mode = #tpu.pipeline_mode<synchronous>, transform_indices = @transform_1, window_bounds = array<i64: 144, 32>}, {pipeline_mode = #tpu.pipeline_mode<synchronous>, transform_indices = @transform_2, window_bounds = array<i64: 1, 32>}, {transform_indices = @transform_3, window_bounds = array<i64: 128, 32>}]} {
    %c0 = arith.constant 0 : index
    %c0_0 = arith.constant 0 : index
    %0 = vector.load %arg1[%c0, %c0_0] : memref<128x144xbf16, #tpu.memory_space<vmem>>, vector<128x144xbf16>
    %c0_1 = arith.constant 0 : index
    %c0_2 = arith.constant 0 : index
    %1 = vector.load %arg2[%c0_1, %c0_2] : memref<144x32xbf16, #tpu.memory_space<vmem>>, vector<144x32xbf16>
    %cst = arith.constant dense<0.000000e+00> : vector<128x32xf32>
    %2 = tpu.matmul %0, %1, %cst {dimension_numbers = #tpu.dot_dimension_numbers<[1], [0], [0], [1], [0, 0, 1, 1], [], []>} : vector<128x144xbf16>, vector<144x32xbf16>, vector<128x32xf32> -> vector<128x32xf32>
    %c0_3 = arith.constant 0 : index
    %c0_4 = arith.constant 0 : index
    %3 = vector.load %arg3[%c0_3, %c0_4] : memref<1x32xf32, #tpu.memory_space<vmem>>, vector<1x32xf32>
    %4 = vector.broadcast %3 : vector<1x32xf32> to vector<128x32xf32>
    %5 = arith.addf %2, %4 : vector<128x32xf32>
    %cst_5 = arith.constant 5.000000e-01 : f32
    %6 = vector.broadcast %cst_5 : f32 to vector<128x32xf32>
    %7 = arith.mulf %6, %5 : vector<128x32xf32>
    %8 = math.tanh %7 : vector<128x32xf32>
    %cst_6 = arith.constant 1.000000e+00 : f32
    %9 = vector.broadcast %cst_6 : f32 to vector<128x32xf32>
    %10 = arith.addf %8, %9 : vector<128x32xf32>
    %cst_7 = arith.constant 5.000000e-01 : f32
    %11 = vector.broadcast %cst_7 : f32 to vector<128x32xf32>
    %12 = arith.mulf %11, %10 : vector<128x32xf32>
    %13 = arith.mulf %5, %12 : vector<128x32xf32>
    %14 = arith.truncf %13 : vector<128x32xf32> to vector<128x32xbf16>
    %c0_8 = arith.constant 0 : index
    %c0_9 = arith.constant 0 : index
    %15 = vector.load %arg4[%c0_8, %c0_9] : memref<128x32xbf16, #tpu.memory_space<vmem>>, vector<128x32xbf16>
    tpu.vector_store %arg4[%c0_8, %c0_9], %14 {strides = array<i32>} : memref<128x32xbf16, #tpu.memory_space<vmem>>, vector<128x32xbf16>,
    return
  }
  func.func @transform_0(%arg0: i32) -> (i32, i32) {
    %c0_i32 = arith.constant 0 : i32
    %c0_i32_0 = arith.constant 0 : i32
    return %arg0, %c0_i32 : i32, i32
  }
  func.func @transform_1(%arg0: i32) -> (i32, i32) {
    %c0_i32 = arith.constant 0 : i32
    %c0_i32_0 = arith.constant 0 : i32
    %c0_i32_1 = arith.constant 0 : i32
    return %c0_i32, %c0_i32_0 : i32, i32
  }
  func.func @transform_2(%arg0: i32) -> (i32, i32) {
    %c0_i32 = arith.constant 0 : i32
    %c0_i32_0 = arith.constant 0 : i32
    %c0_i32_1 = arith.constant 0 : i32
    return %c0_i32, %c0_i32_0 : i32, i32
  }
  func.func @transform_3(%arg0: i32) -> (i32, i32) {
    %c0_i32 = arith.constant 0 : i32
    %c0_i32_0 = arith.constant 0 : i32
    return %arg0, %c0_i32 : i32, i32
  }
}

module attributes {stable_mosaic.version = 11 : i64} {
  func.func @_mm_bias_act_kernel(%arg0: i32, %arg1: memref<128x288xbf16, #tpu.memory_space<vmem>>, %arg2: memref<288x64xbf16, #tpu.memory_space<vmem>>, %arg3: memref<1x64xf32, #tpu.memory_space<vmem>>, %arg4: memref<128x64xbf16, #tpu.memory_space<vmem>>) attributes {dimension_semantics = [#tpu.dimension_semantics<parallel>], iteration_bounds = array<i64: 1>, scalar_prefetch = 0 : i64, scratch_operands = 0 : i64, tpu.core_type = #tpu.core_type<tc>, window_params = [{transform_indices = @transform_0, window_bounds = array<i64: 128, 288>}, {pipeline_mode = #tpu.pipeline_mode<synchronous>, transform_indices = @transform_1, window_bounds = array<i64: 288, 64>}, {pipeline_mode = #tpu.pipeline_mode<synchronous>, transform_indices = @transform_2, window_bounds = array<i64: 1, 64>}, {transform_indices = @transform_3, window_bounds = array<i64: 128, 64>}]} {
    %c0 = arith.constant 0 : index
    %c0_0 = arith.constant 0 : index
    %0 = vector.load %arg1[%c0, %c0_0] : memref<128x288xbf16, #tpu.memory_space<vmem>>, vector<128x288xbf16>
    %c0_1 = arith.constant 0 : index
    %c0_2 = arith.constant 0 : index
    %1 = vector.load %arg2[%c0_1, %c0_2] : memref<288x64xbf16, #tpu.memory_space<vmem>>, vector<288x64xbf16>
    %cst = arith.constant dense<0.000000e+00> : vector<128x64xf32>
    %2 = tpu.matmul %0, %1, %cst {dimension_numbers = #tpu.dot_dimension_numbers<[1], [0], [0], [1], [0, 0, 1, 1], [], []>} : vector<128x288xbf16>, vector<288x64xbf16>, vector<128x64xf32> -> vector<128x64xf32>
    %c0_3 = arith.constant 0 : index
    %c0_4 = arith.constant 0 : index
    %3 = vector.load %arg3[%c0_3, %c0_4] : memref<1x64xf32, #tpu.memory_space<vmem>>, vector<1x64xf32>
    %4 = vector.broadcast %3 : vector<1x64xf32> to vector<128x64xf32>
    %5 = arith.addf %2, %4 : vector<128x64xf32>
    %cst_5 = arith.constant 5.000000e-01 : f32
    %6 = vector.broadcast %cst_5 : f32 to vector<128x64xf32>
    %7 = arith.mulf %6, %5 : vector<128x64xf32>
    %8 = math.tanh %7 : vector<128x64xf32>
    %cst_6 = arith.constant 1.000000e+00 : f32
    %9 = vector.broadcast %cst_6 : f32 to vector<128x64xf32>
    %10 = arith.addf %8, %9 : vector<128x64xf32>
    %cst_7 = arith.constant 5.000000e-01 : f32
    %11 = vector.broadcast %cst_7 : f32 to vector<128x64xf32>
    %12 = arith.mulf %11, %10 : vector<128x64xf32>
    %13 = arith.mulf %5, %12 : vector<128x64xf32>
    %14 = arith.truncf %13 : vector<128x64xf32> to vector<128x64xbf16>
    %c0_8 = arith.constant 0 : index
    %c0_9 = arith.constant 0 : index
    %15 = vector.load %arg4[%c0_8, %c0_9] : memref<128x64xbf16, #tpu.memory_space<vmem>>, vector<128x64xbf16>
    tpu.vector_store %arg4[%c0_8, %c0_9], %14 {strides = array<i32>} : memref<128x64xbf16, #tpu.memory_space<vmem>>, vector<128x64xbf16>,
    return
  }
  func.func @transform_0(%arg0: i32) -> (i32, i32) {
    %c0_i32 = arith.constant 0 : i32
    %c0_i32_0 = arith.constant 0 : i32
    return %arg0, %c0_i32 : i32, i32
  }
  func.func @transform_1(%arg0: i32) -> (i32, i32) {
    %c0_i32 = arith.constant 0 : i32
    %c0_i32_0 = arith.constant 0 : i32
    %c0_i32_1 = arith.constant 0 : i32
    return %c0_i32, %c0_i32_0 : i32, i32
  }
  func.func @transform_2(%arg0: i32) -> (i32, i32) {
    %c0_i32 = arith.constant 0 : i32
    %c0_i32_0 = arith.constant 0 : i32
    %c0_i32_1 = arith.constant 0 : i32
    return %c0_i32, %c0_i32_0 : i32, i32
  }
  func.func @transform_3(%arg0: i32) -> (i32, i32) {
    %c0_i32 = arith.constant 0 : i32
    %c0_i32_0 = arith.constant 0 : i32
    return %arg0, %c0_i32 : i32, i32
  }
}

module attributes {stable_mosaic.version = 11 : i64} {
  func.func @_mm_bias_act_kernel(%arg0: i32, %arg1: memref<128x576xbf16, #tpu.memory_space<vmem>>, %arg2: memref<576x128xbf16, #tpu.memory_space<vmem>>, %arg3: memref<1x128xf32, #tpu.memory_space<vmem>>, %arg4: memref<128x128xbf16, #tpu.memory_space<vmem>>) attributes {dimension_semantics = [#tpu.dimension_semantics<parallel>], iteration_bounds = array<i64: 1>, scalar_prefetch = 0 : i64, scratch_operands = 0 : i64, tpu.core_type = #tpu.core_type<tc>, window_params = [{transform_indices = @transform_0, window_bounds = array<i64: 128, 576>}, {pipeline_mode = #tpu.pipeline_mode<synchronous>, transform_indices = @transform_1, window_bounds = array<i64: 576, 128>}, {pipeline_mode = #tpu.pipeline_mode<synchronous>, transform_indices = @transform_2, window_bounds = array<i64: 1, 128>}, {transform_indices = @transform_3, window_bounds = array<i64: 128, 128>}]} {
    %c0 = arith.constant 0 : index
    %c0_0 = arith.constant 0 : index
    %0 = vector.load %arg1[%c0, %c0_0] : memref<128x576xbf16, #tpu.memory_space<vmem>>, vector<128x576xbf16>
    %c0_1 = arith.constant 0 : index
    %c0_2 = arith.constant 0 : index
    %1 = vector.load %arg2[%c0_1, %c0_2] : memref<576x128xbf16, #tpu.memory_space<vmem>>, vector<576x128xbf16>
    %cst = arith.constant dense<0.000000e+00> : vector<128x128xf32>
    %2 = tpu.matmul %0, %1, %cst {dimension_numbers = #tpu.dot_dimension_numbers<[1], [0], [0], [1], [0, 0, 1, 1], [], []>} : vector<128x576xbf16>, vector<576x128xbf16>, vector<128x128xf32> -> vector<128x128xf32>
    %c0_3 = arith.constant 0 : index
    %c0_4 = arith.constant 0 : index
    %3 = vector.load %arg3[%c0_3, %c0_4] : memref<1x128xf32, #tpu.memory_space<vmem>>, vector<1x128xf32>
    %4 = vector.broadcast %3 : vector<1x128xf32> to vector<128x128xf32>
    %5 = arith.addf %2, %4 : vector<128x128xf32>
    %cst_5 = arith.constant 5.000000e-01 : f32
    %6 = vector.broadcast %cst_5 : f32 to vector<128x128xf32>
    %7 = arith.mulf %6, %5 : vector<128x128xf32>
    %8 = math.tanh %7 : vector<128x128xf32>
    %cst_6 = arith.constant 1.000000e+00 : f32
    %9 = vector.broadcast %cst_6 : f32 to vector<128x128xf32>
    %10 = arith.addf %8, %9 : vector<128x128xf32>
    %cst_7 = arith.constant 5.000000e-01 : f32
    %11 = vector.broadcast %cst_7 : f32 to vector<128x128xf32>
    %12 = arith.mulf %11, %10 : vector<128x128xf32>
    %13 = arith.mulf %5, %12 : vector<128x128xf32>
    %14 = arith.truncf %13 : vector<128x128xf32> to vector<128x128xbf16>
    %c0_8 = arith.constant 0 : index
    %c0_9 = arith.constant 0 : index
    %15 = vector.load %arg4[%c0_8, %c0_9] : memref<128x128xbf16, #tpu.memory_space<vmem>>, vector<128x128xbf16>
    tpu.vector_store %arg4[%c0_8, %c0_9], %14 {strides = array<i32>} : memref<128x128xbf16, #tpu.memory_space<vmem>>, vector<128x128xbf16>,
    return
  }
  func.func @transform_0(%arg0: i32) -> (i32, i32) {
    %c0_i32 = arith.constant 0 : i32
    %c0_i32_0 = arith.constant 0 : i32
    return %arg0, %c0_i32 : i32, i32
  }
  func.func @transform_1(%arg0: i32) -> (i32, i32) {
    %c0_i32 = arith.constant 0 : i32
    %c0_i32_0 = arith.constant 0 : i32
    %c0_i32_1 = arith.constant 0 : i32
    return %c0_i32, %c0_i32_0 : i32, i32
  }
  func.func @transform_2(%arg0: i32) -> (i32, i32) {
    %c0_i32 = arith.constant 0 : i32
    %c0_i32_0 = arith.constant 0 : i32
    %c0_i32_1 = arith.constant 0 : i32
    return %c0_i32, %c0_i32_0 : i32, i32
  }
  func.func @transform_3(%arg0: i32) -> (i32, i32) {
    %c0_i32 = arith.constant 0 : i32
    %c0_i32_0 = arith.constant 0 : i32
    return %arg0, %c0_i32 : i32, i32
  }
}

module attributes {stable_mosaic.version = 11 : i64} {
  func.func @_level_mm_silu_kernel(%arg0: i32, %arg1: i32, %arg2: memref<1x128x128xbf16, #tpu.memory_space<vmem>>, %arg3: memref<1x128x32xbf16, #tpu.memory_space<vmem>>, %arg4: memref<1x1x32xf32, #tpu.memory_space<vmem>>, %arg5: memref<1x128x32xbf16, #tpu.memory_space<vmem>>) attributes {dimension_semantics = [#tpu.dimension_semantics<parallel>, #tpu.dimension_semantics<parallel>], iteration_bounds = array<i64: 3, 1>, scalar_prefetch = 0 : i64, scratch_operands = 0 : i64, tpu.core_type = #tpu.core_type<tc>, window_params = [{transform_indices = @transform_0, window_bounds = array<i64: 1, 128, 128>}, {transform_indices = @transform_1, window_bounds = array<i64: 1, 128, 32>}, {transform_indices = @transform_2, window_bounds = array<i64: 1, 1, 32>}, {transform_indices = @transform_3, window_bounds = array<i64: 1, 128, 32>}]} {
    %c0 = arith.constant 0 : index
    %c0_0 = arith.constant 0 : index
    %c0_1 = arith.constant 0 : index
    %0 = vector.load %arg2[%c0, %c0_0, %c0_1] : memref<1x128x128xbf16, #tpu.memory_space<vmem>>, vector<1x128x128xbf16>
    %1 = vector.shape_cast %0 : vector<1x128x128xbf16> to vector<128x128xbf16>
    %c0_2 = arith.constant 0 : index
    %c0_3 = arith.constant 0 : index
    %c0_4 = arith.constant 0 : index
    %2 = vector.load %arg3[%c0_2, %c0_3, %c0_4] : memref<1x128x32xbf16, #tpu.memory_space<vmem>>, vector<1x128x32xbf16>
    %3 = vector.shape_cast %2 : vector<1x128x32xbf16> to vector<128x32xbf16>
    %cst = arith.constant dense<0.000000e+00> : vector<128x32xf32>
    %4 = tpu.matmul %1, %3, %cst {dimension_numbers = #tpu.dot_dimension_numbers<[1], [0], [0], [1], [0, 0, 1, 1], [], []>} : vector<128x128xbf16>, vector<128x32xbf16>, vector<128x32xf32> -> vector<128x32xf32>
    %c0_5 = arith.constant 0 : index
    %c0_6 = arith.constant 0 : index
    %c0_7 = arith.constant 0 : index
    %5 = vector.load %arg4[%c0_5, %c0_6, %c0_7] : memref<1x1x32xf32, #tpu.memory_space<vmem>>, vector<1x1x32xf32>
    %6 = vector.shape_cast %5 : vector<1x1x32xf32> to vector<1x32xf32>
    %7 = vector.broadcast %6 : vector<1x32xf32> to vector<128x32xf32>
    %8 = arith.addf %4, %7 : vector<128x32xf32>
    %cst_8 = arith.constant 5.000000e-01 : f32
    %9 = vector.broadcast %cst_8 : f32 to vector<128x32xf32>
    %10 = arith.mulf %9, %8 : vector<128x32xf32>
    %11 = math.tanh %10 : vector<128x32xf32>
    %cst_9 = arith.constant 1.000000e+00 : f32
    %12 = vector.broadcast %cst_9 : f32 to vector<128x32xf32>
    %13 = arith.addf %11, %12 : vector<128x32xf32>
    %cst_10 = arith.constant 5.000000e-01 : f32
    %14 = vector.broadcast %cst_10 : f32 to vector<128x32xf32>
    %15 = arith.mulf %14, %13 : vector<128x32xf32>
    %16 = arith.mulf %8, %15 : vector<128x32xf32>
    %17 = arith.truncf %16 : vector<128x32xf32> to vector<128x32xbf16>
    %c0_11 = arith.constant 0 : index
    %c0_12 = arith.constant 0 : index
    %c0_13 = arith.constant 0 : index
    %18 = vector.load %arg5[%c0_11, %c0_12, %c0_13] : memref<1x128x32xbf16, #tpu.memory_space<vmem>>, vector<1x128x32xbf16>
    %19 = vector.shape_cast %18 : vector<1x128x32xbf16> to vector<128x32xbf16>
    %20 = vector.shape_cast %17 : vector<128x32xbf16> to vector<1x128x32xbf16>
    tpu.vector_store %arg5[%c0_11, %c0_12, %c0_13], %20 {strides = array<i32>} : memref<1x128x32xbf16, #tpu.memory_space<vmem>>, vector<1x128x32xbf16>,
    return
  }
  func.func @transform_0(%arg0: i32, %arg1: i32) -> (i32, i32, i32) {
    %c0_i32 = arith.constant 0 : i32
    %c0_i32_0 = arith.constant 0 : i32
    return %arg0, %arg1, %c0_i32 : i32, i32, i32
  }
  func.func @transform_1(%arg0: i32, %arg1: i32) -> (i32, i32, i32) {
    %c0_i32 = arith.constant 0 : i32
    %c0_i32_0 = arith.constant 0 : i32
    %c0_i32_1 = arith.constant 0 : i32
    return %arg0, %c0_i32, %c0_i32_0 : i32, i32, i32
  }
  func.func @transform_2(%arg0: i32, %arg1: i32) -> (i32, i32, i32) {
    %c0_i32 = arith.constant 0 : i32
    %c0_i32_0 = arith.constant 0 : i32
    %c0_i32_1 = arith.constant 0 : i32
    return %arg0, %c0_i32, %c0_i32_0 : i32, i32, i32
  }
  func.func @transform_3(%arg0: i32, %arg1: i32) -> (i32, i32, i32) {
    %c0_i32 = arith.constant 0 : i32
    %c0_i32_0 = arith.constant 0 : i32
    return %arg0, %arg1, %c0_i32 : i32, i32, i32
  }
}

module attributes {stable_mosaic.version = 11 : i64} {
  func.func @_level_pred_decode_kernel(%arg0: i32, %arg1: i32, %arg2: memref<1x128x64xbf16, #tpu.memory_space<vmem>>, %arg3: memref<1x64x128xbf16, #tpu.memory_space<vmem>>, %arg4: memref<1x1x128xf32, #tpu.memory_space<vmem>>, %arg5: memref<1x128x128xf32, #tpu.memory_space<vmem>>, %arg6: memref<1x128x128xf32, #tpu.memory_space<vmem>>, %arg7: memref<1x1x128xf32, #tpu.memory_space<vmem>>, %arg8: memref<1x128x128xf32, #tpu.memory_space<vmem>>) attributes {dimension_semantics = [#tpu.dimension_semantics<parallel>, #tpu.dimension_semantics<parallel>], iteration_bounds = array<i64: 3, 1>, scalar_prefetch = 0 : i64, scratch_operands = 0 : i64, tpu.core_type = #tpu.core_type<tc>, window_params = [{transform_indices = @transform_0, window_bounds = array<i64: 1, 128, 64>}, {transform_indices = @transform_1, window_bounds = array<i64: 1, 64, 128>}, {transform_indices = @transform_2, window_bounds = array<i64: 1, 1, 128>}, {transform_indices = @transform_3, window_bounds = array<i64: 1, 128, 128>}, {transform_indices = @transform_4, window_bounds = array<i64: 1, 128, 128>}, {transform_indices = @transform_5, window_bounds = array<i64: 1, 1, 128>}, {transform_indices = @transform_6, window_bounds = array<i64: 1, 128, 128>}]} {
    %c0 = arith.constant 0 : index
    %c0_0 = arith.constant 0 : index
    %c0_1 = arith.constant 0 : index
    %0 = vector.load %arg2[%c0, %c0_0, %c0_1] : memref<1x128x64xbf16, #tpu.memory_space<vmem>>, vector<1x128x64xbf16>
    %1 = vector.shape_cast %0 : vector<1x128x64xbf16> to vector<128x64xbf16>
    %c0_2 = arith.constant 0 : index
    %c0_3 = arith.constant 0 : index
    %c0_4 = arith.constant 0 : index
    %2 = vector.load %arg3[%c0_2, %c0_3, %c0_4] : memref<1x64x128xbf16, #tpu.memory_space<vmem>>, vector<1x64x128xbf16>
    %3 = vector.shape_cast %2 : vector<1x64x128xbf16> to vector<64x128xbf16>
    %cst = arith.constant dense<0.000000e+00> : vector<128x128xf32>
    %4 = tpu.matmul %1, %3, %cst {dimension_numbers = #tpu.dot_dimension_numbers<[1], [0], [0], [1], [0, 0, 1, 1], [], []>} : vector<128x64xbf16>, vector<64x128xbf16>, vector<128x128xf32> -> vector<128x128xf32>
    %c0_5 = arith.constant 0 : index
    %c0_6 = arith.constant 0 : index
    %c0_7 = arith.constant 0 : index
    %5 = vector.load %arg4[%c0_5, %c0_6, %c0_7] : memref<1x1x128xf32, #tpu.memory_space<vmem>>, vector<1x1x128xf32>
    %6 = vector.shape_cast %5 : vector<1x1x128xf32> to vector<1x128xf32>
    %7 = vector.broadcast %6 : vector<1x128xf32> to vector<128x128xf32>
    %8 = arith.addf %4, %7 : vector<128x128xf32>
    %c0_8 = arith.constant 0 : index
    %c0_9 = arith.constant 0 : index
    %c0_10 = arith.constant 0 : index
    %9 = vector.load %arg7[%c0_8, %c0_9, %c0_10] : memref<1x1x128xf32, #tpu.memory_space<vmem>>, vector<1x1x128xf32>
    %10 = vector.shape_cast %9 : vector<1x1x128xf32> to vector<1x128xf32>
    %cst_11 = arith.constant 5.000000e-01 : f32
    %11 = vector.broadcast %cst_11 : f32 to vector<128x128xf32>
    %12 = arith.mulf %11, %8 : vector<128x128xf32>
    %13 = math.tanh %12 : vector<128x128xf32>
    %cst_12 = arith.constant 1.000000e+00 : f32
    %14 = vector.broadcast %cst_12 : f32 to vector<128x128xf32>
    %15 = arith.addf %13, %14 : vector<128x128xf32>
    %cst_13 = arith.constant 5.000000e-01 : f32
    %16 = vector.broadcast %cst_13 : f32 to vector<128x128xf32>
    %17 = arith.mulf %16, %15 : vector<128x128xf32>
    %cst_14 = arith.constant 2.000000e+00 : f32
    %18 = vector.broadcast %cst_14 : f32 to vector<128x128xf32>
    %19 = arith.mulf %17, %18 : vector<128x128xf32>
    %cst_15 = arith.constant 5.000000e-01 : f32
    %20 = vector.broadcast %cst_15 : f32 to vector<128x128xf32>
    %21 = arith.subf %19, %20 : vector<128x128xf32>
    %c0_16 = arith.constant 0 : index
    %c0_17 = arith.constant 0 : index
    %c0_18 = arith.constant 0 : index
    %22 = vector.load %arg5[%c0_16, %c0_17, %c0_18] : memref<1x128x128xf32, #tpu.memory_space<vmem>>, vector<1x128x128xf32>
    %23 = vector.shape_cast %22 : vector<1x128x128xf32> to vector<128x128xf32>
    %24 = arith.addf %21, %23 : vector<128x128xf32>
    %25 = vector.broadcast %10 : vector<1x128xf32> to vector<128x128xf32>
    %26 = arith.mulf %24, %25 : vector<128x128xf32>
    %cst_19 = arith.constant 6.000000e+01 : f32
    %27 = vector.broadcast %cst_19 : f32 to vector<128x128xf32>
    %28 = arith.minimumf %8, %27 : vector<128x128xf32>
    %29 = math.exp %28 : vector<128x128xf32>
    %c0_20 = arith.constant 0 : index
    %c0_21 = arith.constant 0 : index
    %c0_22 = arith.constant 0 : index
    %30 = vector.load %arg6[%c0_20, %c0_21, %c0_22] : memref<1x128x128xf32, #tpu.memory_space<vmem>>, vector<1x128x128xf32>
    %31 = vector.shape_cast %30 : vector<1x128x128xf32> to vector<128x128xf32>
    %32 = arith.mulf %29, %31 : vector<128x128xf32>
    %c126_i32 = arith.constant 126 : i32
    %33 = tpu.dynamic_rotate %32 by %c126_i32 dim 1 : vector<128x128xf32>, i32 -> vector<128x128xf32>
    %cst_23 = arith.constant 5.000000e-01 : f32
    %34 = vector.broadcast %cst_23 : f32 to vector<128x128xf32>
    %35 = arith.mulf %34, %33 : vector<128x128xf32>
    %36 = arith.subf %26, %35 : vector<128x128xf32>
    %c2_i32 = arith.constant 2 : i32
    %37 = tpu.dynamic_rotate %26 by %c2_i32 dim 1 : vector<128x128xf32>, i32 -> vector<128x128xf32>
    %cst_24 = arith.constant 5.000000e-01 : f32
    %38 = vector.broadcast %cst_24 : f32 to vector<128x128xf32>
    %39 = arith.mulf %38, %32 : vector<128x128xf32>
    %40 = arith.addf %37, %39 : vector<128x128xf32>
    %41 = tpu.iota {dimensions = array<i32: 1>} : vector<128x128xi32>
    %c64_i32 = arith.constant 64 : i32
    %42 = vector.broadcast %c64_i32 : i32 to vector<128x128xi32>
    %43 = arith.subi %41, %42 : vector<128x128xi32>
    %c0_i32 = arith.constant 0 : i32
    %44 = vector.broadcast %c0_i32 : i32 to vector<128x128xi32>
    %45 = arith.cmpi sge, %43, %44 : vector<128x128xi32>
    %c12_i32 = arith.constant 12 : i32
    %46 = vector.broadcast %c12_i32 : i32 to vector<128x128xi32>
    %47 = arith.cmpi slt, %43, %46 : vector<128x128xi32>
    %48 = arith.andi %45, %47 : vector<128x128xi1>
    %c3_i32 = arith.constant 3 : i32
    %49 = vector.broadcast %c3_i32 : i32 to vector<128x128xi32>
    %50 = arith.andi %43, %49 : vector<128x128xi32>
    %c2_i32_25 = arith.constant 2 : i32
    %51 = vector.broadcast %c2_i32_25 : i32 to vector<128x128xi32>
    %52 = arith.cmpi slt, %50, %51 : vector<128x128xi32>
    %53 = arith.select %52, %36, %40 : vector<128x128xi1>, vector<128x128xf32>
    %54 = arith.select %48, %53, %8 : vector<128x128xi1>, vector<128x128xf32>
    %c0_26 = arith.constant 0 : index
    %c0_27 = arith.constant 0 : index
    %c0_28 = arith.constant 0 : index
    %55 = vector.load %arg8[%c0_26, %c0_27, %c0_28] : memref<1x128x128xf32, #tpu.memory_space<vmem>>, vector<1x128x128xf32>
    %56 = vector.shape_cast %55 : vector<1x128x128xf32> to vector<128x128xf32>
    %57 = vector.shape_cast %54 : vector<128x128xf32> to vector<1x128x128xf32>
    tpu.vector_store %arg8[%c0_26, %c0_27, %c0_28], %57 {strides = array<i32>} : memref<1x128x128xf32, #tpu.memory_space<vmem>>, vector<1x128x128xf32>,
    return
  }
  func.func @transform_0(%arg0: i32, %arg1: i32) -> (i32, i32, i32) {
    %c0_i32 = arith.constant 0 : i32
    %c0_i32_0 = arith.constant 0 : i32
    return %arg0, %arg1, %c0_i32 : i32, i32, i32
  }
  func.func @transform_1(%arg0: i32, %arg1: i32) -> (i32, i32, i32) {
    %c0_i32 = arith.constant 0 : i32
    %c0_i32_0 = arith.constant 0 : i32
    %c0_i32_1 = arith.constant 0 : i32
    return %arg0, %c0_i32, %c0_i32_0 : i32, i32, i32
  }
  func.func @transform_2(%arg0: i32, %arg1: i32) -> (i32, i32, i32) {
    %c0_i32 = arith.constant 0 : i32
    %c0_i32_0 = arith.constant 0 : i32
    %c0_i32_1 = arith.constant 0 : i32
    return %arg0, %c0_i32, %c0_i32_0 : i32, i32, i32
  }
  func.func @transform_3(%arg0: i32, %arg1: i32) -> (i32, i32, i32) {
    %c0_i32 = arith.constant 0 : i32
    %c0_i32_0 = arith.constant 0 : i32
    return %arg0, %arg1, %c0_i32 : i32, i32, i32
  }
  func.func @transform_4(%arg0: i32, %arg1: i32) -> (i32, i32, i32) {
    %c0_i32 = arith.constant 0 : i32
    %c0_i32_0 = arith.constant 0 : i32
    return %arg0, %arg1, %c0_i32 : i32, i32, i32
  }
  func.func @transform_5(%arg0: i32, %arg1: i32) -> (i32, i32, i32) {
    %c0_i32 = arith.constant 0 : i32
    %c0_i32_0 = arith.constant 0 : i32
    %c0_i32_1 = arith.constant 0 : i32
    return %arg0, %c0_i32, %c0_i32_0 : i32, i32, i32
  }
  func.func @transform_6(%arg0: i32, %arg1: i32) -> (i32, i32, i32) {
    %c0_i32 = arith.constant 0 : i32
    %c0_i32_0 = arith.constant 0 : i32
    return %arg0, %arg1, %c0_i32 : i32, i32, i32
  }
}

module attributes {stable_mosaic.version = 11 : i64} {
  func.func @_level_mm_silu_kernel(%arg0: i32, %arg1: i32, %arg2: memref<1x128x288xbf16, #tpu.memory_space<vmem>>, %arg3: memref<1x288x64xbf16, #tpu.memory_space<vmem>>, %arg4: memref<1x1x64xf32, #tpu.memory_space<vmem>>, %arg5: memref<1x128x64xbf16, #tpu.memory_space<vmem>>) attributes {dimension_semantics = [#tpu.dimension_semantics<parallel>, #tpu.dimension_semantics<parallel>], iteration_bounds = array<i64: 3, 1>, scalar_prefetch = 0 : i64, scratch_operands = 0 : i64, tpu.core_type = #tpu.core_type<tc>, window_params = [{transform_indices = @transform_0, window_bounds = array<i64: 1, 128, 288>}, {transform_indices = @transform_1, window_bounds = array<i64: 1, 288, 64>}, {transform_indices = @transform_2, window_bounds = array<i64: 1, 1, 64>}, {transform_indices = @transform_3, window_bounds = array<i64: 1, 128, 64>}]} {
    %c0 = arith.constant 0 : index
    %c0_0 = arith.constant 0 : index
    %c0_1 = arith.constant 0 : index
    %0 = vector.load %arg2[%c0, %c0_0, %c0_1] : memref<1x128x288xbf16, #tpu.memory_space<vmem>>, vector<1x128x288xbf16>
    %1 = vector.shape_cast %0 : vector<1x128x288xbf16> to vector<128x288xbf16>
    %c0_2 = arith.constant 0 : index
    %c0_3 = arith.constant 0 : index
    %c0_4 = arith.constant 0 : index
    %2 = vector.load %arg3[%c0_2, %c0_3, %c0_4] : memref<1x288x64xbf16, #tpu.memory_space<vmem>>, vector<1x288x64xbf16>
    %3 = vector.shape_cast %2 : vector<1x288x64xbf16> to vector<288x64xbf16>
    %cst = arith.constant dense<0.000000e+00> : vector<128x64xf32>
    %4 = tpu.matmul %1, %3, %cst {dimension_numbers = #tpu.dot_dimension_numbers<[1], [0], [0], [1], [0, 0, 1, 1], [], []>} : vector<128x288xbf16>, vector<288x64xbf16>, vector<128x64xf32> -> vector<128x64xf32>
    %c0_5 = arith.constant 0 : index
    %c0_6 = arith.constant 0 : index
    %c0_7 = arith.constant 0 : index
    %5 = vector.load %arg4[%c0_5, %c0_6, %c0_7] : memref<1x1x64xf32, #tpu.memory_space<vmem>>, vector<1x1x64xf32>
    %6 = vector.shape_cast %5 : vector<1x1x64xf32> to vector<1x64xf32>
    %7 = vector.broadcast %6 : vector<1x64xf32> to vector<128x64xf32>
    %8 = arith.addf %4, %7 : vector<128x64xf32>
    %cst_8 = arith.constant 5.000000e-01 : f32
    %9 = vector.broadcast %cst_8 : f32 to vector<128x64xf32>
    %10 = arith.mulf %9, %8 : vector<128x64xf32>
    %11 = math.tanh %10 : vector<128x64xf32>
    %cst_9 = arith.constant 1.000000e+00 : f32
    %12 = vector.broadcast %cst_9 : f32 to vector<128x64xf32>
    %13 = arith.addf %11, %12 : vector<128x64xf32>
    %cst_10 = arith.constant 5.000000e-01 : f32
    %14 = vector.broadcast %cst_10 : f32 to vector<128x64xf32>
    %15 = arith.mulf %14, %13 : vector<128x64xf32>
    %16 = arith.mulf %8, %15 : vector<128x64xf32>
    %17 = arith.truncf %16 : vector<128x64xf32> to vector<128x64xbf16>
    %c0_11 = arith.constant 0 : index
    %c0_12 = arith.constant 0 : index
    %c0_13 = arith.constant 0 : index
    %18 = vector.load %arg5[%c0_11, %c0_12, %c0_13] : memref<1x128x64xbf16, #tpu.memory_space<vmem>>, vector<1x128x64xbf16>
    %19 = vector.shape_cast %18 : vector<1x128x64xbf16> to vector<128x64xbf16>
    %20 = vector.shape_cast %17 : vector<128x64xbf16> to vector<1x128x64xbf16>
    tpu.vector_store %arg5[%c0_11, %c0_12, %c0_13], %20 {strides = array<i32>} : memref<1x128x64xbf16, #tpu.memory_space<vmem>>, vector<1x128x64xbf16>,
    return
  }
  func.func @transform_0(%arg0: i32, %arg1: i32) -> (i32, i32, i32) {
    %c0_i32 = arith.constant 0 : i32
    %c0_i32_0 = arith.constant 0 : i32
    return %arg0, %arg1, %c0_i32 : i32, i32, i32
  }
  func.func @transform_1(%arg0: i32, %arg1: i32) -> (i32, i32, i32) {
    %c0_i32 = arith.constant 0 : i32
    %c0_i32_0 = arith.constant 0 : i32
    %c0_i32_1 = arith.constant 0 : i32
    return %arg0, %c0_i32, %c0_i32_0 : i32, i32, i32
  }
  func.func @transform_2(%arg0: i32, %arg1: i32) -> (i32, i32, i32) {
    %c0_i32 = arith.constant 0 : i32
    %c0_i32_0 = arith.constant 0 : i32
    %c0_i32_1 = arith.constant 0 : i32
    return %arg0, %c0_i32, %c0_i32_0 : i32, i32, i32
  }
  func.func @transform_3(%arg0: i32, %arg1: i32) -> (i32, i32, i32) {
    %c0_i32 = arith.constant 0 : i32
    %c0_i32_0 = arith.constant 0 : i32
    return %arg0, %arg1, %c0_i32 : i32, i32, i32
  }
}

</mosaic_0001>

<bundles_post_ra>
// kernel: _forward_impl.8
= control target key start
LH: loop header
LB: loop body
LE: loop exit
PB: predicated region body
PF: predicated region fallthrough
CT: control target
= control target key end

     0   :  { %s2824_s12 = smov 0   ;;  %s3877_s0 = inlined_call_operand.vmem [shape: bf16[2048,32], index: 0, kind: input, shape index: {}]   ;;  %s3878_s1 = inlined_call_operand.vmem [shape: bf16[32,16], index: 1, kind: input, shape index: {}]   ;;  %s3879_s2 = inlined_call_operand.vmem [shape: f32[1,16], index: 2, kind: input, shape index: {}]   ;;  %s3880_s3 = inlined_call_operand.vmem [shape: bf16[2048,16], index: 3, kind: output, shape index: {}]  }
   0x1 LB: > { %s2118_s13 = sadd.s32 4294967295, %s2802_s12   ;;  %p2122_p0 = scmp.ge.s32.totalorder %s2802_s12, 1  ;;  %s2802_s12 = sphi %s2824_s12, %s13_s12  }
   0x2   : > { %p138_p1 = scmp.lt.s32.totalorder %s2802_s12, 3 }
   0x4   : > { %p139_p2 = pnand %p2122_p0, %p138_p1 }
   0x5   : > { %s2123_s16 = sshll.u32 (!%p139_p2), %s2118_s13, 7 }
   0x6   : > { %142 = sbr.rel (%p139_p2) target bundleno = 421 (0x1a5), region = 32  ;;  %p163_p3 = scmp.lt.s32.totalorder (!%p139_p2), %s2123_s16, 255 }
   0xb   : > { %v2522_v0 = vld [vmem:[%s3878_s1 + $0x8] sm:$0xff]  ;;  %v2521_v1 = vld [vmem:[%s3878_s1] sm:$0xff]  ;;  %s3882_s16 = smov (!%p163_p3, %s2123_s16), 255  ;;  %vm643_vm0 = vcmask 261120   ;;  %vm1933_vm1 = vcmask 125952  }
   0xc   : > { %842 = vmatpush.bf16.msra.mxu0 %v2522_v0  ;;  %2523 = vmatpush.bf16.msra.mxu1 %v2522_v0  ;;  %s2124_s19 = sshll.u32 %s3882_s16, 2  ;;  %v2915_v34 = vld [vmem:[%s3879_s2] ss:$0 sm:$0xff] }
   0xd   : > { %2524 = vmatpush.bf16.msra.mxu2 %v2522_v0  ;;  %2525 = vmatpush.bf16.msra.mxu3 %v2522_v0  ;;  %s2846_s22 = scalar_lea.vmem %s3877_s0, %s2124_s19  ;;  %s2955_s27 = scalar_lea.vmem %s3880_s3, %s2124_s19 }
   0xe   : > { %v2457_v2 = vld [vmem:[%s2846_s22] sm:$0xff]  ;;  %v2458_v6 = vld [vmem:[%s2846_s22 + $0x8] sm:$0xff]  ;;  %v2459_v10 = vld [vmem:[%s2846_s22 + $0x10] sm:$0xff] }
   0xf   : > { %v2473_v3 = vld [vmem:[%s2846_s22 + $0x80] sm:$0xff]  ;;  %v2474_v7 = vld [vmem:[%s2846_s22 + $0x88] sm:$0xff]  ;;  %v2475_v11 = vld [vmem:[%s2846_s22 + $0x90] sm:$0xff] }
  0x10   : > { %843 = vmatpush.bf16.msra.mxu0 %v2521_v1  ;;  %2526 = vmatpush.bf16.msra.mxu1 %v2521_v1  ;;  %v2489_v4 = vld [vmem:[%s2846_s22 + $0x100] sm:$0xff]  ;;  %v2490_v8 = vld [vmem:[%s2846_s22 + $0x108] sm:$0xff]  ;;  %v2491_v12 = vld [vmem:[%s2846_s22 + $0x110] sm:$0xff] }
  0x11   : > { %2527 = vmatpush.bf16.msra.mxu2 %v2521_v1  ;;  %2528 = vmatpush.bf16.msra.mxu3 %v2521_v1  ;;  %v2505_v5 = vld [vmem:[%s2846_s22 + $0x180] sm:$0xff]  ;;  %v2506_v9 = vld [vmem:[%s2846_s22 + $0x188] sm:$0xff]  ;;  %v2507_v13 = vld [vmem:[%s2846_s22 + $0x190] sm:$0xff] }
  0x12   : > { %v2460_v14 = vld [vmem:[%s2846_s22 + $0x18] sm:$0xff]  ;;  %v2461_v18 = vld [vmem:[%s2846_s22 + $0x20] sm:$0xff]  ;;  %v2462_v22 = vld [vmem:[%s2846_s22 + $0x28] sm:$0xff] }
  0x13   : > { %2391 = vmatmul.msk.bf16.vlgmr.msra.gmra.mxu0 %vm643_vm0, %v2457_v2  ;;  %2407 = vmatmul.msk.bf16.vlgmr.msra.gmra.mxu1 %vm643_vm0, %v2473_v3  ;;  %v2476_v15 = vld [vmem:[%s2846_s22 + $0x98] sm:$0xff]  ;;  %v2477_v19 = vld [vmem:[%s2846_s22 + $0xa0] sm:$0xff]  ;;  %v2478_v23 = vld [vmem:[%s2846_s22 + $0xa8] sm:$0xff] }
  0x14   : > { %2423 = vmatmul.msk.bf16.vlgmr.msra.gmra.mxu2 %vm643_vm0, %v2489_v4  ;;  %2439 = vmatmul.msk.bf16.vlgmr.msra.gmra.mxu3 %vm643_vm0, %v2505_v5  ;;  %v2492_v16 = vld [vmem:[%s2846_s22 + $0x118] sm:$0xff]  ;;  %v2493_v20 = vld [vmem:[%s2846_s22 + $0x120] sm:$0xff]  ;;  %v2494_v24 = vld [vmem:[%s2846_s22 + $0x128] sm:$0xff] }
  0x15   : > { %v2508_v17 = vld [vmem:[%s2846_s22 + $0x198] sm:$0xff]  ;;  %v2509_v21 = vld [vmem:[%s2846_s22 + $0x1a0] sm:$0xff]  ;;  %v2510_v25 = vld [vmem:[%s2846_s22 + $0x1a8] sm:$0xff] }
  0x16   : > { %v2463_v26 = vld [vmem:[%s2846_s22 + $0x30] sm:$0xff]  ;;  %v2464_v30 = vld [vmem:[%s2846_s22 + $0x38] sm:$0xff]  ;;  %v2465_v35 = vld [vmem:[%s2846_s22 + $0x40] sm:$0xff] }
  0x17   : > { %v2479_v27 = vld [vmem:[%s2846_s22 + $0xb0] sm:$0xff]  ;;  %v2480_v31 = vld [vmem:[%s2846_s22 + $0xb8] sm:$0xff]  ;;  %v2481_v36 = vld [vmem:[%s2846_s22 + $0xc0] sm:$0xff] }
  0x18   : > { %v2495_v28 = vld [vmem:[%s2846_s22 + $0x130] sm:$0xff]  ;;  %v2496_v32 = vld [vmem:[%s2846_s22 + $0x138] sm:$0xff]  ;;  %v2497_v39 = vld [vmem:[%s2846_s22 + $0x140] sm:$0xff] }
  0x19   : > { %v2511_v29 = vld [vmem:[%s2846_s22 + $0x1b0] sm:$0xff]  ;;  %v2512_v33 = vld [vmem:[%s2846_s22 + $0x1b8] sm:$0xff]  ;;  %v2513_v40 = vld [vmem:[%s2846_s22 + $0x1c0] sm:$0xff] }
  0x1a   : > { %v2466_v1 = vld [vmem:[%s2846_s22 + $0x48] sm:$0xff] }
  0x1b   : > { %v2482_v2 = vld [vmem:[%s2846_s22 + $0xc8] sm:$0xff] }
  0x23   : > { %2392 = vmatmul.msk.bf16.gmra.mxu0 %vm643_vm0, %v2458_v6  ;;  %2408 = vmatmul.msk.bf16.gmra.mxu1 %vm643_vm0, %v2474_v7 }
  0x24   : > { %2424 = vmatmul.msk.bf16.gmra.mxu2 %vm643_vm0, %v2490_v8  ;;  %2440 = vmatmul.msk.bf16.gmra.mxu3 %vm643_vm0, %v2506_v9  ;;  %v2498_v8 = vld [vmem:[%s2846_s22 + $0x148] sm:$0xff] }
  0x25   : > { %v2514_v9 = vld [vmem:[%s2846_s22 + $0x1c8] sm:$0xff] }
  0x33   : > { %2393 = vmatmul.msk.bf16.gmra.mxu0 %vm643_vm0, %v2459_v10  ;;  %2409 = vmatmul.msk.bf16.gmra.mxu1 %vm643_vm0, %v2475_v11 }
  0x34   : > { %2425 = vmatmul.msk.bf16.gmra.mxu2 %vm643_vm0, %v2491_v12  ;;  %2441 = vmatmul.msk.bf16.gmra.mxu3 %vm643_vm0, %v2507_v13 }
  0x43   : > { %2394 = vmatmul.msk.bf16.gmra.mxu0 %vm643_vm0, %v2460_v14  ;;  %2410 = vmatmul.msk.bf16.gmra.mxu1 %vm643_vm0, %v2476_v15 }
  0x44   : > { %2426 = vmatmul.msk.bf16.gmra.mxu2 %vm643_vm0, %v2492_v16  ;;  %2442 = vmatmul.msk.bf16.gmra.mxu3 %vm643_vm0, %v2508_v17 }
  0x53   : > { %2395 = vmatmul.msk.bf16.gmra.mxu0 %vm643_vm0, %v2461_v18  ;;  %2411 = vmatmul.msk.bf16.gmra.mxu1 %vm643_vm0, %v2477_v19 }
  0x54   : > { %2427 = vmatmul.msk.bf16.gmra.mxu2 %vm643_vm0, %v2493_v20  ;;  %2443 = vmatmul.msk.bf16.gmra.mxu3 %vm643_vm0, %v2509_v21 }
  0x63   : > { %2396 = vmatmul.msk.bf16.gmra.mxu0 %vm643_vm0, %v2462_v22  ;;  %2412 = vmatmul.msk.bf16.gmra.mxu1 %vm643_vm0, %v2478_v23 }
  0x64   : > { %2428 = vmatmul.msk.bf16.gmra.mxu2 %vm643_vm0, %v2494_v24  ;;  %2444 = vmatmul.msk.bf16.gmra.mxu3 %vm643_vm0, %v2510_v25 }
  0x73   : > { %2397 = vmatmul.msk.bf16.gmra.mxu0 %vm643_vm0, %v2463_v26  ;;  %2413 = vmatmul.msk.bf16.gmra.mxu1 %vm643_vm0, %v2479_v27 }
  0x74   : > { %2429 = vmatmul.msk.bf16.gmra.mxu2 %vm643_vm0, %v2495_v28  ;;  %2445 = vmatmul.msk.bf16.gmra.mxu3 %vm643_vm0, %v2511_v29 }
  0x83   : > { %2398 = vmatmul.msk.bf16.gmra.mxu0 %vm643_vm0, %v2464_v30  ;;  %2414 = vmatmul.msk.bf16.gmra.mxu1 %vm643_vm0, %v2480_v31 }
  0x84   : > { %2430 = vmatmul.msk.bf16.gmra.mxu2 %vm643_vm0, %v2496_v32  ;;  %2446 = vmatmul.msk.bf16.gmra.mxu3 %vm643_vm0, %v2512_v33 }
  0x90   : > { %v845_v37 = vpop.f32.mrf.mxu0  ;;  %v925_v38 = vpop.f32.mrf.mxu1 }
  0x91   : > { %v846_v41 = vadd.f32 %v2915_v34, %v845_v37  ;;  %v926_v42 = vadd.f32 %v2915_v34, %v925_v38 }
  0x93   : > { %v1165_v43 = vmul.f32 0.5, %v846_v41  ;;  %v1197_v44 = vmul.f32 0.5, %v926_v42  ;;  %2399 = vmatmul.msk.bf16.gmra.mxu0 %vm643_vm0, %v2465_v35  ;;  %2415 = vmatmul.msk.bf16.gmra.mxu1 %vm643_vm0, %v2481_v36 }
  0x94   : > { %2431 = vmatmul.msk.bf16.gmra.mxu2 %vm643_vm0, %v2497_v39  ;;  %2447 = vmatmul.msk.bf16.gmra.mxu3 %vm643_vm0, %v2513_v40 }
  0x95   : > { %2538 = vtanh.f32 %v1165_v43 }
  0x96   : > { %2540 = vtanh.f32 %v1197_v44 }
  0x97   : > { %v1005_v45 = vpop.f32.mrf.mxu2  ;;  %v1085_v46 = vpop.f32.mrf.mxu3 }
  0x98   : > { %v1006_v47 = vadd.f32 %v2915_v34, %v1005_v45  ;;  %v2929_v48 = vadd.f32 %v2915_v34, %v1085_v46  ;;  %v847_v49 = vpop.f32.mrf.mxu0  ;;  %v927_v50 = vpop.f32.mrf.mxu1 }
  0x99   : > { %v2932_v51 = vadd.f32 %v2915_v34, %v847_v49  ;;  %v2935_v52 = vadd.f32 %v2915_v34, %v927_v50 }
  0x9a   : > { %v1229_v53 = vmul.f32 0.5, %v1006_v47  ;;  %v1261_v54 = vmul.f32 0.5, %v2929_v48 }
  0x9b   : > { %v2539_v55 = vpop.eup %2538  ;;  %v1166_v56 = vmul.f32 0.5, %v2932_v51  ;;  %v1198_v57 = vmul.f32 0.5, %v2935_v52 }
  0x9c   : > { %v2541_v58 = vpop.eup %2540  ;;  %v1421_v59 = vadd.f32 1.0, %v2539_v55  ;;  %2542 = vtanh.f32 %v1229_v53 }
  0x9d   : > { %v1453_v60 = vadd.f32 1.0, %v2541_v58  ;;  %2544 = vtanh.f32 %v1261_v54 }
  0x9e   : > { %v1549_v61 = vmul.f32 0.5, %v1421_v59  ;;  %2546 = vtanh.f32 %v1166_v56 }
  0x9f   : > { %v1581_v62 = vmul.f32 0.5, %v1453_v60  ;;  %2548 = vtanh.f32 %v1198_v57  ;;  %v1007_v63 = vpop.f32.mrf.mxu2  ;;  %v1087_v0 = vpop.f32.mrf.mxu3 }
  0xa0   : > { %v1677_v3 = vmul.f32 %v1549_v61, %v846_v41  ;;  %v2943_v4 = vadd.f32 %v2915_v34, %v1007_v63  ;;  %v2946_v5 = vadd.f32 %v2915_v34, %v1087_v0  ;;  %v850_v6 = vpop.f32.mrf.mxu0  ;;  %v930_v7 = vpop.f32.mrf.mxu1 }
  0xa1   : > { %v1709_v10 = vmul.f32 %v1581_v62, %v926_v42  ;;  %v2958_v11 = vadd.f32 %v2915_v34, %v850_v6  ;;  %v2961_v12 = vadd.f32 %v2915_v34, %v930_v7 }
  0xa2   : > { %v2543_v13 = vpop.eup %2542  ;;  %v1805_v14 = vpack.c.bf16 %v1677_v3, %v1677_v3  ;;  %v1230_v15 = vmul.f32 0.5, %v2943_v4  ;;  %v1262_v16 = vmul.f32 0.5, %v2946_v5  ;;  %v2483_v3 = vld [vmem:[%s2846_s22 + $0xd0] sm:$0xff] }
  0xa3   : > { %v2545_v17 = vpop.eup %2544  ;;  %v1837_v18 = vpack.c.bf16 %v1709_v10, %v1709_v10  ;;  %v1485_v19 = vadd.f32 1.0, %v2543_v13  ;;  %v1167_v20 = vmul.f32 0.5, %v2958_v11  ;;  %v1199_v21 = vmul.f32 0.5, %v2961_v12  ;;  %2400 = vmatmul.msk.bf16.gmra.mxu0 %vm643_vm0, %v2466_v1  ;;  %2416 = vmatmul.msk.bf16.gmra.mxu1 %vm643_vm0, %v2482_v2  ;;  %v2467_v2 = vld [vmem:[%s2846_s22 + $0x50] sm:$0xff] }
  0xa4   : > { %v2547_v22 = vpop.eup %2546  ;;  %1934 = vst.msk [vmem:[%s2955_s27] sm:$0xf] %vm1933_vm1, %v1805_v14  ;;  %v1517_v23 = vadd.f32 1.0, %v2545_v17  ;;  %2550 = vtanh.f32 %v1230_v15  ;;  %2432 = vmatmul.msk.bf16.gmra.mxu2 %vm643_vm0, %v2498_v8  ;;  %2448 = vmatmul.msk.bf16.gmra.mxu3 %vm643_vm0, %v2514_v9  ;;  %v2499_v14 = vld [vmem:[%s2846_s22 + $0x150] sm:$0xff] }
  0xa5   : > { %v2549_v24 = vpop.eup %2548  ;;  %1966 = vst.msk [vmem:[%s2955_s27 + $0x80] sm:$0xf] %vm1933_vm1, %v1837_v18  ;;  %v1613_v25 = vmul.f32 0.5, %v1485_v19  ;;  %v1422_v26 = vadd.f32 1.0, %v2547_v22  ;;  %2552 = vtanh.f32 %v1262_v16 }
  0xa6   : > { %v1645_v27 = vmul.f32 0.5, %v1517_v23  ;;  %v1454_v28 = vadd.f32 1.0, %v2549_v24  ;;  %2554 = vtanh.f32 %v1167_v20 }
  0xa7   : > { %v1741_v29 = vmul.f32 %v1613_v25, %v1006_v47  ;;  %v1550_v30 = vmul.f32 0.5, %v1422_v26  ;;  %2556 = vtanh.f32 %v1199_v21  ;;  %v1010_v31 = vpop.f32.mrf.mxu2  ;;  %v1090_v32 = vpop.f32.mrf.mxu3 }
  0xa8   : > { %v1773_v33 = vmul.f32 %v1645_v27, %v2929_v48  ;;  %v1582_v35 = vmul.f32 0.5, %v1454_v28  ;;  %v2977_v36 = vadd.f32 %v2915_v34, %v1010_v31  ;;  %v2980_v37 = vadd.f32 %v2915_v34, %v1090_v32  ;;  %v852_v38 = vpop.f32.mrf.mxu0  ;;  %v932_v39 = vpop.f32.mrf.mxu1 }
  0xa9   : > { %v1869_v40 = vpack.c.bf16 %v1741_v29, %v1741_v29  ;;  %v1678_v41 = vmul.f32 %v1550_v30, %v2932_v51  ;;  %v2984_v42 = vadd.f32 %v2915_v34, %v852_v38  ;;  %v2987_v43 = vadd.f32 %v2915_v34, %v932_v39 }
  0xaa   : > { %v2551_v44 = vpop.eup %2550  ;;  %v1901_v45 = vpack.c.bf16 %v1773_v33, %v1773_v33  ;;  %v1710_v46 = vmul.f32 %v1582_v35, %v2935_v52  ;;  %v1231_v47 = vmul.f32 0.5, %v2977_v36  ;;  %v1263_v48 = vmul.f32 0.5, %v2980_v37 }
  0xab   : > { %v2553_v49 = vpop.eup %2552  ;;  %1998 = vst.msk [vmem:[%s2955_s27 + $0x100] sm:$0xf] %vm1933_vm1, %v1869_v40  ;;  %v1806_v50 = vpack.c.bf16 %v1678_v41, %v1678_v41  ;;  %v1486_v51 = vadd.f32 1.0, %v2551_v44  ;;  %v1168_v53 = vmul.f32 0.5, %v2984_v42  ;;  %v1200_v54 = vmul.f32 0.5, %v2987_v43 }
  0xac   : > { %v2555_v55 = vpop.eup %2554  ;;  %2030 = vst.msk [vmem:[%s2955_s27 + $0x180] sm:$0xf] %vm1933_vm1, %v1901_v45  ;;  %v1838_v56 = vpack.c.bf16 %v1710_v46, %v1710_v46  ;;  %v1518_v57 = vadd.f32 1.0, %v2553_v49  ;;  %2558 = vtanh.f32 %v1231_v47 }
  0xad   : > { %v2557_v52 = vpop.eup %2556  ;;  %1935 = vst.msk [vmem:[%s2955_s27 + $0x4] sm:$0xf] %vm1933_vm1, %v1806_v50  ;;  %v1614_v58 = vmul.f32 0.5, %v1486_v51  ;;  %v1423_v59 = vadd.f32 1.0, %v2555_v55  ;;  %2560 = vtanh.f32 %v1263_v48 }
  0xae   : > { %1967 = vst.msk [vmem:[%s2955_s27 + $0x84] sm:$0xf] %vm1933_vm1, %v1838_v56  ;;  %v1646_v60 = vmul.f32 0.5, %v1518_v57  ;;  %v1455_v61 = vadd.f32 1.0, %v2557_v52  ;;  %2562 = vtanh.f32 %v1168_v53 }
  0xaf   : > { %v1742_v62 = vmul.f32 %v1614_v58, %v2943_v4  ;;  %v1551_v63 = vmul.f32 0.5, %v1423_v59  ;;  %2564 = vtanh.f32 %v1200_v54  ;;  %v1012_v0 = vpop.f32.mrf.mxu2  ;;  %v1092_v1 = vpop.f32.mrf.mxu3  ;;  %v2515_v4 = vld [vmem:[%s2846_s22 + $0x1d0] sm:$0xff] }
  0xb0   : > { %v1774_v6 = vmul.f32 %v1646_v60, %v2946_v5  ;;  %v1583_v7 = vmul.f32 0.5, %v1455_v61  ;;  %v3007_v8 = vadd.f32 %v2915_v34, %v1012_v0  ;;  %v3010_v9 = vadd.f32 %v2915_v34, %v1092_v1  ;;  %v855_v10 = vpop.f32.mrf.mxu0  ;;  %v935_v13 = vpop.f32.mrf.mxu1 }
  0xb1   : > { %v1870_v15 = vpack.c.bf16 %v1742_v62, %v1742_v62  ;;  %v1679_v16 = vmul.f32 %v1551_v63, %v2958_v11  ;;  %v3016_v17 = vadd.f32 %v2915_v34, %v855_v10  ;;  %v3019_v5 = vadd.f32 %v2915_v34, %v935_v13  ;;  %v2468_v13 = vld [vmem:[%s2846_s22 + $0x58] sm:$0xff] }
  0xb2   : > { %v2559_v18 = vpop.eup %2558  ;;  %v1902_v19 = vpack.c.bf16 %v1774_v6, %v1774_v6  ;;  %v1711_v20 = vmul.f32 %v1583_v7, %v2961_v12  ;;  %v1232_v21 = vmul.f32 0.5, %v3007_v8  ;;  %v1264_v22 = vmul.f32 0.5, %v3010_v9 }
  0xb3   : > { %v2561_v23 = vpop.eup %2560  ;;  %1999 = vst.msk [vmem:[%s2955_s27 + $0x104] sm:$0xf] %vm1933_vm1, %v1870_v15  ;;  %v1807_v11 = vpack.c.bf16 %v1679_v16, %v1679_v16  ;;  %v1487_v24 = vadd.f32 1.0, %v2559_v18  ;;  %v1169_v25 = vmul.f32 0.5, %v3016_v17  ;;  %v1201_v26 = vmul.f32 0.5, %v3019_v5  ;;  %2401 = vmatmul.msk.bf16.gmra.mxu0 %vm643_vm0, %v2467_v2  ;;  %2417 = vmatmul.msk.bf16.gmra.mxu1 %vm643_vm0, %v2483_v3 }
  0xb4   : > { %v2563_v12 = vpop.eup %2562  ;;  %2031 = vst.msk [vmem:[%s2955_s27 + $0x184] sm:$0xf] %vm1933_vm1, %v1902_v19  ;;  %v1839_v27 = vpack.c.bf16 %v1711_v20, %v1711_v20  ;;  %v1519_v28 = vadd.f32 1.0, %v2561_v23  ;;  %2566 = vtanh.f32 %v1232_v21  ;;  %2433 = vmatmul.msk.bf16.gmra.mxu2 %vm643_vm0, %v2499_v14  ;;  %2449 = vmatmul.msk.bf16.gmra.mxu3 %vm643_vm0, %v2515_v4  ;;  %v2484_v14 = vld [vmem:[%s2846_s22 + $0xd8] sm:$0xff] }
  0xb5   : > { %v2565_v29 = vpop.eup %2564  ;;  %1936 = vst.msk [vmem:[%s2955_s27 + $0x8] sm:$0xf] %vm1933_vm1, %v1807_v11  ;;  %v1615_v30 = vmul.f32 0.5, %v1487_v24  ;;  %v1424_v31 = vadd.f32 1.0, %v2563_v12  ;;  %2568 = vtanh.f32 %v1264_v22  ;;  %v2500_v21 = vld [vmem:[%s2846_s22 + $0x158] sm:$0xff] }
  0xb6   : > { %1968 = vst.msk [vmem:[%s2955_s27 + $0x88] sm:$0xf] %vm1933_vm1, %v1839_v27  ;;  %v1647_v32 = vmul.f32 0.5, %v1519_v28  ;;  %v1456_v33 = vadd.f32 1.0, %v2565_v29  ;;  %2570 = vtanh.f32 %v1169_v25 }
  0xb7   : > { %v1743_v35 = vmul.f32 %v1615_v30, %v2977_v36  ;;  %v1552_v38 = vmul.f32 0.5, %v1424_v31  ;;  %2572 = vtanh.f32 %v1201_v26  ;;  %v1015_v39 = vpop.f32.mrf.mxu2  ;;  %v1095_v40 = vpop.f32.mrf.mxu3 }
  0xb8   : > { %v1775_v41 = vmul.f32 %v1647_v32, %v2980_v37  ;;  %v1584_v44 = vmul.f32 0.5, %v1456_v33  ;;  %v3041_v45 = vadd.f32 %v2915_v34, %v1015_v39  ;;  %v3044_v46 = vadd.f32 %v2915_v34, %v1095_v40  ;;  %v857_v47 = vpop.f32.mrf.mxu0  ;;  %v937_v48 = vpop.f32.mrf.mxu1 }
  0xb9   : > { %v1871_v49 = vpack.c.bf16 %v1743_v35, %v1743_v35  ;;  %v1680_v36 = vmul.f32 %v1552_v38, %v2984_v42  ;;  %v3048_v50 = vadd.f32 %v2915_v34, %v857_v47  ;;  %v3051_v51 = vadd.f32 %v2915_v34, %v937_v48 }
  0xba   : > { %v2567_v37 = vpop.eup %2566  ;;  %v1903_v53 = vpack.c.bf16 %v1775_v41, %v1775_v41  ;;  %v1712_v54 = vmul.f32 %v1584_v44, %v2987_v43  ;;  %v1233_v55 = vmul.f32 0.5, %v3041_v45  ;;  %v1265_v56 = vmul.f32 0.5, %v3044_v46 }
  0xbb   : > { %v2569_v57 = vpop.eup %2568  ;;  %2000 = vst.msk [vmem:[%s2955_s27 + $0x108] sm:$0xf] %vm1933_vm1, %v1871_v49  ;;  %v1808_v42 = vpack.c.bf16 %v1680_v36, %v1680_v36  ;;  %v1488_v52 = vadd.f32 1.0, %v2567_v37  ;;  %v1170_v58 = vmul.f32 0.5, %v3048_v50  ;;  %v1202_v59 = vmul.f32 0.5, %v3051_v51 }
  0xbc   : > { %v2571_v60 = vpop.eup %2570  ;;  %2032 = vst.msk [vmem:[%s2955_s27 + $0x188] sm:$0xf] %vm1933_vm1, %v1903_v53  ;;  %v1840_v61 = vpack.c.bf16 %v1712_v54, %v1712_v54  ;;  %v1520_v62 = vadd.f32 1.0, %v2569_v57  ;;  %2574 = vtanh.f32 %v1233_v55 }
  0xbd   : > { %v2573_v43 = vpop.eup %2572  ;;  %1937 = vst.msk [vmem:[%s2955_s27 + $0xc] sm:$0xf] %vm1933_vm1, %v1808_v42  ;;  %v1616_v63 = vmul.f32 0.5, %v1488_v52  ;;  %v1425_v0 = vadd.f32 1.0, %v2571_v60  ;;  %2576 = vtanh.f32 %v1265_v56 }
  0xbe   : > { %1969 = vst.msk [vmem:[%s2955_s27 + $0x8c] sm:$0xf] %vm1933_vm1, %v1840_v61  ;;  %v1648_v1 = vmul.f32 0.5, %v1520_v62  ;;  %v1457_v2 = vadd.f32 1.0, %v2573_v43  ;;  %2578 = vtanh.f32 %v1170_v58 }
  0xbf   : > { %v1744_v3 = vmul.f32 %v1616_v63, %v3007_v8  ;;  %v1553_v6 = vmul.f32 0.5, %v1425_v0  ;;  %2580 = vtanh.f32 %v1202_v59  ;;  %v1017_v7 = vpop.f32.mrf.mxu2  ;;  %v1097_v10 = vpop.f32.mrf.mxu3  ;;  %v2516_v8 = vld [vmem:[%s2846_s22 + $0x1d8] sm:$0xff] }
  0xc0   : > { %v1776_v4 = vmul.f32 %v1648_v1, %v3010_v9  ;;  %v1585_v15 = vmul.f32 0.5, %v1457_v2  ;;  %v3071_v16 = vadd.f32 %v2915_v34, %v1017_v7  ;;  %v3074_v18 = vadd.f32 %v2915_v34, %v1097_v10  ;;  %v860_v19 = vpop.f32.mrf.mxu0  ;;  %v940_v20 = vpop.f32.mrf.mxu1 }
  0xc1   : > { %v1872_v22 = vpack.c.bf16 %v1744_v3, %v1744_v3  ;;  %v1681_v23 = vmul.f32 %v1553_v6, %v3016_v17  ;;  %v3080_v11 = vadd.f32 %v2915_v34, %v860_v19  ;;  %v3083_v9 = vadd.f32 %v2915_v34, %v940_v20  ;;  %v2469_v20 = vld [vmem:[%s2846_s22 + $0x60] sm:$0xff] }
  0xc2   : > { %v2575_v24 = vpop.eup %2574  ;;  %v1904_v25 = vpack.c.bf16 %v1776_v4, %v1776_v4  ;;  %v1713_v26 = vmul.f32 %v1585_v15, %v3019_v5  ;;  %v1234_v12 = vmul.f32 0.5, %v3071_v16  ;;  %v1266_v27 = vmul.f32 0.5, %v3074_v18 }
  0xc3   : > { %v2577_v28 = vpop.eup %2576  ;;  %2001 = vst.msk [vmem:[%s2955_s27 + $0x10c] sm:$0xf] %vm1933_vm1, %v1872_v22  ;;  %v1809_v17 = vpack.c.bf16 %v1681_v23, %v1681_v23  ;;  %v1489_v29 = vadd.f32 1.0, %v2575_v24  ;;  %v1171_v30 = vmul.f32 0.5, %v3080_v11  ;;  %v1203_v31 = vmul.f32 0.5, %v3083_v9  ;;  %2402 = vmatmul.msk.bf16.gmra.mxu0 %vm643_vm0, %v2468_v13  ;;  %2418 = vmatmul.msk.bf16.gmra.mxu1 %vm643_vm0, %v2484_v14 }
  0xc4   : > { %v2579_v5 = vpop.eup %2578  ;;  %2033 = vst.msk [vmem:[%s2955_s27 + $0x18c] sm:$0xf] %vm1933_vm1, %v1904_v25  ;;  %v1841_v32 = vpack.c.bf16 %v1713_v26, %v1713_v26  ;;  %v1521_v33 = vadd.f32 1.0, %v2577_v28  ;;  %2582 = vtanh.f32 %v1234_v12  ;;  %2434 = vmatmul.msk.bf16.gmra.mxu2 %vm643_vm0, %v2500_v21  ;;  %2450 = vmatmul.msk.bf16.gmra.mxu3 %vm643_vm0, %v2516_v8  ;;  %v2485_v21 = vld [vmem:[%s2846_s22 + $0xe0] sm:$0xff] }
  0xc5   : > { %v2581_v35 = vpop.eup %2580  ;;  %1938 = vst.msk [vmem:[%s2955_s27 + $0x10] sm:$0xf] %vm1933_vm1, %v1809_v17  ;;  %v1617_v38 = vmul.f32 0.5, %v1489_v29  ;;  %v1426_v39 = vadd.f32 1.0, %v2579_v5  ;;  %2584 = vtanh.f32 %v1266_v27  ;;  %v2501_v12 = vld [vmem:[%s2846_s22 + $0x160] sm:$0xff] }
  0xc6   : > { %1970 = vst.msk [vmem:[%s2955_s27 + $0x90] sm:$0xf] %vm1933_vm1, %v1841_v32  ;;  %v1649_v40 = vmul.f32 0.5, %v1521_v33  ;;  %v1458_v41 = vadd.f32 1.0, %v2581_v35  ;;  %2586 = vtanh.f32 %v1171_v30 }
  0xc7   : > { %v1745_v44 = vmul.f32 %v1617_v38, %v3041_v45  ;;  %v1554_v47 = vmul.f32 0.5, %v1426_v39  ;;  %2588 = vtanh.f32 %v1203_v31  ;;  %v1020_v48 = vpop.f32.mrf.mxu2  ;;  %v1100_v49 = vpop.f32.mrf.mxu3 }
  0xc8   : > { %v1777_v36 = vmul.f32 %v1649_v40, %v3044_v46  ;;  %v1586_v37 = vmul.f32 0.5, %v1458_v41  ;;  %v3105_v53 = vadd.f32 %v2915_v34, %v1020_v48  ;;  %v3108_v54 = vadd.f32 %v2915_v34, %v1100_v49  ;;  %v862_v55 = vpop.f32.mrf.mxu0  ;;  %v942_v56 = vpop.f32.mrf.mxu1 }
  0xc9   : > { %v1873_v57 = vpack.c.bf16 %v1745_v44, %v1745_v44  ;;  %v1682_v45 = vmul.f32 %v1554_v47, %v3048_v50  ;;  %v3112_v42 = vadd.f32 %v2915_v34, %v862_v55  ;;  %v3115_v52 = vadd.f32 %v2915_v34, %v942_v56 }
  0xca   : > { %v2583_v46 = vpop.eup %2582  ;;  %v1905_v58 = vpack.c.bf16 %v1777_v36, %v1777_v36  ;;  %v1714_v59 = vmul.f32 %v1586_v37, %v3051_v51  ;;  %v1235_v60 = vmul.f32 0.5, %v3105_v53  ;;  %v1267_v61 = vmul.f32 0.5, %v3108_v54 }
  0xcb   : > { %v2585_v62 = vpop.eup %2584  ;;  %2002 = vst.msk [vmem:[%s2955_s27 + $0x110] sm:$0xf] %vm1933_vm1, %v1873_v57  ;;  %v1810_v50 = vpack.c.bf16 %v1682_v45, %v1682_v45  ;;  %v1490_v43 = vadd.f32 1.0, %v2583_v46  ;;  %v1172_v63 = vmul.f32 0.5, %v3112_v42  ;;  %v1204_v0 = vmul.f32 0.5, %v3115_v52 }
  0xcc   : > { %v2587_v1 = vpop.eup %2586  ;;  %2034 = vst.msk [vmem:[%s2955_s27 + $0x190] sm:$0xf] %vm1933_vm1, %v1905_v58  ;;  %v1842_v2 = vpack.c.bf16 %v1714_v59, %v1714_v59  ;;  %v1522_v3 = vadd.f32 1.0, %v2585_v62  ;;  %2590 = vtanh.f32 %v1235_v60 }
  0xcd   : > { %v2589_v51 = vpop.eup %2588  ;;  %1939 = vst.msk [vmem:[%s2955_s27 + $0x14] sm:$0xf] %vm1933_vm1, %v1810_v50  ;;  %v1618_v6 = vmul.f32 0.5, %v1490_v43  ;;  %v1427_v7 = vadd.f32 1.0, %v2587_v1  ;;  %2592 = vtanh.f32 %v1267_v61 }
  0xce   : > { %1971 = vst.msk [vmem:[%s2955_s27 + $0x94] sm:$0xf] %vm1933_vm1, %v1842_v2  ;;  %v1650_v10 = vmul.f32 0.5, %v1522_v3  ;;  %v1459_v13 = vadd.f32 1.0, %v2589_v51  ;;  %2594 = vtanh.f32 %v1172_v63 }
  0xcf   : > { %v1746_v14 = vmul.f32 %v1618_v6, %v3071_v16  ;;  %v1555_v4 = vmul.f32 0.5, %v1427_v7  ;;  %2596 = vtanh.f32 %v1204_v0  ;;  %v1022_v15 = vpop.f32.mrf.mxu2  ;;  %v1102_v19 = vpop.f32.mrf.mxu3  ;;  %v2517_v16 = vld [vmem:[%s2846_s22 + $0x1e0] sm:$0xff] }
  0xd0   : > { %v1778_v8 = vmul.f32 %v1650_v10, %v3074_v18  ;;  %v1587_v22 = vmul.f32 0.5, %v1459_v13  ;;  %v3135_v23 = vadd.f32 %v2915_v34, %v1022_v15  ;;  %v3138_v24 = vadd.f32 %v2915_v34, %v1102_v19  ;;  %v865_v25 = vpop.f32.mrf.mxu0  ;;  %v945_v26 = vpop.f32.mrf.mxu1 }
  0xd1   : > { %v1874_v27 = vpack.c.bf16 %v1746_v14, %v1746_v14  ;;  %v1683_v28 = vmul.f32 %v1555_v4, %v3080_v11  ;;  %v3144_v17 = vadd.f32 %v2915_v34, %v865_v25  ;;  %v3147_v18 = vadd.f32 %v2915_v34, %v945_v26  ;;  %v2470_v26 = vld [vmem:[%s2846_s22 + $0x68] sm:$0xff] }
  0xd2   : > { %v2591_v29 = vpop.eup %2590  ;;  %v1906_v30 = vpack.c.bf16 %v1778_v8, %v1778_v8  ;;  %v1715_v31 = vmul.f32 %v1587_v22, %v3083_v9  ;;  %v1236_v5 = vmul.f32 0.5, %v3135_v23  ;;  %v1268_v32 = vmul.f32 0.5, %v3138_v24 }
  0xd3   : > { %v2593_v33 = vpop.eup %2592  ;;  %2003 = vst.msk [vmem:[%s2955_s27 + $0x114] sm:$0xf] %vm1933_vm1, %v1874_v27  ;;  %v1811_v11 = vpack.c.bf16 %v1683_v28, %v1683_v28  ;;  %v1491_v35 = vadd.f32 1.0, %v2591_v29  ;;  %v1173_v38 = vmul.f32 0.5, %v3144_v17  ;;  %v1205_v39 = vmul.f32 0.5, %v3147_v18  ;;  %2403 = vmatmul.msk.bf16.gmra.mxu0 %vm643_vm0, %v2469_v20  ;;  %2419 = vmatmul.msk.bf16.gmra.mxu1 %vm643_vm0, %v2485_v21 }
  0xd4   : > { %v2595_v9 = vpop.eup %2594  ;;  %2035 = vst.msk [vmem:[%s2955_s27 + $0x194] sm:$0xf] %vm1933_vm1, %v1906_v30  ;;  %v1843_v40 = vpack.c.bf16 %v1715_v31, %v1715_v31  ;;  %v1523_v41 = vadd.f32 1.0, %v2593_v33  ;;  %2598 = vtanh.f32 %v1236_v5  ;;  %2435 = vmatmul.msk.bf16.gmra.mxu2 %vm643_vm0, %v2501_v12  ;;  %2451 = vmatmul.msk.bf16.gmra.mxu3 %vm643_vm0, %v2517_v16  ;;  %v2486_v12 = vld [vmem:[%s2846_s22 + $0xe8] sm:$0xff] }
  0xd5   : > { %v2597_v44 = vpop.eup %2596  ;;  %1940 = vst.msk [vmem:[%s2955_s27 + $0x18] sm:$0xf] %vm1933_vm1, %v1811_v11  ;;  %v1619_v47 = vmul.f32 0.5, %v1491_v35  ;;  %v1428_v48 = vadd.f32 1.0, %v2595_v9  ;;  %2600 = vtanh.f32 %v1268_v32  ;;  %v2502_v5 = vld [vmem:[%s2846_s22 + $0x168] sm:$0xff] }
  0xd6   : > { %1972 = vst.msk [vmem:[%s2955_s27 + $0x98] sm:$0xf] %vm1933_vm1, %v1843_v40  ;;  %v1651_v49 = vmul.f32 0.5, %v1523_v41  ;;  %v1460_v36 = vadd.f32 1.0, %v2597_v44  ;;  %2602 = vtanh.f32 %v1173_v38 }
  0xd7   : > { %v1747_v37 = vmul.f32 %v1619_v47, %v3105_v53  ;;  %v1556_v55 = vmul.f32 0.5, %v1428_v48  ;;  %2604 = vtanh.f32 %v1205_v39  ;;  %v1025_v56 = vpop.f32.mrf.mxu2  ;;  %v1105_v57 = vpop.f32.mrf.mxu3 }
  0xd8   : > { %v1779_v45 = vmul.f32 %v1651_v49, %v3108_v54  ;;  %v1588_v46 = vmul.f32 0.5, %v1460_v36  ;;  %v3169_v58 = vadd.f32 %v2915_v34, %v1025_v56  ;;  %v3172_v59 = vadd.f32 %v2915_v34, %v1105_v57  ;;  %v867_v60 = vpop.f32.mrf.mxu0  ;;  %v947_v61 = vpop.f32.mrf.mxu1 }
  0xd9   : > { %v1875_v62 = vpack.c.bf16 %v1747_v37, %v1747_v37  ;;  %v1684_v53 = vmul.f32 %v1556_v55, %v3112_v42  ;;  %v3176_v50 = vadd.f32 %v2915_v34, %v867_v60  ;;  %v3179_v43 = vadd.f32 %v2915_v34, %v947_v61 }
  0xda   : > { %v2599_v54 = vpop.eup %2598  ;;  %v1907_v63 = vpack.c.bf16 %v1779_v45, %v1779_v45  ;;  %v1716_v0 = vmul.f32 %v1588_v46, %v3115_v52  ;;  %v1237_v1 = vmul.f32 0.5, %v3169_v58  ;;  %v1269_v2 = vmul.f32 0.5, %v3172_v59 }
  0xdb   : > { %v2601_v3 = vpop.eup %2600  ;;  %2004 = vst.msk [vmem:[%s2955_s27 + $0x118] sm:$0xf] %vm1933_vm1, %v1875_v62  ;;  %v1812_v42 = vpack.c.bf16 %v1684_v53, %v1684_v53  ;;  %v1492_v51 = vadd.f32 1.0, %v2599_v54  ;;  %v1174_v6 = vmul.f32 0.5, %v3176_v50  ;;  %v1206_v7 = vmul.f32 0.5, %v3179_v43 }
  0xdc   : > { %v2603_v10 = vpop.eup %2602  ;;  %2036 = vst.msk [vmem:[%s2955_s27 + $0x198] sm:$0xf] %vm1933_vm1, %v1907_v63  ;;  %v1844_v13 = vpack.c.bf16 %v1716_v0, %v1716_v0  ;;  %v1524_v14 = vadd.f32 1.0, %v2601_v3  ;;  %2606 = vtanh.f32 %v1237_v1 }
  0xdd   : > { %v2605_v52 = vpop.eup %2604  ;;  %1941 = vst.msk [vmem:[%s2955_s27 + $0x1c] sm:$0xf] %vm1933_vm1, %v1812_v42  ;;  %v1620_v4 = vmul.f32 0.5, %v1492_v51  ;;  %v1429_v15 = vadd.f32 1.0, %v2603_v10  ;;  %2608 = vtanh.f32 %v1269_v2 }
  0xde   : > { %1973 = vst.msk [vmem:[%s2955_s27 + $0x9c] sm:$0xf] %vm1933_vm1, %v1844_v13  ;;  %v1652_v19 = vmul.f32 0.5, %v1524_v14  ;;  %v1461_v20 = vadd.f32 1.0, %v2605_v52  ;;  %2610 = vtanh.f32 %v1174_v6 }
  0xdf   : > { %v1748_v21 = vmul.f32 %v1620_v4, %v3135_v23  ;;  %v1557_v8 = vmul.f32 0.5, %v1429_v15  ;;  %2612 = vtanh.f32 %v1206_v7  ;;  %v1027_v22 = vpop.f32.mrf.mxu2  ;;  %v1107_v25 = vpop.f32.mrf.mxu3  ;;  %v2518_v23 = vld [vmem:[%s2846_s22 + $0x1e8] sm:$0xff] }
  0xe0   : > { %v1780_v16 = vmul.f32 %v1652_v19, %v3138_v24  ;;  %v1589_v27 = vmul.f32 0.5, %v1461_v20  ;;  %v3199_v28 = vadd.f32 %v2915_v34, %v1027_v22  ;;  %v3202_v29 = vadd.f32 %v2915_v34, %v1107_v25  ;;  %v870_v30 = vpop.f32.mrf.mxu0  ;;  %v950_v31 = vpop.f32.mrf.mxu1 }
  0xe1   : > { %v1876_v32 = vpack.c.bf16 %v1748_v21, %v1748_v21  ;;  %v1685_v33 = vmul.f32 %v1557_v8, %v3144_v17  ;;  %v3208_v11 = vadd.f32 %v2915_v34, %v870_v30  ;;  %v3211_v24 = vadd.f32 %v2915_v34, %v950_v31  ;;  %v2471_v31 = vld [vmem:[%s2846_s22 + $0x70] sm:$0xff] }
  0xe2   : > { %v2607_v35 = vpop.eup %2606  ;;  %v1908_v38 = vpack.c.bf16 %v1780_v16, %v1780_v16  ;;  %v1717_v39 = vmul.f32 %v1589_v27, %v3147_v18  ;;  %v1238_v9 = vmul.f32 0.5, %v3199_v28  ;;  %v1270_v40 = vmul.f32 0.5, %v3202_v29 }
  0xe3   : > { %v2609_v41 = vpop.eup %2608  ;;  %2005 = vst.msk [vmem:[%s2955_s27 + $0x11c] sm:$0xf] %vm1933_vm1, %v1876_v32  ;;  %v1813_v17 = vpack.c.bf16 %v1685_v33, %v1685_v33  ;;  %v1493_v44 = vadd.f32 1.0, %v2607_v35  ;;  %v1175_v47 = vmul.f32 0.5, %v3208_v11  ;;  %v1207_v48 = vmul.f32 0.5, %v3211_v24  ;;  %2404 = vmatmul.msk.bf16.gmra.mxu0 %vm643_vm0, %v2470_v26  ;;  %2420 = vmatmul.msk.bf16.gmra.mxu1 %vm643_vm0, %v2486_v12 }
  0xe4   : > { %v2611_v18 = vpop.eup %2610  ;;  %2037 = vst.msk [vmem:[%s2955_s27 + $0x19c] sm:$0xf] %vm1933_vm1, %v1908_v38  ;;  %v1845_v49 = vpack.c.bf16 %v1717_v39, %v1717_v39  ;;  %v1525_v36 = vadd.f32 1.0, %v2609_v41  ;;  %2614 = vtanh.f32 %v1238_v9  ;;  %2436 = vmatmul.msk.bf16.gmra.mxu2 %vm643_vm0, %v2502_v5  ;;  %2452 = vmatmul.msk.bf16.gmra.mxu3 %vm643_vm0, %v2518_v23  ;;  %v2487_v5 = vld [vmem:[%s2846_s22 + $0xf0] sm:$0xff] }
  0xe5   : > { %v2613_v37 = vpop.eup %2612  ;;  %1942 = vst.msk [vmem:[%s2955_s27 + $0x20] sm:$0xf] %vm1933_vm1, %v1813_v17  ;;  %v1621_v55 = vmul.f32 0.5, %v1493_v44  ;;  %v1430_v56 = vadd.f32 1.0, %v2611_v18  ;;  %2616 = vtanh.f32 %v1270_v40  ;;  %v2503_v9 = vld [vmem:[%s2846_s22 + $0x170] sm:$0xff] }
  0xe6   : > { %1974 = vst.msk [vmem:[%s2955_s27 + $0xa0] sm:$0xf] %vm1933_vm1, %v1845_v49  ;;  %v1653_v57 = vmul.f32 0.5, %v1525_v36  ;;  %v1462_v45 = vadd.f32 1.0, %v2613_v37  ;;  %2618 = vtanh.f32 %v1175_v47 }
  0xe7   : > { %v1749_v46 = vmul.f32 %v1621_v55, %v3169_v58  ;;  %v1558_v60 = vmul.f32 0.5, %v1430_v56  ;;  %2620 = vtanh.f32 %v1207_v48  ;;  %v1030_v61 = vpop.f32.mrf.mxu2  ;;  %v1110_v62 = vpop.f32.mrf.mxu3 }
  0xe8   : > { %v1781_v53 = vmul.f32 %v1653_v57, %v3172_v59  ;;  %v1590_v54 = vmul.f32 0.5, %v1462_v45  ;;  %v3233_v63 = vadd.f32 %v2915_v34, %v1030_v61  ;;  %v3236_v0 = vadd.f32 %v2915_v34, %v1110_v62  ;;  %v872_v1 = vpop.f32.mrf.mxu0  ;;  %v952_v2 = vpop.f32.mrf.mxu1 }
  0xe9   : > { %v1877_v3 = vpack.c.bf16 %v1749_v46, %v1749_v46  ;;  %v1686_v58 = vmul.f32 %v1558_v60, %v3176_v50  ;;  %v3240_v42 = vadd.f32 %v2915_v34, %v872_v1  ;;  %v3243_v51 = vadd.f32 %v2915_v34, %v952_v2 }
  0xea   : > { %v2615_v59 = vpop.eup %2614  ;;  %v1909_v6 = vpack.c.bf16 %v1781_v53, %v1781_v53  ;;  %v1718_v7 = vmul.f32 %v1590_v54, %v3179_v43  ;;  %v1239_v10 = vmul.f32 0.5, %v3233_v63  ;;  %v1271_v13 = vmul.f32 0.5, %v3236_v0 }
  0xeb   : > { %v2617_v14 = vpop.eup %2616  ;;  %2006 = vst.msk [vmem:[%s2955_s27 + $0x120] sm:$0xf] %vm1933_vm1, %v1877_v3  ;;  %v1814_v50 = vpack.c.bf16 %v1686_v58, %v1686_v58  ;;  %v1494_v52 = vadd.f32 1.0, %v2615_v59  ;;  %v1176_v4 = vmul.f32 0.5, %v3240_v42  ;;  %v1208_v15 = vmul.f32 0.5, %v3243_v51 }
  0xec   : > { %v2619_v19 = vpop.eup %2618  ;;  %2038 = vst.msk [vmem:[%s2955_s27 + $0x1a0] sm:$0xf] %vm1933_vm1, %v1909_v6  ;;  %v1846_v20 = vpack.c.bf16 %v1718_v7, %v1718_v7  ;;  %v1526_v21 = vadd.f32 1.0, %v2617_v14  ;;  %2622 = vtanh.f32 %v1239_v10  ;;  %v3299_v59 = vld [vmem:[%s3879_s2] ss:$0 sm:$0xff] }
  0xed   : > { %v2621_v43 = vpop.eup %2620  ;;  %1943 = vst.msk [vmem:[%s2955_s27 + $0x24] sm:$0xf] %vm1933_vm1, %v1814_v50  ;;  %v1622_v8 = vmul.f32 0.5, %v1494_v52  ;;  %v1431_v22 = vadd.f32 1.0, %v2619_v19  ;;  %2624 = vtanh.f32 %v1271_v13 }
  0xee   : > { %1975 = vst.msk [vmem:[%s2955_s27 + $0xa4] sm:$0xf] %vm1933_vm1, %v1846_v20  ;;  %v1654_v25 = vmul.f32 0.5, %v1526_v21  ;;  %v1463_v26 = vadd.f32 1.0, %v2621_v43  ;;  %2626 = vtanh.f32 %v1176_v4 }
  0xef   : > { %v1750_v12 = vmul.f32 %v1622_v8, %v3199_v28  ;;  %v1559_v16 = vmul.f32 0.5, %v1431_v22  ;;  %2628 = vtanh.f32 %v1208_v15  ;;  %v1032_v27 = vpop.f32.mrf.mxu2  ;;  %v1112_v30 = vpop.f32.mrf.mxu3  ;;  %v2519_v28 = vld [vmem:[%s2846_s22 + $0x1f0] sm:$0xff] }
  0xf0   : > { %v1782_v23 = vmul.f32 %v1654_v25, %v3202_v29  ;;  %v1591_v32 = vmul.f32 0.5, %v1463_v26  ;;  %v3263_v33 = vadd.f32 %v2915_v34, %v1032_v27  ;;  %v3266_v35 = vadd.f32 %v2915_v34, %v1112_v30  ;;  %v875_v38 = vpop.f32.mrf.mxu0  ;;  %v955_v39 = vpop.f32.mrf.mxu1 }
  0xf1   : > { %v1878_v40 = vpack.c.bf16 %v1750_v12, %v1750_v12  ;;  %v1687_v41 = vmul.f32 %v1559_v16, %v3208_v11  ;;  %v3272_v17 = vadd.f32 %v2915_v34, %v875_v38  ;;  %v3275_v29 = vadd.f32 %v2915_v34, %v955_v39  ;;  %v2472_v39 = vld [vmem:[%s2846_s22 + $0x78] sm:$0xff] }
  0xf2   : > { %v2623_v44 = vpop.eup %2622  ;;  %v1910_v47 = vpack.c.bf16 %v1782_v23, %v1782_v23  ;;  %v1719_v48 = vmul.f32 %v1591_v32, %v3211_v24  ;;  %v1240_v18 = vmul.f32 0.5, %v3263_v33  ;;  %v1272_v49 = vmul.f32 0.5, %v3266_v35 }
  0xf3   : > { %v2625_v36 = vpop.eup %2624  ;;  %2007 = vst.msk [vmem:[%s2955_s27 + $0x124] sm:$0xf] %vm1933_vm1, %v1878_v40  ;;  %v1815_v11 = vpack.c.bf16 %v1687_v41, %v1687_v41  ;;  %v1495_v37 = vadd.f32 1.0, %v2623_v44  ;;  %v1177_v55 = vmul.f32 0.5, %v3272_v17  ;;  %v1209_v34 = vmul.f32 0.5, %v3275_v29  ;;  %2405 = vmatmul.msk.bf16.gmra.mxu0 %vm643_vm0, %v2471_v31  ;;  %2421 = vmatmul.msk.bf16.gmra.mxu1 %vm643_vm0, %v2487_v5 }
  0xf4   : > { %v2627_v24 = vpop.eup %2626  ;;  %2039 = vst.msk [vmem:[%s2955_s27 + $0x1a4] sm:$0xf] %vm1933_vm1, %v1910_v47  ;;  %v1847_v56 = vpack.c.bf16 %v1719_v48, %v1719_v48  ;;  %v1527_v57 = vadd.f32 1.0, %v2625_v36  ;;  %2630 = vtanh.f32 %v1240_v18  ;;  %2437 = vmatmul.msk.bf16.gmra.mxu2 %vm643_vm0, %v2503_v9  ;;  %2453 = vmatmul.msk.bf16.gmra.mxu3 %vm643_vm0, %v2519_v28  ;;  %v2488_v9 = vld [vmem:[%s2846_s22 + $0xf8] sm:$0xff] }
  0xf5   : > { %v2629_v45 = vpop.eup %2628  ;;  %1944 = vst.msk [vmem:[%s2955_s27 + $0x28] sm:$0xf] %vm1933_vm1, %v1815_v11  ;;  %v1623_v46 = vmul.f32 0.5, %v1495_v37  ;;  %v1432_v60 = vadd.f32 1.0, %v2627_v24  ;;  %2632 = vtanh.f32 %v1272_v49  ;;  %v2504_v18 = vld [vmem:[%s2846_s22 + $0x178] sm:$0xff] }
  0xf6   : > { %1976 = vst.msk [vmem:[%s2955_s27 + $0xa8] sm:$0xf] %vm1933_vm1, %v1847_v56  ;;  %v1655_v61 = vmul.f32 0.5, %v1527_v57  ;;  %v1464_v62 = vadd.f32 1.0, %v2629_v45  ;;  %2634 = vtanh.f32 %v1177_v55 }
  0xf7   : > { %v1751_v53 = vmul.f32 %v1623_v46, %v3233_v63  ;;  %v1560_v54 = vmul.f32 0.5, %v1432_v60  ;;  %2636 = vtanh.f32 %v1209_v34  ;;  %v1035_v1 = vpop.f32.mrf.mxu2  ;;  %v1115_v2 = vpop.f32.mrf.mxu3 }
  0xf8   : > { %v1783_v3 = vmul.f32 %v1655_v61, %v3236_v0  ;;  %v1592_v58 = vmul.f32 0.5, %v1464_v62  ;;  %v3302_v6 = vadd.f32 %v3299_v59, %v1035_v1  ;;  %v3305_v7 = vadd.f32 %v3299_v59, %v1115_v2  ;;  %v877_v63 = vpop.f32.mrf.mxu0  ;;  %v957_v10 = vpop.f32.mrf.mxu1 }
  0xf9   : > { %v1879_v13 = vpack.c.bf16 %v1751_v53, %v1751_v53  ;;  %v1688_v14 = vmul.f32 %v1560_v54, %v3240_v42  ;;  %v3309_v0 = vadd.f32 %v3299_v59, %v877_v63  ;;  %v3312_v50 = vadd.f32 %v3299_v59, %v957_v10 }
  0xfa   : > { %v2631_v52 = vpop.eup %2630  ;;  %v1911_v4 = vpack.c.bf16 %v1783_v3, %v1783_v3  ;;  %v1720_v15 = vmul.f32 %v1592_v58, %v3243_v51  ;;  %v1241_v19 = vmul.f32 0.5, %v3302_v6  ;;  %v1273_v20 = vmul.f32 0.5, %v3305_v7 }
  0xfb   : > { %v2633_v21 = vpop.eup %2632  ;;  %2008 = vst.msk [vmem:[%s2955_s27 + $0x128] sm:$0xf] %vm1933_vm1, %v1879_v13  ;;  %v1816_v42 = vpack.c.bf16 %v1688_v14, %v1688_v14  ;;  %v1496_v43 = vadd.f32 1.0, %v2631_v52  ;;  %v1178_v8 = vmul.f32 0.5, %v3309_v0  ;;  %v1210_v22 = vmul.f32 0.5, %v3312_v50 }
  0xfc   : > { %v2635_v25 = vpop.eup %2634  ;;  %2040 = vst.msk [vmem:[%s2955_s27 + $0x1a8] sm:$0xf] %vm1933_vm1, %v1911_v4  ;;  %v1848_v26 = vpack.c.bf16 %v1720_v15, %v1720_v15  ;;  %v1528_v12 = vadd.f32 1.0, %v2633_v21  ;;  %2638 = vtanh.f32 %v1241_v19 }
  0xfd   : > { %v2637_v51 = vpop.eup %2636  ;;  %1945 = vst.msk [vmem:[%s2955_s27 + $0x2c] sm:$0xf] %vm1933_vm1, %v1816_v42  ;;  %v1624_v16 = vmul.f32 0.5, %v1496_v43  ;;  %v1433_v27 = vadd.f32 1.0, %v2635_v25  ;;  %2640 = vtanh.f32 %v1273_v20 }
  0xfe   : > { %1977 = vst.msk [vmem:[%s2955_s27 + $0xac] sm:$0xf] %vm1933_vm1, %v1848_v26  ;;  %v1656_v30 = vmul.f32 0.5, %v1528_v12  ;;  %v1465_v31 = vadd.f32 1.0, %v2637_v51  ;;  %2642 = vtanh.f32 %v1178_v8 }
  0xff   : > { %v1752_v5 = vmul.f32 %v1624_v16, %v3263_v33  ;;  %v1561_v23 = vmul.f32 0.5, %v1433_v27  ;;  %2644 = vtanh.f32 %v1210_v22  ;;  %v1037_v32 = vpop.f32.mrf.mxu2  ;;  %v1117_v38 = vpop.f32.mrf.mxu3  ;;  %v2520_v33 = vld [vmem:[%s2846_s22 + $0x1f8] sm:$0xff] }
 0x100   : > { %v1784_v28 = vmul.f32 %v1656_v30, %v3266_v35  ;;  %v1593_v40 = vmul.f32 0.5, %v1465_v31  ;;  %v3332_v41 = vadd.f32 %v3299_v59, %v1037_v32  ;;  %v3335_v44 = vadd.f32 %v3299_v59, %v1117_v38  ;;  %v880_v47 = vpop.f32.mrf.mxu0  ;;  %v960_v48 = vpop.f32.mrf.mxu1 }
 0x101   : > { %v1880_v49 = vpack.c.bf16 %v1752_v5, %v1752_v5  ;;  %v1689_v36 = vmul.f32 %v1561_v23, %v3272_v17  ;;  %v3341_v11 = vadd.f32 %v3299_v59, %v880_v47  ;;  %v3344_v35 = vadd.f32 %v3299_v59, %v960_v48 }
 0x102   : > { %v2639_v37 = vpop.eup %2638  ;;  %v1912_v55 = vpack.c.bf16 %v1784_v28, %v1784_v28  ;;  %v1721_v34 = vmul.f32 %v1593_v40, %v3275_v29  ;;  %v1242_v24 = vmul.f32 0.5, %v3332_v41  ;;  %v1274_v56 = vmul.f32 0.5, %v3335_v44 }
 0x103   : > { %v2641_v57 = vpop.eup %2640  ;;  %2009 = vst.msk [vmem:[%s2955_s27 + $0x12c] sm:$0xf] %vm1933_vm1, %v1880_v49  ;;  %v1817_v17 = vpack.c.bf16 %v1689_v36, %v1689_v36  ;;  %v1497_v45 = vadd.f32 1.0, %v2639_v37  ;;  %v1179_v46 = vmul.f32 0.5, %v3341_v11  ;;  %v1211_v60 = vmul.f32 0.5, %v3344_v35  ;;  %2406 = vmatmul.msk.bf16.gmra.mxu0 %vm643_vm0, %v2472_v39  ;;  %2422 = vmatmul.msk.bf16.gmra.mxu1 %vm643_vm0, %v2488_v9 }
 0x104   : > { %v2643_v29 = vpop.eup %2642  ;;  %2041 = vst.msk [vmem:[%s2955_s27 + $0x1ac] sm:$0xf] %vm1933_vm1, %v1912_v55  ;;  %v1849_v61 = vpack.c.bf16 %v1721_v34, %v1721_v34  ;;  %v1529_v62 = vadd.f32 1.0, %v2641_v57  ;;  %2646 = vtanh.f32 %v1242_v24  ;;  %2438 = vmatmul.msk.bf16.gmra.mxu2 %vm643_vm0, %v2504_v18  ;;  %2454 = vmatmul.msk.bf16.gmra.mxu3 %vm643_vm0, %v2520_v33 }
 0x105   : > { %v2645_v53 = vpop.eup %2644  ;;  %1946 = vst.msk [vmem:[%s2955_s27 + $0x30] sm:$0xf] %vm1933_vm1, %v1817_v17  ;;  %v1625_v54 = vmul.f32 0.5, %v1497_v45  ;;  %v1434_v1 = vadd.f32 1.0, %v2643_v29  ;;  %2648 = vtanh.f32 %v1274_v56 }
 0x106   : > { %1978 = vst.msk [vmem:[%s2955_s27 + $0xb0] sm:$0xf] %vm1933_vm1, %v1849_v61  ;;  %v1657_v2 = vmul.f32 0.5, %v1529_v62  ;;  %v1466_v3 = vadd.f32 1.0, %v2645_v53  ;;  %2650 = vtanh.f32 %v1179_v46 }
 0x107   : > { %v1753_v58 = vmul.f32 %v1625_v54, %v3302_v6  ;;  %v1562_v63 = vmul.f32 0.5, %v1434_v1  ;;  %2652 = vtanh.f32 %v1211_v60  ;;  %v1040_v10 = vpop.f32.mrf.mxu2  ;;  %v1120_v13 = vpop.f32.mrf.mxu3 }
 0x108   : > { %v1785_v14 = vmul.f32 %v1657_v2, %v3305_v7  ;;  %v1594_v52 = vmul.f32 0.5, %v1466_v3  ;;  %v3366_v4 = vadd.f32 %v3299_v59, %v1040_v10  ;;  %v3369_v15 = vadd.f32 %v3299_v59, %v1120_v13  ;;  %v882_v19 = vpop.f32.mrf.mxu0  ;;  %v962_v20 = vpop.f32.mrf.mxu1 }
 0x109   : > { %v1881_v21 = vpack.c.bf16 %v1753_v58, %v1753_v58  ;;  %v1690_v6 = vmul.f32 %v1562_v63, %v3309_v0  ;;  %v3373_v42 = vadd.f32 %v3299_v59, %v882_v19  ;;  %v3376_v43 = vadd.f32 %v3299_v59, %v962_v20 }
 0x10a   : > { %v2647_v7 = vpop.eup %2646  ;;  %v1913_v8 = vpack.c.bf16 %v1785_v14, %v1785_v14  ;;  %v1722_v22 = vmul.f32 %v1594_v52, %v3312_v50  ;;  %v1243_v25 = vmul.f32 0.5, %v3366_v4  ;;  %v1275_v26 = vmul.f32 0.5, %v3369_v15 }
 0x10b   : > { %v2649_v12 = vpop.eup %2648  ;;  %2010 = vst.msk [vmem:[%s2955_s27 + $0x130] sm:$0xf] %vm1933_vm1, %v1881_v21  ;;  %v1818_v0 = vpack.c.bf16 %v1690_v6, %v1690_v6  ;;  %v1498_v51 = vadd.f32 1.0, %v2647_v7  ;;  %v1180_v16 = vmul.f32 0.5, %v3373_v42  ;;  %v1212_v27 = vmul.f32 0.5, %v3376_v43 }
 0x10c   : > { %v2651_v30 = vpop.eup %2650  ;;  %2042 = vst.msk [vmem:[%s2955_s27 + $0x1b0] sm:$0xf] %vm1933_vm1, %v1913_v8  ;;  %v1850_v31 = vpack.c.bf16 %v1722_v22, %v1722_v22  ;;  %v1530_v5 = vadd.f32 1.0, %v2649_v12  ;;  %2654 = vtanh.f32 %v1243_v25 }
 0x10d   : > { %v2653_v50 = vpop.eup %2652  ;;  %1947 = vst.msk [vmem:[%s2955_s27 + $0x34] sm:$0xf] %vm1933_vm1, %v1818_v0  ;;  %v1626_v23 = vmul.f32 0.5, %v1498_v51  ;;  %v1435_v32 = vadd.f32 1.0, %v2651_v30  ;;  %2656 = vtanh.f32 %v1275_v26 }
 0x10e   : > { %1979 = vst.msk [vmem:[%s2955_s27 + $0xb4] sm:$0xf] %vm1933_vm1, %v1850_v31  ;;  %v1658_v38 = vmul.f32 0.5, %v1530_v5  ;;  %v1467_v39 = vadd.f32 1.0, %v2653_v50  ;;  %2658 = vtanh.f32 %v1180_v16 }
 0x10f   : > { %v1754_v9 = vmul.f32 %v1626_v23, %v3332_v41  ;;  %v1563_v28 = vmul.f32 0.5, %v1435_v32  ;;  %2660 = vtanh.f32 %v1212_v27  ;;  %v1042_v40 = vpop.f32.mrf.mxu2  ;;  %v1122_v47 = vpop.f32.mrf.mxu3 }
 0x110   : > { %v1786_v48 = vmul.f32 %v1658_v38, %v3335_v44  ;;  %v1595_v18 = vmul.f32 0.5, %v1467_v39  ;;  %v3394_v33 = vadd.f32 %v3299_v59, %v1042_v40  ;;  %v3397_v49 = vadd.f32 %v3299_v59, %v1122_v47  ;;  %v885_v36 = vpop.f32.mrf.mxu0  ;;  %v965_v37 = vpop.f32.mrf.mxu1 }
 0x111   : > { %v1882_v55 = vpack.c.bf16 %v1754_v9, %v1754_v9  ;;  %v1691_v41 = vmul.f32 %v1563_v28, %v3341_v11  ;;  %v3401_v34 = vadd.f32 %v3299_v59, %v885_v36  ;;  %v3404_v24 = vadd.f32 %v3299_v59, %v965_v37 }
 0x112   : > { %v2655_v44 = vpop.eup %2654  ;;  %v1914_v56 = vpack.c.bf16 %v1786_v48, %v1786_v48  ;;  %v1723_v57 = vmul.f32 %v1595_v18, %v3344_v35  ;;  %v1244_v17 = vmul.f32 0.5, %v3394_v33  ;;  %v1276_v45 = vmul.f32 0.5, %v3397_v49 }
 0x113   : > { %v2657_v46 = vpop.eup %2656  ;;  %2011 = vst.msk [vmem:[%s2955_s27 + $0x134] sm:$0xf] %vm1933_vm1, %v1882_v55  ;;  %v1819_v11 = vpack.c.bf16 %v1691_v41, %v1691_v41  ;;  %v1499_v60 = vadd.f32 1.0, %v2655_v44  ;;  %v1181_v29 = vmul.f32 0.5, %v3401_v34  ;;  %v1213_v61 = vmul.f32 0.5, %v3404_v24 }
 0x114   : > { %v2659_v62 = vpop.eup %2658  ;;  %2043 = vst.msk [vmem:[%s2955_s27 + $0x1b4] sm:$0xf] %vm1933_vm1, %v1914_v56  ;;  %v1851_v53 = vpack.c.bf16 %v1723_v57, %v1723_v57  ;;  %v1531_v54 = vadd.f32 1.0, %v2657_v46  ;;  %2662 = vtanh.f32 %v1244_v17 }
 0x115   : > { %v2661_v35 = vpop.eup %2660  ;;  %1948 = vst.msk [vmem:[%s2955_s27 + $0x38] sm:$0xf] %vm1933_vm1, %v1819_v11  ;;  %v1627_v1 = vmul.f32 0.5, %v1499_v60  ;;  %v1436_v2 = vadd.f32 1.0, %v2659_v62  ;;  %2664 = vtanh.f32 %v1276_v45 }
 0x116   : > { %1980 = vst.msk [vmem:[%s2955_s27 + $0xb8] sm:$0xf] %vm1933_vm1, %v1851_v53  ;;  %v1659_v3 = vmul.f32 0.5, %v1531_v54  ;;  %v1468_v58 = vadd.f32 1.0, %v2661_v35  ;;  %2666 = vtanh.f32 %v1181_v29 }
 0x117   : > { %v1755_v63 = vmul.f32 %v1627_v1, %v3366_v4  ;;  %v1564_v10 = vmul.f32 0.5, %v1436_v2  ;;  %2668 = vtanh.f32 %v1213_v61  ;;  %v1045_v13 = vpop.f32.mrf.mxu2  ;;  %v1125_v14 = vpop.f32.mrf.mxu3 }
 0x118   : > { %v1787_v52 = vmul.f32 %v1659_v3, %v3369_v15  ;;  %v1596_v19 = vmul.f32 0.5, %v1468_v58  ;;  %v3422_v20 = vadd.f32 %v3299_v59, %v1045_v13  ;;  %v3425_v21 = vadd.f32 %v3299_v59, %v1125_v14  ;;  %v887_v6 = vpop.f32.mrf.mxu0  ;;  %v967_v7 = vpop.f32.mrf.mxu1 }
 0x119   : > { %v1883_v8 = vpack.c.bf16 %v1755_v63, %v1755_v63  ;;  %v1692_v4 = vmul.f32 %v1564_v10, %v3373_v42  ;;  %v3429_v22 = vadd.f32 %v3299_v59, %v887_v6  ;;  %v3432_v25 = vadd.f32 %v3299_v59, %v967_v7 }
 0x11a   : > { %v2663_v15 = vpop.eup %2662  ;;  %v1915_v26 = vpack.c.bf16 %v1787_v52, %v1787_v52  ;;  %v1724_v12 = vmul.f32 %v1596_v19, %v3376_v43  ;;  %v1245_v0 = vmul.f32 0.5, %v3422_v20  ;;  %v1277_v51 = vmul.f32 0.5, %v3425_v21 }
 0x11b   : > { %v2665_v16 = vpop.eup %2664  ;;  %2012 = vst.msk [vmem:[%s2955_s27 + $0x138] sm:$0xf] %vm1933_vm1, %v1883_v8  ;;  %v1820_v42 = vpack.c.bf16 %v1692_v4, %v1692_v4  ;;  %v1500_v27 = vadd.f32 1.0, %v2663_v15  ;;  %v1182_v30 = vmul.f32 0.5, %v3429_v22  ;;  %v1214_v31 = vmul.f32 0.5, %v3432_v25 }
 0x11c   : > { %v2667_v5 = vpop.eup %2666  ;;  %2044 = vst.msk [vmem:[%s2955_s27 + $0x1b8] sm:$0xf] %vm1933_vm1, %v1915_v26  ;;  %v1852_v50 = vpack.c.bf16 %v1724_v12, %v1724_v12  ;;  %v1532_v23 = vadd.f32 1.0, %v2665_v16  ;;  %2670 = vtanh.f32 %v1245_v0 }
 0x11d   : > { %v2669_v43 = vpop.eup %2668  ;;  %1949 = vst.msk [vmem:[%s2955_s27 + $0x3c] sm:$0xf] %vm1933_vm1, %v1820_v42  ;;  %v1628_v32 = vmul.f32 0.5, %v1500_v27  ;;  %v1437_v38 = vadd.f32 1.0, %v2667_v5  ;;  %2672 = vtanh.f32 %v1277_v51 }
 0x11e   : > { %1981 = vst.msk [vmem:[%s2955_s27 + $0xbc] sm:$0xf] %vm1933_vm1, %v1852_v50  ;;  %v1660_v39 = vmul.f32 0.5, %v1532_v23  ;;  %v1469_v9 = vadd.f32 1.0, %v2669_v43  ;;  %2674 = vtanh.f32 %v1182_v30 }
 0x11f   : > { %v1756_v28 = vmul.f32 %v1628_v32, %v3394_v33  ;;  %v1565_v40 = vmul.f32 0.5, %v1437_v38  ;;  %2676 = vtanh.f32 %v1214_v31  ;;  %v1047_v47 = vpop.f32.mrf.mxu2  ;;  %v1127_v48 = vpop.f32.mrf.mxu3 }
 0x120   : > { %v1788_v18 = vmul.f32 %v1660_v39, %v3397_v49  ;;  %v1597_v36 = vmul.f32 0.5, %v1469_v9  ;;  %v3450_v37 = vadd.f32 %v3299_v59, %v1047_v47  ;;  %v3453_v55 = vadd.f32 %v3299_v59, %v1127_v48  ;;  %v890_v41 = vpop.f32.mrf.mxu0  ;;  %v970_v44 = vpop.f32.mrf.mxu1 }
 0x121   : > { %v1884_v56 = vpack.c.bf16 %v1756_v28, %v1756_v28  ;;  %v1693_v33 = vmul.f32 %v1565_v40, %v3401_v34  ;;  %v3457_v57 = vadd.f32 %v3299_v59, %v890_v41  ;;  %v3460_v17 = vadd.f32 %v3299_v59, %v970_v44 }
 0x122   : > { %v2671_v49 = vpop.eup %2670  ;;  %v1916_v45 = vpack.c.bf16 %v1788_v18, %v1788_v18  ;;  %v1725_v46 = vmul.f32 %v1597_v36, %v3404_v24  ;;  %v1246_v11 = vmul.f32 0.5, %v3450_v37  ;;  %v1278_v60 = vmul.f32 0.5, %v3453_v55 }
 0x123   : > { %v2673_v29 = vpop.eup %2672  ;;  %2013 = vst.msk [vmem:[%s2955_s27 + $0x13c] sm:$0xf] %vm1933_vm1, %v1884_v56  ;;  %v1821_v34 = vpack.c.bf16 %v1693_v33, %v1693_v33  ;;  %v1501_v61 = vadd.f32 1.0, %v2671_v49  ;;  %v1183_v62 = vmul.f32 0.5, %v3457_v57  ;;  %v1215_v53 = vmul.f32 0.5, %v3460_v17 }
 0x124   : > { %v2675_v54 = vpop.eup %2674  ;;  %2045 = vst.msk [vmem:[%s2955_s27 + $0x1bc] sm:$0xf] %vm1933_vm1, %v1916_v45  ;;  %v1853_v35 = vpack.c.bf16 %v1725_v46, %v1725_v46  ;;  %v1533_v1 = vadd.f32 1.0, %v2673_v29  ;;  %2678 = vtanh.f32 %v1246_v11 }
 0x125   : > { %v2677_v24 = vpop.eup %2676  ;;  %1950 = vst.msk [vmem:[%s2955_s27 + $0x40] sm:$0xf] %vm1933_vm1, %v1821_v34  ;;  %v1629_v2 = vmul.f32 0.5, %v1501_v61  ;;  %v1438_v3 = vadd.f32 1.0, %v2675_v54  ;;  %2680 = vtanh.f32 %v1278_v60 }
 0x126   : > { %1982 = vst.msk [vmem:[%s2955_s27 + $0xc0] sm:$0xf] %vm1933_vm1, %v1853_v35  ;;  %v1661_v58 = vmul.f32 0.5, %v1533_v1  ;;  %v1470_v63 = vadd.f32 1.0, %v2677_v24  ;;  %2682 = vtanh.f32 %v1183_v62 }
 0x127   : > { %v1757_v10 = vmul.f32 %v1629_v2, %v3422_v20  ;;  %v1566_v13 = vmul.f32 0.5, %v1438_v3  ;;  %2684 = vtanh.f32 %v1215_v53  ;;  %v1050_v14 = vpop.f32.mrf.mxu2  ;;  %v1130_v52 = vpop.f32.mrf.mxu3 }
 0x128   : > { %v1789_v19 = vmul.f32 %v1661_v58, %v3425_v21  ;;  %v1598_v6 = vmul.f32 0.5, %v1470_v63  ;;  %v3478_v7 = vadd.f32 %v3299_v59, %v1050_v14  ;;  %v3481_v8 = vadd.f32 %v3299_v59, %v1130_v52  ;;  %v892_v4 = vpop.f32.mrf.mxu0  ;;  %v972_v15 = vpop.f32.mrf.mxu1 }
 0x129   : > { %v1885_v26 = vpack.c.bf16 %v1757_v10, %v1757_v10  ;;  %v1694_v20 = vmul.f32 %v1566_v13, %v3429_v22  ;;  %v3485_v12 = vadd.f32 %v3299_v59, %v892_v4  ;;  %v3488_v0 = vadd.f32 %v3299_v59, %v972_v15 }
 0x12a   : > { %v2679_v21 = vpop.eup %2678  ;;  %v1917_v51 = vpack.c.bf16 %v1789_v19, %v1789_v19  ;;  %v1726_v16 = vmul.f32 %v1598_v6, %v3432_v25  ;;  %v1247_v42 = vmul.f32 0.5, %v3478_v7  ;;  %v1279_v27 = vmul.f32 0.5, %v3481_v8 }
 0x12b   : > { %v2681_v30 = vpop.eup %2680  ;;  %2014 = vst.msk [vmem:[%s2955_s27 + $0x140] sm:$0xf] %vm1933_vm1, %v1885_v26  ;;  %v1822_v22 = vpack.c.bf16 %v1694_v20, %v1694_v20  ;;  %v1502_v31 = vadd.f32 1.0, %v2679_v21  ;;  %v1184_v5 = vmul.f32 0.5, %v3485_v12  ;;  %v1216_v50 = vmul.f32 0.5, %v3488_v0 }
 0x12c   : > { %v2683_v23 = vpop.eup %2682  ;;  %2046 = vst.msk [vmem:[%s2955_s27 + $0x1c0] sm:$0xf] %vm1933_vm1, %v1917_v51  ;;  %v1854_v43 = vpack.c.bf16 %v1726_v16, %v1726_v16  ;;  %v1534_v32 = vadd.f32 1.0, %v2681_v30  ;;  %2686 = vtanh.f32 %v1247_v42 }
 0x12d   : > { %v2685_v25 = vpop.eup %2684  ;;  %1951 = vst.msk [vmem:[%s2955_s27 + $0x44] sm:$0xf] %vm1933_vm1, %v1822_v22  ;;  %v1630_v38 = vmul.f32 0.5, %v1502_v31  ;;  %v1439_v39 = vadd.f32 1.0, %v2683_v23  ;;  %2688 = vtanh.f32 %v1279_v27 }
 0x12e   : > { %1983 = vst.msk [vmem:[%s2955_s27 + $0xc4] sm:$0xf] %vm1933_vm1, %v1854_v43  ;;  %v1662_v9 = vmul.f32 0.5, %v1534_v32  ;;  %v1471_v28 = vadd.f32 1.0, %v2685_v25  ;;  %2690 = vtanh.f32 %v1184_v5 }
 0x12f   : > { %v1758_v40 = vmul.f32 %v1630_v38, %v3450_v37  ;;  %v1567_v47 = vmul.f32 0.5, %v1439_v39  ;;  %2692 = vtanh.f32 %v1216_v50  ;;  %v1052_v48 = vpop.f32.mrf.mxu2  ;;  %v1132_v18 = vpop.f32.mrf.mxu3 }
 0x130   : > { %v1790_v36 = vmul.f32 %v1662_v9, %v3453_v55  ;;  %v1599_v41 = vmul.f32 0.5, %v1471_v28  ;;  %v3506_v44 = vadd.f32 %v3299_v59, %v1052_v48  ;;  %v3509_v56 = vadd.f32 %v3299_v59, %v1132_v18  ;;  %v895_v33 = vpop.f32.mrf.mxu0  ;;  %v975_v49 = vpop.f32.mrf.mxu1 }
 0x131   : > { %v1886_v45 = vpack.c.bf16 %v1758_v40, %v1758_v40  ;;  %v1695_v37 = vmul.f32 %v1567_v47, %v3457_v57  ;;  %v3513_v46 = vadd.f32 %v3299_v59, %v895_v33  ;;  %v3516_v11 = vadd.f32 %v3299_v59, %v975_v49 }
 0x132   : > { %v2687_v55 = vpop.eup %2686  ;;  %v1918_v60 = vpack.c.bf16 %v1790_v36, %v1790_v36  ;;  %v1727_v29 = vmul.f32 %v1599_v41, %v3460_v17  ;;  %v1248_v34 = vmul.f32 0.5, %v3506_v44  ;;  %v1280_v61 = vmul.f32 0.5, %v3509_v56 }
 0x133   : > { %v2689_v62 = vpop.eup %2688  ;;  %2015 = vst.msk [vmem:[%s2955_s27 + $0x144] sm:$0xf] %vm1933_vm1, %v1886_v45  ;;  %v1823_v57 = vpack.c.bf16 %v1695_v37, %v1695_v37  ;;  %v1503_v53 = vadd.f32 1.0, %v2687_v55  ;;  %v1185_v54 = vmul.f32 0.5, %v3513_v46  ;;  %v1217_v35 = vmul.f32 0.5, %v3516_v11 }
 0x134   : > { %v2691_v1 = vpop.eup %2690  ;;  %2047 = vst.msk [vmem:[%s2955_s27 + $0x1c4] sm:$0xf] %vm1933_vm1, %v1918_v60  ;;  %v1855_v24 = vpack.c.bf16 %v1727_v29, %v1727_v29  ;;  %v1535_v2 = vadd.f32 1.0, %v2689_v62  ;;  %2694 = vtanh.f32 %v1248_v34 }
 0x135   : > { %v2693_v17 = vpop.eup %2692  ;;  %1952 = vst.msk [vmem:[%s2955_s27 + $0x48] sm:$0xf] %vm1933_vm1, %v1823_v57  ;;  %v1631_v3 = vmul.f32 0.5, %v1503_v53  ;;  %v1440_v58 = vadd.f32 1.0, %v2691_v1  ;;  %2696 = vtanh.f32 %v1280_v61 }
 0x136   : > { %1984 = vst.msk [vmem:[%s2955_s27 + $0xc8] sm:$0xf] %vm1933_vm1, %v1855_v24  ;;  %v1663_v63 = vmul.f32 0.5, %v1535_v2  ;;  %v1472_v10 = vadd.f32 1.0, %v2693_v17  ;;  %2698 = vtanh.f32 %v1185_v54 }
 0x137   : > { %v1759_v13 = vmul.f32 %v1631_v3, %v3478_v7  ;;  %v1568_v14 = vmul.f32 0.5, %v1440_v58  ;;  %2700 = vtanh.f32 %v1217_v35  ;;  %v1055_v52 = vpop.f32.mrf.mxu2  ;;  %v1135_v19 = vpop.f32.mrf.mxu3 }
 0x138   : > { %v1791_v6 = vmul.f32 %v1663_v63, %v3481_v8  ;;  %v1600_v4 = vmul.f32 0.5, %v1472_v10  ;;  %v3534_v15 = vadd.f32 %v3299_v59, %v1055_v52  ;;  %v3537_v26 = vadd.f32 %v3299_v59, %v1135_v19  ;;  %v897_v20 = vpop.f32.mrf.mxu0  ;;  %v977_v21 = vpop.f32.mrf.mxu1 }
 0x139   : > { %v1887_v51 = vpack.c.bf16 %v1759_v13, %v1759_v13  ;;  %v1696_v7 = vmul.f32 %v1568_v14, %v3485_v12  ;;  %v3541_v16 = vadd.f32 %v3299_v59, %v897_v20  ;;  %v3544_v42 = vadd.f32 %v3299_v59, %v977_v21 }
 0x13a   : > { %v2695_v8 = vpop.eup %2694  ;;  %v1919_v27 = vpack.c.bf16 %v1791_v6, %v1791_v6  ;;  %v1728_v30 = vmul.f32 %v1600_v4, %v3488_v0  ;;  %v1249_v22 = vmul.f32 0.5, %v3534_v15  ;;  %v1281_v31 = vmul.f32 0.5, %v3537_v26 }
 0x13b   : > { %v2697_v5 = vpop.eup %2696  ;;  %2016 = vst.msk [vmem:[%s2955_s27 + $0x148] sm:$0xf] %vm1933_vm1, %v1887_v51  ;;  %v1824_v12 = vpack.c.bf16 %v1696_v7, %v1696_v7  ;;  %v1504_v50 = vadd.f32 1.0, %v2695_v8  ;;  %v1186_v23 = vmul.f32 0.5, %v3541_v16  ;;  %v1218_v43 = vmul.f32 0.5, %v3544_v42 }
 0x13c   : > { %v2699_v32 = vpop.eup %2698  ;;  %2048 = vst.msk [vmem:[%s2955_s27 + $0x1c8] sm:$0xf] %vm1933_vm1, %v1919_v27  ;;  %v1856_v25 = vpack.c.bf16 %v1728_v30, %v1728_v30  ;;  %v1536_v38 = vadd.f32 1.0, %v2697_v5  ;;  %2702 = vtanh.f32 %v1249_v22 }
 0x13d   : > { %v2701_v0 = vpop.eup %2700  ;;  %1953 = vst.msk [vmem:[%s2955_s27 + $0x4c] sm:$0xf] %vm1933_vm1, %v1824_v12  ;;  %v1632_v39 = vmul.f32 0.5, %v1504_v50  ;;  %v1441_v9 = vadd.f32 1.0, %v2699_v32  ;;  %2704 = vtanh.f32 %v1281_v31 }
 0x13e   : > { %1985 = vst.msk [vmem:[%s2955_s27 + $0xcc] sm:$0xf] %vm1933_vm1, %v1856_v25  ;;  %v1664_v28 = vmul.f32 0.5, %v1536_v38  ;;  %v1473_v40 = vadd.f32 1.0, %v2701_v0  ;;  %2706 = vtanh.f32 %v1186_v23 }
 0x13f   : > { %v1760_v47 = vmul.f32 %v1632_v39, %v3506_v44  ;;  %v1569_v48 = vmul.f32 0.5, %v1441_v9  ;;  %2708 = vtanh.f32 %v1218_v43  ;;  %v1057_v18 = vpop.f32.mrf.mxu2  ;;  %v1137_v36 = vpop.f32.mrf.mxu3 }
 0x140   : > { %v1792_v41 = vmul.f32 %v1664_v28, %v3509_v56  ;;  %v1601_v33 = vmul.f32 0.5, %v1473_v40  ;;  %v3562_v49 = vadd.f32 %v3299_v59, %v1057_v18  ;;  %v3565_v45 = vadd.f32 %v3299_v59, %v1137_v36  ;;  %v900_v37 = vpop.f32.mrf.mxu0  ;;  %v980_v55 = vpop.f32.mrf.mxu1 }
 0x141   : > { %v1888_v60 = vpack.c.bf16 %v1760_v47, %v1760_v47  ;;  %v1697_v44 = vmul.f32 %v1569_v48, %v3513_v46  ;;  %v3569_v29 = vadd.f32 %v3299_v59, %v900_v37  ;;  %v3572_v34 = vadd.f32 %v3299_v59, %v980_v55 }
 0x142   : > { %v2703_v56 = vpop.eup %2702  ;;  %v1920_v61 = vpack.c.bf16 %v1792_v41, %v1792_v41  ;;  %v1729_v62 = vmul.f32 %v1601_v33, %v3516_v11  ;;  %v1250_v57 = vmul.f32 0.5, %v3562_v49  ;;  %v1282_v53 = vmul.f32 0.5, %v3565_v45 }
 0x143   : > { %v2705_v54 = vpop.eup %2704  ;;  %2017 = vst.msk [vmem:[%s2955_s27 + $0x14c] sm:$0xf] %vm1933_vm1, %v1888_v60  ;;  %v1825_v46 = vpack.c.bf16 %v1697_v44, %v1697_v44  ;;  %v1505_v35 = vadd.f32 1.0, %v2703_v56  ;;  %v1187_v1 = vmul.f32 0.5, %v3569_v29  ;;  %v1219_v24 = vmul.f32 0.5, %v3572_v34 }
 0x144   : > { %v2707_v2 = vpop.eup %2706  ;;  %2049 = vst.msk [vmem:[%s2955_s27 + $0x1cc] sm:$0xf] %vm1933_vm1, %v1920_v61  ;;  %v1857_v17 = vpack.c.bf16 %v1729_v62, %v1729_v62  ;;  %v1537_v3 = vadd.f32 1.0, %v2705_v54  ;;  %2710 = vtanh.f32 %v1250_v57 }
 0x145   : > { %v2709_v11 = vpop.eup %2708  ;;  %1954 = vst.msk [vmem:[%s2955_s27 + $0x50] sm:$0xf] %vm1933_vm1, %v1825_v46  ;;  %v1633_v58 = vmul.f32 0.5, %v1505_v35  ;;  %v1442_v63 = vadd.f32 1.0, %v2707_v2  ;;  %2712 = vtanh.f32 %v1282_v53 }
 0x146   : > { %1986 = vst.msk [vmem:[%s2955_s27 + $0xd0] sm:$0xf] %vm1933_vm1, %v1857_v17  ;;  %v1665_v10 = vmul.f32 0.5, %v1537_v3  ;;  %v1474_v13 = vadd.f32 1.0, %v2709_v11  ;;  %2714 = vtanh.f32 %v1187_v1 }
 0x147   : > { %v1761_v14 = vmul.f32 %v1633_v58, %v3534_v15  ;;  %v1570_v52 = vmul.f32 0.5, %v1442_v63  ;;  %2716 = vtanh.f32 %v1219_v24  ;;  %v1060_v19 = vpop.f32.mrf.mxu2  ;;  %v1140_v6 = vpop.f32.mrf.mxu3 }
 0x148   : > { %v1793_v4 = vmul.f32 %v1665_v10, %v3537_v26  ;;  %v1602_v20 = vmul.f32 0.5, %v1474_v13  ;;  %v3590_v21 = vadd.f32 %v3299_v59, %v1060_v19  ;;  %v3593_v51 = vadd.f32 %v3299_v59, %v1140_v6  ;;  %v902_v7 = vpop.f32.mrf.mxu0  ;;  %v982_v8 = vpop.f32.mrf.mxu1 }
 0x149   : > { %v1889_v27 = vpack.c.bf16 %v1761_v14, %v1761_v14  ;;  %v1698_v15 = vmul.f32 %v1570_v52, %v3541_v16  ;;  %v3597_v30 = vadd.f32 %v3299_v59, %v902_v7  ;;  %v3600_v22 = vadd.f32 %v3299_v59, %v982_v8 }
 0x14a   : > { %v2711_v26 = vpop.eup %2710  ;;  %v1921_v31 = vpack.c.bf16 %v1793_v4, %v1793_v4  ;;  %v1730_v5 = vmul.f32 %v1602_v20, %v3544_v42  ;;  %v1251_v12 = vmul.f32 0.5, %v3590_v21  ;;  %v1283_v50 = vmul.f32 0.5, %v3593_v51 }
 0x14b   : > { %v2713_v23 = vpop.eup %2712  ;;  %2018 = vst.msk [vmem:[%s2955_s27 + $0x150] sm:$0xf] %vm1933_vm1, %v1889_v27  ;;  %v1826_v16 = vpack.c.bf16 %v1698_v15, %v1698_v15  ;;  %v1506_v43 = vadd.f32 1.0, %v2711_v26  ;;  %v1188_v32 = vmul.f32 0.5, %v3597_v30  ;;  %v1220_v25 = vmul.f32 0.5, %v3600_v22 }
 0x14c   : > { %v2715_v38 = vpop.eup %2714  ;;  %2050 = vst.msk [vmem:[%s2955_s27 + $0x1d0] sm:$0xf] %vm1933_vm1, %v1921_v31  ;;  %v1858_v0 = vpack.c.bf16 %v1730_v5, %v1730_v5  ;;  %v1538_v39 = vadd.f32 1.0, %v2713_v23  ;;  %2718 = vtanh.f32 %v1251_v12 }
 0x14d   : > { %v2717_v42 = vpop.eup %2716  ;;  %1955 = vst.msk [vmem:[%s2955_s27 + $0x54] sm:$0xf] %vm1933_vm1, %v1826_v16  ;;  %v1634_v9 = vmul.f32 0.5, %v1506_v43  ;;  %v1443_v28 = vadd.f32 1.0, %v2715_v38  ;;  %2720 = vtanh.f32 %v1283_v50 }
 0x14e   : > { %1987 = vst.msk [vmem:[%s2955_s27 + $0xd4] sm:$0xf] %vm1933_vm1, %v1858_v0  ;;  %v1666_v40 = vmul.f32 0.5, %v1538_v39  ;;  %v1475_v47 = vadd.f32 1.0, %v2717_v42  ;;  %2722 = vtanh.f32 %v1188_v32 }
 0x14f   : > { %v1762_v48 = vmul.f32 %v1634_v9, %v3562_v49  ;;  %v1571_v18 = vmul.f32 0.5, %v1443_v28  ;;  %2724 = vtanh.f32 %v1220_v25  ;;  %v1062_v36 = vpop.f32.mrf.mxu2  ;;  %v1142_v41 = vpop.f32.mrf.mxu3 }
 0x150   : > { %v1794_v33 = vmul.f32 %v1666_v40, %v3565_v45  ;;  %v1603_v37 = vmul.f32 0.5, %v1475_v47  ;;  %v3618_v55 = vadd.f32 %v3299_v59, %v1062_v36  ;;  %v3621_v60 = vadd.f32 %v3299_v59, %v1142_v41  ;;  %v905_v44 = vpop.f32.mrf.mxu0  ;;  %v985_v56 = vpop.f32.mrf.mxu1 }
 0x151   : > { %v1890_v61 = vpack.c.bf16 %v1762_v48, %v1762_v48  ;;  %v1699_v49 = vmul.f32 %v1571_v18, %v3569_v29  ;;  %v3625_v62 = vadd.f32 %v3299_v59, %v905_v44  ;;  %v3628_v57 = vadd.f32 %v3299_v59, %v985_v56  ;;  %v3676_v44 = vld [vmem:[%s3879_s2] ss:$0 sm:$0xff] }
 0x152   : > { %v2719_v45 = vpop.eup %2718  ;;  %v1922_v53 = vpack.c.bf16 %v1794_v33, %v1794_v33  ;;  %v1731_v54 = vmul.f32 %v1603_v37, %v3572_v34  ;;  %v1252_v46 = vmul.f32 0.5, %v3618_v55  ;;  %v1284_v35 = vmul.f32 0.5, %v3621_v60 }
 0x153   : > { %v2721_v1 = vpop.eup %2720  ;;  %2019 = vst.msk [vmem:[%s2955_s27 + $0x154] sm:$0xf] %vm1933_vm1, %v1890_v61  ;;  %v1827_v29 = vpack.c.bf16 %v1699_v49, %v1699_v49  ;;  %v1507_v24 = vadd.f32 1.0, %v2719_v45  ;;  %v1189_v2 = vmul.f32 0.5, %v3625_v62  ;;  %v1221_v17 = vmul.f32 0.5, %v3628_v57 }
 0x154   : > { %v2723_v3 = vpop.eup %2722  ;;  %2051 = vst.msk [vmem:[%s2955_s27 + $0x1d4] sm:$0xf] %vm1933_vm1, %v1922_v53  ;;  %v1859_v11 = vpack.c.bf16 %v1731_v54, %v1731_v54  ;;  %v1539_v58 = vadd.f32 1.0, %v2721_v1  ;;  %2726 = vtanh.f32 %v1252_v46 }
 0x155   : > { %v2725_v34 = vpop.eup %2724  ;;  %1956 = vst.msk [vmem:[%s2955_s27 + $0x58] sm:$0xf] %vm1933_vm1, %v1827_v29  ;;  %v1635_v63 = vmul.f32 0.5, %v1507_v24  ;;  %v1444_v10 = vadd.f32 1.0, %v2723_v3  ;;  %2728 = vtanh.f32 %v1284_v35 }
 0x156   : > { %1988 = vst.msk [vmem:[%s2955_s27 + $0xd8] sm:$0xf] %vm1933_vm1, %v1859_v11  ;;  %v1667_v13 = vmul.f32 0.5, %v1539_v58  ;;  %v1476_v14 = vadd.f32 1.0, %v2725_v34  ;;  %2730 = vtanh.f32 %v1189_v2 }
 0x157   : > { %v1763_v52 = vmul.f32 %v1635_v63, %v3590_v21  ;;  %v1572_v19 = vmul.f32 0.5, %v1444_v10  ;;  %2732 = vtanh.f32 %v1221_v17  ;;  %v1065_v6 = vpop.f32.mrf.mxu2  ;;  %v1145_v4 = vpop.f32.mrf.mxu3 }
 0x158   : > { %v1795_v20 = vmul.f32 %v1667_v13, %v3593_v51  ;;  %v1604_v7 = vmul.f32 0.5, %v1476_v14  ;;  %v3646_v8 = vadd.f32 %v3299_v59, %v1065_v6  ;;  %v3649_v27 = vadd.f32 %v3299_v59, %v1145_v4  ;;  %v907_v15 = vpop.f32.mrf.mxu0  ;;  %v987_v26 = vpop.f32.mrf.mxu1 }
 0x159   : > { %v1891_v31 = vpack.c.bf16 %v1763_v52, %v1763_v52  ;;  %v1700_v21 = vmul.f32 %v1572_v19, %v3597_v30  ;;  %v3653_v5 = vadd.f32 %v3299_v59, %v907_v15  ;;  %v3656_v12 = vadd.f32 %v3299_v59, %v987_v26 }
 0x15a   : > { %v2727_v51 = vpop.eup %2726  ;;  %v1923_v50 = vpack.c.bf16 %v1795_v20, %v1795_v20  ;;  %v1732_v23 = vmul.f32 %v1604_v7, %v3600_v22  ;;  %v1253_v16 = vmul.f32 0.5, %v3646_v8  ;;  %v1285_v43 = vmul.f32 0.5, %v3649_v27 }
 0x15b   : > { %v2729_v32 = vpop.eup %2728  ;;  %2020 = vst.msk [vmem:[%s2955_s27 + $0x158] sm:$0xf] %vm1933_vm1, %v1891_v31  ;;  %v1828_v30 = vpack.c.bf16 %v1700_v21, %v1700_v21  ;;  %v1508_v25 = vadd.f32 1.0, %v2727_v51  ;;  %v1190_v38 = vmul.f32 0.5, %v3653_v5  ;;  %v1222_v59 = vmul.f32 0.5, %v3656_v12 }
 0x15c   : > { %v2731_v0 = vpop.eup %2730  ;;  %2052 = vst.msk [vmem:[%s2955_s27 + $0x1d8] sm:$0xf] %vm1933_vm1, %v1923_v50  ;;  %v1860_v39 = vpack.c.bf16 %v1732_v23, %v1732_v23  ;;  %v1540_v42 = vadd.f32 1.0, %v2729_v32  ;;  %2734 = vtanh.f32 %v1253_v16 }
 0x15d   : > { %v2733_v22 = vpop.eup %2732  ;;  %1957 = vst.msk [vmem:[%s2955_s27 + $0x5c] sm:$0xf] %vm1933_vm1, %v1828_v30  ;;  %v1636_v9 = vmul.f32 0.5, %v1508_v25  ;;  %v1445_v28 = vadd.f32 1.0, %v2731_v0  ;;  %2736 = vtanh.f32 %v1285_v43 }
 0x15e   : > { %1989 = vst.msk [vmem:[%s2955_s27 + $0xdc] sm:$0xf] %vm1933_vm1, %v1860_v39  ;;  %v1668_v40 = vmul.f32 0.5, %v1540_v42  ;;  %v1477_v47 = vadd.f32 1.0, %v2733_v22  ;;  %2738 = vtanh.f32 %v1190_v38 }
 0x15f   : > { %v1764_v48 = vmul.f32 %v1636_v9, %v3618_v55  ;;  %v1573_v18 = vmul.f32 0.5, %v1445_v28  ;;  %2740 = vtanh.f32 %v1222_v59  ;;  %v1067_v36 = vpop.f32.mrf.mxu2  ;;  %v1147_v41 = vpop.f32.mrf.mxu3 }
 0x160   : > { %v1796_v33 = vmul.f32 %v1668_v40, %v3621_v60  ;;  %v1605_v37 = vmul.f32 0.5, %v1477_v47  ;;  %v3679_v56 = vadd.f32 %v3676_v44, %v1067_v36  ;;  %v3682_v61 = vadd.f32 %v3676_v44, %v1147_v41  ;;  %v910_v55 = vpop.f32.mrf.mxu0  ;;  %v990_v49 = vpop.f32.mrf.mxu1 }
 0x161   : > { %v1892_v45 = vpack.c.bf16 %v1764_v48, %v1764_v48  ;;  %v1701_v53 = vmul.f32 %v1573_v18, %v3625_v62  ;;  %v3686_v60 = vadd.f32 %v3676_v44, %v910_v55  ;;  %v3689_v54 = vadd.f32 %v3676_v44, %v990_v49 }
 0x162   : > { %v2735_v46 = vpop.eup %2734  ;;  %v1924_v35 = vpack.c.bf16 %v1796_v33, %v1796_v33  ;;  %v1733_v1 = vmul.f32 %v1605_v37, %v3628_v57  ;;  %v1254_v29 = vmul.f32 0.5, %v3679_v56  ;;  %v1286_v24 = vmul.f32 0.5, %v3682_v61 }
 0x163   : > { %v2737_v2 = vpop.eup %2736  ;;  %2021 = vst.msk [vmem:[%s2955_s27 + $0x15c] sm:$0xf] %vm1933_vm1, %v1892_v45  ;;  %v1829_v62 = vpack.c.bf16 %v1701_v53, %v1701_v53  ;;  %v1509_v17 = vadd.f32 1.0, %v2735_v46  ;;  %v1191_v3 = vmul.f32 0.5, %v3686_v60  ;;  %v1223_v11 = vmul.f32 0.5, %v3689_v54 }
 0x164   : > { %v2739_v58 = vpop.eup %2738  ;;  %2053 = vst.msk [vmem:[%s2955_s27 + $0x1dc] sm:$0xf] %vm1933_vm1, %v1924_v35  ;;  %v1861_v34 = vpack.c.bf16 %v1733_v1, %v1733_v1  ;;  %v1541_v63 = vadd.f32 1.0, %v2737_v2  ;;  %2742 = vtanh.f32 %v1254_v29 }
 0x165   : > { %v2741_v57 = vpop.eup %2740  ;;  %1958 = vst.msk [vmem:[%s2955_s27 + $0x60] sm:$0xf] %vm1933_vm1, %v1829_v62  ;;  %v1637_v10 = vmul.f32 0.5, %v1509_v17  ;;  %v1446_v13 = vadd.f32 1.0, %v2739_v58  ;;  %2744 = vtanh.f32 %v1286_v24 }
 0x166   : > { %1990 = vst.msk [vmem:[%s2955_s27 + $0xe0] sm:$0xf] %vm1933_vm1, %v1861_v34  ;;  %v1669_v14 = vmul.f32 0.5, %v1541_v63  ;;  %v1478_v52 = vadd.f32 1.0, %v2741_v57  ;;  %2746 = vtanh.f32 %v1191_v3 }
 0x167   : > { %v1765_v19 = vmul.f32 %v1637_v10, %v3646_v8  ;;  %v1574_v6 = vmul.f32 0.5, %v1446_v13  ;;  %2748 = vtanh.f32 %v1223_v11  ;;  %v1070_v4 = vpop.f32.mrf.mxu2  ;;  %v1150_v20 = vpop.f32.mrf.mxu3 }
 0x168   : > { %v1797_v7 = vmul.f32 %v1669_v14, %v3649_v27  ;;  %v1606_v15 = vmul.f32 0.5, %v1478_v52  ;;  %v3707_v26 = vadd.f32 %v3676_v44, %v1070_v4  ;;  %v3710_v31 = vadd.f32 %v3676_v44, %v1150_v20  ;;  %v912_v21 = vpop.f32.mrf.mxu0  ;;  %v992_v51 = vpop.f32.mrf.mxu1 }
 0x169   : > { %v1893_v50 = vpack.c.bf16 %v1765_v19, %v1765_v19  ;;  %v1702_v8 = vmul.f32 %v1574_v6, %v3653_v5  ;;  %v3714_v23 = vadd.f32 %v3676_v44, %v912_v21  ;;  %v3717_v16 = vadd.f32 %v3676_v44, %v992_v51 }
 0x16a   : > { %v2743_v27 = vpop.eup %2742  ;;  %v1925_v43 = vpack.c.bf16 %v1797_v7, %v1797_v7  ;;  %v1734_v32 = vmul.f32 %v1606_v15, %v3656_v12  ;;  %v1255_v30 = vmul.f32 0.5, %v3707_v26  ;;  %v1287_v25 = vmul.f32 0.5, %v3710_v31 }
 0x16b   : > { %v2745_v38 = vpop.eup %2744  ;;  %2022 = vst.msk [vmem:[%s2955_s27 + $0x160] sm:$0xf] %vm1933_vm1, %v1893_v50  ;;  %v1830_v5 = vpack.c.bf16 %v1702_v8, %v1702_v8  ;;  %v1510_v59 = vadd.f32 1.0, %v2743_v27  ;;  %v1192_v0 = vmul.f32 0.5, %v3714_v23  ;;  %v1224_v39 = vmul.f32 0.5, %v3717_v16 }
 0x16c   : > { %v2747_v42 = vpop.eup %2746  ;;  %2054 = vst.msk [vmem:[%s2955_s27 + $0x1e0] sm:$0xf] %vm1933_vm1, %v1925_v43  ;;  %v1862_v22 = vpack.c.bf16 %v1734_v32, %v1734_v32  ;;  %v1542_v9 = vadd.f32 1.0, %v2745_v38  ;;  %2750 = vtanh.f32 %v1255_v30 }
 0x16d   : > { %v2749_v12 = vpop.eup %2748  ;;  %1959 = vst.msk [vmem:[%s2955_s27 + $0x64] sm:$0xf] %vm1933_vm1, %v1830_v5  ;;  %v1638_v28 = vmul.f32 0.5, %v1510_v59  ;;  %v1447_v40 = vadd.f32 1.0, %v2747_v42  ;;  %2752 = vtanh.f32 %v1287_v25 }
 0x16e   : > { %1991 = vst.msk [vmem:[%s2955_s27 + $0xe4] sm:$0xf] %vm1933_vm1, %v1862_v22  ;;  %v1670_v47 = vmul.f32 0.5, %v1542_v9  ;;  %v1479_v48 = vadd.f32 1.0, %v2749_v12  ;;  %2754 = vtanh.f32 %v1192_v0 }
 0x16f   : > { %v1766_v18 = vmul.f32 %v1638_v28, %v3679_v56  ;;  %v1575_v36 = vmul.f32 0.5, %v1447_v40  ;;  %2756 = vtanh.f32 %v1224_v39  ;;  %v1072_v41 = vpop.f32.mrf.mxu2  ;;  %v1152_v33 = vpop.f32.mrf.mxu3 }
 0x170   : > { %v1798_v37 = vmul.f32 %v1670_v47, %v3682_v61  ;;  %v1607_v55 = vmul.f32 0.5, %v1479_v48  ;;  %v3735_v49 = vadd.f32 %v3676_v44, %v1072_v41  ;;  %v3738_v45 = vadd.f32 %v3676_v44, %v1152_v33  ;;  %v915_v53 = vpop.f32.mrf.mxu0  ;;  %v995_v46 = vpop.f32.mrf.mxu1 }
 0x171   : > { %v1894_v35 = vpack.c.bf16 %v1766_v18, %v1766_v18  ;;  %v1703_v56 = vmul.f32 %v1575_v36, %v3686_v60  ;;  %v3742_v1 = vadd.f32 %v3676_v44, %v915_v53  ;;  %v3745_v29 = vadd.f32 %v3676_v44, %v995_v46 }
 0x172   : > { %v2751_v61 = vpop.eup %2750  ;;  %v1926_v24 = vpack.c.bf16 %v1798_v37, %v1798_v37  ;;  %v1735_v2 = vmul.f32 %v1607_v55, %v3689_v54  ;;  %v1256_v62 = vmul.f32 0.5, %v3735_v49  ;;  %v1288_v17 = vmul.f32 0.5, %v3738_v45 }
 0x173   : > { %v2753_v3 = vpop.eup %2752  ;;  %2023 = vst.msk [vmem:[%s2955_s27 + $0x164] sm:$0xf] %vm1933_vm1, %v1894_v35  ;;  %v1831_v60 = vpack.c.bf16 %v1703_v56, %v1703_v56  ;;  %v1511_v11 = vadd.f32 1.0, %v2751_v61  ;;  %v1193_v58 = vmul.f32 0.5, %v3742_v1  ;;  %v1225_v34 = vmul.f32 0.5, %v3745_v29 }
 0x174   : > { %v2755_v63 = vpop.eup %2754  ;;  %2055 = vst.msk [vmem:[%s2955_s27 + $0x1e4] sm:$0xf] %vm1933_vm1, %v1926_v24  ;;  %v1863_v57 = vpack.c.bf16 %v1735_v2, %v1735_v2  ;;  %v1543_v10 = vadd.f32 1.0, %v2753_v3  ;;  %2758 = vtanh.f32 %v1256_v62 }
 0x175   : > { %v2757_v54 = vpop.eup %2756  ;;  %1960 = vst.msk [vmem:[%s2955_s27 + $0x68] sm:$0xf] %vm1933_vm1, %v1831_v60  ;;  %v1639_v13 = vmul.f32 0.5, %v1511_v11  ;;  %v1448_v14 = vadd.f32 1.0, %v2755_v63  ;;  %2760 = vtanh.f32 %v1288_v17 }
 0x176   : > { %1992 = vst.msk [vmem:[%s2955_s27 + $0xe8] sm:$0xf] %vm1933_vm1, %v1863_v57  ;;  %v1671_v52 = vmul.f32 0.5, %v1543_v10  ;;  %v1480_v19 = vadd.f32 1.0, %v2757_v54  ;;  %2762 = vtanh.f32 %v1193_v58 }
 0x177   : > { %v1767_v6 = vmul.f32 %v1639_v13, %v3707_v26  ;;  %v1576_v4 = vmul.f32 0.5, %v1448_v14  ;;  %2764 = vtanh.f32 %v1225_v34  ;;  %v1075_v20 = vpop.f32.mrf.mxu2  ;;  %v1155_v7 = vpop.f32.mrf.mxu3 }
 0x178   : > { %v1799_v15 = vmul.f32 %v1671_v52, %v3710_v31  ;;  %v1608_v21 = vmul.f32 0.5, %v1480_v19  ;;  %v3763_v51 = vadd.f32 %v3676_v44, %v1075_v20  ;;  %v3766_v50 = vadd.f32 %v3676_v44, %v1155_v7  ;;  %v917_v8 = vpop.f32.mrf.mxu0  ;;  %v997_v27 = vpop.f32.mrf.mxu1 }
 0x179   : > { %v1895_v43 = vpack.c.bf16 %v1767_v6, %v1767_v6  ;;  %v1704_v26 = vmul.f32 %v1576_v4, %v3714_v23  ;;  %v3770_v32 = vadd.f32 %v3676_v44, %v917_v8  ;;  %v3773_v30 = vadd.f32 %v3676_v44, %v997_v27 }
 0x17a   : > { %v2759_v31 = vpop.eup %2758  ;;  %v1927_v25 = vpack.c.bf16 %v1799_v15, %v1799_v15  ;;  %v1736_v38 = vmul.f32 %v1608_v21, %v3717_v16  ;;  %v1257_v5 = vmul.f32 0.5, %v3763_v51  ;;  %v1289_v59 = vmul.f32 0.5, %v3766_v50 }
 0x17b   : > { %v2761_v0 = vpop.eup %2760  ;;  %2024 = vst.msk [vmem:[%s2955_s27 + $0x168] sm:$0xf] %vm1933_vm1, %v1895_v43  ;;  %v1832_v23 = vpack.c.bf16 %v1704_v26, %v1704_v26  ;;  %v1512_v39 = vadd.f32 1.0, %v2759_v31  ;;  %v1194_v42 = vmul.f32 0.5, %v3770_v32  ;;  %v1226_v22 = vmul.f32 0.5, %v3773_v30 }
 0x17c   : > { %v2763_v9 = vpop.eup %2762  ;;  %2056 = vst.msk [vmem:[%s2955_s27 + $0x1e8] sm:$0xf] %vm1933_vm1, %v1927_v25  ;;  %v1864_v12 = vpack.c.bf16 %v1736_v38, %v1736_v38  ;;  %v1544_v28 = vadd.f32 1.0, %v2761_v0  ;;  %2766 = vtanh.f32 %v1257_v5 }
 0x17d   : > { %v2765_v16 = vpop.eup %2764  ;;  %1961 = vst.msk [vmem:[%s2955_s27 + $0x6c] sm:$0xf] %vm1933_vm1, %v1832_v23  ;;  %v1640_v40 = vmul.f32 0.5, %v1512_v39  ;;  %v1449_v47 = vadd.f32 1.0, %v2763_v9  ;;  %2768 = vtanh.f32 %v1289_v59 }
 0x17e   : > { %1993 = vst.msk [vmem:[%s2955_s27 + $0xec] sm:$0xf] %vm1933_vm1, %v1864_v12  ;;  %v1672_v48 = vmul.f32 0.5, %v1544_v28  ;;  %v1481_v18 = vadd.f32 1.0, %v2765_v16  ;;  %2770 = vtanh.f32 %v1194_v42 }
 0x17f   : > { %v1768_v36 = vmul.f32 %v1640_v40, %v3735_v49  ;;  %v1577_v41 = vmul.f32 0.5, %v1449_v47  ;;  %2772 = vtanh.f32 %v1226_v22  ;;  %v1077_v33 = vpop.f32.mrf.mxu2  ;;  %v1157_v37 = vpop.f32.mrf.mxu3 }
 0x180   : > { %v1800_v55 = vmul.f32 %v1672_v48, %v3738_v45  ;;  %v1609_v53 = vmul.f32 0.5, %v1481_v18  ;;  %v3791_v46 = vadd.f32 %v3676_v44, %v1077_v33  ;;  %v3794_v35 = vadd.f32 %v3676_v44, %v1157_v37  ;;  %v920_v56 = vpop.f32.mrf.mxu0  ;;  %v1000_v61 = vpop.f32.mrf.mxu1 }
 0x181   : > { %v1896_v24 = vpack.c.bf16 %v1768_v36, %v1768_v36  ;;  %v1705_v49 = vmul.f32 %v1577_v41, %v3742_v1  ;;  %v3798_v2 = vadd.f32 %v3676_v44, %v920_v56  ;;  %v3801_v62 = vadd.f32 %v3676_v44, %v1000_v61 }
 0x182   : > { %v2767_v45 = vpop.eup %2766  ;;  %v1928_v17 = vpack.c.bf16 %v1800_v55, %v1800_v55  ;;  %v1737_v3 = vmul.f32 %v1609_v53, %v3745_v29  ;;  %v1258_v60 = vmul.f32 0.5, %v3791_v46  ;;  %v1290_v11 = vmul.f32 0.5, %v3794_v35 }
 0x183   : > { %v2769_v58 = vpop.eup %2768  ;;  %2025 = vst.msk [vmem:[%s2955_s27 + $0x16c] sm:$0xf] %vm1933_vm1, %v1896_v24  ;;  %v1833_v1 = vpack.c.bf16 %v1705_v49, %v1705_v49  ;;  %v1513_v34 = vadd.f32 1.0, %v2767_v45  ;;  %v1195_v63 = vmul.f32 0.5, %v3798_v2  ;;  %v1227_v57 = vmul.f32 0.5, %v3801_v62 }
 0x184   : > { %v2771_v10 = vpop.eup %2770  ;;  %2057 = vst.msk [vmem:[%s2955_s27 + $0x1ec] sm:$0xf] %vm1933_vm1, %v1928_v17  ;;  %v1865_v54 = vpack.c.bf16 %v1737_v3, %v1737_v3  ;;  %v1545_v13 = vadd.f32 1.0, %v2769_v58  ;;  %2774 = vtanh.f32 %v1258_v60 }
 0x185   : > { %v2773_v29 = vpop.eup %2772  ;;  %1962 = vst.msk [vmem:[%s2955_s27 + $0x70] sm:$0xf] %vm1933_vm1, %v1833_v1  ;;  %v1641_v14 = vmul.f32 0.5, %v1513_v34  ;;  %v1450_v52 = vadd.f32 1.0, %v2771_v10  ;;  %2776 = vtanh.f32 %v1290_v11 }
 0x186   : > { %1994 = vst.msk [vmem:[%s2955_s27 + $0xf0] sm:$0xf] %vm1933_vm1, %v1865_v54  ;;  %v1673_v19 = vmul.f32 0.5, %v1545_v13  ;;  %v1482_v6 = vadd.f32 1.0, %v2773_v29  ;;  %2778 = vtanh.f32 %v1195_v63 }
 0x187   : > { %v1769_v4 = vmul.f32 %v1641_v14, %v3763_v51  ;;  %v1578_v20 = vmul.f32 0.5, %v1450_v52  ;;  %2780 = vtanh.f32 %v1227_v57  ;;  %v1080_v7 = vpop.f32.mrf.mxu2  ;;  %v1160_v15 = vpop.f32.mrf.mxu3 }
 0x188   : > { %v1801_v21 = vmul.f32 %v1673_v19, %v3766_v50  ;;  %v1610_v8 = vmul.f32 0.5, %v1482_v6  ;;  %v3819_v27 = vadd.f32 %v3676_v44, %v1080_v7  ;;  %v3822_v43 = vadd.f32 %v3676_v44, %v1160_v15  ;;  %v922_v26 = vpop.f32.mrf.mxu0  ;;  %v1002_v31 = vpop.f32.mrf.mxu1 }
 0x189   : > { %v1897_v25 = vpack.c.bf16 %v1769_v4, %v1769_v4  ;;  %v1706_v51 = vmul.f32 %v1578_v20, %v3770_v32  ;;  %v3826_v38 = vadd.f32 %v3676_v44, %v922_v26  ;;  %v3829_v5 = vadd.f32 %v3676_v44, %v1002_v31 }
 0x18a   : > { %v2775_v50 = vpop.eup %2774  ;;  %v1929_v59 = vpack.c.bf16 %v1801_v21, %v1801_v21  ;;  %v1738_v0 = vmul.f32 %v1610_v8, %v3773_v30  ;;  %v1259_v23 = vmul.f32 0.5, %v3819_v27  ;;  %v1291_v39 = vmul.f32 0.5, %v3822_v43 }
 0x18b   : > { %v2777_v42 = vpop.eup %2776  ;;  %2026 = vst.msk [vmem:[%s2955_s27 + $0x170] sm:$0xf] %vm1933_vm1, %v1897_v25  ;;  %v1834_v32 = vpack.c.bf16 %v1706_v51, %v1706_v51  ;;  %v1514_v22 = vadd.f32 1.0, %v2775_v50  ;;  %v1196_v9 = vmul.f32 0.5, %v3826_v38  ;;  %v1228_v12 = vmul.f32 0.5, %v3829_v5 }
 0x18c   : > { %v2779_v28 = vpop.eup %2778  ;;  %2058 = vst.msk [vmem:[%s2955_s27 + $0x1f0] sm:$0xf] %vm1933_vm1, %v1929_v59  ;;  %v1866_v16 = vpack.c.bf16 %v1738_v0, %v1738_v0  ;;  %v1546_v40 = vadd.f32 1.0, %v2777_v42  ;;  %2782 = vtanh.f32 %v1259_v23 }
 0x18d   : > { %v2781_v30 = vpop.eup %2780  ;;  %1963 = vst.msk [vmem:[%s2955_s27 + $0x74] sm:$0xf] %vm1933_vm1, %v1834_v32  ;;  %v1642_v47 = vmul.f32 0.5, %v1514_v22  ;;  %v1451_v48 = vadd.f32 1.0, %v2779_v28  ;;  %2784 = vtanh.f32 %v1291_v39 }
 0x18e   : > { %1995 = vst.msk [vmem:[%s2955_s27 + $0xf4] sm:$0xf] %vm1933_vm1, %v1866_v16  ;;  %v1674_v18 = vmul.f32 0.5, %v1546_v40  ;;  %v1483_v36 = vadd.f32 1.0, %v2781_v30  ;;  %2786 = vtanh.f32 %v1196_v9 }
 0x18f   : > { %v1770_v41 = vmul.f32 %v1642_v47, %v3791_v46  ;;  %v1579_v33 = vmul.f32 0.5, %v1451_v48  ;;  %2788 = vtanh.f32 %v1228_v12  ;;  %v1082_v37 = vpop.f32.mrf.mxu2  ;;  %v1162_v55 = vpop.f32.mrf.mxu3 }
 0x190   : > { %v1802_v53 = vmul.f32 %v1674_v18, %v3794_v35  ;;  %v1611_v56 = vmul.f32 0.5, %v1483_v36  ;;  %v1083_v61 = vadd.f32 %v3676_v44, %v1082_v37  ;;  %v1163_v24 = vadd.f32 %v3676_v44, %v1162_v55 }
 0x191   : > { %v1898_v49 = vpack.c.bf16 %v1770_v41, %v1770_v41  ;;  %v1707_v45 = vmul.f32 %v1579_v33, %v3798_v2 }
 0x192   : > { %v2783_v17 = vpop.eup %2782  ;;  %v1930_v3 = vpack.c.bf16 %v1802_v53, %v1802_v53  ;;  %v1739_v46 = vmul.f32 %v1611_v56, %v3801_v62  ;;  %v1260_v60 = vmul.f32 0.5, %v1083_v61  ;;  %v1292_v11 = vmul.f32 0.5, %v1163_v24 }
 0x193   : > { %v2785_v58 = vpop.eup %2784  ;;  %2027 = vst.msk [vmem:[%s2955_s27 + $0x174] sm:$0xf] %vm1933_vm1, %v1898_v49  ;;  %v1835_v35 = vpack.c.bf16 %v1707_v45, %v1707_v45  ;;  %v1515_v1 = vadd.f32 1.0, %v2783_v17 }
 0x194   : > { %v2787_v34 = vpop.eup %2786  ;;  %2059 = vst.msk [vmem:[%s2955_s27 + $0x1f4] sm:$0xf] %vm1933_vm1, %v1930_v3  ;;  %v1867_v44 = vpack.c.bf16 %v1739_v46, %v1739_v46  ;;  %v1547_v63 = vadd.f32 1.0, %v2785_v58  ;;  %2790 = vtanh.f32 %v1260_v60 }
 0x195   : > { %v2789_v2 = vpop.eup %2788  ;;  %1964 = vst.msk [vmem:[%s2955_s27 + $0x78] sm:$0xf] %vm1933_vm1, %v1835_v35  ;;  %v1643_v57 = vmul.f32 0.5, %v1515_v1  ;;  %v1452_v62 = vadd.f32 1.0, %v2787_v34  ;;  %2792 = vtanh.f32 %v1292_v11 }
 0x196   : > { %1996 = vst.msk [vmem:[%s2955_s27 + $0xf8] sm:$0xf] %vm1933_vm1, %v1867_v44  ;;  %v1675_v10 = vmul.f32 0.5, %v1547_v63  ;;  %v1484_v54 = vadd.f32 1.0, %v2789_v2 }
 0x197   : > { %v1771_v13 = vmul.f32 %v1643_v57, %v3819_v27  ;;  %v1580_v29 = vmul.f32 0.5, %v1452_v62 }
 0x198   : > { %v1803_v14 = vmul.f32 %v1675_v10, %v3822_v43  ;;  %v1612_v52 = vmul.f32 0.5, %v1484_v54 }
 0x199   : > { %v1899_v19 = vpack.c.bf16 %v1771_v13, %v1771_v13  ;;  %v1708_v6 = vmul.f32 %v1580_v29, %v3826_v38 }
 0x19a   : > { %v2791_v4 = vpop.eup %2790  ;;  %v1931_v20 = vpack.c.bf16 %v1803_v14, %v1803_v14  ;;  %v1740_v7 = vmul.f32 %v1612_v52, %v3829_v5 }
 0x19b   : > { %v2793_v15 = vpop.eup %2792  ;;  %2028 = vst.msk [vmem:[%s2955_s27 + $0x178] sm:$0xf] %vm1933_vm1, %v1899_v19  ;;  %v1836_v21 = vpack.c.bf16 %v1708_v6, %v1708_v6  ;;  %v1516_v8 = vadd.f32 1.0, %v2791_v4 }
 0x19c   : > { %2060 = vst.msk [vmem:[%s2955_s27 + $0x1f8] sm:$0xf] %vm1933_vm1, %v1931_v20  ;;  %v1868_v27 = vpack.c.bf16 %v1740_v7, %v1740_v7  ;;  %v1548_v43 = vadd.f32 1.0, %v2793_v15 }
 0x19d   : > { %1965 = vst.msk [vmem:[%s2955_s27 + $0x7c] sm:$0xf] %vm1933_vm1, %v1836_v21  ;;  %v1644_v26 = vmul.f32 0.5, %v1516_v8 }
 0x19e   : > { %1997 = vst.msk [vmem:[%s2955_s27 + $0xfc] sm:$0xf] %vm1933_vm1, %v1868_v27  ;;  %v1676_v31 = vmul.f32 0.5, %v1548_v43 }
 0x19f   : > { %v1772_v25 = vmul.f32 %v1644_v26, %v1083_v61 }
 0x1a0   : > { %v1804_v51 = vmul.f32 %v1676_v31, %v1163_v24 }
 0x1a1   : > { %v1900_v38 = vpack.c.bf16 %v1772_v25, %v1772_v25 }
 0x1a2   : > { %v1932_v5 = vpack.c.bf16 %v1804_v51, %v1804_v51 }
 0x1a3   : > { %2029 = vst.msk [vmem:[%s2955_s27 + $0x17c] sm:$0xf] %vm1933_vm1, %v1900_v38 }
 0x1a4   : > { %2061 = vst.msk [vmem:[%s2955_s27 + $0x1fc] sm:$0xf] %vm1933_vm1, %v1932_v5 }
 0x1a5 PF: > { %s13_s12 = sadd.s32 1, %s2802_s12  }
 0x1a6   : > { %p10_p4 = scmp.ge.s32.totalorder %s13_s12, 4  }
 0x1a8   :  { %12 = sbr.rel (!%p10_p4) target bundleno = 1 (0x1), region = 62 }

// kernel: _forward_impl.9
= control target key start
LH: loop header
LB: loop body
LE: loop exit
PB: predicated region body
PF: predicated region fallthrough
CT: control target
= control target key end

     0   :  { %s1282_s12 = smov 0   ;;  %s1551_s0 = inlined_call_operand.vmem [shape: bf16[512,144], index: 0, kind: input, shape index: {}]   ;;  %s1552_s1 = inlined_call_operand.vmem [shape: bf16[144,16], index: 1, kind: input, shape index: {}]   ;;  %s1553_s2 = inlined_call_operand.vmem [shape: f32[1,16], index: 2, kind: input, shape index: {}]   ;;  %s1554_s3 = inlined_call_operand.vmem [shape: bf16[512,16], index: 3, kind: output, shape index: {}]  }
   0x1 LB: > { %s938_s13 = sadd.s32 4294967295, %s1260_s12   ;;  %p942_p0 = scmp.ge.s32.totalorder %s1260_s12, 1  ;;  %s1260_s12 = sphi %s1282_s12, %s13_s12  }
   0x2   : > { %p139_p1 = scmp.lt.s32.totalorder %s1260_s12, 3 }
   0x4   : > { %p140_p2 = pnand %p942_p0, %p139_p1 }
   0x5   : > { %s943_s18 = sshll.u32 (!%p140_p2), %s938_s13, 5 }
   0x6   : > { %143 = sbr.rel (%p140_p2) target bundleno = 317 (0x13d), region = 32  ;;  %p165_p3 = scmp.lt.s32.totalorder (!%p140_p2), %s943_s18, 63 }
   0xb   : > { %v1170_v0 = vld [vmem:[%s1552_s1 + $0x38] sm:$0xff]  ;;  %v1171_v1 = vld [vmem:[%s1552_s1 + $0x40] sm:$0xff]  ;;  %v1169_v2 = vld [vmem:[%s1552_s1 + $0x30] sm:$0xff]  ;;  %s1556_s18 = smov (!%p165_p3, %s943_s18), 63  ;;  %vm430_vm0 = vcmask 130048   ;;  %vm849_vm1 = vcmask 125952  }
   0xc   : > { %479 = vmatpush.bf16.msra.mxu0 %v1170_v0  ;;  %1172 = vmatpush.bf16.msra.mxu2 %v1170_v0  ;;  %s1130_s21 = sshll.u32 %s1556_s18, 3  ;;  %v1168_v3 = vld [vmem:[%s1552_s1 + $0x28] sm:$0xff]  ;;  %v1167_v7 = vld [vmem:[%s1552_s1 + $0x20] sm:$0xff]  ;;  %v1166_v11 = vld [vmem:[%s1552_s1 + $0x18] sm:$0xff]  ;;  %s947_s13 = sshll.u32 %s1556_s18, 2 }
   0xd   : > { %575 = vmatpush.bf16.msra.mxu1 %v1171_v1  ;;  %1180 = vmatpush.bf16.msra.mxu3 %v1171_v1  ;;  %s1305_s24 = scalar_lea.vmem %s1551_s0, %s1130_s21  ;;  %v1165_v12 = vld [vmem:[%s1552_s1 + $0x10] sm:$0xff]  ;;  %v1164_v16 = vld [vmem:[%s1552_s1 + $0x8] sm:$0xff]  ;;  %v1163_v19 = vld [vmem:[%s1552_s1] sm:$0xff]  ;;  %s1421_s16 = scalar_lea.vmem %s1554_s3, %s947_s13 }
   0xe   : > { %v1131_v4 = vld [vmem:[%s1305_s24 + $0x4] sm:$0xf]  ;;  %v952_v5 = vld [vmem:[%s1305_s24 + $0x8] sm:$0xf0]  ;;  %v1149_v8 = vld [vmem:[%s1305_s24 + $0x94] sm:$0xf] }
   0xf   : > { %v955_v6 = vor.u32 %v1131_v4, %v952_v5  ;;  %v1024_v9 = vld [vmem:[%s1305_s24 + $0x98] sm:$0xf0]  ;;  %v1133_v13 = vld [vmem:[%s1305_s24 + $0x14] sm:$0xf]  ;;  %v1151_v17 = vld [vmem:[%s1305_s24 + $0xa4] sm:$0xf] }
  0x10   : > { %480 = vmatpush.bf16.msra.mxu0 %v1169_v2  ;;  %1173 = vmatpush.bf16.msra.mxu2 %v1169_v2  ;;  %v1027_v10 = vor.u32 %v1149_v8, %v1024_v9  ;;  %v960_v14 = vld [vmem:[%s1305_s24 + $0x18] sm:$0xf0]  ;;  %v1032_v18 = vld [vmem:[%s1305_s24 + $0xa8] sm:$0xf0]  ;;  %v950_v20 = vld [vmem:[%s1305_s24] sm:$0xf] }
  0x11   : > { %1112 = vmatmul.msk.bf16.vlgmr.msra.gmra.mxu1 %vm430_vm0, %v955_v6  ;;  %v963_v15 = vor.u32 %v1133_v13, %v960_v14  ;;  %v1132_v21 = vld [vmem:[%s1305_s24 + $0x4] sm:$0xf0]  ;;  %v1035_v22 = vor.u32 %v1151_v17, %v1032_v18  ;;  %v1014_v23 = vld [vmem:[%s1305_s24 + $0x80] sm:$0xf]  ;;  %v1135_v27 = vld [vmem:[%s1305_s24 + $0x24] sm:$0xf] }
  0x12   : > { %1121 = vmatmul.msk.bf16.vlgmr.msra.gmra.mxu3 %vm430_vm0, %v1027_v10  ;;  %v1148_v24 = vld [vmem:[%s1305_s24 + $0x84] sm:$0xf0]  ;;  %v951_v25 = vor.u32 %v1132_v21, %v950_v20  ;;  %v968_v28 = vld [vmem:[%s1305_s24 + $0x28] sm:$0xf0]  ;;  %v1153_v30 = vld [vmem:[%s1305_s24 + $0xb4] sm:$0xf] }
  0x13   : > { %v1015_v26 = vor.u32 %v1148_v24, %v1014_v23  ;;  %v971_v29 = vor.u32 %v1135_v27, %v968_v28  ;;  %v1040_v31 = vld [vmem:[%s1305_s24 + $0xb8] sm:$0xf0]  ;;  %v958_v32 = vld [vmem:[%s1305_s24 + $0x10] sm:$0xf]  ;;  %v1134_v33 = vld [vmem:[%s1305_s24 + $0x14] sm:$0xf0] }
  0x14   : > { %481 = vmatpush.bf16.msra.mxu0 %v1168_v3  ;;  %1174 = vmatpush.bf16.msra.mxu2 %v1168_v3  ;;  %v1043_v34 = vor.u32 %v1153_v30, %v1040_v31  ;;  %v1022_v35 = vld [vmem:[%s1305_s24 + $0x90] sm:$0xf]  ;;  %v1150_v36 = vld [vmem:[%s1305_s24 + $0x94] sm:$0xf0]  ;;  %v959_v37 = vor.u32 %v1134_v33, %v958_v32  ;;  %v1137_v39 = vld [vmem:[%s1305_s24 + $0x34] sm:$0xf] }
  0x15   : > { %v1023_v38 = vor.u32 %v1150_v36, %v1022_v35  ;;  %v976_v40 = vld [vmem:[%s1305_s24 + $0x38] sm:$0xf0]  ;;  %v1155_v42 = vld [vmem:[%s1305_s24 + $0xc4] sm:$0xf]  ;;  %v1048_v43 = vld [vmem:[%s1305_s24 + $0xc8] sm:$0xf0] }
  0x16   : > { %v979_v41 = vor.u32 %v1137_v39, %v976_v40  ;;  %v966_v44 = vld [vmem:[%s1305_s24 + $0x20] sm:$0xf]  ;;  %v1136_v45 = vld [vmem:[%s1305_s24 + $0x24] sm:$0xf0]  ;;  %v1051_v46 = vor.u32 %v1155_v42, %v1048_v43  ;;  %v1139_v51 = vld [vmem:[%s1305_s24 + $0x44] sm:$0xf] }
  0x17   : > { %v1030_v47 = vld [vmem:[%s1305_s24 + $0xa0] sm:$0xf]  ;;  %v1152_v48 = vld [vmem:[%s1305_s24 + $0xa4] sm:$0xf0]  ;;  %v967_v49 = vor.u32 %v1136_v45, %v966_v44  ;;  %v984_v52 = vld [vmem:[%s1305_s24 + $0x48] sm:$0xf0] }
  0x18   : > { %482 = vmatpush.bf16.msra.mxu0 %v1167_v7  ;;  %1175 = vmatpush.bf16.msra.mxu2 %v1167_v7  ;;  %v1031_v50 = vor.u32 %v1152_v48, %v1030_v47  ;;  %v987_v53 = vor.u32 %v1139_v51, %v984_v52  ;;  %v1157_v54 = vld [vmem:[%s1305_s24 + $0xd4] sm:$0xf]  ;;  %v1056_v55 = vld [vmem:[%s1305_s24 + $0xd8] sm:$0xf0]  ;;  %v974_v56 = vld [vmem:[%s1305_s24 + $0x30] sm:$0xf] }
  0x19   : > { %v1138_v57 = vld [vmem:[%s1305_s24 + $0x34] sm:$0xf0]  ;;  %v1059_v58 = vor.u32 %v1157_v54, %v1056_v55  ;;  %v1038_v59 = vld [vmem:[%s1305_s24 + $0xb0] sm:$0xf]  ;;  %v1141_v63 = vld [vmem:[%s1305_s24 + $0x54] sm:$0xf] }
  0x1a   : > { %v1154_v60 = vld [vmem:[%s1305_s24 + $0xb4] sm:$0xf0]  ;;  %v975_v61 = vor.u32 %v1138_v57, %v974_v56  ;;  %v992_v0 = vld [vmem:[%s1305_s24 + $0x58] sm:$0xf0]  ;;  %v1159_v2 = vld [vmem:[%s1305_s24 + $0xe4] sm:$0xf] }
  0x1b   : > { %v1039_v62 = vor.u32 %v1154_v60, %v1038_v59  ;;  %v995_v1 = vor.u32 %v1141_v63, %v992_v0  ;;  %v1064_v3 = vld [vmem:[%s1305_s24 + $0xe8] sm:$0xf0]  ;;  %v982_v4 = vld [vmem:[%s1305_s24 + $0x40] sm:$0xf]  ;;  %v1140_v5 = vld [vmem:[%s1305_s24 + $0x44] sm:$0xf0] }
  0x1c   : > { %483 = vmatpush.bf16.msra.mxu0 %v1166_v11  ;;  %1176 = vmatpush.bf16.msra.mxu2 %v1166_v11  ;;  %v1067_v6 = vor.u32 %v1159_v2, %v1064_v3  ;;  %v1046_v7 = vld [vmem:[%s1305_s24 + $0xc0] sm:$0xf]  ;;  %v1156_v8 = vld [vmem:[%s1305_s24 + $0xc4] sm:$0xf0]  ;;  %v983_v9 = vor.u32 %v1140_v5, %v982_v4  ;;  %v1143_v11 = vld [vmem:[%s1305_s24 + $0x64] sm:$0xf] }
  0x1d   : > { %v1047_v10 = vor.u32 %v1156_v8, %v1046_v7  ;;  %v1161_v14 = vld [vmem:[%s1305_s24 + $0xf4] sm:$0xf]  ;;  %v1142_v17 = vld [vmem:[%s1305_s24 + $0x54] sm:$0xf0]  ;;  %v1008_v24 = vld [vmem:[%s1305_s24 + $0x78] sm:$0xf0] }
  0x1e   : > { %v1158_v20 = vld [vmem:[%s1305_s24 + $0xd4] sm:$0xf0]  ;;  %v1145_v23 = vld [vmem:[%s1305_s24 + $0x74] sm:$0xf]  ;;  %v1144_v27 = vld [vmem:[%s1305_s24 + $0x64] sm:$0xf0] }
  0x1f   : > { %v1062_v28 = vld [vmem:[%s1305_s24 + $0xe0] sm:$0xf]  ;;  %v1147_v32 = vld [vmem:[%s1305_s24 + $0x84] sm:$0xf]  ;;  %v1016_v33 = vld [vmem:[%s1305_s24 + $0x88] sm:$0xf0] }
  0x20   : > { %484 = vmatpush.bf16.msra.mxu0 %v1165_v12  ;;  %1177 = vmatpush.bf16.msra.mxu2 %v1165_v12  ;;  %v1000_v12 = vld [vmem:[%s1305_s24 + $0x68] sm:$0xf0]  ;;  %v1006_v36 = vld [vmem:[%s1305_s24 + $0x70] sm:$0xf]  ;;  %v1162_v39 = vld [vmem:[%s1305_s24 + $0xf4] sm:$0xf0] }
  0x21   : > { %1113 = vmatmul.msk.bf16.gmra.mxu1 %vm430_vm0, %v963_v15  ;;  %v1003_v13 = vor.u32 %v1143_v11, %v1000_v12  ;;  %v1072_v15 = vld [vmem:[%s1305_s24 + $0xf8] sm:$0xf0]  ;;  %v1408_v44 = vld [vmem:[%s1553_s2] ss:$0 sm:$0xff] }
  0x22   : > { %1122 = vmatmul.msk.bf16.gmra.mxu3 %vm430_vm0, %v1035_v22  ;;  %v1075_v18 = vor.u32 %v1161_v14, %v1072_v15 }
  0x24   : > { %485 = vmatpush.bf16.msra.mxu0 %v1164_v16  ;;  %1178 = vmatpush.bf16.msra.mxu2 %v1164_v16  ;;  %v990_v16 = vld [vmem:[%s1305_s24 + $0x50] sm:$0xf] }
  0x25   : > { %v991_v21 = vor.u32 %v1142_v17, %v990_v16 }
  0x28   : > { %486 = vmatpush.bf16.msra.mxu0 %v1163_v19  ;;  %1179 = vmatpush.bf16.msra.mxu2 %v1163_v19  ;;  %v1054_v19 = vld [vmem:[%s1305_s24 + $0xd0] sm:$0xf] }
  0x29   : > { %v1055_v22 = vor.u32 %v1158_v20, %v1054_v19 }
  0x2b   : > { %487 = vmatmul.bf16.vlgmr.msra.gmra.mxu0 %v951_v25  ;;  %527 = vmatmul.bf16.vlgmr.msra.gmra.mxu2 %v1015_v26  ;;  %v1011_v25 = vor.u32 %v1145_v23, %v1008_v24  ;;  %v998_v26 = vld [vmem:[%s1305_s24 + $0x60] sm:$0xf] }
  0x2c   : > { %v999_v30 = vor.u32 %v1144_v27, %v998_v26 }
  0x31   : > { %1114 = vmatmul.msk.bf16.gmra.mxu1 %vm430_vm0, %v971_v29  ;;  %v1160_v29 = vld [vmem:[%s1305_s24 + $0xe4] sm:$0xf0] }
  0x32   : > { %1123 = vmatmul.msk.bf16.gmra.mxu3 %vm430_vm0, %v1043_v34  ;;  %v1063_v31 = vor.u32 %v1160_v29, %v1062_v28  ;;  %v1019_v34 = vor.u32 %v1147_v32, %v1016_v33 }
  0x3b   : > { %492 = vmatmul.bf16.gmra.mxu0 %v959_v37  ;;  %532 = vmatmul.bf16.gmra.mxu2 %v1023_v38  ;;  %v1146_v37 = vld [vmem:[%s1305_s24 + $0x74] sm:$0xf0]  ;;  %v1070_v38 = vld [vmem:[%s1305_s24 + $0xf0] sm:$0xf] }
  0x3c   : > { %v1007_v40 = vor.u32 %v1146_v37, %v1006_v36 }
  0x41   : > { %1115 = vmatmul.msk.bf16.gmra.mxu1 %vm430_vm0, %v979_v41  ;;  %v1071_v41 = vor.u32 %v1162_v39, %v1070_v38 }
  0x42   : > { %1124 = vmatmul.msk.bf16.gmra.mxu3 %vm430_vm0, %v1051_v46 }
  0x4b   : > { %497 = vmatmul.bf16.gmra.mxu0 %v967_v49  ;;  %537 = vmatmul.bf16.gmra.mxu2 %v1031_v50 }
  0x51   : > { %1116 = vmatmul.msk.bf16.gmra.mxu1 %vm430_vm0, %v987_v53 }
  0x52   : > { %1125 = vmatmul.msk.bf16.gmra.mxu3 %vm430_vm0, %v1059_v58 }
  0x5b   : > { %502 = vmatmul.bf16.gmra.mxu0 %v975_v61  ;;  %542 = vmatmul.bf16.gmra.mxu2 %v1039_v62 }
  0x61   : > { %1117 = vmatmul.msk.bf16.gmra.mxu1 %vm430_vm0, %v995_v1 }
  0x62   : > { %1126 = vmatmul.msk.bf16.gmra.mxu3 %vm430_vm0, %v1067_v6 }
  0x6b   : > { %507 = vmatmul.bf16.gmra.mxu0 %v983_v9  ;;  %547 = vmatmul.bf16.gmra.mxu2 %v1047_v10 }
  0x71   : > { %1118 = vmatmul.msk.bf16.gmra.mxu1 %vm430_vm0, %v1003_v13 }
  0x72   : > { %1127 = vmatmul.msk.bf16.gmra.mxu3 %vm430_vm0, %v1075_v18 }
  0x7b   : > { %512 = vmatmul.bf16.gmra.mxu0 %v991_v21  ;;  %552 = vmatmul.bf16.gmra.mxu2 %v1055_v22 }
  0x81   : > { %1119 = vmatmul.msk.bf16.gmra.mxu1 %vm430_vm0, %v1011_v25 }
  0x8b   : > { %517 = vmatmul.bf16.gmra.mxu0 %v999_v30  ;;  %557 = vmatmul.bf16.gmra.mxu2 %v1063_v31 }
  0x8e   : > { %v577_v35 = vpop.f32.mrf.mxu1 }
  0x91   : > { %1120 = vmatmul.msk.bf16.gmra.mxu1 %vm430_vm0, %v1019_v34 }
  0x95   : > { %v622_v45 = vpop.f32.mrf.mxu3 }
  0x96   : > { %v579_v42 = vpop.f32.mrf.mxu1 }
  0x9b   : > { %522 = vmatmul.bf16.gmra.mxu0 %v1007_v40  ;;  %562 = vmatmul.bf16.gmra.mxu2 %v1071_v41 }
  0x9d   : > { %v624_v55 = vpop.f32.mrf.mxu3 }
  0x9e   : > { %v582_v43 = vpop.f32.mrf.mxu1 }
  0xa5   : > { %v627_v3 = vpop.f32.mrf.mxu3 }
  0xa6   : > { %v584_v48 = vpop.f32.mrf.mxu1 }
  0xa8   : > { %v488_v46 = vpop.f32.mrf.mxu0 }
  0xa9   : > { %v489_v47 = vadd.f32 %v1408_v44, %v488_v46 }
  0xab   : > { %v578_v49 = vadd.f32 %v577_v35, %v489_v47 }
  0xad   : > { %v657_v50 = vmul.f32 0.5, %v578_v49  ;;  %v629_v21 = vpop.f32.mrf.mxu3 }
  0xae   : > { %v1411_v51 = vpop.f32.mrf.mxu2  ;;  %v587_v54 = vpop.f32.mrf.mxu1 }
  0xaf   : > { %1190 = vtanh.f32 %v657_v50 }
  0xb0   : > { %v490_v52 = vpop.f32.mrf.mxu0 }
  0xb1   : > { %v491_v53 = vadd.f32 %v1408_v44, %v490_v52 }
  0xb3   : > { %v580_v56 = vadd.f32 %v579_v42, %v491_v53 }
  0xb5   : > { %v1191_v57 = vpop.eup %1190  ;;  %v658_v58 = vmul.f32 0.5, %v580_v56  ;;  %v632_v41 = vpop.f32.mrf.mxu3 }
  0xb6   : > { %v721_v59 = vadd.f32 1.0, %v1191_v57  ;;  %v1414_v60 = vpop.f32.mrf.mxu2  ;;  %v589_v0 = vpop.f32.mrf.mxu1 }
  0xb7   : > { %1192 = vtanh.f32 %v658_v58 }
  0xb8   : > { %v753_v61 = vmul.f32 0.5, %v721_v59  ;;  %v493_v62 = vpop.f32.mrf.mxu0 }
  0xb9   : > { %v494_v63 = vadd.f32 %v1408_v44, %v493_v62 }
  0xba   : > { %v785_v1 = vmul.f32 %v753_v61, %v578_v49 }
  0xbb   : > { %v583_v2 = vadd.f32 %v582_v43, %v494_v63 }
  0xbc   : > { %v817_v4 = vpack.c.bf16 %v785_v1, %v785_v1 }
  0xbd   : > { %v1193_v5 = vpop.eup %1192  ;;  %v659_v6 = vmul.f32 0.5, %v583_v2 }
  0xbe   : > { %850 = vst.msk [vmem:[%s1421_s16] sm:$0xf] %vm849_vm1, %v817_v4  ;;  %v722_v7 = vadd.f32 1.0, %v1193_v5  ;;  %v533_v8 = vpop.f32.mrf.mxu2  ;;  %v1427_v13 = vpop.f32.mrf.mxu1 }
  0xbf   : > { %1194 = vtanh.f32 %v659_v6  ;;  %v534_v10 = vadd.f32 %v1408_v44, %v533_v8  ;;  %v634_v6 = vpop.f32.mrf.mxu3 }
  0xc0   : > { %v754_v9 = vmul.f32 0.5, %v722_v7  ;;  %v495_v11 = vpop.f32.mrf.mxu0 }
  0xc1   : > { %v496_v12 = vadd.f32 %v1408_v44, %v495_v11  ;;  %v623_v15 = vadd.f32 %v622_v45, %v534_v10 }
  0xc2   : > { %v786_v14 = vmul.f32 %v754_v9, %v580_v56 }
  0xc3   : > { %v585_v16 = vadd.f32 %v584_v48, %v496_v12  ;;  %v675_v18 = vmul.f32 0.5, %v623_v15 }
  0xc4   : > { %v818_v17 = vpack.c.bf16 %v786_v14, %v786_v14 }
  0xc5   : > { %v1195_v19 = vpop.eup %1194  ;;  %v660_v20 = vmul.f32 0.5, %v585_v16  ;;  %1196 = vtanh.f32 %v675_v18 }
  0xc6   : > { %851 = vst.msk [vmem:[%s1421_s16 + $0x4] sm:$0xf] %vm849_vm1, %v818_v17  ;;  %v723_v22 = vadd.f32 1.0, %v1195_v19  ;;  %v535_v23 = vpop.f32.mrf.mxu2  ;;  %v1433_v28 = vpop.f32.mrf.mxu1 }
  0xc7   : > { %1198 = vtanh.f32 %v660_v20  ;;  %v536_v25 = vadd.f32 %v1408_v44, %v535_v23 }
  0xc8   : > { %v755_v24 = vmul.f32 0.5, %v723_v22  ;;  %v498_v26 = vpop.f32.mrf.mxu0 }
  0xc9   : > { %v499_v27 = vadd.f32 %v1408_v44, %v498_v26  ;;  %v625_v30 = vadd.f32 %v624_v55, %v536_v25 }
  0xca   : > { %v787_v29 = vmul.f32 %v755_v24, %v583_v2 }
  0xcb   : > { %v588_v31 = vadd.f32 %v587_v54, %v499_v27  ;;  %v1197_v32 = vpop.eup %1196  ;;  %v676_v34 = vmul.f32 0.5, %v625_v30 }
  0xcc   : > { %v819_v33 = vpack.c.bf16 %v787_v29, %v787_v29  ;;  %v739_v36 = vadd.f32 1.0, %v1197_v32 }
  0xcd   : > { %v1199_v35 = vpop.eup %1198  ;;  %v661_v37 = vmul.f32 0.5, %v588_v31  ;;  %1200 = vtanh.f32 %v676_v34 }
  0xce   : > { %852 = vst.msk [vmem:[%s1421_s16 + $0x8] sm:$0xf] %vm849_vm1, %v819_v33  ;;  %v724_v38 = vadd.f32 1.0, %v1199_v35  ;;  %v771_v39 = vmul.f32 0.5, %v739_v36  ;;  %v538_v40 = vpop.f32.mrf.mxu2  ;;  %v1439_v48 = vpop.f32.mrf.mxu1 }
  0xcf   : > { %1202 = vtanh.f32 %v661_v37  ;;  %v539_v43 = vadd.f32 %v1408_v44, %v538_v40 }
  0xd0   : > { %v756_v42 = vmul.f32 0.5, %v724_v38  ;;  %v500_v45 = vpop.f32.mrf.mxu0  ;;  %v803_v46 = vmul.f32 %v771_v39, %v623_v15 }
  0xd1   : > { %v501_v47 = vadd.f32 %v1408_v44, %v500_v45  ;;  %v628_v50 = vadd.f32 %v627_v3, %v539_v43 }
  0xd2   : > { %v788_v49 = vmul.f32 %v756_v42, %v585_v16  ;;  %v835_v52 = vpack.c.bf16 %v803_v46, %v803_v46 }
  0xd3   : > { %v590_v53 = vadd.f32 %v589_v0, %v501_v47  ;;  %v1201_v54 = vpop.eup %1200  ;;  %v677_v56 = vmul.f32 0.5, %v628_v50 }
  0xd4   : > { %v820_v55 = vpack.c.bf16 %v788_v49, %v788_v49  ;;  %868 = vst.msk [vmem:[%s1421_s16 + $0x48] sm:$0xf] %vm849_vm1, %v835_v52  ;;  %v740_v58 = vadd.f32 1.0, %v1201_v54 }
  0xd5   : > { %v1203_v57 = vpop.eup %1202  ;;  %v662_v59 = vmul.f32 0.5, %v590_v53  ;;  %1204 = vtanh.f32 %v677_v56 }
  0xd6   : > { %853 = vst.msk [vmem:[%s1421_s16 + $0xc] sm:$0xf] %vm849_vm1, %v820_v55  ;;  %v725_v61 = vadd.f32 1.0, %v1203_v57  ;;  %v772_v62 = vmul.f32 0.5, %v740_v58  ;;  %v540_v63 = vpop.f32.mrf.mxu2  ;;  %v1447_v5 = vpop.f32.mrf.mxu1 }
  0xd7   : > { %1206 = vtanh.f32 %v662_v59  ;;  %v541_v2 = vadd.f32 %v1408_v44, %v540_v63 }
  0xd8   : > { %v757_v1 = vmul.f32 0.5, %v725_v61  ;;  %v503_v0 = vpop.f32.mrf.mxu0  ;;  %v804_v3 = vmul.f32 %v772_v62, %v625_v30 }
  0xd9   : > { %v504_v4 = vadd.f32 %v1408_v44, %v503_v0  ;;  %v630_v8 = vadd.f32 %v629_v21, %v541_v2 }
  0xda   : > { %v789_v7 = vmul.f32 %v757_v1, %v588_v31  ;;  %v836_v9 = vpack.c.bf16 %v804_v3, %v804_v3  ;;  %v637_v31 = vpop.f32.mrf.mxu3 }
  0xdb   : > { %v593_v10 = vadd.f32 %v1427_v13, %v504_v4  ;;  %v1205_v11 = vpop.eup %1204  ;;  %v678_v14 = vmul.f32 0.5, %v630_v8 }
  0xdc   : > { %v821_v12 = vpack.c.bf16 %v789_v7, %v789_v7  ;;  %869 = vst.msk [vmem:[%s1421_s16 + $0x4c] sm:$0xf] %vm849_vm1, %v836_v9  ;;  %v741_v16 = vadd.f32 1.0, %v1205_v11 }
  0xdd   : > { %v1207_v15 = vpop.eup %1206  ;;  %v663_v17 = vmul.f32 0.5, %v593_v10  ;;  %1208 = vtanh.f32 %v678_v14 }
  0xde   : > { %854 = vst.msk [vmem:[%s1421_s16 + $0x10] sm:$0xf] %vm849_vm1, %v821_v12  ;;  %v726_v18 = vadd.f32 1.0, %v1207_v15  ;;  %v773_v19 = vmul.f32 0.5, %v741_v16  ;;  %v543_v20 = vpop.f32.mrf.mxu2  ;;  %v1456_v25 = vpop.f32.mrf.mxu1 }
  0xdf   : > { %1210 = vtanh.f32 %v663_v17  ;;  %v544_v22 = vadd.f32 %v1408_v44, %v543_v20 }
  0xe0   : > { %v758_v21 = vmul.f32 0.5, %v726_v18  ;;  %v505_v13 = vpop.f32.mrf.mxu0  ;;  %v805_v23 = vmul.f32 %v773_v19, %v628_v50 }
  0xe1   : > { %v506_v24 = vadd.f32 %v1408_v44, %v505_v13  ;;  %v633_v27 = vadd.f32 %v632_v41, %v544_v22 }
  0xe2   : > { %v790_v26 = vmul.f32 %v758_v21, %v590_v53  ;;  %v837_v29 = vpack.c.bf16 %v805_v23, %v805_v23  ;;  %v639_v59 = vpop.f32.mrf.mxu3 }
  0xe3   : > { %v595_v30 = vadd.f32 %v1433_v28, %v506_v24  ;;  %v1209_v32 = vpop.eup %1208  ;;  %v679_v34 = vmul.f32 0.5, %v633_v27 }
  0xe4   : > { %v822_v33 = vpack.c.bf16 %v790_v26, %v790_v26  ;;  %870 = vst.msk [vmem:[%s1421_s16 + $0x50] sm:$0xf] %vm849_vm1, %v837_v29  ;;  %v742_v36 = vadd.f32 1.0, %v1209_v32 }
  0xe5   : > { %v1211_v35 = vpop.eup %1210  ;;  %v664_v37 = vmul.f32 0.5, %v595_v30  ;;  %1212 = vtanh.f32 %v679_v34 }
  0xe6   : > { %855 = vst.msk [vmem:[%s1421_s16 + $0x14] sm:$0xf] %vm849_vm1, %v822_v33  ;;  %v727_v38 = vadd.f32 1.0, %v1211_v35  ;;  %v774_v39 = vmul.f32 0.5, %v742_v36  ;;  %v545_v40 = vpop.f32.mrf.mxu2  ;;  %v1465_v46 = vpop.f32.mrf.mxu1 }
  0xe7   : > { %1214 = vtanh.f32 %v664_v37  ;;  %v546_v28 = vadd.f32 %v1408_v44, %v545_v40 }
  0xe8   : > { %v759_v41 = vmul.f32 0.5, %v727_v38  ;;  %v508_v42 = vpop.f32.mrf.mxu0  ;;  %v806_v43 = vmul.f32 %v774_v39, %v630_v8 }
  0xe9   : > { %v509_v45 = vadd.f32 %v1408_v44, %v508_v42  ;;  %v635_v49 = vadd.f32 %v634_v6, %v546_v28 }
  0xea   : > { %v791_v47 = vmul.f32 %v759_v41, %v593_v10  ;;  %v838_v50 = vpack.c.bf16 %v806_v43, %v806_v43  ;;  %v642_v20 = vpop.f32.mrf.mxu3 }
  0xeb   : > { %v598_v52 = vadd.f32 %v1439_v48, %v509_v45  ;;  %v1213_v53 = vpop.eup %1212  ;;  %v680_v55 = vmul.f32 0.5, %v635_v49 }
  0xec   : > { %v823_v54 = vpack.c.bf16 %v791_v47, %v791_v47  ;;  %871 = vst.msk [vmem:[%s1421_s16 + $0x54] sm:$0xf] %vm849_vm1, %v838_v50  ;;  %v743_v57 = vadd.f32 1.0, %v1213_v53 }
  0xed   : > { %v1215_v56 = vpop.eup %1214  ;;  %v665_v58 = vmul.f32 0.5, %v598_v52  ;;  %1216 = vtanh.f32 %v680_v55 }
  0xee   : > { %856 = vst.msk [vmem:[%s1421_s16 + $0x18] sm:$0xf] %vm849_vm1, %v823_v54  ;;  %v728_v61 = vadd.f32 1.0, %v1215_v56  ;;  %v775_v62 = vmul.f32 0.5, %v743_v57  ;;  %v548_v63 = vpop.f32.mrf.mxu2  ;;  %v1474_v4 = vpop.f32.mrf.mxu1 }
  0xef   : > { %1218 = vtanh.f32 %v665_v58  ;;  %v549_v48 = vadd.f32 %v1408_v44, %v548_v63 }
  0xf0   : > { %v760_v1 = vmul.f32 0.5, %v728_v61  ;;  %v510_v2 = vpop.f32.mrf.mxu0  ;;  %v807_v0 = vmul.f32 %v775_v62, %v633_v27 }
  0xf1   : > { %v511_v3 = vadd.f32 %v1408_v44, %v510_v2  ;;  %v638_v7 = vadd.f32 %v637_v31, %v549_v48 }
  0xf2   : > { %v792_v6 = vmul.f32 %v760_v1, %v595_v30  ;;  %v839_v8 = vpack.c.bf16 %v807_v0, %v807_v0  ;;  %v644_v45 = vpop.f32.mrf.mxu3 }
  0xf3   : > { %v600_v9 = vadd.f32 %v1447_v5, %v511_v3  ;;  %v1217_v10 = vpop.eup %1216  ;;  %v681_v12 = vmul.f32 0.5, %v638_v7 }
  0xf4   : > { %v824_v11 = vpack.c.bf16 %v792_v6, %v792_v6  ;;  %872 = vst.msk [vmem:[%s1421_s16 + $0x58] sm:$0xf] %vm849_vm1, %v839_v8  ;;  %v744_v15 = vadd.f32 1.0, %v1217_v10 }
  0xf5   : > { %v1219_v14 = vpop.eup %1218  ;;  %v666_v16 = vmul.f32 0.5, %v600_v9  ;;  %1220 = vtanh.f32 %v681_v12 }
  0xf6   : > { %857 = vst.msk [vmem:[%s1421_s16 + $0x1c] sm:$0xf] %vm849_vm1, %v824_v11  ;;  %v729_v17 = vadd.f32 1.0, %v1219_v14  ;;  %v776_v18 = vmul.f32 0.5, %v744_v15  ;;  %v550_v19 = vpop.f32.mrf.mxu2  ;;  %v1483_v24 = vpop.f32.mrf.mxu1 }
  0xf7   : > { %1222 = vtanh.f32 %v666_v16  ;;  %v551_v5 = vadd.f32 %v1408_v44, %v550_v19 }
  0xf8   : > { %v761_v21 = vmul.f32 0.5, %v729_v17  ;;  %v513_v22 = vpop.f32.mrf.mxu0  ;;  %v808_v13 = vmul.f32 %v776_v18, %v635_v49 }
  0xf9   : > { %v514_v23 = vadd.f32 %v1408_v44, %v513_v22  ;;  %v640_v27 = vadd.f32 %v639_v59, %v551_v5 }
  0xfa   : > { %v793_v26 = vmul.f32 %v761_v21, %v598_v52  ;;  %v840_v29 = vpack.c.bf16 %v808_v13, %v808_v13 }
  0xfb   : > { %v603_v30 = vadd.f32 %v1456_v25, %v514_v23  ;;  %v1221_v31 = vpop.eup %1220  ;;  %v682_v33 = vmul.f32 0.5, %v640_v27 }
  0xfc   : > { %v825_v32 = vpack.c.bf16 %v793_v26, %v793_v26  ;;  %873 = vst.msk [vmem:[%s1421_s16 + $0x5c] sm:$0xf] %vm849_vm1, %v840_v29  ;;  %v745_v35 = vadd.f32 1.0, %v1221_v31 }
  0xfd   : > { %v1223_v34 = vpop.eup %1222  ;;  %v667_v36 = vmul.f32 0.5, %v603_v30  ;;  %1224 = vtanh.f32 %v682_v33 }
  0xfe   : > { %858 = vst.msk [vmem:[%s1421_s16 + $0x20] sm:$0xf] %vm849_vm1, %v825_v32  ;;  %v730_v37 = vadd.f32 1.0, %v1223_v34  ;;  %v777_v38 = vmul.f32 0.5, %v745_v35  ;;  %v553_v39 = vpop.f32.mrf.mxu2  ;;  %v1492_v43 = vpop.f32.mrf.mxu1 }
  0xff   : > { %1226 = vtanh.f32 %v667_v36  ;;  %v554_v41 = vadd.f32 %v1408_v44, %v553_v39 }
 0x100   : > { %v762_v40 = vmul.f32 0.5, %v730_v37  ;;  %v515_v25 = vpop.f32.mrf.mxu0  ;;  %v809_v28 = vmul.f32 %v777_v38, %v638_v7 }
 0x101   : > { %v516_v42 = vadd.f32 %v1408_v44, %v515_v25  ;;  %v643_v49 = vadd.f32 %v642_v20, %v554_v41  ;;  %v529_v20 = vadd.f32 %v1408_v44, %v1411_v51 }
 0x102   : > { %v794_v47 = vmul.f32 %v762_v40, %v600_v9  ;;  %v841_v50 = vpack.c.bf16 %v809_v28, %v809_v28  ;;  %v647_v9 = vpop.f32.mrf.mxu3 }
 0x103   : > { %v605_v52 = vadd.f32 %v1465_v46, %v516_v42  ;;  %v1225_v53 = vpop.eup %1224  ;;  %v683_v55 = vmul.f32 0.5, %v643_v49 }
 0x104   : > { %v826_v54 = vpack.c.bf16 %v794_v47, %v794_v47  ;;  %874 = vst.msk [vmem:[%s1421_s16 + $0x60] sm:$0xf] %vm849_vm1, %v841_v50  ;;  %v746_v57 = vadd.f32 1.0, %v1225_v53 }
 0x105   : > { %v1227_v56 = vpop.eup %1226  ;;  %v668_v58 = vmul.f32 0.5, %v605_v52  ;;  %1228 = vtanh.f32 %v683_v55 }
 0x106   : > { %859 = vst.msk [vmem:[%s1421_s16 + $0x24] sm:$0xf] %vm849_vm1, %v826_v54  ;;  %v731_v59 = vadd.f32 1.0, %v1227_v56  ;;  %v778_v61 = vmul.f32 0.5, %v746_v57  ;;  %v555_v62 = vpop.f32.mrf.mxu2  ;;  %v1501_v0 = vpop.f32.mrf.mxu1 }
 0x107   : > { %1230 = vtanh.f32 %v668_v58  ;;  %v556_v1 = vadd.f32 %v1408_v44, %v555_v62 }
 0x108   : > { %v763_v63 = vmul.f32 0.5, %v731_v59  ;;  %v518_v46 = vpop.f32.mrf.mxu0  ;;  %v810_v48 = vmul.f32 %v778_v61, %v640_v27 }
 0x109   : > { %v519_v2 = vadd.f32 %v1408_v44, %v518_v46  ;;  %v645_v6 = vadd.f32 %v644_v45, %v556_v1 }
 0x10a   : > { %v795_v3 = vmul.f32 %v763_v63, %v603_v30  ;;  %v842_v7 = vpack.c.bf16 %v810_v48, %v810_v48  ;;  %v649_v38 = vpop.f32.mrf.mxu3 }
 0x10b   : > { %v608_v8 = vadd.f32 %v1474_v4, %v519_v2  ;;  %v1229_v10 = vpop.eup %1228  ;;  %v684_v12 = vmul.f32 0.5, %v645_v6 }
 0x10c   : > { %v827_v11 = vpack.c.bf16 %v795_v3, %v795_v3  ;;  %875 = vst.msk [vmem:[%s1421_s16 + $0x64] sm:$0xf] %vm849_vm1, %v842_v7  ;;  %v747_v15 = vadd.f32 1.0, %v1229_v10 }
 0x10d   : > { %v1231_v14 = vpop.eup %1230  ;;  %v669_v16 = vmul.f32 0.5, %v608_v8  ;;  %1232 = vtanh.f32 %v684_v12 }
 0x10e   : > { %860 = vst.msk [vmem:[%s1421_s16 + $0x28] sm:$0xf] %vm849_vm1, %v827_v11  ;;  %v732_v17 = vadd.f32 1.0, %v1231_v14  ;;  %v779_v18 = vmul.f32 0.5, %v747_v15  ;;  %v558_v19 = vpop.f32.mrf.mxu2  ;;  %v617_v23 = vpop.f32.mrf.mxu1 }
 0x10f   : > { %1234 = vtanh.f32 %v669_v16  ;;  %v559_v21 = vadd.f32 %v1408_v44, %v558_v19  ;;  %v618_v29 = vadd.f32 %v617_v23, %v529_v20 }
 0x110   : > { %v764_v4 = vmul.f32 0.5, %v732_v17  ;;  %v520_v5 = vpop.f32.mrf.mxu0  ;;  %v811_v22 = vmul.f32 %v779_v18, %v643_v49 }
 0x111   : > { %v521_v13 = vadd.f32 %v1408_v44, %v520_v5  ;;  %v648_v27 = vadd.f32 %v647_v9, %v559_v21  ;;  %v673_v51 = vmul.f32 0.5, %v618_v29 }
 0x112   : > { %v796_v26 = vmul.f32 %v764_v4, %v605_v52  ;;  %v843_v30 = vpack.c.bf16 %v811_v22, %v811_v22  ;;  %v652_v2 = vpop.f32.mrf.mxu3 }
 0x113   : > { %v610_v31 = vadd.f32 %v1483_v24, %v521_v13  ;;  %v1233_v32 = vpop.eup %1232  ;;  %v685_v34 = vmul.f32 0.5, %v648_v27  ;;  %v531_v24 = vadd.f32 %v1408_v44, %v1414_v60 }
 0x114   : > { %v828_v33 = vpack.c.bf16 %v796_v26, %v796_v26  ;;  %876 = vst.msk [vmem:[%s1421_s16 + $0x68] sm:$0xf] %vm849_vm1, %v843_v30  ;;  %v748_v36 = vadd.f32 1.0, %v1233_v32 }
 0x115   : > { %v1235_v35 = vpop.eup %1234  ;;  %v670_v37 = vmul.f32 0.5, %v610_v31  ;;  %1236 = vtanh.f32 %v685_v34 }
 0x116   : > { %861 = vst.msk [vmem:[%s1421_s16 + $0x2c] sm:$0xf] %vm849_vm1, %v828_v33  ;;  %v733_v39 = vadd.f32 1.0, %v1235_v35  ;;  %v780_v40 = vmul.f32 0.5, %v748_v36  ;;  %v560_v41 = vpop.f32.mrf.mxu2  ;;  %v619_v49 = vpop.f32.mrf.mxu1 }
 0x117   : > { %1238 = vtanh.f32 %v670_v37  ;;  %v561_v28 = vadd.f32 %v1408_v44, %v560_v41  ;;  %v620_v53 = vadd.f32 %v619_v49, %v531_v24 }
 0x118   : > { %v765_v25 = vmul.f32 0.5, %v733_v39  ;;  %1240 = vtanh.f32 %v673_v51  ;;  %v523_v42 = vpop.f32.mrf.mxu0  ;;  %v812_v45 = vmul.f32 %v780_v40, %v645_v6 }
 0x119   : > { %v524_v47 = vadd.f32 %v1408_v44, %v523_v42  ;;  %v650_v52 = vadd.f32 %v649_v38, %v561_v28  ;;  %v674_v58 = vmul.f32 0.5, %v620_v53 }
 0x11a   : > { %v797_v50 = vmul.f32 %v765_v25, %v608_v8  ;;  %v844_v54 = vpack.c.bf16 %v812_v45, %v812_v45  ;;  %v654_v32 = vpop.f32.mrf.mxu3 }
 0x11b   : > { %v613_v55 = vadd.f32 %v1492_v43, %v524_v47  ;;  %v1237_v56 = vpop.eup %1236  ;;  %v686_v60 = vmul.f32 0.5, %v650_v52 }
 0x11c   : > { %v829_v57 = vpack.c.bf16 %v797_v50, %v797_v50  ;;  %877 = vst.msk [vmem:[%s1421_s16 + $0x6c] sm:$0xf] %vm849_vm1, %v844_v54  ;;  %v749_v61 = vadd.f32 1.0, %v1237_v56 }
 0x11d   : > { %v1239_v59 = vpop.eup %1238  ;;  %v671_v62 = vmul.f32 0.5, %v613_v55  ;;  %1242 = vtanh.f32 %v686_v60 }
 0x11e   : > { %v1241_v63 = vpop.eup %1240  ;;  %862 = vst.msk [vmem:[%s1421_s16 + $0x30] sm:$0xf] %vm849_vm1, %v829_v57  ;;  %v734_v1 = vadd.f32 1.0, %v1239_v59  ;;  %v781_v46 = vmul.f32 0.5, %v749_v61  ;;  %v563_v3 = vpop.f32.mrf.mxu2 }
 0x11f   : > { %v737_v48 = vadd.f32 1.0, %v1241_v63  ;;  %1244 = vtanh.f32 %v671_v62  ;;  %v564_v6 = vadd.f32 %v1408_v44, %v563_v3 }
 0x120   : > { %v766_v43 = vmul.f32 0.5, %v734_v1  ;;  %1246 = vtanh.f32 %v674_v58  ;;  %v525_v7 = vpop.f32.mrf.mxu0  ;;  %v813_v8 = vmul.f32 %v781_v46, %v648_v27 }
 0x121   : > { %v769_v9 = vmul.f32 0.5, %v737_v48  ;;  %v526_v10 = vadd.f32 %v1408_v44, %v525_v7  ;;  %v653_v12 = vadd.f32 %v652_v2, %v564_v6 }
 0x122   : > { %v798_v11 = vmul.f32 %v766_v43, %v610_v31  ;;  %v845_v14 = vpack.c.bf16 %v813_v8, %v813_v8 }
 0x123   : > { %v801_v15 = vmul.f32 %v769_v9, %v618_v29  ;;  %v615_v16 = vadd.f32 %v1501_v0, %v526_v10  ;;  %v1243_v17 = vpop.eup %1242  ;;  %v687_v19 = vmul.f32 0.5, %v653_v12 }
 0x124   : > { %v830_v18 = vpack.c.bf16 %v798_v11, %v798_v11  ;;  %878 = vst.msk [vmem:[%s1421_s16 + $0x70] sm:$0xf] %vm849_vm1, %v845_v14  ;;  %v750_v21 = vadd.f32 1.0, %v1243_v17 }
 0x125   : > { %v1245_v20 = vpop.eup %1244  ;;  %v833_v4 = vpack.c.bf16 %v801_v15, %v801_v15  ;;  %v672_v5 = vmul.f32 0.5, %v615_v16  ;;  %1248 = vtanh.f32 %v687_v19 }
 0x126   : > { %v1247_v22 = vpop.eup %1246  ;;  %863 = vst.msk [vmem:[%s1421_s16 + $0x34] sm:$0xf] %vm849_vm1, %v830_v18  ;;  %v735_v13 = vadd.f32 1.0, %v1245_v20  ;;  %v782_v23 = vmul.f32 0.5, %v750_v21  ;;  %v565_v0 = vpop.f32.mrf.mxu2 }
 0x127   : > { %866 = vst.msk [vmem:[%s1421_s16 + $0x40] sm:$0xf] %vm849_vm1, %v833_v4  ;;  %v738_v26 = vadd.f32 1.0, %v1247_v22  ;;  %1250 = vtanh.f32 %v672_v5  ;;  %v566_v29 = vadd.f32 %v1408_v44, %v565_v0 }
 0x128   : > { %v767_v27 = vmul.f32 0.5, %v735_v13  ;;  %v814_v30 = vmul.f32 %v782_v23, %v650_v52 }
 0x129   : > { %v770_v31 = vmul.f32 0.5, %v738_v26  ;;  %v655_v34 = vadd.f32 %v654_v32, %v566_v29 }
 0x12a   : > { %v799_v33 = vmul.f32 %v767_v27, %v613_v55  ;;  %v846_v51 = vpack.c.bf16 %v814_v30, %v814_v30 }
 0x12b   : > { %v802_v35 = vmul.f32 %v770_v31, %v620_v53  ;;  %v1249_v36 = vpop.eup %1248  ;;  %v688_v38 = vmul.f32 0.5, %v655_v34 }
 0x12c   : > { %v831_v37 = vpack.c.bf16 %v799_v33, %v799_v33  ;;  %879 = vst.msk [vmem:[%s1421_s16 + $0x74] sm:$0xf] %vm849_vm1, %v846_v51  ;;  %v751_v41 = vadd.f32 1.0, %v1249_v36 }
 0x12d   : > { %v1251_v39 = vpop.eup %1250  ;;  %v834_v40 = vpack.c.bf16 %v802_v35, %v802_v35  ;;  %1252 = vtanh.f32 %v688_v38 }
 0x12e   : > { %864 = vst.msk [vmem:[%s1421_s16 + $0x38] sm:$0xf] %vm849_vm1, %v831_v37  ;;  %v736_v44 = vadd.f32 1.0, %v1251_v39  ;;  %v783_v24 = vmul.f32 0.5, %v751_v41 }
 0x12f   : > { %867 = vst.msk [vmem:[%s1421_s16 + $0x44] sm:$0xf] %vm849_vm1, %v834_v40 }
 0x130   : > { %v768_v25 = vmul.f32 0.5, %v736_v44  ;;  %v815_v28 = vmul.f32 %v783_v24, %v653_v12 }
 0x132   : > { %v800_v42 = vmul.f32 %v768_v25, %v615_v16  ;;  %v847_v45 = vpack.c.bf16 %v815_v28, %v815_v28 }
 0x133   : > { %v1253_v47 = vpop.eup %1252 }
 0x134   : > { %v832_v49 = vpack.c.bf16 %v800_v42, %v800_v42  ;;  %880 = vst.msk [vmem:[%s1421_s16 + $0x78] sm:$0xf] %vm849_vm1, %v847_v45  ;;  %v752_v50 = vadd.f32 1.0, %v1253_v47 }
 0x136   : > { %865 = vst.msk [vmem:[%s1421_s16 + $0x3c] sm:$0xf] %vm849_vm1, %v832_v49  ;;  %v784_v52 = vmul.f32 0.5, %v752_v50 }
 0x138   : > { %v816_v53 = vmul.f32 %v784_v52, %v655_v34 }
 0x13a   : > { %v848_v54 = vpack.c.bf16 %v816_v53, %v816_v53 }
 0x13c   : > { %881 = vst.msk [vmem:[%s1421_s16 + $0x7c] sm:$0xf] %vm849_vm1, %v848_v54 }
 0x13d PF: > { %s13_s12 = sadd.s32 1, %s1260_s12  }
 0x13e   : > { %p10_p4 = scmp.ge.s32.totalorder %s13_s12, 4  }
 0x140   :  { %12 = sbr.rel (!%p10_p4) target bundleno = 1 (0x1), region = 62 }

// kernel: _forward_impl.10
= control target key start
LH: loop header
LB: loop body
LE: loop exit
PB: predicated region body
PF: predicated region fallthrough
CT: control target
= control target key end

     0   :  { %vm179_vm0 = vcmask 130048   ;;  %vm398_vm1 = vcmask 257024   ;;  %s842_s1 = inlined_call_operand.vmem [shape: bf16[144,32], index: 1, kind: input, shape index: {}]   ;;  %s843_s0 = inlined_call_operand.vmem [shape: bf16[128,144], index: 0, kind: input, shape index: {}]   ;;  %s844_s2 = inlined_call_operand.vmem [shape: f32[1,32], index: 2, kind: input, shape index: {}]   ;;  %s845_s3 = inlined_call_operand.vmem [shape: bf16[128,32], index: 3, kind: output, shape index: {}]  }
   0x1   :  { %v550_v0 = vld [vmem:[%s842_s1 + $0x38] sm:$0xff]  ;;  %v551_v1 = vld [vmem:[%s842_s1 + $0x40] sm:$0xff]  ;;  %v423_v3 = vld [vmem:[%s843_s0 + $0x8] sm:$0xf0] }
   0x2   :  { %v527_v2 = vld [vmem:[%s843_s0 + $0x4] sm:$0xf]  ;;  %204 = vmatpush.bf16.msra.mxu0 %v550_v0  ;;  %552 = vmatpush.bf16.msra.mxu2 %v550_v0  ;;  %v549_v5 = vld [vmem:[%s842_s1 + $0x30] sm:$0xff]  ;;  %v548_v6 = vld [vmem:[%s842_s1 + $0x28] sm:$0xff] }
   0x3   :  { %v426_v4 = vor.u32 %v527_v2, %v423_v3  ;;  %260 = vmatpush.bf16.msra.mxu1 %v551_v1  ;;  %560 = vmatpush.bf16.msra.mxu3 %v551_v1  ;;  %v537_v7 = vld [vmem:[%s843_s0 + $0x54] sm:$0xf]  ;;  %v463_v8 = vld [vmem:[%s843_s0 + $0x58] sm:$0xf0]  ;;  %v547_v10 = vld [vmem:[%s842_s1 + $0x20] sm:$0xff] }
   0x4   :  { %v466_v9 = vor.u32 %v537_v7, %v463_v8  ;;  %v546_v11 = vld [vmem:[%s842_s1 + $0x18] sm:$0xff]  ;;  %v529_v12 = vld [vmem:[%s843_s0 + $0x14] sm:$0xf]  ;;  %v544_v16 = vld [vmem:[%s842_s1 + $0x8] sm:$0xff] }
   0x5   :  { %v431_v13 = vld [vmem:[%s843_s0 + $0x18] sm:$0xf0]  ;;  %v545_v15 = vld [vmem:[%s842_s1 + $0x10] sm:$0xff]  ;;  %v539_v17 = vld [vmem:[%s843_s0 + $0x64] sm:$0xf] }
   0x6   :  { %519 = vmatmul.msk.bf16.vlgmr.msra.gmra.mxu1 %vm179_vm0, %v426_v4  ;;  %205 = vmatpush.bf16.msra.mxu0 %v549_v5  ;;  %v434_v14 = vor.u32 %v529_v12, %v431_v13  ;;  %v471_v18 = vld [vmem:[%s843_s0 + $0x68] sm:$0xf0]  ;;  %v543_v20 = vld [vmem:[%s842_s1] sm:$0xff]  ;;  %v528_v22 = vld [vmem:[%s843_s0 + $0x4] sm:$0xf0] }
   0x7   :  { %553 = vmatpush.bf16.msra.mxu2 %v549_v5  ;;  %524 = vmatmul.msk.bf16.vlgmr.msra.gmra.mxu3 %vm179_vm0, %v466_v9  ;;  %v474_v19 = vor.u32 %v539_v17, %v471_v18  ;;  %v421_v21 = vld [vmem:[%s843_s0] sm:$0xf]  ;;  %v536_v24 = vld [vmem:[%s843_s0 + $0x44] sm:$0xf0]  ;;  %v531_v27 = vld [vmem:[%s843_s0 + $0x24] sm:$0xf] }
   0x8   :  { %v453_v23 = vld [vmem:[%s843_s0 + $0x40] sm:$0xf]  ;;  %v422_v25 = vor.u32 %v528_v22, %v421_v21  ;;  %v439_v28 = vld [vmem:[%s843_s0 + $0x28] sm:$0xf0]  ;;  %v541_v30 = vld [vmem:[%s843_s0 + $0x74] sm:$0xf] }
   0x9   :  { %v454_v26 = vor.u32 %v536_v24, %v453_v23  ;;  %v442_v29 = vor.u32 %v531_v27, %v439_v28  ;;  %v479_v31 = vld [vmem:[%s843_s0 + $0x78] sm:$0xf0]  ;;  %v429_v33 = vld [vmem:[%s843_s0 + $0x10] sm:$0xf]  ;;  %v530_v34 = vld [vmem:[%s843_s0 + $0x14] sm:$0xf0] }
   0xa   :  { %206 = vmatpush.bf16.msra.mxu0 %v548_v6  ;;  %v482_v32 = vor.u32 %v541_v30, %v479_v31  ;;  %v461_v35 = vld [vmem:[%s843_s0 + $0x50] sm:$0xf]  ;;  %v538_v36 = vld [vmem:[%s843_s0 + $0x54] sm:$0xf0]  ;;  %v430_v37 = vor.u32 %v530_v34, %v429_v33  ;;  %v533_v39 = vld [vmem:[%s843_s0 + $0x34] sm:$0xf] }
   0xb   :  { %554 = vmatpush.bf16.msra.mxu2 %v548_v6  ;;  %v462_v38 = vor.u32 %v538_v36, %v461_v35  ;;  %v447_v40 = vld [vmem:[%s843_s0 + $0x38] sm:$0xf0]  ;;  %v437_v42 = vld [vmem:[%s843_s0 + $0x20] sm:$0xf]  ;;  %v532_v43 = vld [vmem:[%s843_s0 + $0x24] sm:$0xf0] }
   0xc   :  { %v450_v41 = vor.u32 %v533_v39, %v447_v40  ;;  %v469_v44 = vld [vmem:[%s843_s0 + $0x60] sm:$0xf]  ;;  %v540_v45 = vld [vmem:[%s843_s0 + $0x64] sm:$0xf0]  ;;  %v438_v46 = vor.u32 %v532_v43, %v437_v42  ;;  %v535_v48 = vld [vmem:[%s843_s0 + $0x44] sm:$0xf] }
   0xd   :  { %v470_v47 = vor.u32 %v540_v45, %v469_v44  ;;  %v455_v49 = vld [vmem:[%s843_s0 + $0x48] sm:$0xf0]  ;;  %v445_v51 = vld [vmem:[%s843_s0 + $0x30] sm:$0xf]  ;;  %v534_v52 = vld [vmem:[%s843_s0 + $0x34] sm:$0xf0] }
   0xe   :  { %207 = vmatpush.bf16.msra.mxu0 %v547_v10  ;;  %v458_v50 = vor.u32 %v535_v48, %v455_v49  ;;  %v477_v53 = vld [vmem:[%s843_s0 + $0x70] sm:$0xf]  ;;  %v542_v54 = vld [vmem:[%s843_s0 + $0x74] sm:$0xf0]  ;;  %v446_v55 = vor.u32 %v534_v52, %v445_v51  ;;  %v748_v61 = vld [vmem:[%s844_s2] ss:$0 sm:$0xff] }
   0xf   :  { %555 = vmatpush.bf16.msra.mxu2 %v547_v10  ;;  %v478_v56 = vor.u32 %v542_v54, %v477_v53 }
  0x12   :  { %208 = vmatpush.bf16.msra.mxu0 %v546_v11 }
  0x13   :  { %556 = vmatpush.bf16.msra.mxu2 %v546_v11 }
  0x16   :  { %520 = vmatmul.msk.bf16.gmra.mxu1 %vm179_vm0, %v434_v14  ;;  %209 = vmatpush.bf16.msra.mxu0 %v545_v15 }
  0x17   :  { %557 = vmatpush.bf16.msra.mxu2 %v545_v15  ;;  %525 = vmatmul.msk.bf16.gmra.mxu3 %vm179_vm0, %v474_v19 }
  0x1a   :  { %210 = vmatpush.bf16.msra.mxu0 %v544_v16 }
  0x1b   :  { %558 = vmatpush.bf16.msra.mxu2 %v544_v16 }
  0x1e   :  { %211 = vmatpush.bf16.msra.mxu0 %v543_v20 }
  0x1f   :  { %559 = vmatpush.bf16.msra.mxu2 %v543_v20 }
  0x21   :  { %212 = vmatmul.bf16.vlgmr.msra.gmra.mxu0 %v422_v25 }
  0x22   :  { %232 = vmatmul.bf16.vlgmr.msra.gmra.mxu2 %v454_v26 }
  0x26   :  { %521 = vmatmul.msk.bf16.gmra.mxu1 %vm179_vm0, %v442_v29 }
  0x27   :  { %526 = vmatmul.msk.bf16.gmra.mxu3 %vm179_vm0, %v482_v32 }
  0x31   :  { %217 = vmatmul.bf16.gmra.mxu0 %v430_v37 }
  0x32   :  { %237 = vmatmul.bf16.gmra.mxu2 %v462_v38 }
  0x36   :  { %522 = vmatmul.msk.bf16.gmra.mxu1 %vm179_vm0, %v450_v41 }
  0x41   :  { %222 = vmatmul.bf16.gmra.mxu0 %v438_v46 }
  0x42   :  { %242 = vmatmul.bf16.gmra.mxu2 %v470_v47 }
  0x46   :  { %523 = vmatmul.msk.bf16.gmra.mxu1 %vm179_vm0, %v458_v50 }
  0x51   :  { %227 = vmatmul.bf16.gmra.mxu0 %v446_v55 }
  0x52   :  { %247 = vmatmul.bf16.gmra.mxu2 %v478_v56 }
  0x83   :  { %v262_v57 = vpop.f32.mrf.mxu1 }
  0x8a   :  { %v287_v12 = vpop.f32.mrf.mxu3 }
  0x8b   :  { %v264_v58 = vpop.f32.mrf.mxu1 }
  0x92   :  { %v289_v28 = vpop.f32.mrf.mxu3 }
  0x93   :  { %v267_v59 = vpop.f32.mrf.mxu1 }
  0x9a   :  { %v292_v46 = vpop.f32.mrf.mxu3 }
  0x9b   :  { %v269_v60 = vpop.f32.mrf.mxu1 }
  0x9e   :  { %v213_v62 = vpop.f32.mrf.mxu0 }
  0x9f   :  { %v214_v63 = vadd.f32 %v748_v61, %v213_v62 }
  0xa1   :  { %v263_v0 = vadd.f32 %v262_v57, %v214_v63 }
  0xa3   :  { %v302_v1 = vmul.f32 0.5, %v263_v0  ;;  %v272_v2 = vpop.f32.mrf.mxu1 }
  0xa5   :  { %562 = vtanh.f32 %v302_v1  ;;  %v233_v3 = vpop.f32.mrf.mxu2 }
  0xa6   :  { %v215_v4 = vpop.f32.mrf.mxu0  ;;  %v234_v48 = vadd.f32 %v748_v61, %v233_v3 }
  0xa7   :  { %v216_v5 = vadd.f32 %v748_v61, %v215_v4 }
  0xa9   :  { %v265_v6 = vadd.f32 %v264_v58, %v216_v5 }
  0xab   :  { %v563_v7 = vpop.eup %562  ;;  %v303_v8 = vmul.f32 0.5, %v265_v6  ;;  %v752_v9 = vpop.f32.mrf.mxu1 }
  0xac   :  { %v334_v10 = vadd.f32 1.0, %v563_v7 }
  0xad   :  { %564 = vtanh.f32 %v303_v8  ;;  %v754_v11 = vpop.f32.mrf.mxu2 }
  0xae   :  { %v350_v13 = vmul.f32 0.5, %v334_v10  ;;  %v218_v14 = vpop.f32.mrf.mxu0  ;;  %v236_v7 = vadd.f32 %v748_v61, %v754_v11 }
  0xaf   :  { %v219_v15 = vadd.f32 %v748_v61, %v218_v14 }
  0xb0   :  { %v366_v16 = vmul.f32 %v350_v13, %v263_v0 }
  0xb1   :  { %v268_v17 = vadd.f32 %v267_v59, %v219_v15  ;;  %v294_v15 = vpop.f32.mrf.mxu3 }
  0xb2   :  { %v382_v18 = vpack.c.bf16 %v366_v16, %v366_v16 }
  0xb3   :  { %v565_v19 = vpop.eup %564  ;;  %v304_v20 = vmul.f32 0.5, %v268_v17  ;;  %v757_v21 = vpop.f32.mrf.mxu1 }
  0xb4   :  { %399 = vst.msk [vmem:[%s845_s3] sm:$0xf] %vm398_vm1, %v382_v18  ;;  %v335_v22 = vadd.f32 1.0, %v565_v19 }
  0xb5   :  { %566 = vtanh.f32 %v304_v20  ;;  %v238_v23 = vpop.f32.mrf.mxu2 }
  0xb6   :  { %v351_v24 = vmul.f32 0.5, %v335_v22  ;;  %v239_v25 = vadd.f32 %v748_v61, %v238_v23  ;;  %v220_v26 = vpop.f32.mrf.mxu0 }
  0xb7   :  { %v221_v27 = vadd.f32 %v748_v61, %v220_v26 }
  0xb8   :  { %v367_v29 = vmul.f32 %v351_v24, %v265_v6  ;;  %v288_v30 = vadd.f32 %v287_v12, %v239_v25 }
  0xb9   :  { %v270_v31 = vadd.f32 %v269_v60, %v221_v27 }
  0xba   :  { %v383_v32 = vpack.c.bf16 %v367_v29, %v367_v29  ;;  %v312_v33 = vmul.f32 0.5, %v288_v30 }
  0xbb   :  { %v567_v34 = vpop.eup %566  ;;  %v305_v35 = vmul.f32 0.5, %v270_v31  ;;  %v765_v36 = vpop.f32.mrf.mxu1 }
  0xbc   :  { %400 = vst.msk [vmem:[%s845_s3 + $0x4] sm:$0xf] %vm398_vm1, %v383_v32  ;;  %v336_v37 = vadd.f32 1.0, %v567_v34  ;;  %568 = vtanh.f32 %v312_v33 }
  0xbd   :  { %570 = vtanh.f32 %v305_v35  ;;  %v240_v38 = vpop.f32.mrf.mxu2 }
  0xbe   :  { %v352_v39 = vmul.f32 0.5, %v336_v37  ;;  %v241_v40 = vadd.f32 %v748_v61, %v240_v38  ;;  %v223_v41 = vpop.f32.mrf.mxu0 }
  0xbf   :  { %v224_v42 = vadd.f32 %v748_v61, %v223_v41 }
  0xc0   :  { %v368_v43 = vmul.f32 %v352_v39, %v268_v17  ;;  %v290_v44 = vadd.f32 %v289_v28, %v241_v40 }
  0xc1   :  { %v273_v45 = vadd.f32 %v272_v2, %v224_v42 }
  0xc2   :  { %v569_v47 = vpop.eup %568  ;;  %v384_v49 = vpack.c.bf16 %v368_v43, %v368_v43  ;;  %v313_v50 = vmul.f32 0.5, %v290_v44  ;;  %v297_v43 = vpop.f32.mrf.mxu3 }
  0xc3   :  { %v571_v51 = vpop.eup %570  ;;  %v344_v52 = vadd.f32 1.0, %v569_v47  ;;  %v306_v53 = vmul.f32 0.5, %v273_v45  ;;  %v282_v54 = vpop.f32.mrf.mxu1 }
  0xc4   :  { %401 = vst.msk [vmem:[%s845_s3 + $0x8] sm:$0xf] %vm398_vm1, %v384_v49  ;;  %v337_v55 = vadd.f32 1.0, %v571_v51  ;;  %572 = vtanh.f32 %v313_v50  ;;  %v283_v56 = vadd.f32 %v282_v54, %v234_v48 }
  0xc5   :  { %v360_v57 = vmul.f32 0.5, %v344_v52  ;;  %574 = vtanh.f32 %v306_v53  ;;  %v243_v58 = vpop.f32.mrf.mxu2 }
  0xc6   :  { %v353_v59 = vmul.f32 0.5, %v337_v55  ;;  %v310_v60 = vmul.f32 0.5, %v283_v56  ;;  %v244_v62 = vadd.f32 %v748_v61, %v243_v58  ;;  %v225_v63 = vpop.f32.mrf.mxu0 }
  0xc7   :  { %v376_v0 = vmul.f32 %v360_v57, %v288_v30  ;;  %v226_v1 = vadd.f32 %v748_v61, %v225_v63 }
  0xc8   :  { %v369_v2 = vmul.f32 %v353_v59, %v270_v31  ;;  %576 = vtanh.f32 %v310_v60  ;;  %v293_v3 = vadd.f32 %v292_v46, %v244_v62 }
  0xc9   :  { %v392_v4 = vpack.c.bf16 %v376_v0, %v376_v0  ;;  %v275_v5 = vadd.f32 %v752_v9, %v226_v1 }
  0xca   :  { %v573_v6 = vpop.eup %572  ;;  %v385_v8 = vpack.c.bf16 %v369_v2, %v369_v2  ;;  %v314_v10 = vmul.f32 0.5, %v293_v3 }
  0xcb   :  { %v575_v12 = vpop.eup %574  ;;  %409 = vst.msk [vmem:[%s845_s3 + $0x28] sm:$0xf] %vm398_vm1, %v392_v4  ;;  %v345_v13 = vadd.f32 1.0, %v573_v6  ;;  %v307_v14 = vmul.f32 0.5, %v275_v5  ;;  %v284_v16 = vpop.f32.mrf.mxu1 }
  0xcc   :  { %402 = vst.msk [vmem:[%s845_s3 + $0xc] sm:$0xf] %vm398_vm1, %v385_v8  ;;  %v338_v9 = vadd.f32 1.0, %v575_v12  ;;  %578 = vtanh.f32 %v314_v10  ;;  %v285_v11 = vadd.f32 %v284_v16, %v236_v7  ;;  %v299_v7 = vpop.f32.mrf.mxu3 }
  0xcd   :  { %v361_v17 = vmul.f32 0.5, %v345_v13  ;;  %580 = vtanh.f32 %v307_v14  ;;  %v245_v18 = vpop.f32.mrf.mxu2 }
  0xce   :  { %v577_v19 = vpop.eup %576  ;;  %v354_v20 = vmul.f32 0.5, %v338_v9  ;;  %v311_v22 = vmul.f32 0.5, %v285_v11  ;;  %v246_v23 = vadd.f32 %v748_v61, %v245_v18  ;;  %v228_v24 = vpop.f32.mrf.mxu0 }
  0xcf   :  { %v377_v25 = vmul.f32 %v361_v17, %v290_v44  ;;  %v342_v26 = vadd.f32 1.0, %v577_v19  ;;  %v229_v27 = vadd.f32 %v748_v61, %v228_v24 }
  0xd0   :  { %v370_v28 = vmul.f32 %v354_v20, %v273_v45  ;;  %582 = vtanh.f32 %v311_v22  ;;  %v295_v29 = vadd.f32 %v294_v15, %v246_v23 }
  0xd1   :  { %v393_v30 = vpack.c.bf16 %v377_v25, %v377_v25  ;;  %v358_v31 = vmul.f32 0.5, %v342_v26  ;;  %v278_v32 = vadd.f32 %v757_v21, %v229_v27 }
  0xd2   :  { %v579_v33 = vpop.eup %578  ;;  %v386_v34 = vpack.c.bf16 %v370_v28, %v370_v28  ;;  %v315_v35 = vmul.f32 0.5, %v295_v29 }
  0xd3   :  { %v581_v37 = vpop.eup %580  ;;  %410 = vst.msk [vmem:[%s845_s3 + $0x2c] sm:$0xf] %vm398_vm1, %v393_v30  ;;  %v374_v38 = vmul.f32 %v358_v31, %v283_v56  ;;  %v346_v39 = vadd.f32 1.0, %v579_v33  ;;  %v308_v40 = vmul.f32 0.5, %v278_v32 }
  0xd4   :  { %403 = vst.msk [vmem:[%s845_s3 + $0x10] sm:$0xf] %vm398_vm1, %v386_v34  ;;  %v339_v41 = vadd.f32 1.0, %v581_v37  ;;  %584 = vtanh.f32 %v315_v35 }
  0xd5   :  { %v390_v21 = vpack.c.bf16 %v374_v38, %v374_v38  ;;  %v362_v42 = vmul.f32 0.5, %v346_v39  ;;  %586 = vtanh.f32 %v308_v40  ;;  %v248_v44 = vpop.f32.mrf.mxu2 }
  0xd6   :  { %v583_v45 = vpop.eup %582  ;;  %v355_v46 = vmul.f32 0.5, %v339_v41  ;;  %v249_v47 = vadd.f32 %v748_v61, %v248_v44  ;;  %v230_v48 = vpop.f32.mrf.mxu0 }
  0xd7   :  { %407 = vst.msk [vmem:[%s845_s3 + $0x20] sm:$0xf] %vm398_vm1, %v390_v21  ;;  %v378_v49 = vmul.f32 %v362_v42, %v293_v3  ;;  %v343_v50 = vadd.f32 1.0, %v583_v45  ;;  %v231_v51 = vadd.f32 %v748_v61, %v230_v48 }
  0xd8   :  { %v371_v52 = vmul.f32 %v355_v46, %v275_v5  ;;  %v298_v53 = vadd.f32 %v297_v43, %v249_v47 }
  0xd9   :  { %v394_v54 = vpack.c.bf16 %v378_v49, %v378_v49  ;;  %v359_v55 = vmul.f32 0.5, %v343_v50  ;;  %v280_v56 = vadd.f32 %v765_v36, %v231_v51 }
  0xda   :  { %v585_v57 = vpop.eup %584  ;;  %v387_v58 = vpack.c.bf16 %v371_v52, %v371_v52  ;;  %v316_v59 = vmul.f32 0.5, %v298_v53 }
  0xdb   :  { %v587_v60 = vpop.eup %586  ;;  %411 = vst.msk [vmem:[%s845_s3 + $0x30] sm:$0xf] %vm398_vm1, %v394_v54  ;;  %v375_v62 = vmul.f32 %v359_v55, %v285_v11  ;;  %v347_v63 = vadd.f32 1.0, %v585_v57  ;;  %v309_v0 = vmul.f32 0.5, %v280_v56 }
  0xdc   :  { %404 = vst.msk [vmem:[%s845_s3 + $0x14] sm:$0xf] %vm398_vm1, %v387_v58  ;;  %v340_v1 = vadd.f32 1.0, %v587_v60  ;;  %588 = vtanh.f32 %v316_v59 }
  0xdd   :  { %v391_v36 = vpack.c.bf16 %v375_v62, %v375_v62  ;;  %v363_v2 = vmul.f32 0.5, %v347_v63  ;;  %590 = vtanh.f32 %v309_v0  ;;  %v250_v3 = vpop.f32.mrf.mxu2 }
  0xde   :  { %v356_v4 = vmul.f32 0.5, %v340_v1  ;;  %v251_v5 = vadd.f32 %v748_v61, %v250_v3 }
  0xdf   :  { %408 = vst.msk [vmem:[%s845_s3 + $0x24] sm:$0xf] %vm398_vm1, %v391_v36  ;;  %v379_v6 = vmul.f32 %v363_v2, %v295_v29 }
  0xe0   :  { %v372_v8 = vmul.f32 %v356_v4, %v278_v32  ;;  %v300_v10 = vadd.f32 %v299_v7, %v251_v5 }
  0xe1   :  { %v395_v12 = vpack.c.bf16 %v379_v6, %v379_v6 }
  0xe2   :  { %v589_v13 = vpop.eup %588  ;;  %v388_v14 = vpack.c.bf16 %v372_v8, %v372_v8  ;;  %v317_v15 = vmul.f32 0.5, %v300_v10 }
  0xe3   :  { %v591_v16 = vpop.eup %590  ;;  %412 = vst.msk [vmem:[%s845_s3 + $0x34] sm:$0xf] %vm398_vm1, %v395_v12  ;;  %v348_v61 = vadd.f32 1.0, %v589_v13 }
  0xe4   :  { %405 = vst.msk [vmem:[%s845_s3 + $0x18] sm:$0xf] %vm398_vm1, %v388_v14  ;;  %v341_v9 = vadd.f32 1.0, %v591_v16  ;;  %592 = vtanh.f32 %v317_v15 }
  0xe5   :  { %v364_v11 = vmul.f32 0.5, %v348_v61 }
  0xe6   :  { %v357_v17 = vmul.f32 0.5, %v341_v9 }
  0xe7   :  { %v380_v18 = vmul.f32 %v364_v11, %v298_v53 }
  0xe8   :  { %v373_v19 = vmul.f32 %v357_v17, %v280_v56 }
  0xe9   :  { %v396_v20 = vpack.c.bf16 %v380_v18, %v380_v18 }
  0xea   :  { %v593_v22 = vpop.eup %592  ;;  %v389_v23 = vpack.c.bf16 %v373_v19, %v373_v19 }
  0xeb   :  { %413 = vst.msk [vmem:[%s845_s3 + $0x38] sm:$0xf] %vm398_vm1, %v396_v20  ;;  %v349_v24 = vadd.f32 1.0, %v593_v22 }
  0xec   :  { %406 = vst.msk [vmem:[%s845_s3 + $0x1c] sm:$0xf] %vm398_vm1, %v389_v23 }
  0xed   :  { %v365_v25 = vmul.f32 0.5, %v349_v24 }
  0xef   :  { %v381_v26 = vmul.f32 %v365_v25, %v300_v10 }
  0xf1   :  { %v397_v27 = vpack.c.bf16 %v381_v26, %v381_v26 }
  0xf3   :  { %414 = vst.msk [vmem:[%s845_s3 + $0x3c] sm:$0xf] %vm398_vm1, %v397_v27 }

// kernel: _forward_impl.11
= control target key start
LH: loop header
LB: loop body
LE: loop exit
PB: predicated region body
PF: predicated region fallthrough
CT: control target
= control target key end

     0   :  { %vm315_vm0 = vcmask 261120   ;;  %vm583_vm1 = vcmask 519168   ;;  %s1194_s1 = inlined_call_operand.vmem [shape: bf16[288,64], index: 1, kind: input, shape index: {}]   ;;  %s1195_s0 = inlined_call_operand.vmem [shape: bf16[128,288], index: 0, kind: input, shape index: {}]   ;;  %s1196_s2 = inlined_call_operand.vmem [shape: f32[1,64], index: 2, kind: input, shape index: {}]   ;;  %s1197_s3 = inlined_call_operand.vmem [shape: bf16[128,64], index: 3, kind: output, shape index: {}]  }
   0x1   :  { %v811_v0 = vld [vmem:[%s1194_s1 + $0x38] sm:$0xff]  ;;  %v821_v1 = vld [vmem:[%s1194_s1 + $0x88] sm:$0xff]  ;;  %v810_v3 = vld [vmem:[%s1194_s1 + $0x30] sm:$0xff] }
   0x2   :  { %v819_v2 = vld [vmem:[%s1194_s1 + $0x78] sm:$0xff]  ;;  %340 = vmatpush.bf16.msra.mxu0 %v811_v0  ;;  %822 = vmatpush.bf16.msra.mxu3 %v811_v0  ;;  %v820_v4 = vld [vmem:[%s1194_s1 + $0x80] sm:$0xff]  ;;  %v818_v5 = vld [vmem:[%s1194_s1 + $0x70] sm:$0xff] }
   0x3   :  { %444 = vmatpush.bf16.msra.mxu2 %v821_v1  ;;  %389 = vmatpush.bf16.msra.mxu1 %v819_v2  ;;  %v614_v6 = vld [vmem:[%s1195_s0 + $0x8] sm:$0xf]  ;;  %v782_v7 = vld [vmem:[%s1195_s0 + $0x10] sm:$0xf0]  ;;  %v808_v11 = vld [vmem:[%s1194_s1 + $0x20] sm:$0xff] }
   0x4   :  { %v615_v8 = vor.u32 %v782_v7, %v614_v6  ;;  %v809_v9 = vld [vmem:[%s1194_s1 + $0x28] sm:$0xff]  ;;  %v816_v12 = vld [vmem:[%s1194_s1 + $0x60] sm:$0xff]  ;;  %v807_v13 = vld [vmem:[%s1194_s1 + $0x18] sm:$0xff] }
   0x5   :  { %v817_v10 = vld [vmem:[%s1194_s1 + $0x68] sm:$0xff]  ;;  %v815_v14 = vld [vmem:[%s1194_s1 + $0x58] sm:$0xff]  ;;  %v806_v15 = vld [vmem:[%s1194_s1 + $0x10] sm:$0xff] }
   0x6   :  { %341 = vmatpush.bf16.msra.mxu0 %v810_v3  ;;  %823 = vmatpush.bf16.msra.mxu3 %v810_v3  ;;  %v814_v16 = vld [vmem:[%s1194_s1 + $0x50] sm:$0xff]  ;;  %v626_v17 = vld [vmem:[%s1195_s0 + $0x20] sm:$0xf]  ;;  %v785_v18 = vld [vmem:[%s1195_s0 + $0x28] sm:$0xf0] }
   0x7   :  { %445 = vmatpush.bf16.msra.mxu2 %v820_v4  ;;  %390 = vmatpush.bf16.msra.mxu1 %v818_v5  ;;  %v627_v19 = vor.u32 %v785_v18, %v626_v17  ;;  %v805_v20 = vld [vmem:[%s1194_s1 + $0x8] sm:$0xff]  ;;  %v804_v22 = vld [vmem:[%s1194_s1] sm:$0xff]  ;;  %v678_v26 = vld [vmem:[%s1195_s0 + $0x90] sm:$0xf] }
   0x8   :  { %v813_v21 = vld [vmem:[%s1194_s1 + $0x48] sm:$0xff]  ;;  %v812_v23 = vld [vmem:[%s1194_s1 + $0x40] sm:$0xff]  ;;  %v799_v27 = vld [vmem:[%s1195_s0 + $0x98] sm:$0xf0] }
   0x9   :  { %v606_v24 = vld [vmem:[%s1195_s0] sm:$0xf]  ;;  %v781_v25 = vld [vmem:[%s1195_s0 + $0x8] sm:$0xf0]  ;;  %v780_v28 = vld [vmem:[%s1195_s0 + $0x4] sm:$0xf]  ;;  %v679_v31 = vor.u32 %v799_v27, %v678_v26 }
   0xa   :  { %772 = vmatmul.msk.bf16.vlgmr.msra.gmra.mxu2 %vm315_vm0, %v615_v8  ;;  %342 = vmatpush.bf16.msra.mxu0 %v809_v9  ;;  %v608_v29 = vld [vmem:[%s1195_s0 + $0xc] sm:$0xf0]  ;;  %v607_v30 = vor.u32 %v781_v25, %v606_v24  ;;  %v638_v33 = vld [vmem:[%s1195_s0 + $0x38] sm:$0xf]  ;;  %v788_v34 = vld [vmem:[%s1195_s0 + $0x40] sm:$0xf0] }
   0xb   :  { %824 = vmatpush.bf16.msra.mxu3 %v809_v9  ;;  %391 = vmatpush.bf16.msra.mxu1 %v817_v10  ;;  %v611_v32 = vor.u32 %v780_v28, %v608_v29  ;;  %v639_v35 = vor.u32 %v788_v34, %v638_v33  ;;  %v618_v36 = vld [vmem:[%s1195_s0 + $0x18] sm:$0xf]  ;;  %v784_v37 = vld [vmem:[%s1195_s0 + $0x20] sm:$0xf0]  ;;  %v690_v38 = vld [vmem:[%s1195_s0 + $0xa8] sm:$0xf] }
   0xc   :  { %v802_v39 = vld [vmem:[%s1195_s0 + $0xb0] sm:$0xf0]  ;;  %v783_v40 = vld [vmem:[%s1195_s0 + $0x1c] sm:$0xf]  ;;  %v620_v41 = vld [vmem:[%s1195_s0 + $0x24] sm:$0xf0]  ;;  %v619_v42 = vor.u32 %v784_v37, %v618_v36 }
   0xd   :  { %v691_v43 = vor.u32 %v802_v39, %v690_v38  ;;  %v623_v44 = vor.u32 %v783_v40, %v620_v41  ;;  %v650_v45 = vld [vmem:[%s1195_s0 + $0x50] sm:$0xf]  ;;  %v791_v46 = vld [vmem:[%s1195_s0 + $0x58] sm:$0xf0]  ;;  %v798_v50 = vld [vmem:[%s1195_s0 + $0x94] sm:$0xf] }
   0xe   :  { %343 = vmatpush.bf16.msra.mxu0 %v808_v11  ;;  %v651_v47 = vor.u32 %v791_v46, %v650_v45  ;;  %v630_v48 = vld [vmem:[%s1195_s0 + $0x30] sm:$0xf]  ;;  %v787_v49 = vld [vmem:[%s1195_s0 + $0x38] sm:$0xf0]  ;;  %v680_v51 = vld [vmem:[%s1195_s0 + $0x9c] sm:$0xf0] }
   0xf   :  { %825 = vmatpush.bf16.msra.mxu3 %v808_v11  ;;  %392 = vmatpush.bf16.msra.mxu1 %v816_v12  ;;  %v786_v52 = vld [vmem:[%s1195_s0 + $0x34] sm:$0xf]  ;;  %v632_v53 = vld [vmem:[%s1195_s0 + $0x3c] sm:$0xf0]  ;;  %v631_v54 = vor.u32 %v787_v49, %v630_v48  ;;  %v683_v55 = vor.u32 %v798_v50, %v680_v51  ;;  %v662_v57 = vld [vmem:[%s1195_s0 + $0x68] sm:$0xf] }
  0x10   :  { %v635_v56 = vor.u32 %v786_v52, %v632_v53  ;;  %v794_v58 = vld [vmem:[%s1195_s0 + $0x70] sm:$0xf0]  ;;  %v642_v60 = vld [vmem:[%s1195_s0 + $0x48] sm:$0xf]  ;;  %v801_v62 = vld [vmem:[%s1195_s0 + $0xac] sm:$0xf] }
  0x11   :  { %v663_v59 = vor.u32 %v794_v58, %v662_v57  ;;  %v790_v61 = vld [vmem:[%s1195_s0 + $0x50] sm:$0xf0]  ;;  %v692_v63 = vld [vmem:[%s1195_s0 + $0xb4] sm:$0xf0]  ;;  %v789_v0 = vld [vmem:[%s1195_s0 + $0x4c] sm:$0xf] }
  0x12   :  { %344 = vmatpush.bf16.msra.mxu0 %v807_v13  ;;  %v644_v1 = vld [vmem:[%s1195_s0 + $0x54] sm:$0xf0]  ;;  %v695_v3 = vor.u32 %v801_v62, %v692_v63  ;;  %v797_v6 = vld [vmem:[%s1195_s0 + $0x88] sm:$0xf0]  ;;  %v654_v8 = vld [vmem:[%s1195_s0 + $0x60] sm:$0xf] }
  0x13   :  { %826 = vmatpush.bf16.msra.mxu3 %v807_v13  ;;  %393 = vmatpush.bf16.msra.mxu1 %v815_v14  ;;  %v647_v4 = vor.u32 %v789_v0, %v644_v1  ;;  %v793_v9 = vld [vmem:[%s1195_s0 + $0x68] sm:$0xf0]  ;;  %v656_v11 = vld [vmem:[%s1195_s0 + $0x6c] sm:$0xf0]  ;;  %v666_v17 = vld [vmem:[%s1195_s0 + $0x78] sm:$0xf] }
  0x14   :  { %v796_v18 = vld [vmem:[%s1195_s0 + $0x80] sm:$0xf0]  ;;  %v803_v24 = vld [vmem:[%s1195_s0 + $0xb8] sm:$0xf0]  ;;  %v1100_v28 = vld [vmem:[%s1196_s2] ss:$0 sm:$0xff] }
  0x16   :  { %345 = vmatpush.bf16.msra.mxu0 %v806_v15 }
  0x17   :  { %827 = vmatpush.bf16.msra.mxu3 %v806_v15  ;;  %394 = vmatpush.bf16.msra.mxu1 %v814_v16  ;;  %v800_v15 = vld [vmem:[%s1195_s0 + $0xa0] sm:$0xf0] }
  0x1a   :  { %773 = vmatmul.msk.bf16.gmra.mxu2 %vm315_vm0, %v627_v19  ;;  %346 = vmatpush.bf16.msra.mxu0 %v805_v20  ;;  %v795_v19 = vld [vmem:[%s1195_s0 + $0x7c] sm:$0xf] }
  0x1b   :  { %828 = vmatpush.bf16.msra.mxu3 %v805_v20  ;;  %395 = vmatpush.bf16.msra.mxu1 %v813_v21  ;;  %v668_v20 = vld [vmem:[%s1195_s0 + $0x84] sm:$0xf0] }
  0x1e   :  { %347 = vmatpush.bf16.msra.mxu0 %v804_v22 }
  0x1f   :  { %829 = vmatpush.bf16.msra.mxu3 %v804_v22  ;;  %396 = vmatpush.bf16.msra.mxu1 %v812_v23  ;;  %v671_v22 = vor.u32 %v795_v19, %v668_v20 }
  0x21   :  { %348 = vmatmul.bf16.vlgmr.msra.gmra.mxu0 %v607_v30 }
  0x22   :  { %378 = vmatmul.bf16.vlgmr.msra.gmra.mxu3 %v679_v31  ;;  %397 = vmatmul.bf16.vlgmr.msra.gmra.mxu1 %v611_v32 }
  0x23   :  { %830 = vmatpush.bf16.msrb.mxu3 %v819_v2  ;;  %v643_v2 = vor.u32 %v790_v61, %v642_v60 }
  0x27   :  { %831 = vmatpush.bf16.msrb.mxu3 %v818_v5  ;;  %v674_v5 = vld [vmem:[%s1195_s0 + $0x80] sm:$0xf] }
  0x28   :  { %v675_v7 = vor.u32 %v797_v6, %v674_v5 }
  0x2a   :  { %774 = vmatmul.msk.bf16.gmra.mxu2 %vm315_vm0, %v639_v35 }
  0x2b   :  { %832 = vmatpush.bf16.msrb.mxu3 %v817_v10  ;;  %v792_v10 = vld [vmem:[%s1195_s0 + $0x64] sm:$0xf] }
  0x2c   :  { %v659_v13 = vor.u32 %v792_v10, %v656_v11 }
  0x2f   :  { %833 = vmatpush.bf16.msrb.mxu3 %v816_v12  ;;  %v655_v12 = vor.u32 %v793_v9, %v654_v8 }
  0x31   :  { %353 = vmatmul.bf16.gmra.mxu0 %v619_v42 }
  0x32   :  { %383 = vmatmul.bf16.gmra.mxu3 %v691_v43  ;;  %402 = vmatmul.bf16.gmra.mxu1 %v623_v44 }
  0x33   :  { %834 = vmatpush.bf16.msrb.mxu3 %v815_v14  ;;  %v686_v14 = vld [vmem:[%s1195_s0 + $0x98] sm:$0xf] }
  0x37   :  { %835 = vmatpush.bf16.msrb.mxu3 %v814_v16  ;;  %v687_v16 = vor.u32 %v800_v15, %v686_v14 }
  0x3a   :  { %775 = vmatmul.msk.bf16.gmra.mxu2 %vm315_vm0, %v651_v47 }
  0x3b   :  { %836 = vmatpush.bf16.msrb.mxu3 %v813_v21  ;;  %v667_v21 = vor.u32 %v796_v18, %v666_v17 }
  0x3f   :  { %837 = vmatpush.bf16.msrb.mxu3 %v812_v23  ;;  %v698_v23 = vld [vmem:[%s1195_s0 + $0xb0] sm:$0xf] }
  0x40   :  { %v699_v25 = vor.u32 %v803_v24, %v698_v23 }
  0x41   :  { %358 = vmatmul.bf16.gmra.mxu0 %v631_v54 }
  0x42   :  { %427 = vmatmul.bf16.vlgmr.msrb.gmra.mxu3 %v683_v55  ;;  %407 = vmatmul.bf16.gmra.mxu1 %v635_v56 }
  0x4a   :  { %776 = vmatmul.msk.bf16.gmra.mxu2 %vm315_vm0, %v663_v59 }
  0x51   :  { %363 = vmatmul.bf16.gmra.mxu0 %v643_v2 }
  0x52   :  { %432 = vmatmul.bf16.gmra.mxu3 %v695_v3  ;;  %412 = vmatmul.bf16.gmra.mxu1 %v647_v4 }
  0x5a   :  { %777 = vmatmul.msk.bf16.gmra.mxu2 %vm315_vm0, %v675_v7 }
  0x61   :  { %368 = vmatmul.bf16.gmra.mxu0 %v655_v12 }
  0x62   :  { %417 = vmatmul.bf16.gmra.mxu1 %v659_v13 }
  0x6a   :  { %778 = vmatmul.msk.bf16.gmra.mxu2 %vm315_vm0, %v687_v16 }
  0x71   :  { %373 = vmatmul.bf16.gmra.mxu0 %v667_v21 }
  0x72   :  { %422 = vmatmul.bf16.gmra.mxu1 %v671_v22 }
  0x7a   :  { %779 = vmatmul.msk.bf16.gmra.mxu2 %vm315_vm0, %v699_v25 }
  0x8d   :  { %v447_v26 = vpop.f32.mrf.mxu2 }
  0x95   :  { %v449_v27 = vpop.f32.mrf.mxu2 }
  0x9d   :  { %v452_v29 = vpop.f32.mrf.mxu2 }
  0x9e   :  { %v349_v30 = vpop.f32.mrf.mxu0 }
  0x9f   :  { %v350_v31 = vadd.f32 %v1100_v28, %v349_v30  ;;  %v398_v32 = vpop.f32.mrf.mxu1 }
  0xa1   :  { %v399_v33 = vadd.f32 %v398_v32, %v350_v31 }
  0xa3   :  { %v448_v34 = vadd.f32 %v447_v26, %v399_v33 }
  0xa5   :  { %v487_v35 = vmul.f32 0.5, %v448_v34  ;;  %v454_v36 = vpop.f32.mrf.mxu2  ;;  %v1110_v0 = vpop.f32.mrf.mxu3 }
  0xa6   :  { %v351_v37 = vpop.f32.mrf.mxu0 }
  0xa7   :  { %839 = vtanh.f32 %v487_v35  ;;  %v352_v38 = vadd.f32 %v1100_v28, %v351_v37  ;;  %v400_v39 = vpop.f32.mrf.mxu1 }
  0xa9   :  { %v401_v40 = vadd.f32 %v400_v39, %v352_v38 }
  0xab   :  { %v450_v41 = vadd.f32 %v449_v27, %v401_v40 }
  0xad   :  { %v840_v42 = vpop.eup %839  ;;  %v488_v43 = vmul.f32 0.5, %v450_v41  ;;  %v457_v44 = vpop.f32.mrf.mxu2 }
  0xae   :  { %v519_v45 = vadd.f32 1.0, %v840_v42  ;;  %v354_v46 = vpop.f32.mrf.mxu0  ;;  %v1117_v16 = vpop.f32.mrf.mxu3 }
  0xaf   :  { %841 = vtanh.f32 %v488_v43  ;;  %v355_v47 = vadd.f32 %v1100_v28, %v354_v46  ;;  %v403_v48 = vpop.f32.mrf.mxu1 }
  0xb0   :  { %v535_v49 = vmul.f32 0.5, %v519_v45 }
  0xb1   :  { %v404_v50 = vadd.f32 %v403_v48, %v355_v47 }
  0xb2   :  { %v551_v51 = vmul.f32 %v535_v49, %v448_v34 }
  0xb3   :  { %v453_v52 = vadd.f32 %v452_v29, %v404_v50 }
  0xb4   :  { %v567_v53 = vpack.c.bf16 %v551_v51, %v551_v51 }
  0xb5   :  { %v842_v54 = vpop.eup %841  ;;  %v489_v55 = vmul.f32 0.5, %v453_v52  ;;  %v459_v56 = vpop.f32.mrf.mxu2 }
  0xb6   :  { %584 = vst.msk [vmem:[%s1197_s3] sm:$0xf] %vm583_vm1, %v567_v53  ;;  %v520_v57 = vadd.f32 1.0, %v842_v54  ;;  %v356_v58 = vpop.f32.mrf.mxu0  ;;  %v1128_v34 = vpop.f32.mrf.mxu3 }
  0xb7   :  { %843 = vtanh.f32 %v489_v55  ;;  %v357_v59 = vadd.f32 %v1100_v28, %v356_v58  ;;  %v405_v60 = vpop.f32.mrf.mxu1 }
  0xb8   :  { %v536_v61 = vmul.f32 0.5, %v520_v57 }
  0xb9   :  { %v406_v62 = vadd.f32 %v405_v60, %v357_v59 }
  0xba   :  { %v552_v63 = vmul.f32 %v536_v61, %v450_v41 }
  0xbb   :  { %v455_v1 = vadd.f32 %v454_v36, %v406_v62 }
  0xbc   :  { %v568_v2 = vpack.c.bf16 %v552_v63, %v552_v63 }
  0xbd   :  { %v844_v3 = vpop.eup %843  ;;  %v490_v4 = vmul.f32 0.5, %v455_v1  ;;  %v462_v5 = vpop.f32.mrf.mxu2 }
  0xbe   :  { %585 = vst.msk [vmem:[%s1197_s3 + $0x4] sm:$0xf] %vm583_vm1, %v568_v2  ;;  %v521_v6 = vadd.f32 1.0, %v844_v3  ;;  %v359_v7 = vpop.f32.mrf.mxu0  ;;  %v1136_v50 = vpop.f32.mrf.mxu3 }
  0xbf   :  { %845 = vtanh.f32 %v490_v4  ;;  %v360_v8 = vadd.f32 %v1100_v28, %v359_v7  ;;  %v408_v9 = vpop.f32.mrf.mxu1 }
  0xc0   :  { %v537_v10 = vmul.f32 0.5, %v521_v6 }
  0xc1   :  { %v409_v11 = vadd.f32 %v408_v9, %v360_v8 }
  0xc2   :  { %v553_v12 = vmul.f32 %v537_v10, %v453_v52 }
  0xc3   :  { %v458_v13 = vadd.f32 %v457_v44, %v409_v11 }
  0xc4   :  { %v569_v14 = vpack.c.bf16 %v553_v12, %v553_v12  ;;  %v380_v12 = vadd.f32 %v1100_v28, %v1110_v0 }
  0xc5   :  { %v846_v15 = vpop.eup %845  ;;  %v491_v17 = vmul.f32 0.5, %v458_v13  ;;  %v464_v18 = vpop.f32.mrf.mxu2 }
  0xc6   :  { %586 = vst.msk [vmem:[%s1197_s3 + $0x8] sm:$0xf] %vm583_vm1, %v569_v14  ;;  %v522_v19 = vadd.f32 1.0, %v846_v15  ;;  %v361_v20 = vpop.f32.mrf.mxu0  ;;  %v428_v2 = vpop.f32.mrf.mxu3 }
  0xc7   :  { %847 = vtanh.f32 %v491_v17  ;;  %v362_v21 = vadd.f32 %v1100_v28, %v361_v20  ;;  %v410_v22 = vpop.f32.mrf.mxu1 }
  0xc8   :  { %v538_v23 = vmul.f32 0.5, %v522_v19 }
  0xc9   :  { %v411_v24 = vadd.f32 %v410_v22, %v362_v21 }
  0xca   :  { %v554_v25 = vmul.f32 %v538_v23, %v455_v1 }
  0xcb   :  { %v460_v26 = vadd.f32 %v459_v56, %v411_v24 }
  0xcc   :  { %v570_v27 = vpack.c.bf16 %v554_v25, %v554_v25 }
  0xcd   :  { %v848_v29 = vpop.eup %847  ;;  %v492_v30 = vmul.f32 0.5, %v460_v26  ;;  %v467_v31 = vpop.f32.mrf.mxu2 }
  0xce   :  { %587 = vst.msk [vmem:[%s1197_s3 + $0xc] sm:$0xf] %vm583_vm1, %v570_v27  ;;  %v523_v32 = vadd.f32 1.0, %v848_v29  ;;  %v364_v33 = vpop.f32.mrf.mxu0  ;;  %v430_v21 = vpop.f32.mrf.mxu3  ;;  %v382_v29 = vadd.f32 %v1100_v28, %v1117_v16 }
  0xcf   :  { %849 = vtanh.f32 %v492_v30  ;;  %v365_v35 = vadd.f32 %v1100_v28, %v364_v33  ;;  %v413_v36 = vpop.f32.mrf.mxu1 }
  0xd0   :  { %v539_v37 = vmul.f32 0.5, %v523_v32 }
  0xd1   :  { %v414_v38 = vadd.f32 %v413_v36, %v365_v35  ;;  %v431_v36 = vadd.f32 %v430_v21, %v382_v29 }
  0xd2   :  { %v555_v39 = vmul.f32 %v539_v37, %v458_v13 }
  0xd3   :  { %v463_v40 = vadd.f32 %v462_v5, %v414_v38 }
  0xd4   :  { %v571_v41 = vpack.c.bf16 %v555_v39, %v555_v39 }
  0xd5   :  { %v850_v42 = vpop.eup %849  ;;  %v493_v43 = vmul.f32 0.5, %v463_v40  ;;  %v469_v44 = vpop.f32.mrf.mxu2 }
  0xd6   :  { %588 = vst.msk [vmem:[%s1197_s3 + $0x10] sm:$0xf] %vm583_vm1, %v571_v41  ;;  %v524_v45 = vadd.f32 1.0, %v850_v42  ;;  %v366_v46 = vpop.f32.mrf.mxu0  ;;  %v433_v16 = vpop.f32.mrf.mxu3 }
  0xd7   :  { %851 = vtanh.f32 %v493_v43  ;;  %v367_v47 = vadd.f32 %v1100_v28, %v366_v46  ;;  %v415_v48 = vpop.f32.mrf.mxu1 }
  0xd8   :  { %v540_v49 = vmul.f32 0.5, %v524_v45 }
  0xd9   :  { %v416_v51 = vadd.f32 %v415_v48, %v367_v47  ;;  %v385_v47 = vadd.f32 %v1100_v28, %v1128_v34 }
  0xda   :  { %v556_v52 = vmul.f32 %v540_v49, %v460_v26 }
  0xdb   :  { %v465_v53 = vadd.f32 %v464_v18, %v416_v51  ;;  %v429_v18 = vadd.f32 %v428_v2, %v380_v12  ;;  %v387_v2 = vadd.f32 %v1100_v28, %v1136_v50 }
  0xdc   :  { %v572_v54 = vpack.c.bf16 %v556_v52, %v556_v52 }
  0xdd   :  { %v852_v55 = vpop.eup %851  ;;  %v494_v56 = vmul.f32 0.5, %v465_v53  ;;  %v472_v57 = vpop.f32.mrf.mxu2 }
  0xde   :  { %589 = vst.msk [vmem:[%s1197_s3 + $0x14] sm:$0xf] %vm583_vm1, %v572_v54  ;;  %v525_v58 = vadd.f32 1.0, %v852_v55  ;;  %v369_v59 = vpop.f32.mrf.mxu0 }
  0xdf   :  { %853 = vtanh.f32 %v494_v56  ;;  %v370_v60 = vadd.f32 %v1100_v28, %v369_v59  ;;  %v418_v61 = vpop.f32.mrf.mxu1  ;;  %v434_v56 = vadd.f32 %v433_v16, %v385_v47 }
  0xe0   :  { %v541_v62 = vmul.f32 0.5, %v525_v58 }
  0xe1   :  { %v419_v63 = vadd.f32 %v418_v61, %v370_v60 }
  0xe2   :  { %v557_v1 = vmul.f32 %v541_v62, %v463_v40 }
  0xe3   :  { %v468_v3 = vadd.f32 %v467_v31, %v419_v63 }
  0xe4   :  { %v573_v4 = vpack.c.bf16 %v557_v1, %v557_v1 }
  0xe5   :  { %v854_v5 = vpop.eup %853  ;;  %v495_v6 = vmul.f32 0.5, %v468_v3  ;;  %v474_v7 = vpop.f32.mrf.mxu2 }
  0xe6   :  { %590 = vst.msk [vmem:[%s1197_s3 + $0x18] sm:$0xf] %vm583_vm1, %v573_v4  ;;  %v526_v8 = vadd.f32 1.0, %v854_v5  ;;  %v371_v9 = vpop.f32.mrf.mxu0  ;;  %v435_v5 = vpop.f32.mrf.mxu3 }
  0xe7   :  { %855 = vtanh.f32 %v495_v6  ;;  %v372_v10 = vadd.f32 %v1100_v28, %v371_v9  ;;  %v420_v11 = vpop.f32.mrf.mxu1  ;;  %v436_v9 = vadd.f32 %v435_v5, %v387_v2 }
  0xe8   :  { %v542_v13 = vmul.f32 0.5, %v526_v8 }
  0xe9   :  { %v421_v14 = vadd.f32 %v420_v11, %v372_v10 }
  0xea   :  { %v558_v15 = vmul.f32 %v542_v13, %v465_v53 }
  0xeb   :  { %v470_v17 = vadd.f32 %v469_v44, %v421_v14 }
  0xec   :  { %v574_v19 = vpack.c.bf16 %v558_v15, %v558_v15 }
  0xed   :  { %v856_v20 = vpop.eup %855  ;;  %v496_v22 = vmul.f32 0.5, %v470_v17  ;;  %v477_v23 = vpop.f32.mrf.mxu2 }
  0xee   :  { %591 = vst.msk [vmem:[%s1197_s3 + $0x1c] sm:$0xf] %vm583_vm1, %v574_v19  ;;  %v527_v24 = vadd.f32 1.0, %v856_v20  ;;  %v478_v25 = vadd.f32 %v477_v23, %v429_v18  ;;  %v374_v26 = vpop.f32.mrf.mxu0 }
  0xef   :  { %857 = vtanh.f32 %v496_v22  ;;  %v375_v0 = vadd.f32 %v1100_v28, %v374_v26  ;;  %v423_v27 = vpop.f32.mrf.mxu1 }
  0xf0   :  { %v543_v30 = vmul.f32 0.5, %v527_v24  ;;  %v499_v31 = vmul.f32 0.5, %v478_v25 }
  0xf1   :  { %v424_v32 = vadd.f32 %v423_v27, %v375_v0 }
  0xf2   :  { %v559_v33 = vmul.f32 %v543_v30, %v468_v3  ;;  %859 = vtanh.f32 %v499_v31 }
  0xf3   :  { %v473_v35 = vadd.f32 %v472_v57, %v424_v32 }
  0xf4   :  { %v575_v37 = vpack.c.bf16 %v559_v33, %v559_v33 }
  0xf5   :  { %v858_v38 = vpop.eup %857  ;;  %v497_v39 = vmul.f32 0.5, %v473_v35  ;;  %v479_v40 = vpop.f32.mrf.mxu2 }
  0xf6   :  { %592 = vst.msk [vmem:[%s1197_s3 + $0x20] sm:$0xf] %vm583_vm1, %v575_v37  ;;  %v528_v41 = vadd.f32 1.0, %v858_v38  ;;  %v480_v42 = vadd.f32 %v479_v40, %v431_v36  ;;  %v376_v43 = vpop.f32.mrf.mxu0 }
  0xf7   :  { %861 = vtanh.f32 %v497_v39  ;;  %v377_v44 = vadd.f32 %v1100_v28, %v376_v43  ;;  %v425_v45 = vpop.f32.mrf.mxu1 }
  0xf8   :  { %v860_v46 = vpop.eup %859  ;;  %v544_v48 = vmul.f32 0.5, %v528_v41  ;;  %v500_v49 = vmul.f32 0.5, %v480_v42 }
  0xf9   :  { %v531_v51 = vadd.f32 1.0, %v860_v46  ;;  %v426_v52 = vadd.f32 %v425_v45, %v377_v44 }
  0xfa   :  { %v560_v53 = vmul.f32 %v544_v48, %v470_v17  ;;  %863 = vtanh.f32 %v500_v49 }
  0xfb   :  { %v547_v54 = vmul.f32 0.5, %v531_v51  ;;  %v475_v55 = vadd.f32 %v474_v7, %v426_v52 }
  0xfc   :  { %v576_v57 = vpack.c.bf16 %v560_v53, %v560_v53 }
  0xfd   :  { %v862_v58 = vpop.eup %861  ;;  %v563_v59 = vmul.f32 %v547_v54, %v478_v25  ;;  %v498_v60 = vmul.f32 0.5, %v475_v55  ;;  %v482_v61 = vpop.f32.mrf.mxu2 }
  0xfe   :  { %593 = vst.msk [vmem:[%s1197_s3 + $0x24] sm:$0xf] %vm583_vm1, %v576_v57  ;;  %v529_v34 = vadd.f32 1.0, %v862_v58  ;;  %v483_v62 = vadd.f32 %v482_v61, %v434_v56 }
  0xff   :  { %v579_v63 = vpack.c.bf16 %v563_v59, %v563_v59  ;;  %865 = vtanh.f32 %v498_v60 }
 0x100   :  { %v864_v1 = vpop.eup %863  ;;  %v545_v3 = vmul.f32 0.5, %v529_v34  ;;  %v501_v4 = vmul.f32 0.5, %v483_v62 }
 0x101   :  { %596 = vst.msk [vmem:[%s1197_s3 + $0x30] sm:$0xf] %vm583_vm1, %v579_v63  ;;  %v532_v6 = vadd.f32 1.0, %v864_v1 }
 0x102   :  { %v561_v7 = vmul.f32 %v545_v3, %v473_v35  ;;  %867 = vtanh.f32 %v501_v4 }
 0x103   :  { %v548_v8 = vmul.f32 0.5, %v532_v6 }
 0x104   :  { %v577_v10 = vpack.c.bf16 %v561_v7, %v561_v7 }
 0x105   :  { %v866_v11 = vpop.eup %865  ;;  %v564_v12 = vmul.f32 %v548_v8, %v480_v42  ;;  %v484_v13 = vpop.f32.mrf.mxu2 }
 0x106   :  { %594 = vst.msk [vmem:[%s1197_s3 + $0x28] sm:$0xf] %vm583_vm1, %v577_v10  ;;  %v530_v28 = vadd.f32 1.0, %v866_v11  ;;  %v485_v50 = vadd.f32 %v484_v13, %v436_v9 }
 0x107   :  { %v580_v14 = vpack.c.bf16 %v564_v12, %v564_v12 }
 0x108   :  { %v868_v15 = vpop.eup %867  ;;  %v546_v17 = vmul.f32 0.5, %v530_v28  ;;  %v502_v18 = vmul.f32 0.5, %v485_v50 }
 0x109   :  { %597 = vst.msk [vmem:[%s1197_s3 + $0x34] sm:$0xf] %vm583_vm1, %v580_v14  ;;  %v533_v19 = vadd.f32 1.0, %v868_v15 }
 0x10a   :  { %v562_v20 = vmul.f32 %v546_v17, %v475_v55  ;;  %869 = vtanh.f32 %v502_v18 }
 0x10b   :  { %v549_v21 = vmul.f32 0.5, %v533_v19 }
 0x10c   :  { %v578_v22 = vpack.c.bf16 %v562_v20, %v562_v20 }
 0x10d   :  { %v565_v23 = vmul.f32 %v549_v21, %v483_v62 }
 0x10e   :  { %595 = vst.msk [vmem:[%s1197_s3 + $0x2c] sm:$0xf] %vm583_vm1, %v578_v22 }
 0x10f   :  { %v581_v24 = vpack.c.bf16 %v565_v23, %v565_v23 }
 0x110   :  { %v870_v25 = vpop.eup %869 }
 0x111   :  { %598 = vst.msk [vmem:[%s1197_s3 + $0x38] sm:$0xf] %vm583_vm1, %v581_v24  ;;  %v534_v26 = vadd.f32 1.0, %v870_v25 }
 0x113   :  { %v550_v0 = vmul.f32 0.5, %v534_v26 }
 0x115   :  { %v566_v27 = vmul.f32 %v550_v0, %v485_v50 }
 0x117   :  { %v582_v29 = vpack.c.bf16 %v566_v27, %v566_v27 }
 0x119   :  { %599 = vst.msk [vmem:[%s1197_s3 + $0x3c] sm:$0xf] %vm583_vm1, %v582_v29 }

// kernel: _forward_impl.12
= control target key start
LH: loop header
LB: loop body
LE: loop exit
PB: predicated region body
PF: predicated region fallthrough
CT: control target
= control target key end

     0   :  { %vm555_vm0 = vcmask 523264   ;;  %s1890_s1 = inlined_call_operand.vmem [shape: bf16[576,128], index: 1, kind: input, shape index: {}]   ;;  %s1891_s2 = inlined_call_operand.vmem [shape: f32[1,128], index: 2, kind: input, shape index: {}]   ;;  %s1892_s0 = inlined_call_operand.vmem [shape: bf16[128,576], index: 0, kind: input, shape index: {}]   ;;  %s1893_s3 = inlined_call_operand.vmem [shape: bf16[128,128], index: 3, kind: output, shape index: {}]  }
   0x1   :  { %v1300_v0 = vld [vmem:[%s1890_s1 + $0x38] sm:$0xff]  ;;  %v1299_v1 = vld [vmem:[%s1890_s1 + $0x30] sm:$0xff]  ;;  %v1298_v2 = vld [vmem:[%s1890_s1 + $0x28] sm:$0xff] }
   0x2   :  { %1376 = vmatpush.bf16.msra.mxu1 %v1300_v0  ;;  %1377 = vmatpush.bf16.msra.mxu2 %v1300_v0  ;;  %v1297_v3 = vld [vmem:[%s1890_s1 + $0x20] sm:$0xff]  ;;  %v1296_v4 = vld [vmem:[%s1890_s1 + $0x18] sm:$0xff]  ;;  %v1295_v5 = vld [vmem:[%s1890_s1 + $0x10] sm:$0xff] }
   0x3   :  { %1378 = vmatpush.bf16.msra.mxu3 %v1300_v0  ;;  %580 = vmatpush.bf16.msra.mxu0 %v1300_v0  ;;  %v1294_v6 = vld [vmem:[%s1890_s1 + $0x8] sm:$0xff]  ;;  %v1293_v7 = vld [vmem:[%s1890_s1] sm:$0xff]  ;;  %v983_v8 = vld [vmem:[%s1892_s0 + $0x50] sm:$0xf] }
   0x4   :  { %v1265_v9 = vld [vmem:[%s1892_s0 + $0x60] sm:$0xf0]  ;;  %v1023_v10 = vld [vmem:[%s1892_s0 + $0xa0] sm:$0xf]  ;;  %v1275_v11 = vld [vmem:[%s1892_s0 + $0xb0] sm:$0xf0] }
   0x5   :  { %v1063_v12 = vld [vmem:[%s1892_s0 + $0xf0] sm:$0xf]  ;;  %v1285_v13 = vld [vmem:[%s1892_s0 + $0x100] sm:$0xf0]  ;;  %v943_v14 = vld [vmem:[%s1892_s0] sm:$0xf]  ;;  %v984_v18 = vor.u32 %v1265_v9, %v983_v8  ;;  %v1024_v19 = vor.u32 %v1275_v11, %v1023_v10 }
   0x6   :  { %1379 = vmatpush.bf16.msra.mxu1 %v1299_v1  ;;  %1380 = vmatpush.bf16.msra.mxu2 %v1299_v1  ;;  %v1255_v15 = vld [vmem:[%s1892_s0 + $0x10] sm:$0xf0]  ;;  %v1316_v16 = vld [vmem:[%s1890_s1 + $0xb8] sm:$0xff]  ;;  %v1064_v20 = vor.u32 %v1285_v13, %v1063_v12  ;;  %v1314_v28 = vld [vmem:[%s1890_s1 + $0xa8] sm:$0xff] }
   0x7   :  { %1381 = vmatpush.bf16.msra.mxu3 %v1299_v1  ;;  %581 = vmatpush.bf16.msra.mxu0 %v1299_v1  ;;  %v1308_v17 = vld [vmem:[%s1890_s1 + $0x78] sm:$0xff]  ;;  %v944_v21 = vor.u32 %v1255_v15, %v943_v14  ;;  %v1315_v24 = vld [vmem:[%s1890_s1 + $0xb0] sm:$0xff]  ;;  %v1306_v29 = vld [vmem:[%s1890_s1 + $0x68] sm:$0xff] }
   0x8   :  { %v1324_v22 = vld [vmem:[%s1890_s1 + $0xf8] sm:$0xff]  ;;  %v1307_v25 = vld [vmem:[%s1890_s1 + $0x70] sm:$0xff]  ;;  %v1322_v30 = vld [vmem:[%s1890_s1 + $0xe8] sm:$0xff] }
   0x9   :  { %v1328_v23 = vld [vmem:[%s1890_s1 + $0x118] sm:$0xff]  ;;  %v1323_v26 = vld [vmem:[%s1890_s1 + $0xf0] sm:$0xff]  ;;  %v1326_v31 = vld [vmem:[%s1890_s1 + $0x108] sm:$0xff] }
   0xa   :  { %1382 = vmatpush.bf16.msra.mxu1 %v1298_v2  ;;  %1383 = vmatpush.bf16.msra.mxu2 %v1298_v2  ;;  %v1327_v27 = vld [vmem:[%s1890_s1 + $0x110] sm:$0xff]  ;;  %v1313_v32 = vld [vmem:[%s1890_s1 + $0xa0] sm:$0xff]  ;;  %v1003_v35 = vld [vmem:[%s1892_s0 + $0x78] sm:$0xf] }
   0xb   :  { %1384 = vmatpush.bf16.msra.mxu3 %v1298_v2  ;;  %582 = vmatpush.bf16.msra.mxu0 %v1298_v2  ;;  %v1305_v33 = vld [vmem:[%s1890_s1 + $0x60] sm:$0xff]  ;;  %v1270_v36 = vld [vmem:[%s1892_s0 + $0x88] sm:$0xf0]  ;;  %v1043_v37 = vld [vmem:[%s1892_s0 + $0xc8] sm:$0xf] }
   0xc   :  { %v1321_v34 = vld [vmem:[%s1890_s1 + $0xe0] sm:$0xff]  ;;  %v1280_v38 = vld [vmem:[%s1892_s0 + $0xd8] sm:$0xf0]  ;;  %v1083_v39 = vld [vmem:[%s1892_s0 + $0x118] sm:$0xf]  ;;  %v1004_v46 = vor.u32 %v1270_v36, %v1003_v35 }
   0xd   :  { %v1290_v40 = vld [vmem:[%s1892_s0 + $0x128] sm:$0xf0]  ;;  %v963_v41 = vld [vmem:[%s1892_s0 + $0x28] sm:$0xf]  ;;  %v1260_v42 = vld [vmem:[%s1892_s0 + $0x38] sm:$0xf0]  ;;  %v1044_v47 = vor.u32 %v1280_v38, %v1043_v37 }
   0xe   :  { %1385 = vmatpush.bf16.msra.mxu1 %v1297_v3  ;;  %1386 = vmatpush.bf16.msra.mxu2 %v1297_v3  ;;  %v1325_v43 = vld [vmem:[%s1890_s1 + $0x100] sm:$0xff]  ;;  %v1312_v44 = vld [vmem:[%s1890_s1 + $0x98] sm:$0xff]  ;;  %v1084_v48 = vor.u32 %v1290_v40, %v1083_v39  ;;  %v964_v49 = vor.u32 %v1260_v42, %v963_v41  ;;  %v1311_v51 = vld [vmem:[%s1890_s1 + $0x90] sm:$0xff] }
   0xf   :  { %1387 = vmatpush.bf16.msra.mxu3 %v1297_v3  ;;  %583 = vmatpush.bf16.msra.mxu0 %v1297_v3  ;;  %v1304_v45 = vld [vmem:[%s1890_s1 + $0x58] sm:$0xff]  ;;  %v1303_v52 = vld [vmem:[%s1890_s1 + $0x50] sm:$0xff]  ;;  %v1310_v54 = vld [vmem:[%s1890_s1 + $0x88] sm:$0xff] }
  0x10   :  { %v1320_v50 = vld [vmem:[%s1890_s1 + $0xd8] sm:$0xff]  ;;  %v1319_v53 = vld [vmem:[%s1890_s1 + $0xd0] sm:$0xff]  ;;  %v1302_v55 = vld [vmem:[%s1890_s1 + $0x48] sm:$0xff] }
  0x11   :  { %v1318_v56 = vld [vmem:[%s1890_s1 + $0xc8] sm:$0xff]  ;;  %v1309_v57 = vld [vmem:[%s1890_s1 + $0x80] sm:$0xff]  ;;  %v945_v61 = vld [vmem:[%s1892_s0 + $0x14] sm:$0xf0] }
  0x12   :  { %1388 = vmatpush.bf16.msra.mxu1 %v1296_v4  ;;  %1389 = vmatpush.bf16.msra.mxu2 %v1296_v4  ;;  %v1301_v58 = vld [vmem:[%s1890_s1 + $0x40] sm:$0xff]  ;;  %v951_v62 = vld [vmem:[%s1892_s0 + $0x8] sm:$0xf]  ;;  %v1256_v63 = vld [vmem:[%s1892_s0 + $0x18] sm:$0xf0] }
  0x13   :  { %1390 = vmatpush.bf16.msra.mxu3 %v1296_v4  ;;  %584 = vmatpush.bf16.msra.mxu0 %v1296_v4  ;;  %v1317_v59 = vld [vmem:[%s1890_s1 + $0xc0] sm:$0xff]  ;;  %v1254_v0 = vld [vmem:[%s1892_s0 + $0xc] sm:$0xf]  ;;  %v959_v2 = vld [vmem:[%s1892_s0 + $0x10] sm:$0xf] }
  0x14   :  { %v1253_v60 = vld [vmem:[%s1892_s0 + $0x4] sm:$0xf]  ;;  %v953_v1 = vld [vmem:[%s1892_s0 + $0x1c] sm:$0xf0]  ;;  %v1258_v8 = vld [vmem:[%s1892_s0 + $0x2c] sm:$0xf] }
  0x15   :  { %v1257_v3 = vld [vmem:[%s1892_s0 + $0x20] sm:$0xf0]  ;;  %v948_v4 = vor.u32 %v1253_v60, %v945_v61  ;;  %v965_v9 = vld [vmem:[%s1892_s0 + $0x3c] sm:$0xf0]  ;;  %v971_v10 = vld [vmem:[%s1892_s0 + $0x30] sm:$0xf] }
  0x16   :  { %1391 = vmatpush.bf16.msra.mxu1 %v1295_v5  ;;  %1392 = vmatpush.bf16.msra.mxu2 %v1295_v5  ;;  %v1261_v11 = vld [vmem:[%s1892_s0 + $0x40] sm:$0xf0]  ;;  %v1259_v12 = vld [vmem:[%s1892_s0 + $0x34] sm:$0xf]  ;;  %v973_v13 = vld [vmem:[%s1892_s0 + $0x44] sm:$0xf0] }
  0x17   :  { %1393 = vmatpush.bf16.msra.mxu3 %v1295_v5  ;;  %585 = vmatpush.bf16.msra.mxu0 %v1295_v5  ;;  %v952_v5 = vor.u32 %v1256_v63, %v951_v62  ;;  %v979_v14 = vld [vmem:[%s1892_s0 + $0x38] sm:$0xf]  ;;  %v1262_v15 = vld [vmem:[%s1892_s0 + $0x48] sm:$0xf0]  ;;  %v1271_v35 = vld [vmem:[%s1892_s0 + $0x90] sm:$0xf0] }
  0x18   :  { %v1269_v36 = vld [vmem:[%s1892_s0 + $0x84] sm:$0xf]  ;;  %v1013_v37 = vld [vmem:[%s1892_s0 + $0x94] sm:$0xf0]  ;;  %v1019_v38 = vld [vmem:[%s1892_s0 + $0x88] sm:$0xf] }
  0x19   :  { %v1272_v39 = vld [vmem:[%s1892_s0 + $0x98] sm:$0xf0]  ;;  %v1016_v42 = vor.u32 %v1269_v36, %v1013_v37  ;;  %v1279_v60 = vld [vmem:[%s1892_s0 + $0xd4] sm:$0xf]  ;;  %v1053_v61 = vld [vmem:[%s1892_s0 + $0xe4] sm:$0xf0] }
  0x1a   :  { %1394 = vmatpush.bf16.msra.mxu1 %v1294_v6  ;;  %1395 = vmatpush.bf16.msra.mxu2 %v1294_v6  ;;  %v1059_v62 = vld [vmem:[%s1892_s0 + $0xd8] sm:$0xf]  ;;  %v1282_v63 = vld [vmem:[%s1892_s0 + $0xe8] sm:$0xf0] }
  0x1b   :  { %1396 = vmatpush.bf16.msra.mxu3 %v1294_v6  ;;  %586 = vmatpush.bf16.msra.mxu0 %v1294_v6  ;;  %v956_v6 = vor.u32 %v1254_v0, %v953_v1 }
  0x1e   :  { %1397 = vmatpush.bf16.msra.mxu1 %v1293_v7  ;;  %1398 = vmatpush.bf16.msra.mxu2 %v1293_v7 }
  0x1f   :  { %1399 = vmatpush.bf16.msra.mxu3 %v1293_v7  ;;  %587 = vmatpush.bf16.msra.mxu0 %v1293_v7  ;;  %v960_v7 = vor.u32 %v1257_v3, %v959_v2  ;;  %v1056_v2 = vor.u32 %v1279_v60, %v1053_v61  ;;  %v1060_v3 = vor.u32 %v1282_v63, %v1059_v62 }
  0x21   :  { %598 = vmatmul.bf16.vlgmr.msra.gmra.mxu1 %v984_v18  ;;  %608 = vmatmul.bf16.vlgmr.msra.gmra.mxu2 %v1024_v19  ;;  %v976_v18 = vor.u32 %v1259_v12, %v973_v13  ;;  %v980_v19 = vor.u32 %v1262_v15, %v979_v14 }
  0x22   :  { %678 = vmatpush.bf16.msrb.mxu2 %v1316_v16  ;;  %629 = vmatpush.bf16.msrb.mxu1 %v1308_v17  ;;  %v968_v16 = vor.u32 %v1258_v8, %v965_v9  ;;  %v972_v17 = vor.u32 %v1261_v11, %v971_v10  ;;  %v1284_v8 = vld [vmem:[%s1892_s0 + $0xfc] sm:$0xf]  ;;  %v1073_v9 = vld [vmem:[%s1892_s0 + $0x10c] sm:$0xf0]  ;;  %v1079_v10 = vld [vmem:[%s1892_s0 + $0x100] sm:$0xf] }
  0x23   :  { %618 = vmatmul.bf16.vlgmr.msra.gmra.mxu3 %v1064_v20  ;;  %588 = vmatmul.bf16.vlgmr.msra.gmra.mxu0 %v944_v21  ;;  %v1263_v20 = vld [vmem:[%s1892_s0 + $0x54] sm:$0xf]  ;;  %v985_v21 = vld [vmem:[%s1892_s0 + $0x64] sm:$0xf0]  ;;  %v1076_v15 = vor.u32 %v1284_v8, %v1073_v9 }
  0x24   :  { %727 = vmatpush.bf16.msrb.mxu3 %v1324_v22  ;;  %780 = vmatpush.bf16.msrb.mxu0 %v1328_v23  ;;  %v991_v22 = vld [vmem:[%s1892_s0 + $0x58] sm:$0xf]  ;;  %v1266_v23 = vld [vmem:[%s1892_s0 + $0x68] sm:$0xf0]  ;;  %v1287_v11 = vld [vmem:[%s1892_s0 + $0x110] sm:$0xf0] }
  0x26   :  { %679 = vmatpush.bf16.msrb.mxu2 %v1315_v24  ;;  %630 = vmatpush.bf16.msrb.mxu1 %v1307_v25  ;;  %v1264_v24 = vld [vmem:[%s1892_s0 + $0x5c] sm:$0xf]  ;;  %v993_v25 = vld [vmem:[%s1892_s0 + $0x6c] sm:$0xf0] }
  0x28   :  { %728 = vmatpush.bf16.msrb.mxu3 %v1323_v26  ;;  %781 = vmatpush.bf16.msrb.mxu0 %v1327_v27  ;;  %v999_v26 = vld [vmem:[%s1892_s0 + $0x60] sm:$0xf]  ;;  %v1267_v27 = vld [vmem:[%s1892_s0 + $0x70] sm:$0xf0] }
  0x2a   :  { %680 = vmatpush.bf16.msrb.mxu2 %v1314_v28  ;;  %631 = vmatpush.bf16.msrb.mxu1 %v1306_v29  ;;  %v988_v28 = vor.u32 %v1263_v20, %v985_v21  ;;  %v992_v29 = vor.u32 %v1266_v23, %v991_v22 }
  0x2c   :  { %729 = vmatpush.bf16.msrb.mxu3 %v1322_v30  ;;  %782 = vmatpush.bf16.msrb.mxu0 %v1326_v31  ;;  %v996_v30 = vor.u32 %v1264_v24, %v993_v25  ;;  %v1000_v31 = vor.u32 %v1267_v27, %v999_v26  ;;  %v1288_v25 = vld [vmem:[%s1892_s0 + $0x11c] sm:$0xf]  ;;  %v1085_v26 = vld [vmem:[%s1892_s0 + $0x12c] sm:$0xf0]  ;;  %v1091_v27 = vld [vmem:[%s1892_s0 + $0x120] sm:$0xf] }
  0x2d   :  { %v1088_v36 = vor.u32 %v1288_v25, %v1085_v26 }
  0x2e   :  { %681 = vmatpush.bf16.msrb.mxu2 %v1313_v32  ;;  %632 = vmatpush.bf16.msrb.mxu1 %v1305_v33  ;;  %v1268_v32 = vld [vmem:[%s1892_s0 + $0x7c] sm:$0xf]  ;;  %v1005_v33 = vld [vmem:[%s1892_s0 + $0x8c] sm:$0xf0] }
  0x2f   :  { %v1008_v40 = vor.u32 %v1268_v32, %v1005_v33  ;;  %v1292_v32 = vld [vmem:[%s1892_s0 + $0x138] sm:$0xf0] }
  0x30   :  { %730 = vmatpush.bf16.msrb.mxu3 %v1321_v34  ;;  %783 = vmatpush.bf16.msrb.mxu0 %v1325_v43  ;;  %v1011_v34 = vld [vmem:[%s1892_s0 + $0x80] sm:$0xf]  ;;  %v1020_v43 = vor.u32 %v1272_v39, %v1019_v38 }
  0x31   :  { %603 = vmatmul.bf16.gmra.mxu1 %v1004_v46  ;;  %613 = vmatmul.bf16.gmra.mxu2 %v1044_v47  ;;  %v1012_v41 = vor.u32 %v1271_v35, %v1011_v34  ;;  %v1031_v46 = vld [vmem:[%s1892_s0 + $0xa8] sm:$0xf]  ;;  %v1276_v47 = vld [vmem:[%s1892_s0 + $0xb8] sm:$0xf0] }
  0x32   :  { %682 = vmatpush.bf16.msrb.mxu2 %v1312_v44  ;;  %633 = vmatpush.bf16.msrb.mxu1 %v1304_v45  ;;  %v1273_v44 = vld [vmem:[%s1892_s0 + $0xa4] sm:$0xf]  ;;  %v1025_v45 = vld [vmem:[%s1892_s0 + $0xb4] sm:$0xf0] }
  0x33   :  { %623 = vmatmul.bf16.gmra.mxu3 %v1084_v48  ;;  %593 = vmatmul.bf16.gmra.mxu0 %v964_v49  ;;  %v1274_v48 = vld [vmem:[%s1892_s0 + $0xac] sm:$0xf]  ;;  %v1033_v49 = vld [vmem:[%s1892_s0 + $0xbc] sm:$0xf0] }
  0x34   :  { %731 = vmatpush.bf16.msrb.mxu3 %v1320_v50  ;;  %v1039_v50 = vld [vmem:[%s1892_s0 + $0xb0] sm:$0xf] }
  0x36   :  { %683 = vmatpush.bf16.msrb.mxu2 %v1311_v51  ;;  %634 = vmatpush.bf16.msrb.mxu1 %v1303_v52  ;;  %v1277_v51 = vld [vmem:[%s1892_s0 + $0xc0] sm:$0xf0]  ;;  %v1028_v52 = vor.u32 %v1273_v44, %v1025_v45 }
  0x38   :  { %732 = vmatpush.bf16.msrb.mxu3 %v1319_v53  ;;  %v1032_v53 = vor.u32 %v1276_v47, %v1031_v46 }
  0x3a   :  { %684 = vmatpush.bf16.msrb.mxu2 %v1310_v54  ;;  %635 = vmatpush.bf16.msrb.mxu1 %v1302_v55  ;;  %v1036_v54 = vor.u32 %v1274_v48, %v1033_v49  ;;  %v1040_v55 = vor.u32 %v1277_v51, %v1039_v50 }
  0x3c   :  { %733 = vmatpush.bf16.msrb.mxu3 %v1318_v56  ;;  %v1278_v56 = vld [vmem:[%s1892_s0 + $0xcc] sm:$0xf] }
  0x3e   :  { %685 = vmatpush.bf16.msrb.mxu2 %v1309_v57  ;;  %636 = vmatpush.bf16.msrb.mxu1 %v1301_v58  ;;  %v1045_v57 = vld [vmem:[%s1892_s0 + $0xdc] sm:$0xf0]  ;;  %v1051_v58 = vld [vmem:[%s1892_s0 + $0xd0] sm:$0xf] }
  0x3f   :  { %v1048_v0 = vor.u32 %v1278_v56, %v1045_v57 }
  0x40   :  { %734 = vmatpush.bf16.msrb.mxu3 %v1317_v59  ;;  %v1281_v59 = vld [vmem:[%s1892_s0 + $0xe0] sm:$0xf0] }
  0x41   :  { %637 = vmatmul.bf16.vlgmr.msrb.gmra.mxu1 %v948_v4  ;;  %686 = vmatmul.bf16.vlgmr.msrb.gmra.mxu2 %v952_v5  ;;  %v1052_v1 = vor.u32 %v1281_v59, %v1051_v58  ;;  %v1283_v4 = vld [vmem:[%s1892_s0 + $0xf4] sm:$0xf]  ;;  %v1065_v5 = vld [vmem:[%s1892_s0 + $0x104] sm:$0xf0] }
  0x42   :  { %v1068_v12 = vor.u32 %v1283_v4, %v1065_v5 }
  0x43   :  { %735 = vmatmul.bf16.vlgmr.msrb.gmra.mxu3 %v956_v6  ;;  %1245 = vmatmul.msk.bf16.vlgmr.msrb.gmra.mxu0 %vm555_vm0, %v960_v7  ;;  %v1071_v6 = vld [vmem:[%s1892_s0 + $0xf8] sm:$0xf]  ;;  %v1286_v7 = vld [vmem:[%s1892_s0 + $0x108] sm:$0xf0] }
  0x44   :  { %v1072_v13 = vor.u32 %v1286_v7, %v1071_v6 }
  0x51   :  { %642 = vmatmul.bf16.gmra.mxu1 %v968_v16  ;;  %691 = vmatmul.bf16.gmra.mxu2 %v972_v17  ;;  %v1080_v16 = vor.u32 %v1287_v11, %v1079_v10 }
  0x53   :  { %740 = vmatmul.bf16.gmra.mxu3 %v976_v18  ;;  %1246 = vmatmul.msk.bf16.gmra.mxu0 %vm555_vm0, %v980_v19  ;;  %v1789_v18 = vld [vmem:[%s1891_s2] ss:$0 sm:$0xff] }
  0x61   :  { %647 = vmatmul.bf16.gmra.mxu1 %v988_v28  ;;  %696 = vmatmul.bf16.gmra.mxu2 %v992_v29  ;;  %v1291_v28 = vld [vmem:[%s1892_s0 + $0x130] sm:$0xf0]  ;;  %v1289_v29 = vld [vmem:[%s1892_s0 + $0x124] sm:$0xf] }
  0x62   :  { %v1092_v37 = vor.u32 %v1291_v28, %v1091_v27 }
  0x63   :  { %745 = vmatmul.bf16.gmra.mxu3 %v996_v30  ;;  %1247 = vmatmul.msk.bf16.gmra.mxu0 %vm555_vm0, %v1000_v31  ;;  %v1093_v30 = vld [vmem:[%s1892_s0 + $0x134] sm:$0xf0]  ;;  %v1099_v31 = vld [vmem:[%s1892_s0 + $0x128] sm:$0xf] }
  0x71   :  { %652 = vmatmul.bf16.gmra.mxu1 %v1008_v40  ;;  %701 = vmatmul.bf16.gmra.mxu2 %v1012_v41  ;;  %v1096_v40 = vor.u32 %v1289_v29, %v1093_v30  ;;  %v1100_v41 = vor.u32 %v1292_v32, %v1099_v31 }
  0x73   :  { %750 = vmatmul.bf16.gmra.mxu3 %v1016_v42  ;;  %1248 = vmatmul.msk.bf16.gmra.mxu0 %vm555_vm0, %v1020_v43 }
  0x81   :  { %657 = vmatmul.bf16.gmra.mxu1 %v1028_v52  ;;  %706 = vmatmul.bf16.gmra.mxu2 %v1032_v53 }
  0x83   :  { %755 = vmatmul.bf16.gmra.mxu3 %v1036_v54  ;;  %1249 = vmatmul.msk.bf16.gmra.mxu0 %vm555_vm0, %v1040_v55 }
  0x91   :  { %662 = vmatmul.bf16.gmra.mxu1 %v1048_v0  ;;  %711 = vmatmul.bf16.gmra.mxu2 %v1052_v1 }
  0x93   :  { %760 = vmatmul.bf16.gmra.mxu3 %v1056_v2  ;;  %1250 = vmatmul.msk.bf16.gmra.mxu0 %vm555_vm0, %v1060_v3 }
  0x9e   :  { %v1783_v14 = vpop.f32.mrf.mxu1 }
  0xa0   :  { %v589_v17 = vpop.f32.mrf.mxu0 }
  0xa1   :  { %667 = vmatmul.bf16.gmra.mxu1 %v1068_v12  ;;  %716 = vmatmul.bf16.gmra.mxu2 %v1072_v13  ;;  %v590_v55 = vadd.f32 %v1789_v18, %v589_v17 }
  0xa3   :  { %765 = vmatmul.bf16.gmra.mxu3 %v1076_v15  ;;  %1251 = vmatmul.msk.bf16.gmra.mxu0 %vm555_vm0, %v1080_v16 }
  0xa4   :  { %v609_v19 = vpop.f32.mrf.mxu2 }
  0xa5   :  { %v1792_v20 = vadd.f32 %v1789_v18, %v609_v19 }
  0xa6   :  { %v619_v21 = vpop.f32.mrf.mxu3  ;;  %v1797_v23 = vpop.f32.mrf.mxu1 }
  0xa7   :  { %v1795_v22 = vadd.f32 %v1789_v18, %v619_v21 }
  0xa8   :  { %v591_v24 = vpop.f32.mrf.mxu0 }
  0xa9   :  { %v592_v63 = vadd.f32 %v1789_v18, %v591_v24 }
  0xac   :  { %v611_v33 = vpop.f32.mrf.mxu2 }
  0xad   :  { %v1824_v34 = vadd.f32 %v1789_v18, %v611_v33 }
  0xae   :  { %v621_v35 = vpop.f32.mrf.mxu3  ;;  %v1829_v39 = vpop.f32.mrf.mxu1 }
  0xaf   :  { %v1827_v38 = vadd.f32 %v1789_v18, %v621_v35 }
  0xb0   :  { %v594_v42 = vpop.f32.mrf.mxu0 }
  0xb1   :  { %672 = vmatmul.bf16.gmra.mxu1 %v1088_v36  ;;  %721 = vmatmul.bf16.gmra.mxu2 %v1092_v37  ;;  %v595_v9 = vadd.f32 %v1789_v18, %v594_v42 }
  0xb3   :  { %770 = vmatmul.bf16.gmra.mxu3 %v1096_v40  ;;  %1252 = vmatmul.msk.bf16.gmra.mxu0 %vm555_vm0, %v1100_v41 }
  0xb4   :  { %v614_v43 = vpop.f32.mrf.mxu2 }
  0xb5   :  { %v1833_v44 = vadd.f32 %v1789_v18, %v614_v43 }
  0xb6   :  { %v624_v45 = vpop.f32.mrf.mxu3  ;;  %v1838_v47 = vpop.f32.mrf.mxu1 }
  0xb7   :  { %v1836_v46 = vadd.f32 %v1789_v18, %v624_v45 }
  0xb8   :  { %v596_v48 = vpop.f32.mrf.mxu0 }
  0xb9   :  { %v597_v26 = vadd.f32 %v1789_v18, %v596_v48 }
  0xbc   :  { %v616_v49 = vpop.f32.mrf.mxu2 }
  0xbd   :  { %v1841_v50 = vadd.f32 %v1789_v18, %v616_v49  ;;  %v600_v49 = vadd.f32 %v1789_v18, %v1783_v14  ;;  %v602_v14 = vadd.f32 %v1789_v18, %v1797_v23 }
  0xbe   :  { %v626_v51 = vpop.f32.mrf.mxu3  ;;  %v638_v53 = vpop.f32.mrf.mxu1 }
  0xbf   :  { %v1844_v52 = vadd.f32 %v1789_v18, %v626_v51  ;;  %v639_v56 = vadd.f32 %v638_v53, %v590_v55 }
  0xc0   :  { %v785_v54 = vpop.f32.mrf.mxu0 }
  0xc4   :  { %v687_v57 = vpop.f32.mrf.mxu2 }
  0xc5   :  { %v688_v58 = vadd.f32 %v687_v57, %v639_v56 }
  0xc6   :  { %v736_v59 = vpop.f32.mrf.mxu3  ;;  %v640_v60 = vpop.f32.mrf.mxu1 }
  0xc7   :  { %v737_v61 = vadd.f32 %v736_v59, %v688_v58  ;;  %v641_v2 = vadd.f32 %v640_v60, %v592_v63 }
  0xc8   :  { %v787_v62 = vpop.f32.mrf.mxu0 }
  0xc9   :  { %v786_v0 = vadd.f32 %v785_v54, %v737_v61 }
  0xcb   :  { %v825_v1 = vmul.f32 0.5, %v786_v0 }
  0xcc   :  { %v689_v3 = vpop.f32.mrf.mxu2 }
  0xcd   :  { %v690_v4 = vadd.f32 %v689_v3, %v641_v2  ;;  %1401 = vtanh.f32 %v825_v1 }
  0xce   :  { %v738_v5 = vpop.f32.mrf.mxu3  ;;  %v643_v6 = vpop.f32.mrf.mxu1 }
  0xcf   :  { %v739_v7 = vadd.f32 %v738_v5, %v690_v4  ;;  %v644_v12 = vadd.f32 %v643_v6, %v595_v9 }
  0xd0   :  { %v790_v8 = vpop.f32.mrf.mxu0 }
  0xd1   :  { %v788_v10 = vadd.f32 %v787_v62, %v739_v7 }
  0xd3   :  { %v826_v11 = vmul.f32 0.5, %v788_v10  ;;  %v1402_v15 = vpop.eup %1401 }
  0xd4   :  { %v692_v13 = vpop.f32.mrf.mxu2  ;;  %v857_v25 = vadd.f32 1.0, %v1402_v15  ;;  %v605_v15 = vadd.f32 %v1789_v18, %v1829_v39  ;;  %v607_v39 = vadd.f32 %v1789_v18, %v1838_v47 }
  0xd5   :  { %1403 = vtanh.f32 %v826_v11  ;;  %v693_v16 = vadd.f32 %v692_v13, %v644_v12 }
  0xd6   :  { %v741_v17 = vpop.f32.mrf.mxu3  ;;  %v645_v19 = vpop.f32.mrf.mxu1  ;;  %v873_v31 = vmul.f32 0.5, %v857_v25 }
  0xd7   :  { %v742_v21 = vadd.f32 %v741_v17, %v693_v16  ;;  %v646_v30 = vadd.f32 %v645_v19, %v597_v26 }
  0xd8   :  { %v792_v24 = vpop.f32.mrf.mxu0  ;;  %v889_v43 = vmul.f32 %v873_v31, %v786_v0 }
  0xd9   :  { %v791_v27 = vadd.f32 %v790_v8, %v742_v21 }
  0xdb   :  { %v1404_v28 = vpop.eup %1403  ;;  %v827_v29 = vmul.f32 0.5, %v791_v27 }
  0xdc   :  { %v858_v32 = vadd.f32 1.0, %v1404_v28  ;;  %v694_v33 = vpop.f32.mrf.mxu2 }
  0xdd   :  { %v695_v35 = vadd.f32 %v694_v33, %v646_v30  ;;  %1405 = vtanh.f32 %v827_v29 }
  0xde   :  { %v743_v36 = vpop.f32.mrf.mxu3  ;;  %v874_v37 = vmul.f32 0.5, %v858_v32  ;;  %v648_v40 = vpop.f32.mrf.mxu1 }
  0xdf   :  { %v744_v41 = vadd.f32 %v743_v36, %v695_v35  ;;  %v649_v54 = vadd.f32 %v648_v40, %v600_v49 }
  0xe0   :  { %v795_v42 = vpop.f32.mrf.mxu0  ;;  %v890_v45 = vmul.f32 %v874_v37, %v788_v10 }
  0xe1   :  { %v793_v48 = vadd.f32 %v792_v24, %v744_v41 }
  0xe2   :  { %v1332_v51 = vpack.c.bf16 %v890_v45, %v889_v43 }
  0xe3   :  { %v828_v53 = vmul.f32 0.5, %v793_v48  ;;  %v1406_v56 = vpop.eup %1405 }
  0xe4   :  { %1333 = vst [vmem:[%s1893_s3] sm:$0xff] %v1332_v51   ;;  %v697_v55 = vpop.f32.mrf.mxu2  ;;  %v859_v62 = vadd.f32 1.0, %v1406_v56 }
  0xe5   :  { %1407 = vtanh.f32 %v828_v53  ;;  %v698_v57 = vadd.f32 %v697_v55, %v649_v54 }
  0xe6   :  { %v746_v58 = vpop.f32.mrf.mxu3  ;;  %v650_v59 = vpop.f32.mrf.mxu1  ;;  %v875_v3 = vmul.f32 0.5, %v859_v62 }
  0xe7   :  { %v747_v60 = vadd.f32 %v746_v58, %v698_v57  ;;  %v651_v2 = vadd.f32 %v650_v59, %v602_v14 }
  0xe8   :  { %v797_v61 = vpop.f32.mrf.mxu0  ;;  %v891_v12 = vmul.f32 %v875_v3, %v791_v27 }
  0xe9   :  { %v796_v63 = vadd.f32 %v795_v42, %v747_v60 }
  0xeb   :  { %v1408_v0 = vpop.eup %1407  ;;  %v829_v1 = vmul.f32 0.5, %v796_v63 }
  0xec   :  { %v860_v4 = vadd.f32 1.0, %v1408_v0  ;;  %v699_v5 = vpop.f32.mrf.mxu2 }
  0xed   :  { %v700_v6 = vadd.f32 %v699_v5, %v651_v2  ;;  %1409 = vtanh.f32 %v829_v1 }
  0xee   :  { %v748_v7 = vpop.f32.mrf.mxu3  ;;  %v876_v8 = vmul.f32 0.5, %v860_v4  ;;  %v653_v9 = vpop.f32.mrf.mxu1 }
  0xef   :  { %v749_v10 = vadd.f32 %v748_v7, %v700_v6  ;;  %v654_v19 = vadd.f32 %v653_v9, %v605_v15 }
  0xf0   :  { %v800_v11 = vpop.f32.mrf.mxu0  ;;  %v892_v13 = vmul.f32 %v876_v8, %v793_v48 }
  0xf1   :  { %v798_v23 = vadd.f32 %v797_v61, %v749_v10 }
  0xf2   :  { %v1337_v16 = vpack.c.bf16 %v892_v13, %v891_v12 }
  0xf3   :  { %v830_v17 = vmul.f32 0.5, %v798_v23  ;;  %v1410_v24 = vpop.eup %1409 }
  0xf4   :  { %1369 = vst [vmem:[%s1893_s3 + $0x8] sm:$0xff] %v1337_v16   ;;  %v702_v21 = vpop.f32.mrf.mxu2  ;;  %v861_v30 = vadd.f32 1.0, %v1410_v24 }
  0xf5   :  { %1411 = vtanh.f32 %v830_v17  ;;  %v703_v25 = vadd.f32 %v702_v21, %v654_v19 }
  0xf6   :  { %v751_v26 = vpop.f32.mrf.mxu3  ;;  %v655_v28 = vpop.f32.mrf.mxu1  ;;  %v877_v36 = vmul.f32 0.5, %v861_v30 }
  0xf7   :  { %v752_v29 = vadd.f32 %v751_v26, %v703_v25  ;;  %v656_v35 = vadd.f32 %v655_v28, %v607_v39 }
  0xf8   :  { %v802_v27 = vpop.f32.mrf.mxu0  ;;  %v893_v51 = vmul.f32 %v877_v36, %v796_v63 }
  0xf9   :  { %v801_v31 = vadd.f32 %v800_v11, %v752_v29 }
  0xfb   :  { %v1412_v32 = vpop.eup %1411  ;;  %v831_v33 = vmul.f32 0.5, %v801_v31 }
  0xfc   :  { %v862_v37 = vadd.f32 1.0, %v1412_v32  ;;  %v704_v40 = vpop.f32.mrf.mxu2 }
  0xfd   :  { %v705_v41 = vadd.f32 %v704_v40, %v656_v35  ;;  %1413 = vtanh.f32 %v831_v33 }
  0xfe   :  { %v753_v42 = vpop.f32.mrf.mxu3  ;;  %v878_v43 = vmul.f32 0.5, %v862_v37  ;;  %v658_v45 = vpop.f32.mrf.mxu1 }
  0xff   :  { %v754_v49 = vadd.f32 %v753_v42, %v705_v41  ;;  %v659_v18 = vadd.f32 %v658_v45, %v1792_v20 }
 0x100   :  { %v805_v48 = vpop.f32.mrf.mxu0  ;;  %v894_v53 = vmul.f32 %v878_v43, %v798_v23 }
 0x101   :  { %v803_v54 = vadd.f32 %v802_v27, %v754_v49 }
 0x102   :  { %v1342_v55 = vpack.c.bf16 %v894_v53, %v893_v51 }
 0x103   :  { %v832_v56 = vmul.f32 0.5, %v803_v54  ;;  %v1414_v57 = vpop.eup %1413 }
 0x104   :  { %1370 = vst [vmem:[%s1893_s3 + $0x10] sm:$0xff] %v1342_v55   ;;  %v707_v47 = vpop.f32.mrf.mxu2  ;;  %v863_v14 = vadd.f32 1.0, %v1414_v57 }
 0x105   :  { %1415 = vtanh.f32 %v832_v56  ;;  %v708_v58 = vadd.f32 %v707_v47, %v659_v18 }
 0x106   :  { %v756_v59 = vpop.f32.mrf.mxu3  ;;  %v660_v60 = vpop.f32.mrf.mxu1  ;;  %v879_v3 = vmul.f32 0.5, %v863_v14 }
 0x107   :  { %v757_v61 = vadd.f32 %v756_v59, %v708_v58  ;;  %v661_v2 = vadd.f32 %v660_v60, %v1824_v34 }
 0x108   :  { %v807_v62 = vpop.f32.mrf.mxu0  ;;  %v895_v11 = vmul.f32 %v879_v3, %v801_v31 }
 0x109   :  { %v806_v63 = vadd.f32 %v805_v48, %v757_v61 }
 0x10b   :  { %v1416_v0 = vpop.eup %1415  ;;  %v833_v1 = vmul.f32 0.5, %v806_v63 }
 0x10c   :  { %v864_v20 = vadd.f32 1.0, %v1416_v0  ;;  %v709_v4 = vpop.f32.mrf.mxu2 }
 0x10d   :  { %v710_v5 = vadd.f32 %v709_v4, %v661_v2  ;;  %1417 = vtanh.f32 %v833_v1 }
 0x10e   :  { %v758_v6 = vpop.f32.mrf.mxu3  ;;  %v880_v7 = vmul.f32 0.5, %v864_v20  ;;  %v663_v8 = vpop.f32.mrf.mxu1 }
 0x10f   :  { %v759_v9 = vadd.f32 %v758_v6, %v710_v5  ;;  %v664_v16 = vadd.f32 %v663_v8, %v1833_v44 }
 0x110   :  { %v810_v10 = vpop.f32.mrf.mxu0  ;;  %v896_v12 = vmul.f32 %v880_v7, %v803_v54 }
 0x111   :  { %v808_v13 = vadd.f32 %v807_v62, %v759_v9 }
 0x112   :  { %v1347_v15 = vpack.c.bf16 %v896_v12, %v895_v11 }
 0x113   :  { %v834_v23 = vmul.f32 0.5, %v808_v13  ;;  %v1418_v17 = vpop.eup %1417 }
 0x114   :  { %1371 = vst [vmem:[%s1893_s3 + $0x18] sm:$0xff] %v1347_v15   ;;  %v712_v34 = vpop.f32.mrf.mxu2  ;;  %v865_v26 = vadd.f32 1.0, %v1418_v17 }
 0x115   :  { %1419 = vtanh.f32 %v834_v23  ;;  %v713_v19 = vadd.f32 %v712_v34, %v664_v16 }
 0x116   :  { %v761_v21 = vpop.f32.mrf.mxu3  ;;  %v665_v24 = vpop.f32.mrf.mxu1  ;;  %v881_v31 = vmul.f32 0.5, %v865_v26 }
 0x117   :  { %v762_v25 = vadd.f32 %v761_v21, %v713_v19  ;;  %v666_v39 = vadd.f32 %v665_v24, %v1841_v50 }
 0x118   :  { %v812_v28 = vpop.f32.mrf.mxu0  ;;  %v897_v41 = vmul.f32 %v881_v31, %v806_v63 }
 0x119   :  { %v811_v29 = vadd.f32 %v810_v10, %v762_v25 }
 0x11b   :  { %v1420_v27 = vpop.eup %1419  ;;  %v835_v30 = vmul.f32 0.5, %v811_v29 }
 0x11c   :  { %v866_v44 = vadd.f32 1.0, %v1420_v27  ;;  %v714_v32 = vpop.f32.mrf.mxu2 }
 0x11d   :  { %v715_v33 = vadd.f32 %v714_v32, %v666_v39  ;;  %1421 = vtanh.f32 %v835_v30 }
 0x11e   :  { %v763_v35 = vpop.f32.mrf.mxu3  ;;  %v882_v36 = vmul.f32 0.5, %v866_v44  ;;  %v668_v37 = vpop.f32.mrf.mxu1 }
 0x11f   :  { %v764_v40 = vadd.f32 %v763_v35, %v715_v33  ;;  %v669_v51 = vadd.f32 %v668_v37, %v1795_v22 }
 0x120   :  { %v898_v42 = vmul.f32 %v882_v36, %v808_v13  ;;  %v815_v49 = vpop.f32.mrf.mxu0 }
 0x121   :  { %v813_v43 = vadd.f32 %v812_v28, %v764_v40 }
 0x122   :  { %v1352_v45 = vpack.c.bf16 %v898_v42, %v897_v41 }
 0x123   :  { %v836_v48 = vmul.f32 0.5, %v813_v43  ;;  %v1422_v53 = vpop.eup %1421 }
 0x124   :  { %1372 = vst [vmem:[%s1893_s3 + $0x20] sm:$0xff] %v1352_v45   ;;  %v717_v50 = vpop.f32.mrf.mxu2  ;;  %v867_v47 = vadd.f32 1.0, %v1422_v53 }
 0x125   :  { %1423 = vtanh.f32 %v836_v48  ;;  %v718_v54 = vadd.f32 %v717_v50, %v669_v51 }
 0x126   :  { %v766_v55 = vpop.f32.mrf.mxu3  ;;  %v670_v56 = vpop.f32.mrf.mxu1  ;;  %v883_v61 = vmul.f32 0.5, %v867_v47 }
 0x127   :  { %v767_v18 = vadd.f32 %v766_v55, %v718_v54  ;;  %v671_v60 = vadd.f32 %v670_v56, %v1827_v38 }
 0x128   :  { %v817_v22 = vpop.f32.mrf.mxu0  ;;  %v899_v20 = vmul.f32 %v883_v61, %v811_v29 }
 0x129   :  { %v816_v57 = vadd.f32 %v815_v49, %v767_v18 }
 0x12b   :  { %v1424_v58 = vpop.eup %1423  ;;  %v837_v59 = vmul.f32 0.5, %v816_v57 }
 0x12c   :  { %v868_v62 = vadd.f32 1.0, %v1424_v58  ;;  %v719_v14 = vpop.f32.mrf.mxu2 }
 0x12d   :  { %v720_v63 = vadd.f32 %v719_v14, %v671_v60  ;;  %1425 = vtanh.f32 %v837_v59 }
 0x12e   :  { %v768_v0 = vpop.f32.mrf.mxu3  ;;  %v884_v1 = vmul.f32 0.5, %v868_v62  ;;  %v673_v2 = vpop.f32.mrf.mxu1 }
 0x12f   :  { %v769_v3 = vadd.f32 %v768_v0, %v720_v63  ;;  %v674_v8 = vadd.f32 %v673_v2, %v1836_v46 }
 0x130   :  { %v900_v4 = vmul.f32 %v884_v1, %v813_v43  ;;  %v820_v12 = vpop.f32.mrf.mxu0 }
 0x131   :  { %v818_v5 = vadd.f32 %v817_v22, %v769_v3 }
 0x132   :  { %v1357_v6 = vpack.c.bf16 %v900_v4, %v899_v20 }
 0x133   :  { %v838_v7 = vmul.f32 0.5, %v818_v5  ;;  %v1426_v9 = vpop.eup %1425 }
 0x134   :  { %1373 = vst [vmem:[%s1893_s3 + $0x28] sm:$0xff] %v1357_v6   ;;  %v722_v38 = vpop.f32.mrf.mxu2  ;;  %v869_v15 = vadd.f32 1.0, %v1426_v9 }
 0x135   :  { %1427 = vtanh.f32 %v838_v7  ;;  %v723_v10 = vadd.f32 %v722_v38, %v674_v8 }
 0x136   :  { %v771_v11 = vpop.f32.mrf.mxu3  ;;  %v675_v23 = vpop.f32.mrf.mxu1  ;;  %v885_v21 = vmul.f32 0.5, %v869_v15 }
 0x137   :  { %v772_v13 = vadd.f32 %v771_v11, %v723_v10  ;;  %v676_v19 = vadd.f32 %v675_v23, %v1844_v52 }
 0x138   :  { %v901_v27 = vmul.f32 %v885_v21, %v816_v57  ;;  %v822_v39 = vpop.f32.mrf.mxu0 }
 0x139   :  { %v821_v16 = vadd.f32 %v820_v12, %v772_v13 }
 0x13b   :  { %v1428_v34 = vpop.eup %1427  ;;  %v839_v17 = vmul.f32 0.5, %v821_v16 }
 0x13c   :  { %v870_v46 = vadd.f32 1.0, %v1428_v34  ;;  %v724_v24 = vpop.f32.mrf.mxu2 }
 0x13d   :  { %v725_v25 = vadd.f32 %v724_v24, %v676_v19  ;;  %1429 = vtanh.f32 %v839_v17 }
 0x13e   :  { %v886_v26 = vmul.f32 0.5, %v870_v46  ;;  %v773_v28 = vpop.f32.mrf.mxu3 }
 0x13f   :  { %v774_v29 = vadd.f32 %v773_v28, %v725_v25 }
 0x140   :  { %v902_v30 = vmul.f32 %v886_v26, %v818_v5 }
 0x141   :  { %v823_v31 = vadd.f32 %v822_v39, %v774_v29 }
 0x142   :  { %v1362_v44 = vpack.c.bf16 %v902_v30, %v901_v27 }
 0x143   :  { %v840_v32 = vmul.f32 0.5, %v823_v31  ;;  %v1430_v33 = vpop.eup %1429 }
 0x144   :  { %1374 = vst [vmem:[%s1893_s3 + $0x30] sm:$0xff] %v1362_v44   ;;  %v871_v52 = vadd.f32 1.0, %v1430_v33 }
 0x145   :  { %1431 = vtanh.f32 %v840_v32 }
 0x146   :  { %v887_v36 = vmul.f32 0.5, %v871_v52 }
 0x148   :  { %v903_v41 = vmul.f32 %v887_v36, %v821_v16 }
 0x14b   :  { %v1432_v35 = vpop.eup %1431 }
 0x14c   :  { %v872_v37 = vadd.f32 1.0, %v1432_v35 }
 0x14e   :  { %v888_v40 = vmul.f32 0.5, %v872_v37 }
 0x150   :  { %v904_v42 = vmul.f32 %v888_v40, %v823_v31 }
 0x152   :  { %v1367_v43 = vpack.c.bf16 %v904_v42, %v903_v41 }
 0x154   :  { %1375 = vst [vmem:[%s1893_s3 + $0x38] sm:$0xff] %v1367_v43  }

// kernel: _forward_impl.13
= control target key start
LH: loop header
LB: loop body
LE: loop exit
PB: predicated region body
PF: predicated region fallthrough
CT: control target
= control target key end

     0   :  { %s867_s12 = smov 0   ;;  %s869_s13 = smov 0   ;;  %s1018_s0 = inlined_call_operand.vmem [shape: bf16[3,128,128], index: 0, kind: input, shape index: {}]   ;;  %s1019_s1 = inlined_call_operand.vmem [shape: bf16[3,128,32], index: 1, kind: input, shape index: {}]   ;;  %s1020_s2 = inlined_call_operand.vmem [shape: f32[3,1,32], index: 2, kind: input, shape index: {}]   ;;  %s1021_s3 = inlined_call_operand.vmem [shape: bf16[3,128,32], index: 3, kind: output, shape index: {}]  }
   0x1   :  { %s871_s14 = smov 0  }
   0x2 LB: > { %s25_s15 = sadd.s32 1, %s841_s13  ;;  %p650_p0 = scmp.ge.s32.totalorder %s845_s14, 1  ;;  %s845_s14 = sphi %s871_s14, %s13_s14   ;;  %s841_s13 = sphi %s869_s13, %s1023_s13   ;;  %s837_s12 = sphi %s867_s12, %s1022_s12  }
   0x3   : > { %p27_p1 = scmp.ge.s32.totalorder %s25_s15, 3  ;;  %p176_p2 = scmp.lt.s32.totalorder %s845_s14, 4 }
   0x5   : > { %s1025_s15 = smov (%p27_p1, %s25_s15), 0  ;;  %p177_p3 = pnand %p650_p0, %p176_p2 }
   0x6   : > { %p217_p4 = scmp.lt.s32.totalorder (!%p177_p3), %s837_s12, 2 }
   0x7   : > { %180 = sbr.rel (%p177_p3) target bundleno = 225 (0xe1), region = 32 }
   0xc   : > { %s1027_s12 = smov (!%p217_p4, %s837_s12), 2  ;;  %vm521_vm0 = vcmask 257024  }
   0xd   : > { %s888_s16 = sshll.u32 %s1027_s12, 6  ;;  %s233_s19 = scalar_lea.vmem %s1020_s2, %s1027_s12 }
   0xe   : > { %s898_s22 = scalar_lea.vmem %s1019_s1, %s888_s16  ;;  %s224_s25 = scalar_lea.vmem %s1018_s0, %s888_s16  ;;  %v917_v16 = vld [vmem:[%s233_s19] ss:$0 sm:$0xff] }
   0xf   : > { %v741_v0 = vld [vmem:[%s898_s22 + $0x38] sm:$0xff]  ;;  %v740_v1 = vld [vmem:[%s898_s22 + $0x30] sm:$0xff]  ;;  %v739_v2 = vld [vmem:[%s898_s22 + $0x28] sm:$0xff]  ;;  %s938_s30 = scalar_lea.vmem %s1021_s3, %s888_s16 }
  0x10   : > { %376 = vmatpush.bf16.msra.mxu0 %v741_v0  ;;  %742 = vmatpush.bf16.msra.mxu1 %v741_v0  ;;  %v738_v3 = vld [vmem:[%s898_s22 + $0x20] sm:$0xff]  ;;  %v737_v4 = vld [vmem:[%s898_s22 + $0x18] sm:$0xff]  ;;  %v736_v5 = vld [vmem:[%s898_s22 + $0x10] sm:$0xff] }
  0x11   : > { %743 = vmatpush.bf16.msra.mxu2 %v741_v0  ;;  %744 = vmatpush.bf16.msra.mxu3 %v741_v0  ;;  %v735_v6 = vld [vmem:[%s898_s22 + $0x8] sm:$0xff]  ;;  %v734_v7 = vld [vmem:[%s898_s22] sm:$0xff]  ;;  %v728_v9 = vld [vmem:[%s224_s25 + $0x10] sm:$0xff] }
  0x12   : > { %v726_v8 = vld [vmem:[%s224_s25] sm:$0xff]  ;;  %v732_v11 = vld [vmem:[%s224_s25 + $0x30] sm:$0xff]  ;;  %v727_v12 = vld [vmem:[%s224_s25 + $0x8] sm:$0xff] }
  0x13   : > { %v730_v10 = vld [vmem:[%s224_s25 + $0x20] sm:$0xff]  ;;  %v729_v13 = vld [vmem:[%s224_s25 + $0x18] sm:$0xff]  ;;  %v731_v14 = vld [vmem:[%s224_s25 + $0x28] sm:$0xff] }
  0x14   : > { %377 = vmatpush.bf16.msra.mxu0 %v740_v1  ;;  %745 = vmatpush.bf16.msra.mxu1 %v740_v1  ;;  %v733_v15 = vld [vmem:[%s224_s25 + $0x38] sm:$0xff] }
  0x15   : > { %746 = vmatpush.bf16.msra.mxu2 %v740_v1  ;;  %747 = vmatpush.bf16.msra.mxu3 %v740_v1 }
  0x18   : > { %378 = vmatpush.bf16.msra.mxu0 %v739_v2  ;;  %748 = vmatpush.bf16.msra.mxu1 %v739_v2 }
  0x19   : > { %749 = vmatpush.bf16.msra.mxu2 %v739_v2  ;;  %750 = vmatpush.bf16.msra.mxu3 %v739_v2 }
  0x1c   : > { %379 = vmatpush.bf16.msra.mxu0 %v738_v3  ;;  %751 = vmatpush.bf16.msra.mxu1 %v738_v3 }
  0x1d   : > { %752 = vmatpush.bf16.msra.mxu2 %v738_v3  ;;  %753 = vmatpush.bf16.msra.mxu3 %v738_v3 }
  0x20   : > { %380 = vmatpush.bf16.msra.mxu0 %v737_v4  ;;  %754 = vmatpush.bf16.msra.mxu1 %v737_v4 }
  0x21   : > { %755 = vmatpush.bf16.msra.mxu2 %v737_v4  ;;  %756 = vmatpush.bf16.msra.mxu3 %v737_v4 }
  0x24   : > { %381 = vmatpush.bf16.msra.mxu0 %v736_v5  ;;  %757 = vmatpush.bf16.msra.mxu1 %v736_v5 }
  0x25   : > { %758 = vmatpush.bf16.msra.mxu2 %v736_v5  ;;  %759 = vmatpush.bf16.msra.mxu3 %v736_v5 }
  0x28   : > { %382 = vmatpush.bf16.msra.mxu0 %v735_v6  ;;  %760 = vmatpush.bf16.msra.mxu1 %v735_v6 }
  0x29   : > { %761 = vmatpush.bf16.msra.mxu2 %v735_v6  ;;  %762 = vmatpush.bf16.msra.mxu3 %v735_v6 }
  0x2c   : > { %383 = vmatpush.bf16.msra.mxu0 %v734_v7  ;;  %763 = vmatpush.bf16.msra.mxu1 %v734_v7 }
  0x2d   : > { %764 = vmatpush.bf16.msra.mxu2 %v734_v7  ;;  %765 = vmatpush.bf16.msra.mxu3 %v734_v7 }
  0x2f   : > { %384 = vmatmul.bf16.vlgmr.msra.gmra.mxu0 %v726_v8  ;;  %394 = vmatmul.bf16.vlgmr.msra.gmra.mxu1 %v728_v9 }
  0x30   : > { %404 = vmatmul.bf16.vlgmr.msra.gmra.mxu2 %v730_v10  ;;  %414 = vmatmul.bf16.vlgmr.msra.gmra.mxu3 %v732_v11 }
  0x3f   : > { %389 = vmatmul.bf16.gmra.mxu0 %v727_v12  ;;  %399 = vmatmul.bf16.gmra.mxu1 %v729_v13 }
  0x40   : > { %409 = vmatmul.bf16.gmra.mxu2 %v731_v14  ;;  %419 = vmatmul.bf16.gmra.mxu3 %v733_v15 }
  0xac   : > { %v385_v17 = vpop.f32.mrf.mxu0  ;;  %v395_v18 = vpop.f32.mrf.mxu1 }
  0xad   : > { %v386_v19 = vadd.f32 %v917_v16, %v385_v17  ;;  %v396_v20 = vadd.f32 %v917_v16, %v395_v18 }
  0xaf   : > { %v425_v21 = vmul.f32 0.5, %v386_v19  ;;  %v429_v22 = vmul.f32 0.5, %v396_v20 }
  0xb1   : > { %791 = vtanh.f32 %v425_v21 }
  0xb2   : > { %793 = vtanh.f32 %v429_v22 }
  0xb3   : > { %v405_v23 = vpop.f32.mrf.mxu2  ;;  %v415_v24 = vpop.f32.mrf.mxu3 }
  0xb4   : > { %v406_v25 = vadd.f32 %v917_v16, %v405_v23  ;;  %v416_v26 = vadd.f32 %v917_v16, %v415_v24  ;;  %v387_v27 = vpop.f32.mrf.mxu0  ;;  %v397_v28 = vpop.f32.mrf.mxu1 }
  0xb5   : > { %v388_v29 = vadd.f32 %v917_v16, %v387_v27  ;;  %v925_v30 = vadd.f32 %v917_v16, %v397_v28 }
  0xb6   : > { %v433_v31 = vmul.f32 0.5, %v406_v25  ;;  %v437_v32 = vmul.f32 0.5, %v416_v26 }
  0xb7   : > { %v792_v33 = vpop.eup %791  ;;  %v426_v34 = vmul.f32 0.5, %v388_v29  ;;  %v430_v35 = vmul.f32 0.5, %v925_v30 }
  0xb8   : > { %v794_v36 = vpop.eup %793  ;;  %v457_v37 = vadd.f32 1.0, %v792_v33  ;;  %795 = vtanh.f32 %v433_v31 }
  0xb9   : > { %v461_v38 = vadd.f32 1.0, %v794_v36  ;;  %797 = vtanh.f32 %v437_v32 }
  0xba   : > { %v473_v39 = vmul.f32 0.5, %v457_v37  ;;  %799 = vtanh.f32 %v426_v34 }
  0xbb   : > { %v477_v40 = vmul.f32 0.5, %v461_v38  ;;  %801 = vtanh.f32 %v430_v35  ;;  %v407_v41 = vpop.f32.mrf.mxu2  ;;  %v417_v42 = vpop.f32.mrf.mxu3 }
  0xbc   : > { %v489_v43 = vmul.f32 %v473_v39, %v386_v19  ;;  %v929_v44 = vadd.f32 %v917_v16, %v407_v41  ;;  %v932_v45 = vadd.f32 %v917_v16, %v417_v42  ;;  %v390_v46 = vpop.f32.mrf.mxu0  ;;  %v400_v47 = vpop.f32.mrf.mxu1 }
  0xbd   : > { %v493_v48 = vmul.f32 %v477_v40, %v396_v20  ;;  %v941_v49 = vadd.f32 %v917_v16, %v390_v46  ;;  %v944_v50 = vadd.f32 %v917_v16, %v400_v47 }
  0xbe   : > { %v796_v51 = vpop.eup %795  ;;  %v505_v52 = vpack.c.bf16 %v489_v43, %v489_v43  ;;  %v434_v53 = vmul.f32 0.5, %v929_v44  ;;  %v438_v54 = vmul.f32 0.5, %v932_v45 }
  0xbf   : > { %v798_v55 = vpop.eup %797  ;;  %v509_v56 = vpack.c.bf16 %v493_v48, %v493_v48  ;;  %v465_v57 = vadd.f32 1.0, %v796_v51  ;;  %v427_v58 = vmul.f32 0.5, %v941_v49  ;;  %v431_v59 = vmul.f32 0.5, %v944_v50 }
  0xc0   : > { %v800_v60 = vpop.eup %799  ;;  %522 = vst.msk [vmem:[%s938_s30] sm:$0xf] %vm521_vm0, %v505_v52  ;;  %v469_v61 = vadd.f32 1.0, %v798_v55  ;;  %803 = vtanh.f32 %v434_v53 }
  0xc1   : > { %v802_v62 = vpop.eup %801  ;;  %526 = vst.msk [vmem:[%s938_s30 + $0x10] sm:$0xf] %vm521_vm0, %v509_v56  ;;  %v481_v63 = vmul.f32 0.5, %v465_v57  ;;  %v458_v0 = vadd.f32 1.0, %v800_v60  ;;  %805 = vtanh.f32 %v438_v54 }
  0xc2   : > { %v485_v1 = vmul.f32 0.5, %v469_v61  ;;  %v462_v2 = vadd.f32 1.0, %v802_v62  ;;  %807 = vtanh.f32 %v427_v58 }
  0xc3   : > { %v497_v3 = vmul.f32 %v481_v63, %v406_v25  ;;  %v474_v4 = vmul.f32 0.5, %v458_v0  ;;  %809 = vtanh.f32 %v431_v59  ;;  %v410_v5 = vpop.f32.mrf.mxu2  ;;  %v420_v6 = vpop.f32.mrf.mxu3 }
  0xc4   : > { %v501_v7 = vmul.f32 %v485_v1, %v416_v26  ;;  %v478_v8 = vmul.f32 0.5, %v462_v2  ;;  %v955_v9 = vadd.f32 %v917_v16, %v410_v5  ;;  %v958_v10 = vadd.f32 %v917_v16, %v420_v6  ;;  %v392_v11 = vpop.f32.mrf.mxu0  ;;  %v402_v12 = vpop.f32.mrf.mxu1 }
  0xc5   : > { %v513_v13 = vpack.c.bf16 %v497_v3, %v497_v3  ;;  %v490_v14 = vmul.f32 %v474_v4, %v388_v29  ;;  %v961_v15 = vadd.f32 %v917_v16, %v392_v11  ;;  %v964_v17 = vadd.f32 %v917_v16, %v402_v12 }
  0xc6   : > { %v804_v18 = vpop.eup %803  ;;  %v517_v19 = vpack.c.bf16 %v501_v7, %v501_v7  ;;  %v494_v20 = vmul.f32 %v478_v8, %v925_v30  ;;  %v435_v21 = vmul.f32 0.5, %v955_v9  ;;  %v439_v22 = vmul.f32 0.5, %v958_v10 }
  0xc7   : > { %v806_v23 = vpop.eup %805  ;;  %530 = vst.msk [vmem:[%s938_s30 + $0x20] sm:$0xf] %vm521_vm0, %v513_v13  ;;  %v506_v24 = vpack.c.bf16 %v490_v14, %v490_v14  ;;  %v466_v25 = vadd.f32 1.0, %v804_v18  ;;  %v428_v26 = vmul.f32 0.5, %v961_v15  ;;  %v432_v27 = vmul.f32 0.5, %v964_v17 }
  0xc8   : > { %v808_v28 = vpop.eup %807  ;;  %534 = vst.msk [vmem:[%s938_s30 + $0x30] sm:$0xf] %vm521_vm0, %v517_v19  ;;  %v510_v29 = vpack.c.bf16 %v494_v20, %v494_v20  ;;  %v470_v31 = vadd.f32 1.0, %v806_v23  ;;  %811 = vtanh.f32 %v435_v21 }
  0xc9   : > { %v810_v30 = vpop.eup %809  ;;  %523 = vst.msk [vmem:[%s938_s30 + $0x4] sm:$0xf] %vm521_vm0, %v506_v24  ;;  %v482_v32 = vmul.f32 0.5, %v466_v25  ;;  %v459_v33 = vadd.f32 1.0, %v808_v28  ;;  %813 = vtanh.f32 %v439_v22 }
  0xca   : > { %527 = vst.msk [vmem:[%s938_s30 + $0x14] sm:$0xf] %vm521_vm0, %v510_v29  ;;  %v486_v34 = vmul.f32 0.5, %v470_v31  ;;  %v463_v35 = vadd.f32 1.0, %v810_v30  ;;  %815 = vtanh.f32 %v428_v26 }
  0xcb   : > { %v498_v36 = vmul.f32 %v482_v32, %v929_v44  ;;  %v475_v37 = vmul.f32 0.5, %v459_v33  ;;  %817 = vtanh.f32 %v432_v27  ;;  %v412_v38 = vpop.f32.mrf.mxu2  ;;  %v422_v39 = vpop.f32.mrf.mxu3 }
  0xcc   : > { %v502_v40 = vmul.f32 %v486_v34, %v932_v45  ;;  %v479_v41 = vmul.f32 0.5, %v463_v35  ;;  %v413_v42 = vadd.f32 %v917_v16, %v412_v38  ;;  %v423_v43 = vadd.f32 %v917_v16, %v422_v39 }
  0xcd   : > { %v514_v46 = vpack.c.bf16 %v498_v36, %v498_v36  ;;  %v491_v47 = vmul.f32 %v475_v37, %v941_v49 }
  0xce   : > { %v812_v48 = vpop.eup %811  ;;  %v518_v51 = vpack.c.bf16 %v502_v40, %v502_v40  ;;  %v495_v44 = vmul.f32 %v479_v41, %v944_v50  ;;  %v436_v52 = vmul.f32 0.5, %v413_v42  ;;  %v440_v53 = vmul.f32 0.5, %v423_v43 }
  0xcf   : > { %v814_v54 = vpop.eup %813  ;;  %531 = vst.msk [vmem:[%s938_s30 + $0x24] sm:$0xf] %vm521_vm0, %v514_v46  ;;  %v507_v45 = vpack.c.bf16 %v491_v47, %v491_v47  ;;  %v467_v55 = vadd.f32 1.0, %v812_v48 }
  0xd0   : > { %v816_v56 = vpop.eup %815  ;;  %535 = vst.msk [vmem:[%s938_s30 + $0x34] sm:$0xf] %vm521_vm0, %v518_v51  ;;  %v511_v16 = vpack.c.bf16 %v495_v44, %v495_v44  ;;  %v471_v57 = vadd.f32 1.0, %v814_v54  ;;  %819 = vtanh.f32 %v436_v52 }
  0xd1   : > { %v818_v49 = vpop.eup %817  ;;  %524 = vst.msk [vmem:[%s938_s30 + $0x8] sm:$0xf] %vm521_vm0, %v507_v45  ;;  %v483_v58 = vmul.f32 0.5, %v467_v55  ;;  %v460_v50 = vadd.f32 1.0, %v816_v56  ;;  %821 = vtanh.f32 %v440_v53 }
  0xd2   : > { %528 = vst.msk [vmem:[%s938_s30 + $0x18] sm:$0xf] %vm521_vm0, %v511_v16  ;;  %v487_v59 = vmul.f32 0.5, %v471_v57  ;;  %v464_v60 = vadd.f32 1.0, %v818_v49 }
  0xd3   : > { %v499_v61 = vmul.f32 %v483_v58, %v955_v9  ;;  %v476_v62 = vmul.f32 0.5, %v460_v50 }
  0xd4   : > { %v503_v63 = vmul.f32 %v487_v59, %v958_v10  ;;  %v480_v0 = vmul.f32 0.5, %v464_v60 }
  0xd5   : > { %v515_v1 = vpack.c.bf16 %v499_v61, %v499_v61  ;;  %v492_v2 = vmul.f32 %v476_v62, %v961_v15 }
  0xd6   : > { %v820_v3 = vpop.eup %819  ;;  %v519_v4 = vpack.c.bf16 %v503_v63, %v503_v63  ;;  %v496_v5 = vmul.f32 %v480_v0, %v964_v17 }
  0xd7   : > { %v822_v6 = vpop.eup %821  ;;  %532 = vst.msk [vmem:[%s938_s30 + $0x28] sm:$0xf] %vm521_vm0, %v515_v1  ;;  %v508_v7 = vpack.c.bf16 %v492_v2, %v492_v2  ;;  %v468_v8 = vadd.f32 1.0, %v820_v3 }
  0xd8   : > { %536 = vst.msk [vmem:[%s938_s30 + $0x38] sm:$0xf] %vm521_vm0, %v519_v4  ;;  %v512_v9 = vpack.c.bf16 %v496_v5, %v496_v5  ;;  %v472_v10 = vadd.f32 1.0, %v822_v6 }
  0xd9   : > { %525 = vst.msk [vmem:[%s938_s30 + $0xc] sm:$0xf] %vm521_vm0, %v508_v7  ;;  %v484_v11 = vmul.f32 0.5, %v468_v8 }
  0xda   : > { %529 = vst.msk [vmem:[%s938_s30 + $0x1c] sm:$0xf] %vm521_vm0, %v512_v9  ;;  %v488_v12 = vmul.f32 0.5, %v472_v10 }
  0xdb   : > { %v500_v13 = vmul.f32 %v484_v11, %v413_v42 }
  0xdc   : > { %v504_v14 = vmul.f32 %v488_v12, %v423_v43 }
  0xdd   : > { %v516_v15 = vpack.c.bf16 %v500_v13, %v500_v13 }
  0xde   : > { %v520_v17 = vpack.c.bf16 %v504_v14, %v504_v14 }
  0xdf   : > { %533 = vst.msk [vmem:[%s938_s30 + $0x2c] sm:$0xf] %vm521_vm0, %v516_v15 }
  0xe0   : > { %537 = vst.msk [vmem:[%s938_s30 + $0x3c] sm:$0xf] %vm521_vm0, %v520_v17 }
  0xe1 PF: > { %s13_s14 = sadd.s32 1, %s845_s14   ;;  %s1022_s12 = smov %s841_s13 }
  0xe2   : > { %p10_p5 = scmp.ge.s32.totalorder %s13_s14, 5   ;;  %s1023_s13 = smov %s1025_s15 }
  0xe4   :  { %12 = sbr.rel (!%p10_p5) target bundleno = 2 (0x2), region = 68 }

// kernel: _forward_impl.15
= control target key start
LH: loop header
LB: loop body
LE: loop exit
PB: predicated region body
PF: predicated region fallthrough
CT: control target
= control target key end

     0   :  { %s1415_s21 = smov 0   ;;  %s1417_s22 = smov 0   ;;  %s1898_s0 = inlined_call_operand.vmem [shape: bf16[3,128,64], index: 0, kind: input, shape index: {}]   ;;  %s1899_s1 = inlined_call_operand.vmem [shape: bf16[3,64,128], index: 1, kind: input, shape index: {}]   ;;  %s1900_s2 = inlined_call_operand.vmem [shape: f32[3,1,128], index: 2, kind: input, shape index: {}]   ;;  %s1901_s3 = inlined_call_operand.vmem [shape: f32[3,128,128], index: 3, kind: input, shape index: {}]   ;;  %s1902_s4 = inlined_call_operand.vmem [shape: f32[3,128,128], index: 4, kind: input, shape index: {}]   ;;  %s1903_s5 = inlined_call_operand.vmem [shape: f32[3,1,128], index: 5, kind: input, shape index: {}]   ;;  %s1904_s6 = inlined_call_operand.vmem [shape: f32[3,128,128], index: 6, kind: output, shape index: {}]  }
   0x1   :  { %s1419_s23 = smov 0  }
   0x2 LB: > { %s28_s24 = sadd.s32 1, %s1372_s22  ;;  %p1147_p0 = scmp.ge.s32.totalorder %s1376_s23, 1  ;;  %s1376_s23 = sphi %s1419_s23, %s16_s23   ;;  %s1372_s22 = sphi %s1417_s22, %s1910_s22   ;;  %s1368_s21 = sphi %s1415_s21, %s1909_s21  }
   0x3   : > { %p30_p1 = scmp.ge.s32.totalorder %s28_s24, 3  ;;  %p293_p2 = scmp.lt.s32.totalorder %s1376_s23, 4 }
   0x5   : > { %s1912_s24 = smov (%p30_p1, %s28_s24), 0  ;;  %p294_p3 = pnand %p1147_p0, %p293_p2 }
   0x6   : > { %p361_p4 = scmp.lt.s32.totalorder (!%p294_p3), %s1368_s21, 2 }
   0x7   : > { %297 = sbr.rel (%p294_p3) target bundleno = 380 (0x17c), region = 44 }
   0xc   : > { %s1914_s21 = smov (!%p361_p4, %s1368_s21), 2  ;;  %vm504_vm0 = vcmask 523264  }
   0xd   : > { %s1234_s25 = sshll.u32 %s1914_s21, 5  ;;  %s377_s7 = scalar_lea.vmem %s1900_s2, %s1914_s21 }
   0xe   : > { %s374_s28 = scalar_lea.vmem %s1899_s1, %s1234_s25  ;;  %s400_s10 = scalar_lea.vmem %s1903_s5, %s1914_s21  ;;  %v1464_v12 = vld [vmem:[%s377_s7] ss:$0 sm:$0xff] }
   0xf   : > { %v1249_v0 = vld [vmem:[%s374_s28 + $0x18] sm:$0xff]  ;;  %v1248_v1 = vld [vmem:[%s374_s28 + $0x10] sm:$0xff]  ;;  %v1247_v2 = vld [vmem:[%s374_s28 + $0x8] sm:$0xff]  ;;  %s1233_s11 = sshll.u32 %s1914_s21, 6  ;;  %s1476_s17 = sshll.u32 %s1914_s21, 7 }
  0x10   : > { %533 = vmatpush.bf16.msra.mxu0 %v1249_v0  ;;  %1250 = vmatpush.bf16.msra.mxu1 %v1249_v0  ;;  %s368_s14 = scalar_lea.vmem %s1898_s0, %s1233_s11  ;;  %v1246_v3 = vld [vmem:[%s374_s28] sm:$0xff]  ;;  %s1482_s20 = scalar_lea.vmem %s1902_s4, %s1476_s17 }
  0x11   : > { %1252 = vmatpush.bf16.msra.mxu3 %v1249_v0  ;;  %1251 = vmatpush.bf16.msra.mxu2 %v1249_v0  ;;  %v1238_v4 = vld [vmem:[%s368_s14] sm:$0xff]  ;;  %v1240_v5 = vld [vmem:[%s368_s14 + $0x10] sm:$0xff]  ;;  %v1239_v8 = vld [vmem:[%s368_s14 + $0x8] sm:$0xff]  ;;  %s1378_s25 = smov 126   ;;  %s1524_s28 = scalar_lea.vmem %s1901_s3, %s1476_s17 }
  0x12   : > { %v1244_v6 = vld [vmem:[%s368_s14 + $0x30] sm:$0xff]  ;;  %v1242_v7 = vld [vmem:[%s368_s14 + $0x20] sm:$0xff]  ;;  %v1241_v9 = vld [vmem:[%s368_s14 + $0x18] sm:$0xff]  ;;  %s1379_s21 = smov 2   ;;  %s1758_s9 = scalar_lea.vmem %s1904_s6, %s1476_s17 }
  0x13   : > { %v1243_v10 = vld [vmem:[%s368_s14 + $0x28] sm:$0xff]  ;;  %v1245_v11 = vld [vmem:[%s368_s14 + $0x38] sm:$0xff]  ;;  %v774_v35 = vld [vmem:[%s1482_s20] sm:$0xff] }
  0x14   : > { %534 = vmatpush.bf16.msra.mxu0 %v1248_v1  ;;  %1253 = vmatpush.bf16.msra.mxu1 %v1248_v1  ;;  %v778_v38 = vld [vmem:[%s1482_s20 + $0x20] sm:$0xff] }
  0x15   : > { %1255 = vmatpush.bf16.msra.mxu3 %v1248_v1  ;;  %1254 = vmatpush.bf16.msra.mxu2 %v1248_v1  ;;  %v786_v57 = vld [vmem:[%s1482_s20 + $0x60] sm:$0xff] }
  0x16   : > { %v782_v63 = vld [vmem:[%s1482_s20 + $0x40] sm:$0xff] }
  0x17   : > { %v675_v1 = vld [vmem:[%s1524_s28] sm:$0xff] }
  0x18   : > { %535 = vmatpush.bf16.msra.mxu0 %v1247_v2  ;;  %1256 = vmatpush.bf16.msra.mxu1 %v1247_v2 }
  0x19   : > { %1258 = vmatpush.bf16.msra.mxu3 %v1247_v2  ;;  %1257 = vmatpush.bf16.msra.mxu2 %v1247_v2 }
  0x1c   : > { %536 = vmatpush.bf16.msra.mxu0 %v1246_v3  ;;  %1259 = vmatpush.bf16.msra.mxu1 %v1246_v3 }
  0x1d   : > { %1261 = vmatpush.bf16.msra.mxu3 %v1246_v3  ;;  %1260 = vmatpush.bf16.msra.mxu2 %v1246_v3  ;;  %v1538_v3 = vld [vmem:[%s400_s10] ss:$0 sm:$0xff] }
  0x1f   : > { %1206 = vmatmul.msk.bf16.vlgmr.msra.gmra.mxu0 %vm504_vm0, %v1238_v4  ;;  %1208 = vmatmul.msk.bf16.vlgmr.msra.gmra.mxu1 %vm504_vm0, %v1240_v5 }
  0x20   : > { %1212 = vmatmul.msk.bf16.vlgmr.msra.gmra.mxu3 %vm504_vm0, %v1244_v6  ;;  %1210 = vmatmul.msk.bf16.vlgmr.msra.gmra.mxu2 %vm504_vm0, %v1242_v7 }
  0x2f   : > { %1207 = vmatmul.msk.bf16.gmra.mxu0 %vm504_vm0, %v1239_v8  ;;  %1209 = vmatmul.msk.bf16.gmra.mxu1 %vm504_vm0, %v1241_v9 }
  0x30   : > { %1211 = vmatmul.msk.bf16.gmra.mxu2 %vm504_vm0, %v1243_v10  ;;  %1213 = vmatmul.msk.bf16.gmra.mxu3 %vm504_vm0, %v1245_v11 }
  0x9c   : > { %v538_v13 = vpop.f32.mrf.mxu0  ;;  %v548_v14 = vpop.f32.mrf.mxu1 }
  0x9d   : > { %v1467_v15 = vadd.f32 %v1464_v12, %v538_v13  ;;  %v1470_v16 = vadd.f32 %v1464_v12, %v548_v14 }
  0x9f   : > { %v579_v17 = vmul.f32 0.5, %v1467_v15  ;;  %v726_v18 = vmin.f32 %v1467_v15, 60.0  ;;  %v730_v19 = vmin.f32 %v1470_v16, 60.0  ;;  %v583_v24 = vmul.f32 0.5, %v1470_v16 }
  0xa1   : > { %1290 = vtanh.f32 %v579_v17  ;;  %v742_v20 = vmul.f32 1.442695, %v726_v18  ;;  %v750_v21 = vmul.f32 1.442695, %v730_v19 }
  0xa3   : > { %1292 = vpow2.f32 %v742_v20  ;;  %v568_v22 = vpop.f32.mrf.mxu3  ;;  %v558_v23 = vpop.f32.mrf.mxu2 }
  0xa4   : > { %1294 = vpow2.f32 %v750_v21  ;;  %v1486_v25 = vadd.f32 %v1464_v12, %v568_v22  ;;  %v540_v26 = vpop.f32.mrf.mxu0  ;;  %v1489_v27 = vadd.f32 %v1464_v12, %v558_v23  ;;  %v550_v28 = vpop.f32.mrf.mxu1  ;;  %v779_v21 = vld [vmem:[%s1482_s20 + $0x28] sm:$0xff] }
  0xa5   : > { %v1492_v29 = vadd.f32 %v1464_v12, %v540_v26  ;;  %v1495_v30 = vadd.f32 %v1464_v12, %v550_v28  ;;  %1296 = vtanh.f32 %v583_v24  ;;  %v775_v22 = vld [vmem:[%s1482_s20 + $0x8] sm:$0xff] }
  0xa6   : > { %v738_v31 = vmin.f32 %v1486_v25, 60.0  ;;  %v734_v32 = vmin.f32 %v1489_v27, 60.0  ;;  %v591_v36 = vmul.f32 0.5, %v1486_v25  ;;  %v587_v51 = vmul.f32 0.5, %v1489_v27 }
  0xa7   : > { %v1291_v33 = vpop.eup %1290  ;;  %v727_v34 = vmin.f32 %v1492_v29, 60.0  ;;  %v731_v42 = vmin.f32 %v1495_v30, 60.0  ;;  %v580_v44 = vmul.f32 0.5, %v1492_v29  ;;  %v584_v24 = vmul.f32 0.5, %v1495_v30 }
  0xa8   : > { %v766_v37 = vmul.f32 1.442695, %v738_v31  ;;  %v611_v39 = vadd.f32 1.0, %v1291_v33  ;;  %v758_v41 = vmul.f32 1.442695, %v734_v32 }
  0xa9   : > { %v1293_v40 = vpop.eup %1292  ;;  %v744_v47 = vmul.f32 1.442695, %v727_v34  ;;  %v752_v54 = vmul.f32 1.442695, %v731_v42 }
  0xaa   : > { %v1295_v43 = vpop.eup %1294  ;;  %1298 = vpow2.f32 %v766_v37  ;;  %v1505_v45 = vmul.f32 %v1293_v40, %v774_v35  ;;  %v627_v46 = vmul.f32 0.5, %v611_v39  ;;  %v787_v39 = vld [vmem:[%s1482_s20 + $0x68] sm:$0xff] }
  0xab   : > { %v570_v48 = vpop.f32.mrf.mxu3  ;;  %v1507_v49 = vmul.f32 %v1295_v43, %v778_v38  ;;  %v560_v50 = vpop.f32.mrf.mxu2  ;;  %1300 = vtanh.f32 %v591_v36  ;;  %v679_v43 = vld [vmem:[%s1524_s28 + $0x20] sm:$0xff] }
  0xac   : > { %v1511_v52 = vadd.f32 %v1464_v12, %v570_v48  ;;  %806 = vrot.lane.b32.xlu0 %v1505_v45, %s1378_s25  ;;  %v1516_v53 = vadd.f32 %v1464_v12, %v560_v50  ;;  %1302 = vpow2.f32 %v758_v41  ;;  %v1297_v55 = vpop.eup %1296  ;;  %v643_v58 = vmul.f32 2.0, %v627_v46  ;;  %v543_v17 = vpop.f32.mrf.mxu0 }
  0xad   : > { %814 = vrot.lane.b32.xlu2 %v1507_v49, %s1378_s25  ;;  %1304 = vtanh.f32 %v580_v44  ;;  %v615_v61 = vadd.f32 1.0, %v1297_v55  ;;  %v1550_v20 = vadd.f32 %v1464_v12, %v543_v17  ;;  %v553_v26 = vpop.f32.mrf.mxu1  ;;  %v683_v17 = vld [vmem:[%s1524_s28 + $0x40] sm:$0xff] }
  0xae   : > { %v739_v56 = vmin.f32 %v1511_v52, 60.0  ;;  %1306 = vpow2.f32 %v744_v47  ;;  %v735_v59 = vmin.f32 %v1516_v53, 60.0  ;;  %v1214_v4 = vadd.f32 -0.5, %v643_v58 }
  0xaf   : > { %1308 = vtanh.f32 %v587_v51  ;;  %v631_v11 = vmul.f32 0.5, %v615_v61  ;;  %v728_v38 = vmin.f32 %v1550_v20, 60.0  ;;  %v1564_v40 = vadd.f32 %v1464_v12, %v553_v26  ;;  %v783_v51 = vld [vmem:[%s1482_s20 + $0x48] sm:$0xff] }
  0xb0   : > { %v1299_v60 = vpop.eup %1298  ;;  %v768_v62 = vmul.f32 1.442695, %v739_v56  ;;  %1310 = vpow2.f32 %v752_v54  ;;  %v760_v6 = vmul.f32 1.442695, %v735_v59  ;;  %v691_v9 = vadd.f32 %v1214_v4, %v675_v1 }
  0xb1   : > { %v1530_v0 = vmul.f32 %v1299_v60, %v786_v57  ;;  %v1301_v2 = vpop.eup %1300  ;;  %v647_v28 = vmul.f32 2.0, %v631_v11  ;;  %v588_v42 = vmul.f32 0.5, %v1516_v53  ;;  %v746_v56 = vmul.f32 1.442695, %v728_v38 }
  0xb2   : > { %v1303_v5 = vpop.eup %1302  ;;  %v623_v13 = vadd.f32 1.0, %v1301_v2  ;;  %1312 = vpow2.f32 %v768_v62  ;;  %v1547_v18 = vmul.f32 %v1538_v3, %v691_v9  ;;  %v732_v57 = vmin.f32 %v1564_v40, 60.0  ;;  %v687_v62 = vld [vmem:[%s1524_s28 + $0x60] sm:$0xff] }
  0xb3   : > { %v1305_v7 = vpop.eup %1304  ;;  %v1540_v8 = vmul.f32 %v1303_v5, %v782_v63  ;;  %1314 = vpow2.f32 %v760_v6  ;;  %v563_v33 = vpop.f32.mrf.mxu2  ;;  %v1218_v50 = vadd.f32 -0.5, %v647_v28  ;;  %v581_v60 = vmul.f32 0.5, %v1550_v20 }
  0xb4   : > { %830 = vrot.lane.b32.xlu0 %v1530_v0, %s1378_s25  ;;  %v1307_v10 = vpop.eup %1306  ;;  %v612_v23 = vadd.f32 1.0, %v1305_v7  ;;  %870 = vrot.lane.b32.xlu1 %v1547_v18, %s1379_s21  ;;  %v639_v31 = vmul.f32 0.5, %v623_v13  ;;  %v573_v36 = vpop.f32.mrf.mxu3  ;;  %1316 = vtanh.f32 %v584_v24  ;;  %v1575_v54 = vadd.f32 %v1464_v12, %v563_v33 }
  0xb5   : > { %v1309_v14 = vpop.eup %1308  ;;  %822 = vrot.lane.b32.xlu2 %v1540_v8, %s1378_s25  ;;  %v1559_v35 = vmul.f32 %v1307_v10, %v775_v22  ;;  %v1571_v48 = vadd.f32 %v1464_v12, %v573_v36  ;;  %v695_v58 = vadd.f32 %v1218_v50, %v679_v43  ;;  %1318 = vtanh.f32 %v588_v42  ;;  %v555_v13 = vpop.f32.mrf.mxu1 }
  0xb6   : > { %v1311_v19 = vpop.eup %1310  ;;  %v619_v32 = vadd.f32 1.0, %v1309_v14  ;;  %v628_v41 = vmul.f32 0.5, %v612_v23  ;;  %v655_v46 = vmul.f32 2.0, %v639_v31  ;;  %v589_v5 = vmul.f32 0.5, %v1575_v54 }
  0xb7   : > { %v1557_v34 = vmul.f32 %v1311_v19, %v779_v21  ;;  %v740_v1 = vmin.f32 %v1571_v48, 60.0  ;;  %v736_v6 = vmin.f32 %v1575_v54, 60.0  ;;  %v1592_v7 = vmul.f32 %v1538_v3, %v695_v58  ;;  %v676_v21 = vld [vmem:[%s1524_s28 + $0x8] sm:$0xff]  ;;  %v780_v58 = vld [vmem:[%s1482_s20 + $0x30] sm:$0xff] }
  0xb8   : > { %v1313_v37 = vpop.eup %1312  ;;  %v635_v47 = vmul.f32 0.5, %v619_v32  ;;  %v644_v59 = vmul.f32 2.0, %v628_v41  ;;  %v1226_v2 = vadd.f32 -0.5, %v655_v46  ;;  %1320 = vpow2.f32 %v746_v56 }
  0xb9   : > { %v1315_v44 = vpop.eup %1314  ;;  %v1579_v55 = vmul.f32 %v1313_v37, %v787_v39  ;;  %v754_v9 = vmul.f32 1.442695, %v732_v57  ;;  %1322 = vtanh.f32 %v581_v60  ;;  %v770_v19 = vmul.f32 1.442695, %v740_v1  ;;  %v776_v39 = vld [vmem:[%s1482_s20 + $0x10] sm:$0xff]  ;;  %v545_v57 = vpop.f32.mrf.mxu0 }
  0xba   : > { %v1585_v61 = vmul.f32 %v1315_v44, %v783_v51  ;;  %v651_v63 = vmul.f32 2.0, %v635_v47  ;;  %v1317_v4 = vpop.eup %1316  ;;  %v703_v10 = vadd.f32 %v1226_v2, %v687_v62  ;;  %v1215_v14 = vadd.f32 -0.5, %v644_v59  ;;  %v788_v2 = vld [vmem:[%s1482_s20 + $0x70] sm:$0xff] }
  0xbb   : > { %v565_v11 = vpop.f32.mrf.mxu2  ;;  %v616_v23 = vadd.f32 1.0, %v1317_v4  ;;  %1324 = vtanh.f32 %v589_v5  ;;  %v762_v24 = vmul.f32 1.442695, %v736_v6  ;;  %v1319_v28 = vpop.eup %1318  ;;  %v1607_v32 = vadd.f32 %v1464_v12, %v555_v13  ;;  %v784_v13 = vld [vmem:[%s1482_s20 + $0x50] sm:$0xff] }
  0xbc   : > { %808 = vrot.lane.b32.xlu0 %v1559_v35, %s1378_s25  ;;  %832 = vrot.lane.b32.xlu1 %v1579_v55, %s1378_s25  ;;  %v1222_v22 = vadd.f32 -0.5, %v651_v63  ;;  %v1601_v26 = vmul.f32 %v1538_v3, %v703_v10  ;;  %1326 = vpow2.f32 %v754_v9  ;;  %v1604_v31 = vadd.f32 %v1464_v12, %v565_v11  ;;  %v575_v9 = vpop.f32.mrf.mxu3 }
  0xbd   : > { %816 = vrot.lane.b32.xlu2 %v1557_v34, %s1378_s25  ;;  %v692_v36 = vadd.f32 %v1215_v14, %v676_v21  ;;  %1328 = vpow2.f32 %v770_v19  ;;  %v632_v41 = vmul.f32 0.5, %v616_v23  ;;  %v620_v42 = vadd.f32 1.0, %v1319_v28 }
  0xbe   : > { %v699_v33 = vadd.f32 %v1222_v22, %v683_v17  ;;  %v1321_v37 = vpop.eup %1320  ;;  %1330 = vpow2.f32 %v762_v24  ;;  %v737_v44 = vmin.f32 %v1604_v31, 60.0  ;;  %v586_v46 = vmul.f32 0.5, %v1607_v32  ;;  %v680_v24 = vld [vmem:[%s1524_s28 + $0x28] sm:$0xff] }
  0xbf   : > { %v1323_v43 = vpop.eup %1322  ;;  %v1618_v50 = vmul.f32 %v1538_v3, %v692_v36  ;;  %v1622_v51 = vmul.f32 %v1321_v37, %v776_v39  ;;  %v648_v59 = vmul.f32 2.0, %v632_v41  ;;  %v636_v60 = vmul.f32 0.5, %v620_v42 }
  0xc0   : > { %v1612_v38 = vmul.f32 %v1538_v3, %v699_v33  ;;  %v613_v62 = vadd.f32 1.0, %v1323_v43  ;;  %v764_v1 = vmul.f32 1.442695, %v737_v44  ;;  %1332 = vtanh.f32 %v586_v46  ;;  %v684_v44 = vld [vmem:[%s1524_s28 + $0x48] sm:$0xff] }
  0xc1   : > { %v1325_v47 = vpop.eup %1324  ;;  %v1629_v5 = vadd.f32 %v1464_v12, %v545_v57  ;;  %v590_v11 = vmul.f32 0.5, %v1604_v31  ;;  %v652_v14 = vmul.f32 2.0, %v636_v60  ;;  %v1219_v21 = vadd.f32 -0.5, %v648_v59  ;;  %v785_v59 = vld [vmem:[%s1482_s20 + $0x58] sm:$0xff] }
  0xc2   : > { %v1327_v56 = vpop.eup %1326  ;;  %v621_v4 = vadd.f32 1.0, %v1325_v47  ;;  %v629_v17 = vmul.f32 0.5, %v613_v62  ;;  %v592_v22 = vmul.f32 0.5, %v1511_v52  ;;  %1334 = vpow2.f32 %v764_v1 }
  0xc3   : > { %v1329_v63 = vpop.eup %1328  ;;  %v1633_v6 = vmul.f32 %v1327_v56, %v780_v58  ;;  %v1641_v23 = vadd.f32 %v1464_v12, %v575_v9  ;;  %v729_v33 = vmin.f32 %v1629_v5, 60.0  ;;  %v585_v39 = vmul.f32 0.5, %v1564_v40  ;;  %v677_v9 = vld [vmem:[%s1524_s28 + $0x10] sm:$0xff] }
  0xc4   : > { %824 = vrot.lane.b32.xlu0 %v1585_v61, %s1378_s25  ;;  %894 = vrot.lane.b32.xlu1 %v1601_v26, %s1379_s21  ;;  %v1331_v10 = vpop.eup %1330  ;;  %v1637_v19 = vmul.f32 %v1329_v63, %v788_v2  ;;  %v637_v28 = vmul.f32 0.5, %v621_v4  ;;  %1336 = vtanh.f32 %v590_v11  ;;  %v645_v41 = vmul.f32 2.0, %v629_v17 }
  0xc5   : > { %878 = vrot.lane.b32.xlu2 %v1592_v7, %s1379_s21  ;;  %v1647_v36 = vmul.f32 %v1331_v10, %v784_v13  ;;  %v696_v12 = vadd.f32 %v1219_v21, %v680_v24  ;;  %v1223_v42 = vadd.f32 -0.5, %v652_v14  ;;  %1338 = vtanh.f32 %v592_v22  ;;  %v685_v21 = vld [vmem:[%s1524_s28 + $0x50] sm:$0xff] }
  0xc6   : > { %v1333_v37 = vpop.eup %1332  ;;  %v741_v43 = vmin.f32 %v1641_v23, 60.0  ;;  %v653_v46 = vmul.f32 2.0, %v637_v28  ;;  %v748_v47 = vmul.f32 1.442695, %v729_v33  ;;  %1340 = vtanh.f32 %v585_v39 }
  0xc7   : > { %v618_v56 = vadd.f32 1.0, %v1333_v37  ;;  %v593_v58 = vmul.f32 0.5, %v1571_v48  ;;  %v1659_v60 = vmul.f32 %v1538_v3, %v696_v12  ;;  %v700_v62 = vadd.f32 %v1223_v42, %v684_v44 }
  0xc8   : > { %v1335_v57 = vpop.eup %1334  ;;  %v1216_v63 = vadd.f32 -0.5, %v645_v41  ;;  %v582_v2 = vmul.f32 0.5, %v1629_v5  ;;  %v772_v4 = vmul.f32 1.442695, %v741_v43  ;;  %1342 = vpow2.f32 %v748_v47 }
  0xc9   : > { %v634_v10 = vmul.f32 0.5, %v618_v56  ;;  %v1663_v11 = vmul.f32 %v1335_v57, %v785_v59  ;;  %v1224_v13 = vadd.f32 -0.5, %v653_v46  ;;  %1344 = vtanh.f32 %v593_v58  ;;  %v777_v56 = vld [vmem:[%s1482_s20 + $0x18] sm:$0xff] }
  0xca   : > { %v1337_v1 = vpop.eup %1336  ;;  %v733_v17 = vmin.f32 %v1607_v32, 60.0  ;;  %v1672_v24 = vmul.f32 %v1538_v3, %v700_v62  ;;  %v693_v28 = vadd.f32 %v1216_v63, %v677_v9  ;;  %1346 = vpow2.f32 %v772_v4 }
  0xcb   : > { %v1339_v14 = vpop.eup %1338  ;;  %v622_v22 = vadd.f32 1.0, %v1337_v1  ;;  %1348 = vtanh.f32 %v582_v2  ;;  %v650_v39 = vmul.f32 2.0, %v634_v10  ;;  %v701_v41 = vadd.f32 %v1224_v13, %v685_v21  ;;  %v682_v1 = vld [vmem:[%s1524_s28 + $0x38] sm:$0xff] }
  0xcc   : > { %886 = vrot.lane.b32.xlu0 %v1612_v38, %s1379_s21  ;;  %810 = vrot.lane.b32.xlu1 %v1622_v51, %s1378_s25  ;;  %v1341_v33 = vpop.eup %1340  ;;  %v624_v37 = vadd.f32 1.0, %v1339_v14  ;;  %v756_v12 = vmul.f32 1.442695, %v733_v17  ;;  %v1677_v46 = vmul.f32 %v1538_v3, %v693_v28  ;;  %v594_v63 = vmul.f32 0.5, %v1641_v23  ;;  %v789_v2 = vld [vmem:[%s1482_s20 + $0x78] sm:$0xff] }
  0xcd   : > { %872 = vrot.lane.b32.xlu2 %v1618_v50, %s1379_s21  ;;  %v617_v43 = vadd.f32 1.0, %v1341_v33  ;;  %v638_v44 = vmul.f32 0.5, %v622_v22  ;;  %v1681_v58 = vmul.f32 %v1538_v3, %v701_v41  ;;  %v1221_v59 = vadd.f32 -0.5, %v650_v39 }
  0xce   : > { %v1343_v42 = vpop.eup %1342  ;;  %v640_v57 = vmul.f32 0.5, %v624_v37  ;;  %1350 = vpow2.f32 %v756_v12  ;;  %v781_v12 = vld [vmem:[%s1482_s20 + $0x38] sm:$0xff] }
  0xcf   : > { %v1345_v47 = vpop.eup %1344  ;;  %v633_v9 = vmul.f32 0.5, %v617_v43  ;;  %v654_v10 = vmul.f32 2.0, %v638_v44  ;;  %v1690_v14 = vmul.f32 %v1343_v42, %v777_v56  ;;  %v698_v21 = vadd.f32 %v1221_v59, %v682_v1  ;;  %v686_v43 = vld [vmem:[%s1524_s28 + $0x58] sm:$0xff]  ;;  %v688_v56 = vld [vmem:[%s1524_s28 + $0x68] sm:$0xff] }
  0xd0   : > { %v1347_v62 = vpop.eup %1346  ;;  %v625_v13 = vadd.f32 1.0, %v1345_v47  ;;  %v656_v17 = vmul.f32 2.0, %v640_v57  ;;  %1352 = vtanh.f32 %v594_v63 }
  0xd1   : > { %v1349_v4 = vpop.eup %1348  ;;  %v1694_v22 = vmul.f32 %v1347_v62, %v789_v2  ;;  %v649_v33 = vmul.f32 2.0, %v633_v9  ;;  %v1225_v39 = vadd.f32 -0.5, %v654_v10  ;;  %v1699_v42 = vmul.f32 %v1538_v3, %v698_v21  ;;  %v681_v2 = vld [vmem:[%s1524_s28 + $0x30] sm:$0xff] }
  0xd2   : > { %v614_v28 = vadd.f32 1.0, %v1349_v4  ;;  %v641_v37 = vmul.f32 0.5, %v625_v13  ;;  %v1227_v44 = vadd.f32 -0.5, %v656_v17 }
  0xd3   : > { %v702_v62 = vadd.f32 %v1225_v39, %v686_v43  ;;  %v1220_v63 = vadd.f32 -0.5, %v649_v33  ;;  %v678_v43 = vld [vmem:[%s1524_s28 + $0x18] sm:$0xff] }
  0xd4   : > { %818 = vrot.lane.b32.xlu0 %v1633_v6, %s1378_s25  ;;  %826 = vrot.lane.b32.xlu1 %v1647_v36, %s1378_s25  ;;  %v1351_v41 = vpop.eup %1350  ;;  %v630_v47 = vmul.f32 0.5, %v614_v28  ;;  %v657_v57 = vmul.f32 2.0, %v641_v37  ;;  %v704_v4 = vadd.f32 %v1227_v44, %v688_v56  ;;  %v689_v28 = vld [vmem:[%s1524_s28 + $0x70] sm:$0xff] }
  0xd5   : > { %834 = vrot.lane.b32.xlu2 %v1637_v19, %s1378_s25  ;;  %v1706_v59 = vmul.f32 %v1351_v41, %v781_v12  ;;  %v1712_v13 = vmul.f32 %v1538_v3, %v702_v62  ;;  %v697_v17 = vadd.f32 %v1220_v63, %v681_v2  ;;  %v690_v63 = vld [vmem:[%s1524_s28 + $0x78] sm:$0xff] }
  0xd6   : > { %v1353_v1 = vpop.eup %1352  ;;  %v646_v9 = vmul.f32 2.0, %v630_v47  ;;  %v1228_v21 = vadd.f32 -0.5, %v657_v57  ;;  %v1716_v37 = vmul.f32 %v1538_v3, %v704_v4 }
  0xd7   : > { %v626_v10 = vadd.f32 1.0, %v1353_v1  ;;  %v1723_v39 = vmul.f32 %v1538_v3, %v697_v17 }
  0xd8   : > { %v705_v41 = vadd.f32 %v1228_v21, %v689_v28  ;;  %v1217_v12 = vadd.f32 -0.5, %v646_v9 }
  0xd9   : > { %v642_v33 = vmul.f32 0.5, %v626_v10  ;;  %v934_v10 = vlaneseq }
  0xda   : > { %v1729_v47 = vmul.f32 %v1538_v3, %v705_v41  ;;  %v694_v56 = vadd.f32 %v1217_v12, %v678_v43  ;;  %v906_v43 = vmul.f32 0.5, %v1507_v49 }
  0xdb   : > { %v658_v44 = vmul.f32 2.0, %v642_v33  ;;  %v935_v17 = vand.u32 127, %v934_v10 }
  0xdc   : > { %880 = vrot.lane.b32.xlu0 %v1659_v60, %s1379_s21  ;;  %888 = vrot.lane.b32.xlu1 %v1672_v24, %s1379_s21  ;;  %v1734_v57 = vmul.f32 %v1538_v3, %v694_v56 }
  0xdd   : > { %828 = vrot.lane.b32.xlu2 %v1663_v11, %s1378_s25  ;;  %v1229_v62 = vadd.f32 -0.5, %v658_v44  ;;  %v1230_v28 = vadd.s32 4294967232, %v935_v17  ;;  %v902_v17 = vmul.f32 0.5, %v1505_v45 }
  0xdf   : > { %v706_v1 = vadd.f32 %v1229_v62, %v690_v63  ;;  %v940_v33 = vand.u32 3, %v1230_v28  ;;  %vm937_vm1 = vcmp.ge.s32.totalorder %v1230_v28, 0  ;;  %vm938_vm2 = vcmp.lt.s32.totalorder %v1230_v28, 12 }
  0xe0   : > { %vm1750_vm4 = vmand %vm937_vm1, %vm938_vm2 }
  0xe1   : > { %v1740_v2 = vmul.f32 %v1538_v3, %v706_v1  ;;  %vm1745_vm3 = vcmp.lt.s32.totalorder %v940_v33, 2 }
  0xe4   : > { %874 = vrot.lane.b32.xlu0 %v1677_v46, %s1379_s21  ;;  %812 = vrot.lane.b32.xlu1 %v1690_v14, %s1378_s25 }
  0xe5   : > { %890 = vrot.lane.b32.xlu2 %v1681_v58, %s1379_s21 }
  0xec   : > { %836 = vrot.lane.b32.xlu0 %v1694_v22, %s1378_s25  ;;  %820 = vrot.lane.b32.xlu1 %v1706_v59, %s1378_s25 }
  0xed   : > { %884 = vrot.lane.b32.xlu2 %v1699_v42, %s1379_s21 }
  0xf4   : > { %892 = vrot.lane.b32.xlu0 %v1712_v13, %s1379_s21  ;;  %882 = vrot.lane.b32.xlu1 %v1723_v39, %s1379_s21 }
  0xf5   : > { %896 = vrot.lane.b32.xlu2 %v1716_v37, %s1379_s21 }
  0xfc   : > { %898 = vrot.lane.b32.xlu0 %v1729_v47, %s1379_s21  ;;  %876 = vrot.lane.b32.xlu1 %v1734_v57, %s1379_s21 }
 0x104   : > { %900 = vrot.lane.b32.xlu1 %v1740_v2, %s1379_s21 }
 0x107   : > { %v815_v4 = vpop.permute.xlu2 %814 }
 0x108   : > { %v842_v41 = vmul.f32 0.5, %v815_v4 }
 0x10a   : > { %v858_v56 = vsub.f32 %v1592_v7, %v842_v41 }
 0x10f   : > { %v823_v9 = vpop.permute.xlu2 %822 }
 0x117   : > { %v817_v21 = vpop.permute.xlu2 %816 }
 0x11e   : > { %v807_v12 = vpop.permute.xlu0 %806 }
 0x11f   : > { %v879_v44 = vpop.permute.xlu2 %878  ;;  %v838_v4 = vmul.f32 0.5, %v807_v12 }
 0x120   : > { %v922_v63 = vadd.f32 %v906_v43, %v879_v44 }
 0x121   : > { %v854_v33 = vsub.f32 %v1547_v18, %v838_v4 }
 0x122   : > { %v946_v49 = vsel %vm1745_vm3, %v858_v56, %v922_v63 }
 0x123   : > { %v962_v1 = vsel %vm1750_vm4, %v946_v49, %v1470_v16  ;;  %v903_v16 = vmul.f32 0.5, %v1559_v35 }
 0x124   : > { %978 = vst [vmem:[%s1758_s9 + $0x20] sm:$0xff] %v962_v1 }
 0x126   : > { %v831_v7 = vpop.permute.xlu0 %830  ;;  %v871_v28 = vpop.permute.xlu1 %870 }
 0x127   : > { %v873_v10 = vpop.permute.xlu2 %872  ;;  %v918_v41 = vadd.f32 %v902_v17, %v871_v28  ;;  %v850_v17 = vmul.f32 0.5, %v831_v7  ;;  %v914_v28 = vmul.f32 0.5, %v1530_v0 }
 0x128   : > { %v919_v45 = vadd.f32 %v903_v16, %v873_v10  ;;  %v846_v10 = vmul.f32 0.5, %v823_v9 }
 0x129   : > { %v942_v43 = vsel %vm1745_vm3, %v854_v33, %v918_v41 }
 0x12a   : > { %v958_v44 = vsel %vm1750_vm4, %v942_v43, %v1467_v15  ;;  %v862_v7 = vsub.f32 %v1612_v38, %v846_v10  ;;  %v915_v10 = vmul.f32 0.5, %v1579_v55 }
 0x12b   : > { %974 = vst [vmem:[%s1758_s9] sm:$0xff] %v958_v44  ;;  %v910_v44 = vmul.f32 0.5, %v1540_v8 }
 0x12e   : > { %v809_v56 = vpop.permute.xlu0 %808  ;;  %v833_v1 = vpop.permute.xlu1 %832 }
 0x12f   : > { %v839_v12 = vmul.f32 0.5, %v809_v56  ;;  %v1775_v63 = vpop.permute.xlu2 %834 }
 0x131   : > { %v855_v49 = vsub.f32 %v1618_v50, %v839_v12  ;;  %v866_v50 = vsub.f32 %v1601_v26, %v850_v17 }
 0x133   : > { %v943_v18 = vsel %vm1745_vm3, %v855_v49, %v919_v45 }
 0x134   : > { %v959_v4 = vsel %vm1750_vm4, %v943_v18, %v1492_v29  ;;  %v843_v18 = vmul.f32 0.5, %v817_v21 }
 0x135   : > { %975 = vst [vmem:[%s1758_s9 + $0x8] sm:$0xff] %v959_v4  ;;  %v851_v4 = vmul.f32 0.5, %v833_v1 }
 0x136   : > { %v825_v15 = vpop.permute.xlu0 %824  ;;  %v895_v33 = vpop.permute.xlu1 %894 }
 0x137   : > { %v829_v35 = vpop.permute.xlu2 %828  ;;  %v930_v41 = vadd.f32 %v914_v28, %v895_v33  ;;  %v907_v33 = vmul.f32 0.5, %v1557_v34 }
 0x139   : > { %v954_v43 = vsel %vm1745_vm3, %v866_v50, %v930_v41  ;;  %v847_v41 = vmul.f32 0.5, %v825_v15 }
 0x13a   : > { %v970_v29 = vsel %vm1750_vm4, %v954_v43, %v1486_v25  ;;  %v912_v25 = vmul.f32 0.5, %v1647_v36 }
 0x13b   : > { %986 = vst [vmem:[%s1758_s9 + $0x60] sm:$0xff] %v970_v29  ;;  %v863_v29 = vsub.f32 %v1672_v24, %v847_v41 }
 0x13e   : > { %v887_v56 = vpop.permute.xlu0 %886  ;;  %v811_v12 = vpop.permute.xlu1 %810 }
 0x13f   : > { %v926_v0 = vadd.f32 %v910_v44, %v887_v56  ;;  %v891_v16 = vpop.permute.xlu2 %890  ;;  %v840_v56 = vmul.f32 0.5, %v811_v12 }
 0x140   : > { %v928_v17 = vadd.f32 %v912_v25, %v891_v16 }
 0x141   : > { %v950_v9 = vsel %vm1745_vm3, %v862_v7, %v926_v0  ;;  %v856_v16 = vsub.f32 %v1677_v46, %v840_v56 }
 0x142   : > { %v966_v26 = vsel %vm1750_vm4, %v950_v9, %v1489_v27  ;;  %v859_v27 = vsub.f32 %v1659_v60, %v843_v18  ;;  %v911_v60 = vmul.f32 0.5, %v1585_v61  ;;  %v849_v18 = vmul.f32 0.5, %v829_v35 }
 0x143   : > { %982 = vst [vmem:[%s1758_s9 + $0x40] sm:$0xff] %v966_v26 }
 0x146   : > { %v819_v8 = vpop.permute.xlu0 %818  ;;  %v827_v49 = vpop.permute.xlu1 %826 }
 0x147   : > { %v885_v45 = vpop.permute.xlu2 %884  ;;  %v848_v38 = vmul.f32 0.5, %v827_v49 }
 0x149   : > { %v864_v28 = vsub.f32 %v1681_v58, %v848_v38  ;;  %v867_v58 = vsub.f32 %v1716_v37, %v851_v4  ;;  %v913_v4 = vmul.f32 0.5, %v1663_v11 }
 0x14b   : > { %v952_v21 = vsel %vm1745_vm3, %v864_v28, %v928_v17  ;;  %v865_v28 = vsub.f32 %v1712_v13, %v849_v18 }
 0x14c   : > { %v968_v36 = vsel %vm1750_vm4, %v952_v21, %v1575_v54 }
 0x14d   : > { %984 = vst [vmem:[%s1758_s9 + $0x50] sm:$0xff] %v968_v36 }
 0x14e   : > { %v881_v50 = vpop.permute.xlu0 %880  ;;  %v889_v44 = vpop.permute.xlu1 %888 }
 0x14f   : > { %v923_v43 = vadd.f32 %v907_v33, %v881_v50  ;;  %v897_v1 = vpop.permute.xlu2 %896  ;;  %v927_v37 = vadd.f32 %v911_v60, %v889_v44  ;;  %v844_v33 = vmul.f32 0.5, %v819_v8  ;;  %v852_v8 = vmul.f32 0.5, %v1775_v63 }
 0x150   : > { %v931_v34 = vadd.f32 %v915_v10, %v897_v1 }
 0x151   : > { %v947_v55 = vsel %vm1745_vm3, %v859_v27, %v923_v43  ;;  %v951_v61 = vsel %vm1745_vm3, %v863_v29, %v927_v37  ;;  %v916_v27 = vmul.f32 0.5, %v1637_v19  ;;  %v905_v43 = vmul.f32 0.5, %v1690_v14 }
 0x152   : > { %v963_v15 = vsel %vm1750_vm4, %v947_v55, %v1495_v30  ;;  %v955_v54 = vsel %vm1745_vm3, %v867_v58, %v931_v34  ;;  %v904_v30 = vmul.f32 0.5, %v1622_v51  ;;  %v967_v24 = vsel %vm1750_vm4, %v951_v61, %v1516_v53 }
 0x153   : > { %979 = vst [vmem:[%s1758_s9 + $0x28] sm:$0xff] %v963_v15  ;;  %v971_v7 = vsel %vm1750_vm4, %v955_v54, %v1511_v52  ;;  %v909_v53 = vmul.f32 0.5, %v1706_v59  ;;  %v917_v14 = vmul.f32 0.5, %v1694_v22 }
 0x154   : > { %987 = vst [vmem:[%s1758_s9 + $0x68] sm:$0xff] %v971_v7 }
 0x155   : > { %983 = vst [vmem:[%s1758_s9 + $0x48] sm:$0xff] %v967_v24  ;;  %v925_v38 = vadd.f32 %v909_v53, %v885_v45  ;;  %v860_v45 = vsub.f32 %v1723_v39, %v844_v33 }
 0x156   : > { %v875_v0 = vpop.permute.xlu0 %874  ;;  %v813_v12 = vpop.permute.xlu1 %812 }
 0x157   : > { %v920_v9 = vadd.f32 %v904_v30, %v875_v0  ;;  %v841_v21 = vmul.f32 0.5, %v813_v12 }
 0x159   : > { %v944_v26 = vsel %vm1745_vm3, %v856_v16, %v920_v9 }
 0x15a   : > { %v960_v52 = vsel %vm1750_vm4, %v944_v26, %v1550_v20 }
 0x15b   : > { %976 = vst [vmem:[%s1758_s9 + $0x10] sm:$0xff] %v960_v52 }
 0x15e   : > { %v837_v51 = vpop.permute.xlu0 %836  ;;  %v821_v49 = vpop.permute.xlu1 %820 }
 0x15f   : > { %v845_v25 = vmul.f32 0.5, %v821_v49  ;;  %v853_v34 = vmul.f32 0.5, %v837_v51 }
 0x161   : > { %v861_v46 = vsub.f32 %v1699_v42, %v845_v25  ;;  %v908_v42 = vmul.f32 0.5, %v1633_v6  ;;  %v869_v60 = vsub.f32 %v1740_v2, %v853_v34 }
 0x163   : > { %v949_v20 = vsel %vm1745_vm3, %v861_v46, %v925_v38 }
 0x164   : > { %v965_v35 = vsel %vm1750_vm4, %v949_v20, %v1607_v32 }
 0x165   : > { %981 = vst [vmem:[%s1758_s9 + $0x38] sm:$0xff] %v965_v35 }
 0x166   : > { %v893_v17 = vpop.permute.xlu0 %892  ;;  %v883_v13 = vpop.permute.xlu1 %882 }
 0x167   : > { %v929_v10 = vadd.f32 %v913_v4, %v893_v17  ;;  %v924_v50 = vadd.f32 %v908_v42, %v883_v13 }
 0x169   : > { %v953_v59 = vsel %vm1745_vm3, %v865_v28, %v929_v10  ;;  %v948_v32 = vsel %vm1745_vm3, %v860_v45, %v924_v50 }
 0x16a   : > { %v969_v11 = vsel %vm1750_vm4, %v953_v59, %v1604_v31  ;;  %v964_v6 = vsel %vm1750_vm4, %v948_v32, %v1564_v40  ;;  %v868_v31 = vsub.f32 %v1729_v47, %v852_v8  ;;  %v857_v40 = vsub.f32 %v1734_v57, %v841_v21 }
 0x16b   : > { %985 = vst [vmem:[%s1758_s9 + $0x58] sm:$0xff] %v969_v11 }
 0x16c   : > { %980 = vst [vmem:[%s1758_s9 + $0x30] sm:$0xff] %v964_v6 }
 0x16e   : > { %v899_v41 = vpop.permute.xlu0 %898  ;;  %v877_v36 = vpop.permute.xlu1 %876 }
 0x16f   : > { %v932_v63 = vadd.f32 %v916_v27, %v899_v41  ;;  %v921_v1 = vadd.f32 %v905_v43, %v877_v36 }
 0x171   : > { %v956_v39 = vsel %vm1745_vm3, %v868_v31, %v932_v63  ;;  %v945_v47 = vsel %vm1745_vm3, %v857_v40, %v921_v1 }
 0x172   : > { %v972_v19 = vsel %vm1750_vm4, %v956_v39, %v1571_v48  ;;  %v961_v58 = vsel %vm1750_vm4, %v945_v47, %v1629_v5 }
 0x173   : > { %988 = vst [vmem:[%s1758_s9 + $0x70] sm:$0xff] %v972_v19 }
 0x174   : > { %977 = vst [vmem:[%s1758_s9 + $0x18] sm:$0xff] %v961_v58 }
 0x176   : > { %v901_v55 = vpop.permute.xlu1 %900 }
 0x177   : > { %v933_v48 = vadd.f32 %v917_v14, %v901_v55 }
 0x179   : > { %v957_v57 = vsel %vm1745_vm3, %v869_v60, %v933_v48 }
 0x17a   : > { %v973_v15 = vsel %vm1750_vm4, %v957_v57, %v1641_v23 }
 0x17b   : > { %989 = vst [vmem:[%s1758_s9 + $0x78] sm:$0xff] %v973_v15 }
 0x17c PF: > { %s16_s23 = sadd.s32 1, %s1376_s23   ;;  %s1909_s21 = smov %s1372_s22 }
 0x17d   : > { %p13_p5 = scmp.ge.s32.totalorder %s16_s23, 5   ;;  %s1910_s22 = smov %s1912_s24 }
 0x17f   :  { %15 = sbr.rel (!%p13_p5) target bundleno = 2 (0x2), region = 89 }

// kernel: _forward_impl.14
= control target key start
LH: loop header
LB: loop body
LE: loop exit
PB: predicated region body
PF: predicated region fallthrough
CT: control target
= control target key end

     0   :  { %s1293_s12 = smov 0   ;;  %s1295_s13 = smov 0   ;;  %s1485_s0 = inlined_call_operand.vmem [shape: bf16[3,128,288], index: 0, kind: input, shape index: {}]   ;;  %s1486_s1 = inlined_call_operand.vmem [shape: bf16[3,288,64], index: 1, kind: input, shape index: {}]   ;;  %s1487_s2 = inlined_call_operand.vmem [shape: f32[3,1,64], index: 2, kind: input, shape index: {}]   ;;  %s1488_s3 = inlined_call_operand.vmem [shape: bf16[3,128,64], index: 3, kind: output, shape index: {}]  }
   0x1   :  { %s1297_s14 = smov 0  }
   0x2 LB: > { %s25_s15 = sadd.s32 1, %s1267_s13  ;;  %p948_p0 = scmp.ge.s32.totalorder %s1271_s14, 1  ;;  %s1271_s14 = sphi %s1297_s14, %s13_s14   ;;  %s1267_s13 = sphi %s1295_s13, %s1490_s13   ;;  %s1263_s12 = sphi %s1293_s12, %s1489_s12  }
   0x3   : > { %p27_p1 = scmp.ge.s32.totalorder %s25_s15, 3  ;;  %p177_p2 = scmp.lt.s32.totalorder %s1271_s14, 4 }
   0x5   : > { %s1492_s15 = smov (%p27_p1, %s25_s15), 0  ;;  %p178_p3 = pnand %p948_p0, %p177_p2 }
   0x6   : > { %p219_p4 = scmp.lt.s32.totalorder (!%p178_p3), %s1263_s12, 2 }
   0x7   : > { %181 = sbr.rel (%p178_p3) target bundleno = 298 (0x12a), region = 32 }
   0xc   : > { %s1494_s12 = smov (!%p219_p4, %s1263_s12), 2  ;;  %vm548_vm0 = vcmask 261120   ;;  %vm816_vm1 = vcmask 519168  }
   0xd   : > { %s1190_s16 = smul.u32 192, %s1494_s12  ;;  %s236_s26 = scalar_lea.vmem %s1487_s2, %s1494_s12 }
   0xe   : > { %s1191_s17 = smul.u32 144, %s1494_s12  ;;  %s1131_s29 = sshll.u32 %s1494_s12, 6 }
   0xf   : > { %s1318_s20 = scalar_lea.vmem %s1485_s0, %s1190_s16  ;;  %s1417_s5 = scalar_lea.vmem %s1488_s3, %s1131_s29 }
  0x10   : > { %s1323_s23 = scalar_lea.vmem %s1486_s1, %s1191_s17  ;;  %v963_v4 = vld [vmem:[%s1318_s20 + $0x8] sm:$0xf]  ;;  %v1134_v7 = vld [vmem:[%s1318_s20 + $0x10] sm:$0xf0]  ;;  %v975_v17 = vld [vmem:[%s1318_s20 + $0x20] sm:$0xf] }
  0x11   : > { %v1163_v0 = vld [vmem:[%s1323_s23 + $0x38] sm:$0xff]  ;;  %v1173_v1 = vld [vmem:[%s1323_s23 + $0x88] sm:$0xff]  ;;  %v1162_v3 = vld [vmem:[%s1323_s23 + $0x30] sm:$0xff]  ;;  %v964_v8 = vor.u32 %v1134_v7, %v963_v4 }
  0x12   : > { %v1171_v2 = vld [vmem:[%s1323_s23 + $0x78] sm:$0xff]  ;;  %573 = vmatpush.bf16.msra.mxu0 %v1163_v0  ;;  %1174 = vmatpush.bf16.msra.mxu3 %v1163_v0  ;;  %v1172_v5 = vld [vmem:[%s1323_s23 + $0x80] sm:$0xff]  ;;  %v1170_v6 = vld [vmem:[%s1323_s23 + $0x70] sm:$0xff] }
  0x13   : > { %677 = vmatpush.bf16.msra.mxu2 %v1173_v1  ;;  %622 = vmatpush.bf16.msra.mxu1 %v1171_v2  ;;  %v1161_v9 = vld [vmem:[%s1323_s23 + $0x28] sm:$0xff]  ;;  %v1160_v11 = vld [vmem:[%s1323_s23 + $0x20] sm:$0xff]  ;;  %v1159_v13 = vld [vmem:[%s1323_s23 + $0x18] sm:$0xff] }
  0x14   : > { %v1169_v10 = vld [vmem:[%s1323_s23 + $0x68] sm:$0xff]  ;;  %v1168_v12 = vld [vmem:[%s1323_s23 + $0x60] sm:$0xff]  ;;  %v1167_v14 = vld [vmem:[%s1323_s23 + $0x58] sm:$0xff] }
  0x15   : > { %v1158_v15 = vld [vmem:[%s1323_s23 + $0x10] sm:$0xff]  ;;  %v1137_v18 = vld [vmem:[%s1318_s20 + $0x28] sm:$0xf0]  ;;  %v1156_v22 = vld [vmem:[%s1323_s23] sm:$0xff] }
  0x16   : > { %574 = vmatpush.bf16.msra.mxu0 %v1162_v3  ;;  %1175 = vmatpush.bf16.msra.mxu3 %v1162_v3  ;;  %v1166_v16 = vld [vmem:[%s1323_s23 + $0x50] sm:$0xff]  ;;  %v976_v19 = vor.u32 %v1137_v18, %v975_v17  ;;  %v1157_v20 = vld [vmem:[%s1323_s23 + $0x8] sm:$0xff]  ;;  %v1164_v23 = vld [vmem:[%s1323_s23 + $0x40] sm:$0xff] }
  0x17   : > { %678 = vmatpush.bf16.msra.mxu2 %v1172_v5  ;;  %623 = vmatpush.bf16.msra.mxu1 %v1170_v6  ;;  %v1165_v21 = vld [vmem:[%s1323_s23 + $0x48] sm:$0xff]  ;;  %v955_v24 = vld [vmem:[%s1318_s20] sm:$0xf]  ;;  %v1027_v26 = vld [vmem:[%s1318_s20 + $0x90] sm:$0xf] }
  0x18   : > { %v1133_v25 = vld [vmem:[%s1318_s20 + $0x8] sm:$0xf0]  ;;  %v1151_v27 = vld [vmem:[%s1318_s20 + $0x98] sm:$0xf0]  ;;  %v1132_v28 = vld [vmem:[%s1318_s20 + $0x4] sm:$0xf] }
  0x19   : > { %v957_v29 = vld [vmem:[%s1318_s20 + $0xc] sm:$0xf0]  ;;  %v956_v30 = vor.u32 %v1133_v25, %v955_v24  ;;  %v1028_v31 = vor.u32 %v1151_v27, %v1027_v26  ;;  %v987_v33 = vld [vmem:[%s1318_s20 + $0x38] sm:$0xf]  ;;  %v1140_v34 = vld [vmem:[%s1318_s20 + $0x40] sm:$0xf0] }
  0x1a   : > { %1121 = vmatmul.msk.bf16.vlgmr.msra.gmra.mxu2 %vm548_vm0, %v964_v8  ;;  %575 = vmatpush.bf16.msra.mxu0 %v1161_v9  ;;  %v960_v32 = vor.u32 %v1132_v28, %v957_v29  ;;  %v988_v35 = vor.u32 %v1140_v34, %v987_v33  ;;  %v967_v36 = vld [vmem:[%s1318_s20 + $0x18] sm:$0xf]  ;;  %v1136_v37 = vld [vmem:[%s1318_s20 + $0x20] sm:$0xf0]  ;;  %v1039_v38 = vld [vmem:[%s1318_s20 + $0xa8] sm:$0xf] }
  0x1b   : > { %1176 = vmatpush.bf16.msra.mxu3 %v1161_v9  ;;  %624 = vmatpush.bf16.msra.mxu1 %v1169_v10  ;;  %v1154_v39 = vld [vmem:[%s1318_s20 + $0xb0] sm:$0xf0]  ;;  %v1135_v40 = vld [vmem:[%s1318_s20 + $0x1c] sm:$0xf]  ;;  %v969_v41 = vld [vmem:[%s1318_s20 + $0x24] sm:$0xf0]  ;;  %v968_v42 = vor.u32 %v1136_v37, %v967_v36 }
  0x1c   : > { %v1040_v43 = vor.u32 %v1154_v39, %v1039_v38  ;;  %v972_v44 = vor.u32 %v1135_v40, %v969_v41  ;;  %v999_v45 = vld [vmem:[%s1318_s20 + $0x50] sm:$0xf]  ;;  %v1143_v46 = vld [vmem:[%s1318_s20 + $0x58] sm:$0xf0]  ;;  %v1150_v50 = vld [vmem:[%s1318_s20 + $0x94] sm:$0xf] }
  0x1d   : > { %v1000_v47 = vor.u32 %v1143_v46, %v999_v45  ;;  %v979_v48 = vld [vmem:[%s1318_s20 + $0x30] sm:$0xf]  ;;  %v1139_v49 = vld [vmem:[%s1318_s20 + $0x38] sm:$0xf0]  ;;  %v1029_v51 = vld [vmem:[%s1318_s20 + $0x9c] sm:$0xf0] }
  0x1e   : > { %576 = vmatpush.bf16.msra.mxu0 %v1160_v11  ;;  %v1138_v52 = vld [vmem:[%s1318_s20 + $0x34] sm:$0xf]  ;;  %v981_v53 = vld [vmem:[%s1318_s20 + $0x3c] sm:$0xf0]  ;;  %v980_v54 = vor.u32 %v1139_v49, %v979_v48  ;;  %v1032_v55 = vor.u32 %v1150_v50, %v1029_v51  ;;  %v1011_v57 = vld [vmem:[%s1318_s20 + $0x68] sm:$0xf] }
  0x1f   : > { %1177 = vmatpush.bf16.msra.mxu3 %v1160_v11  ;;  %625 = vmatpush.bf16.msra.mxu1 %v1168_v12  ;;  %v984_v56 = vor.u32 %v1138_v52, %v981_v53  ;;  %v1146_v58 = vld [vmem:[%s1318_s20 + $0x70] sm:$0xf0]  ;;  %v991_v60 = vld [vmem:[%s1318_s20 + $0x48] sm:$0xf]  ;;  %v1153_v62 = vld [vmem:[%s1318_s20 + $0xac] sm:$0xf] }
  0x20   : > { %v1012_v59 = vor.u32 %v1146_v58, %v1011_v57  ;;  %v1142_v61 = vld [vmem:[%s1318_s20 + $0x50] sm:$0xf0]  ;;  %v1041_v63 = vld [vmem:[%s1318_s20 + $0xb4] sm:$0xf0]  ;;  %v1141_v0 = vld [vmem:[%s1318_s20 + $0x4c] sm:$0xf] }
  0x21   : > { %v993_v1 = vld [vmem:[%s1318_s20 + $0x54] sm:$0xf0]  ;;  %v1044_v3 = vor.u32 %v1153_v62, %v1041_v63  ;;  %v1023_v5 = vld [vmem:[%s1318_s20 + $0x80] sm:$0xf]  ;;  %v1145_v9 = vld [vmem:[%s1318_s20 + $0x68] sm:$0xf0] }
  0x22   : > { %577 = vmatpush.bf16.msra.mxu0 %v1159_v13  ;;  %v996_v4 = vor.u32 %v1141_v0, %v993_v1  ;;  %v1003_v8 = vld [vmem:[%s1318_s20 + $0x60] sm:$0xf]  ;;  %v1005_v11 = vld [vmem:[%s1318_s20 + $0x6c] sm:$0xf0]  ;;  %v1015_v17 = vld [vmem:[%s1318_s20 + $0x78] sm:$0xf] }
  0x23   : > { %1178 = vmatpush.bf16.msra.mxu3 %v1159_v13  ;;  %626 = vmatpush.bf16.msra.mxu1 %v1167_v14  ;;  %v1148_v18 = vld [vmem:[%s1318_s20 + $0x80] sm:$0xf0]  ;;  %v1155_v24 = vld [vmem:[%s1318_s20 + $0xb8] sm:$0xf0]  ;;  %v1408_v28 = vld [vmem:[%s236_s26] ss:$0 sm:$0xff] }
  0x26   : > { %578 = vmatpush.bf16.msra.mxu0 %v1158_v15 }
  0x27   : > { %1179 = vmatpush.bf16.msra.mxu3 %v1158_v15  ;;  %627 = vmatpush.bf16.msra.mxu1 %v1166_v16  ;;  %v1152_v15 = vld [vmem:[%s1318_s20 + $0xa0] sm:$0xf0] }
  0x2a   : > { %1122 = vmatmul.msk.bf16.gmra.mxu2 %vm548_vm0, %v976_v19  ;;  %579 = vmatpush.bf16.msra.mxu0 %v1157_v20  ;;  %v1147_v19 = vld [vmem:[%s1318_s20 + $0x7c] sm:$0xf] }
  0x2b   : > { %1180 = vmatpush.bf16.msra.mxu3 %v1157_v20  ;;  %628 = vmatpush.bf16.msra.mxu1 %v1165_v21  ;;  %v1017_v20 = vld [vmem:[%s1318_s20 + $0x84] sm:$0xf0] }
  0x2e   : > { %580 = vmatpush.bf16.msra.mxu0 %v1156_v22 }
  0x2f   : > { %1181 = vmatpush.bf16.msra.mxu3 %v1156_v22  ;;  %629 = vmatpush.bf16.msra.mxu1 %v1164_v23  ;;  %v1020_v22 = vor.u32 %v1147_v19, %v1017_v20 }
  0x31   : > { %581 = vmatmul.bf16.vlgmr.msra.gmra.mxu0 %v956_v30 }
  0x32   : > { %611 = vmatmul.bf16.vlgmr.msra.gmra.mxu3 %v1028_v31  ;;  %630 = vmatmul.bf16.vlgmr.msra.gmra.mxu1 %v960_v32 }
  0x33   : > { %1182 = vmatpush.bf16.msrb.mxu3 %v1171_v2  ;;  %v992_v2 = vor.u32 %v1142_v61, %v991_v60 }
  0x37   : > { %1183 = vmatpush.bf16.msrb.mxu3 %v1170_v6  ;;  %v1149_v6 = vld [vmem:[%s1318_s20 + $0x88] sm:$0xf0] }
  0x38   : > { %v1024_v7 = vor.u32 %v1149_v6, %v1023_v5 }
  0x3a   : > { %1123 = vmatmul.msk.bf16.gmra.mxu2 %vm548_vm0, %v988_v35 }
  0x3b   : > { %1184 = vmatpush.bf16.msrb.mxu3 %v1169_v10  ;;  %v1144_v10 = vld [vmem:[%s1318_s20 + $0x64] sm:$0xf] }
  0x3c   : > { %v1008_v13 = vor.u32 %v1144_v10, %v1005_v11 }
  0x3f   : > { %1185 = vmatpush.bf16.msrb.mxu3 %v1168_v12  ;;  %v1004_v12 = vor.u32 %v1145_v9, %v1003_v8 }
  0x41   : > { %586 = vmatmul.bf16.gmra.mxu0 %v968_v42 }
  0x42   : > { %616 = vmatmul.bf16.gmra.mxu3 %v1040_v43  ;;  %635 = vmatmul.bf16.gmra.mxu1 %v972_v44 }
  0x43   : > { %1186 = vmatpush.bf16.msrb.mxu3 %v1167_v14  ;;  %v1035_v14 = vld [vmem:[%s1318_s20 + $0x98] sm:$0xf] }
  0x47   : > { %1187 = vmatpush.bf16.msrb.mxu3 %v1166_v16  ;;  %v1036_v16 = vor.u32 %v1152_v15, %v1035_v14 }
  0x4a   : > { %1124 = vmatmul.msk.bf16.gmra.mxu2 %vm548_vm0, %v1000_v47 }
  0x4b   : > { %1188 = vmatpush.bf16.msrb.mxu3 %v1165_v21  ;;  %v1016_v21 = vor.u32 %v1148_v18, %v1015_v17 }
  0x4f   : > { %1189 = vmatpush.bf16.msrb.mxu3 %v1164_v23  ;;  %v1047_v23 = vld [vmem:[%s1318_s20 + $0xb0] sm:$0xf] }
  0x50   : > { %v1048_v25 = vor.u32 %v1155_v24, %v1047_v23 }
  0x51   : > { %591 = vmatmul.bf16.gmra.mxu0 %v980_v54 }
  0x52   : > { %660 = vmatmul.bf16.vlgmr.msrb.gmra.mxu3 %v1032_v55  ;;  %640 = vmatmul.bf16.gmra.mxu1 %v984_v56 }
  0x5a   : > { %1125 = vmatmul.msk.bf16.gmra.mxu2 %vm548_vm0, %v1012_v59 }
  0x61   : > { %596 = vmatmul.bf16.gmra.mxu0 %v992_v2 }
  0x62   : > { %665 = vmatmul.bf16.gmra.mxu3 %v1044_v3  ;;  %645 = vmatmul.bf16.gmra.mxu1 %v996_v4 }
  0x6a   : > { %1126 = vmatmul.msk.bf16.gmra.mxu2 %vm548_vm0, %v1024_v7 }
  0x71   : > { %601 = vmatmul.bf16.gmra.mxu0 %v1004_v12 }
  0x72   : > { %650 = vmatmul.bf16.gmra.mxu1 %v1008_v13 }
  0x7a   : > { %1127 = vmatmul.msk.bf16.gmra.mxu2 %vm548_vm0, %v1036_v16 }
  0x81   : > { %606 = vmatmul.bf16.gmra.mxu0 %v1016_v21 }
  0x82   : > { %655 = vmatmul.bf16.gmra.mxu1 %v1020_v22 }
  0x8a   : > { %1128 = vmatmul.msk.bf16.gmra.mxu2 %vm548_vm0, %v1048_v25 }
  0x9d   : > { %v680_v26 = vpop.f32.mrf.mxu2 }
  0xa5   : > { %v682_v27 = vpop.f32.mrf.mxu2 }
  0xad   : > { %v685_v29 = vpop.f32.mrf.mxu2 }
  0xae   : > { %v582_v30 = vpop.f32.mrf.mxu0 }
  0xaf   : > { %v583_v31 = vadd.f32 %v1408_v28, %v582_v30  ;;  %v631_v32 = vpop.f32.mrf.mxu1 }
  0xb1   : > { %v632_v33 = vadd.f32 %v631_v32, %v583_v31 }
  0xb3   : > { %v681_v34 = vadd.f32 %v680_v26, %v632_v33 }
  0xb5   : > { %v720_v35 = vmul.f32 0.5, %v681_v34  ;;  %v687_v36 = vpop.f32.mrf.mxu2  ;;  %v1422_v0 = vpop.f32.mrf.mxu3 }
  0xb6   : > { %v584_v37 = vpop.f32.mrf.mxu0 }
  0xb7   : > { %1217 = vtanh.f32 %v720_v35  ;;  %v585_v38 = vadd.f32 %v1408_v28, %v584_v37  ;;  %v633_v39 = vpop.f32.mrf.mxu1 }
  0xb9   : > { %v634_v40 = vadd.f32 %v633_v39, %v585_v38 }
  0xbb   : > { %v683_v41 = vadd.f32 %v682_v27, %v634_v40 }
  0xbd   : > { %v1218_v42 = vpop.eup %1217  ;;  %v721_v43 = vmul.f32 0.5, %v683_v41  ;;  %v690_v44 = vpop.f32.mrf.mxu2 }
  0xbe   : > { %v752_v45 = vadd.f32 1.0, %v1218_v42  ;;  %v587_v46 = vpop.f32.mrf.mxu0  ;;  %v1427_v16 = vpop.f32.mrf.mxu3 }
  0xbf   : > { %1219 = vtanh.f32 %v721_v43  ;;  %v588_v47 = vadd.f32 %v1408_v28, %v587_v46  ;;  %v636_v48 = vpop.f32.mrf.mxu1 }
  0xc0   : > { %v768_v49 = vmul.f32 0.5, %v752_v45 }
  0xc1   : > { %v637_v50 = vadd.f32 %v636_v48, %v588_v47 }
  0xc2   : > { %v784_v51 = vmul.f32 %v768_v49, %v681_v34 }
  0xc3   : > { %v686_v52 = vadd.f32 %v685_v29, %v637_v50 }
  0xc4   : > { %v800_v53 = vpack.c.bf16 %v784_v51, %v784_v51 }
  0xc5   : > { %v1220_v54 = vpop.eup %1219  ;;  %v722_v55 = vmul.f32 0.5, %v686_v52  ;;  %v692_v56 = vpop.f32.mrf.mxu2 }
  0xc6   : > { %817 = vst.msk [vmem:[%s1417_s5] sm:$0xf] %vm816_vm1, %v800_v53  ;;  %v753_v57 = vadd.f32 1.0, %v1220_v54  ;;  %v589_v58 = vpop.f32.mrf.mxu0  ;;  %v1434_v34 = vpop.f32.mrf.mxu3 }
  0xc7   : > { %1221 = vtanh.f32 %v722_v55  ;;  %v590_v59 = vadd.f32 %v1408_v28, %v589_v58  ;;  %v638_v60 = vpop.f32.mrf.mxu1 }
  0xc8   : > { %v769_v61 = vmul.f32 0.5, %v753_v57 }
  0xc9   : > { %v639_v62 = vadd.f32 %v638_v60, %v590_v59 }
  0xca   : > { %v785_v63 = vmul.f32 %v769_v61, %v683_v41 }
  0xcb   : > { %v688_v1 = vadd.f32 %v687_v36, %v639_v62 }
  0xcc   : > { %v801_v2 = vpack.c.bf16 %v785_v63, %v785_v63 }
  0xcd   : > { %v1222_v3 = vpop.eup %1221  ;;  %v723_v4 = vmul.f32 0.5, %v688_v1  ;;  %v695_v5 = vpop.f32.mrf.mxu2 }
  0xce   : > { %818 = vst.msk [vmem:[%s1417_s5 + $0x4] sm:$0xf] %vm816_vm1, %v801_v2  ;;  %v754_v6 = vadd.f32 1.0, %v1222_v3  ;;  %v592_v7 = vpop.f32.mrf.mxu0  ;;  %v1440_v50 = vpop.f32.mrf.mxu3 }
  0xcf   : > { %1223 = vtanh.f32 %v723_v4  ;;  %v593_v8 = vadd.f32 %v1408_v28, %v592_v7  ;;  %v641_v9 = vpop.f32.mrf.mxu1 }
  0xd0   : > { %v770_v10 = vmul.f32 0.5, %v754_v6 }
  0xd1   : > { %v642_v11 = vadd.f32 %v641_v9, %v593_v8 }
  0xd2   : > { %v786_v12 = vmul.f32 %v770_v10, %v686_v52 }
  0xd3   : > { %v691_v13 = vadd.f32 %v690_v44, %v642_v11 }
  0xd4   : > { %v802_v14 = vpack.c.bf16 %v786_v12, %v786_v12  ;;  %v613_v12 = vadd.f32 %v1408_v28, %v1422_v0 }
  0xd5   : > { %v1224_v15 = vpop.eup %1223  ;;  %v724_v17 = vmul.f32 0.5, %v691_v13  ;;  %v697_v18 = vpop.f32.mrf.mxu2 }
  0xd6   : > { %819 = vst.msk [vmem:[%s1417_s5 + $0x8] sm:$0xf] %vm816_vm1, %v802_v14  ;;  %v755_v19 = vadd.f32 1.0, %v1224_v15  ;;  %v594_v20 = vpop.f32.mrf.mxu0  ;;  %v661_v2 = vpop.f32.mrf.mxu3 }
  0xd7   : > { %1225 = vtanh.f32 %v724_v17  ;;  %v595_v21 = vadd.f32 %v1408_v28, %v594_v20  ;;  %v643_v22 = vpop.f32.mrf.mxu1 }
  0xd8   : > { %v771_v23 = vmul.f32 0.5, %v755_v19 }
  0xd9   : > { %v644_v24 = vadd.f32 %v643_v22, %v595_v21 }
  0xda   : > { %v787_v25 = vmul.f32 %v771_v23, %v688_v1 }
  0xdb   : > { %v693_v26 = vadd.f32 %v692_v56, %v644_v24 }
  0xdc   : > { %v803_v27 = vpack.c.bf16 %v787_v25, %v787_v25 }
  0xdd   : > { %v1226_v29 = vpop.eup %1225  ;;  %v725_v30 = vmul.f32 0.5, %v693_v26  ;;  %v700_v31 = vpop.f32.mrf.mxu2 }
  0xde   : > { %820 = vst.msk [vmem:[%s1417_s5 + $0xc] sm:$0xf] %vm816_vm1, %v803_v27  ;;  %v756_v32 = vadd.f32 1.0, %v1226_v29  ;;  %v597_v33 = vpop.f32.mrf.mxu0  ;;  %v663_v21 = vpop.f32.mrf.mxu3  ;;  %v615_v29 = vadd.f32 %v1408_v28, %v1427_v16 }
  0xdf   : > { %1227 = vtanh.f32 %v725_v30  ;;  %v598_v35 = vadd.f32 %v1408_v28, %v597_v33  ;;  %v646_v36 = vpop.f32.mrf.mxu1 }
  0xe0   : > { %v772_v37 = vmul.f32 0.5, %v756_v32 }
  0xe1   : > { %v647_v38 = vadd.f32 %v646_v36, %v598_v35  ;;  %v664_v36 = vadd.f32 %v663_v21, %v615_v29 }
  0xe2   : > { %v788_v39 = vmul.f32 %v772_v37, %v691_v13 }
  0xe3   : > { %v696_v40 = vadd.f32 %v695_v5, %v647_v38 }
  0xe4   : > { %v804_v41 = vpack.c.bf16 %v788_v39, %v788_v39 }
  0xe5   : > { %v1228_v42 = vpop.eup %1227  ;;  %v726_v43 = vmul.f32 0.5, %v696_v40  ;;  %v702_v44 = vpop.f32.mrf.mxu2 }
  0xe6   : > { %821 = vst.msk [vmem:[%s1417_s5 + $0x10] sm:$0xf] %vm816_vm1, %v804_v41  ;;  %v757_v45 = vadd.f32 1.0, %v1228_v42  ;;  %v599_v46 = vpop.f32.mrf.mxu0 }
  0xe7   : > { %1229 = vtanh.f32 %v726_v43  ;;  %v600_v47 = vadd.f32 %v1408_v28, %v599_v46  ;;  %v648_v48 = vpop.f32.mrf.mxu1 }
  0xe8   : > { %v773_v49 = vmul.f32 0.5, %v757_v45 }
  0xe9   : > { %v649_v51 = vadd.f32 %v648_v48, %v600_v47  ;;  %v618_v47 = vadd.f32 %v1408_v28, %v1434_v34 }
  0xea   : > { %v789_v52 = vmul.f32 %v773_v49, %v693_v26 }
  0xeb   : > { %v698_v53 = vadd.f32 %v697_v18, %v649_v51  ;;  %v662_v18 = vadd.f32 %v661_v2, %v613_v12  ;;  %v620_v2 = vadd.f32 %v1408_v28, %v1440_v50 }
  0xec   : > { %v805_v54 = vpack.c.bf16 %v789_v52, %v789_v52 }
  0xed   : > { %v1230_v55 = vpop.eup %1229  ;;  %v727_v56 = vmul.f32 0.5, %v698_v53  ;;  %v705_v57 = vpop.f32.mrf.mxu2 }
  0xee   : > { %822 = vst.msk [vmem:[%s1417_s5 + $0x14] sm:$0xf] %vm816_vm1, %v805_v54  ;;  %v758_v58 = vadd.f32 1.0, %v1230_v55  ;;  %v602_v59 = vpop.f32.mrf.mxu0 }
  0xef   : > { %1231 = vtanh.f32 %v727_v56  ;;  %v603_v60 = vadd.f32 %v1408_v28, %v602_v59  ;;  %v651_v61 = vpop.f32.mrf.mxu1 }
  0xf0   : > { %v774_v62 = vmul.f32 0.5, %v758_v58 }
  0xf1   : > { %v652_v63 = vadd.f32 %v651_v61, %v603_v60 }
  0xf2   : > { %v790_v1 = vmul.f32 %v774_v62, %v696_v40 }
  0xf3   : > { %v701_v3 = vadd.f32 %v700_v31, %v652_v63 }
  0xf4   : > { %v806_v4 = vpack.c.bf16 %v790_v1, %v790_v1 }
  0xf5   : > { %v1232_v5 = vpop.eup %1231  ;;  %v728_v6 = vmul.f32 0.5, %v701_v3  ;;  %v707_v7 = vpop.f32.mrf.mxu2 }
  0xf6   : > { %823 = vst.msk [vmem:[%s1417_s5 + $0x18] sm:$0xf] %vm816_vm1, %v806_v4  ;;  %v759_v8 = vadd.f32 1.0, %v1232_v5  ;;  %v604_v9 = vpop.f32.mrf.mxu0 }
  0xf7   : > { %1233 = vtanh.f32 %v728_v6  ;;  %v605_v10 = vadd.f32 %v1408_v28, %v604_v9  ;;  %v653_v11 = vpop.f32.mrf.mxu1 }
  0xf8   : > { %v775_v13 = vmul.f32 0.5, %v759_v8 }
  0xf9   : > { %v654_v14 = vadd.f32 %v653_v11, %v605_v10 }
  0xfa   : > { %v791_v15 = vmul.f32 %v775_v13, %v698_v53 }
  0xfb   : > { %v703_v17 = vadd.f32 %v702_v44, %v654_v14  ;;  %v666_v44 = vpop.f32.mrf.mxu3 }
  0xfc   : > { %v807_v19 = vpack.c.bf16 %v791_v15, %v791_v15  ;;  %v667_v56 = vadd.f32 %v666_v44, %v618_v47 }
  0xfd   : > { %v1234_v20 = vpop.eup %1233  ;;  %v729_v22 = vmul.f32 0.5, %v703_v17  ;;  %v710_v23 = vpop.f32.mrf.mxu2 }
  0xfe   : > { %824 = vst.msk [vmem:[%s1417_s5 + $0x1c] sm:$0xf] %vm816_vm1, %v807_v19  ;;  %v760_v24 = vadd.f32 1.0, %v1234_v20  ;;  %v711_v25 = vadd.f32 %v710_v23, %v662_v18  ;;  %v607_v26 = vpop.f32.mrf.mxu0 }
  0xff   : > { %1235 = vtanh.f32 %v729_v22  ;;  %v608_v27 = vadd.f32 %v1408_v28, %v607_v26  ;;  %v656_v0 = vpop.f32.mrf.mxu1 }
 0x100   : > { %v776_v30 = vmul.f32 0.5, %v760_v24  ;;  %v732_v31 = vmul.f32 0.5, %v711_v25 }
 0x101   : > { %v657_v32 = vadd.f32 %v656_v0, %v608_v27 }
 0x102   : > { %v792_v33 = vmul.f32 %v776_v30, %v701_v3  ;;  %1237 = vtanh.f32 %v732_v31 }
 0x103   : > { %v706_v35 = vadd.f32 %v705_v57, %v657_v32  ;;  %v668_v5 = vpop.f32.mrf.mxu3 }
 0x104   : > { %v808_v37 = vpack.c.bf16 %v792_v33, %v792_v33  ;;  %v669_v9 = vadd.f32 %v668_v5, %v620_v2 }
 0x105   : > { %v1236_v38 = vpop.eup %1235  ;;  %v730_v39 = vmul.f32 0.5, %v706_v35  ;;  %v712_v40 = vpop.f32.mrf.mxu2 }
 0x106   : > { %825 = vst.msk [vmem:[%s1417_s5 + $0x20] sm:$0xf] %vm816_vm1, %v808_v37  ;;  %v761_v41 = vadd.f32 1.0, %v1236_v38  ;;  %v713_v42 = vadd.f32 %v712_v40, %v664_v36  ;;  %v609_v43 = vpop.f32.mrf.mxu0 }
 0x107   : > { %1239 = vtanh.f32 %v730_v39  ;;  %v610_v16 = vadd.f32 %v1408_v28, %v609_v43  ;;  %v658_v45 = vpop.f32.mrf.mxu1 }
 0x108   : > { %v1238_v46 = vpop.eup %1237  ;;  %v777_v48 = vmul.f32 0.5, %v761_v41  ;;  %v733_v49 = vmul.f32 0.5, %v713_v42 }
 0x109   : > { %v764_v51 = vadd.f32 1.0, %v1238_v46  ;;  %v659_v52 = vadd.f32 %v658_v45, %v610_v16 }
 0x10a   : > { %v793_v53 = vmul.f32 %v777_v48, %v703_v17  ;;  %1241 = vtanh.f32 %v733_v49 }
 0x10b   : > { %v780_v54 = vmul.f32 0.5, %v764_v51  ;;  %v708_v55 = vadd.f32 %v707_v7, %v659_v52 }
 0x10c   : > { %v809_v57 = vpack.c.bf16 %v793_v53, %v793_v53 }
 0x10d   : > { %v1240_v58 = vpop.eup %1239  ;;  %v796_v59 = vmul.f32 %v780_v54, %v711_v25  ;;  %v731_v60 = vmul.f32 0.5, %v708_v55  ;;  %v715_v61 = vpop.f32.mrf.mxu2 }
 0x10e   : > { %826 = vst.msk [vmem:[%s1417_s5 + $0x24] sm:$0xf] %vm816_vm1, %v809_v57  ;;  %v762_v62 = vadd.f32 1.0, %v1240_v58  ;;  %v716_v63 = vadd.f32 %v715_v61, %v667_v56 }
 0x10f   : > { %v812_v34 = vpack.c.bf16 %v796_v59, %v796_v59  ;;  %1243 = vtanh.f32 %v731_v60 }
 0x110   : > { %v1242_v1 = vpop.eup %1241  ;;  %v778_v3 = vmul.f32 0.5, %v762_v62  ;;  %v734_v4 = vmul.f32 0.5, %v716_v63 }
 0x111   : > { %829 = vst.msk [vmem:[%s1417_s5 + $0x30] sm:$0xf] %vm816_vm1, %v812_v34  ;;  %v765_v6 = vadd.f32 1.0, %v1242_v1 }
 0x112   : > { %v794_v7 = vmul.f32 %v778_v3, %v706_v35  ;;  %1245 = vtanh.f32 %v734_v4 }
 0x113   : > { %v781_v8 = vmul.f32 0.5, %v765_v6 }
 0x114   : > { %v810_v10 = vpack.c.bf16 %v794_v7, %v794_v7 }
 0x115   : > { %v1244_v11 = vpop.eup %1243  ;;  %v797_v12 = vmul.f32 %v781_v8, %v713_v42  ;;  %v717_v13 = vpop.f32.mrf.mxu2 }
 0x116   : > { %827 = vst.msk [vmem:[%s1417_s5 + $0x28] sm:$0xf] %vm816_vm1, %v810_v10  ;;  %v763_v14 = vadd.f32 1.0, %v1244_v11  ;;  %v718_v28 = vadd.f32 %v717_v13, %v669_v9 }
 0x117   : > { %v813_v50 = vpack.c.bf16 %v797_v12, %v797_v12 }
 0x118   : > { %v1246_v15 = vpop.eup %1245  ;;  %v779_v17 = vmul.f32 0.5, %v763_v14  ;;  %v735_v18 = vmul.f32 0.5, %v718_v28 }
 0x119   : > { %830 = vst.msk [vmem:[%s1417_s5 + $0x34] sm:$0xf] %vm816_vm1, %v813_v50  ;;  %v766_v19 = vadd.f32 1.0, %v1246_v15 }
 0x11a   : > { %v795_v20 = vmul.f32 %v779_v17, %v708_v55  ;;  %1247 = vtanh.f32 %v735_v18 }
 0x11b   : > { %v782_v21 = vmul.f32 0.5, %v766_v19 }
 0x11c   : > { %v811_v22 = vpack.c.bf16 %v795_v20, %v795_v20 }
 0x11d   : > { %v798_v23 = vmul.f32 %v782_v21, %v716_v63 }
 0x11e   : > { %828 = vst.msk [vmem:[%s1417_s5 + $0x2c] sm:$0xf] %vm816_vm1, %v811_v22 }
 0x11f   : > { %v814_v24 = vpack.c.bf16 %v798_v23, %v798_v23 }
 0x120   : > { %v1248_v25 = vpop.eup %1247 }
 0x121   : > { %831 = vst.msk [vmem:[%s1417_s5 + $0x38] sm:$0xf] %vm816_vm1, %v814_v24  ;;  %v767_v26 = vadd.f32 1.0, %v1248_v25 }
 0x123   : > { %v783_v27 = vmul.f32 0.5, %v767_v26 }
 0x125   : > { %v799_v0 = vmul.f32 %v783_v27, %v718_v28 }
 0x127   : > { %v815_v29 = vpack.c.bf16 %v799_v0, %v799_v0 }
 0x129   : > { %832 = vst.msk [vmem:[%s1417_s5 + $0x3c] sm:$0xf] %vm816_vm1, %v815_v29 }
 0x12a PF: > { %s13_s14 = sadd.s32 1, %s1271_s14   ;;  %s1489_s12 = smov %s1267_s13 }
 0x12b   : > { %p10_p5 = scmp.ge.s32.totalorder %s13_s14, 5   ;;  %s1490_s13 = smov %s1492_s15 }
 0x12d   :  { %12 = sbr.rel (!%p10_p5) target bundleno = 2 (0x2), region = 68 }

</bundles_post_ra>
